<compile_context>
chip_gen: v7x
topology: tpu7x:2x2x1
jax: 0.10.0
libtpu: 0.0.40
codegen_flags: <defaults>
</compile_context>

<pallas_src>
import functools

import jax
import jax.numpy as jnp
from jax.experimental import pallas as pl
from jax.experimental.pallas import tpu as pltpu

LRELU_SLOPE = 0.1
BN_EPS = 1e-5

# Scoped-VMEM ceiling requested from Mosaic (safe on every generation: well
# under v7x's 64 MiB physical VMEM).  Tile pickers keep the estimated
# double-buffered working set under _VMEM_BUDGET, leaving ample headroom.
_VMEM_LIMIT = 48 * 1024 * 1024
_VMEM_BUDGET = 24 * 1024 * 1024


def _round_up(x, m):
    return (x + m - 1) // m * m


def _leaky_relu(y):
    return jnp.where(y > 0, y, LRELU_SLOPE * y)


def _pick_tile(total, target, align):
    """Largest multiple of `align` <= target that divides `total` (so the
    wrapper-side pad and the final slice become no-ops); falls back to
    padding only when no such divisor exists."""
    target = max(align, min(target, _round_up(total, align)))
    target -= target % align
    for t in range(target, 0, -align):
        if total % t == 0:
            return t, total
    return target, _round_up(total, target)


# ---------------------------------------------------------------------------
# Kernel 1: 1x1 conv as single-pass tiled matmul + folded BN + LeakyReLU.
# ---------------------------------------------------------------------------
def _matmul_bn_lrelu_kernel(x_ref, w_ref, scale_ref, shift_ref, o_ref):
    y = jnp.dot(x_ref[...], w_ref[...], preferred_element_type=jnp.float32)
    y = y * scale_ref[...] + shift_ref[...]
    o_ref[...] = _leaky_relu(y).astype(o_ref.dtype)


def matmul_bn_lrelu(x2d, w, scale, shift, *, out_dtype, tm=2048):
    """o = leaky_relu((x2d @ w) * scale + shift), M tiling only (K resident)."""
    M, K = x2d.shape
    Kw, N = w.shape
    assert K == Kw
    isz = jnp.dtype(x2d.dtype).itemsize
    # TODO(synk): add an in-kernel K loop over a resident weight block for K
    # too large to hold as one block (never the case for this module).
    tm_cap = max(8, _VMEM_BUDGET // (2 * (K + N) * isz))
    align = 128 if (M % 128 == 0) else 8
    tm_sel, Mp = _pick_tile(M, min(tm, tm_cap), align)
    xp = x2d if Mp == M else jnp.pad(x2d, ((0, Mp - M), (0, 0)))
    nm = Mp // tm_sel

    flops = 2 * Mp * K * N
    bytes_accessed = (Mp * K * isz + K * N * jnp.dtype(w.dtype).itemsize
                      + Mp * N * jnp.dtype(out_dtype).itemsize)

    y = pl.pallas_call(
        _matmul_bn_lrelu_kernel,
        out_shape=jax.ShapeDtypeStruct((Mp, N), out_dtype),
        grid_spec=pltpu.PrefetchScalarGridSpec(
            num_scalar_prefetch=0,
            grid=(nm,),
            in_specs=[
                pl.BlockSpec((tm_sel, K), lambda i: (i, 0)),
                pl.BlockSpec((K, N), lambda i: (0, 0)),    # resident weight
                pl.BlockSpec((1, N), lambda i: (0, 0)),    # resident scale
                pl.BlockSpec((1, N), lambda i: (0, 0)),    # resident shift
            ],
            out_specs=pl.BlockSpec((tm_sel, N), lambda i: (i, 0)),
        ),
        compiler_params=pltpu.CompilerParams(
            dimension_semantics=("parallel",),
            vmem_limit_bytes=_VMEM_LIMIT),
        cost_estimate=pl.CostEstimate(flops=flops, transcendentals=0,
                                      bytes_accessed=bytes_accessed),
    )(xp, w, scale, shift)
    return y if Mp == M else y[:M]


# ---------------------------------------------------------------------------
# Kernel 2: 3x3 conv (padding=1) + folded BN + LeakyReLU.
#   Padded activation stays in HBM (pl.ANY); halo row windows are pulled into
#   a manually double-buffered VMEM slab; 9 taps accumulate into a f32 VMEM
#   scratch; the output row-tile is stored as a flattened (th*W, Cout) slab.
# ---------------------------------------------------------------------------
def _conv3x3_bn_lrelu_kernel(x_hbm, w_ref, scale_ref, shift_ref, o_ref,
                             slab, sem, acc_ref, *, th, width, cin, cout, nh):
    b = pl.program_id(0)
    r = pl.program_id(1)
    rows = th + 2

    def fetch(row_tile, slot):
        pltpu.make_async_copy(
            x_hbm.at[b, pl.ds(row_tile * th, rows)],
            slab.at[pl.ds(slot * rows, rows)],
            sem.at[slot]).start()

    @pl.when(r == 0)
    def _prime():
        fetch(0, 0)

    slot = r % 2

    @pl.when(r + 1 < nh)
    def _prefetch_next():
        fetch(r + 1, 1 - slot)

    pltpu.make_async_copy(
        x_hbm.at[b, pl.ds(r * th, rows)],
        slab.at[pl.ds(slot * rows, rows)],
        sem.at[slot]).wait()

    base = slot * rows
    first = True
    for dy in range(3):
        for dx in range(3):
            # TODO(synk): the dx-shifted slice + reshape still costs a small
            # sublane relayout per tap; it hides under the MXU work here.
            xs = slab[pl.ds(base + dy, th), dx:dx + width, :]
            xs = xs.reshape(th * width, cin)
            tap = jnp.dot(xs, w_ref[dy, dx],
                          preferred_element_type=jnp.float32)
            if first:
                acc_ref[...] = tap
                first = False
            else:
                acc_ref[...] += tap

    y = acc_ref[...] * scale_ref[...] + shift_ref[...]
    o_ref[...] = _leaky_relu(y).astype(o_ref.dtype)


def _conv_row_tile(H, W, Cin, Cout, itemsize, target):
    # Divisors of H whose flattened row block keeps the (8,128) store rule.
    cands = [t for t in range(1, H + 1)
             if H % t == 0 and ((t * W) % 8 == 0 or t == H)]

    def vmem(th):
        return (2 * (th + 2) * (W + 2) * Cin * itemsize   # slab, dbl-buffered
                + th * W * Cout * 4                       # f32 accumulator
                + 2 * th * W * Cout * itemsize            # output, dbl-buffered
                + 2 * 9 * Cin * Cout * itemsize)          # resident weights

    fitting = [t for t in cands if t <= max(1, target) and vmem(t) <= _VMEM_BUDGET]
    if fitting:
        return max(fitting)
    return min(cands)


def conv3x3_bn_lrelu(x_nhwc, w, scale, shift, *, out_dtype, row_tile=32):
    B, H, W, Cin = x_nhwc.shape
    Cout = w.shape[-1]
    isz = jnp.dtype(x_nhwc.dtype).itemsize
    th = _conv_row_tile(H, W, Cin, Cout, isz, row_tile)
    nh = H // th
    # Single 1-pixel spatial halo pad; the kernel's own DMAs pull overlapping
    # (th+2)-row windows straight out of this padded HBM array (no gather).
    xp = jnp.pad(x_nhwc, ((0, 0), (1, 1), (1, 1), (0, 0)))

    kern = functools.partial(_conv3x3_bn_lrelu_kernel, th=th, width=W,
                             cin=Cin, cout=Cout, nh=nh)
    flops = 2 * B * H * W * 9 * Cin * Cout
    bytes_accessed = (xp.size * isz + w.size * jnp.dtype(w.dtype).itemsize
                      + B * H * W * Cout * jnp.dtype(out_dtype).itemsize)

    y = pl.pallas_call(
        kern,
        out_shape=jax.ShapeDtypeStruct((B, H * W, Cout), out_dtype),
        grid_spec=pltpu.PrefetchScalarGridSpec(
            num_scalar_prefetch=0,
            grid=(B, nh),
            in_specs=[
                pl.BlockSpec(memory_space=pl.ANY),          # padded act in HBM
                pl.BlockSpec((3, 3, Cin, Cout), lambda b, r: (0, 0, 0, 0)),
                pl.BlockSpec((1, Cout), lambda b, r: (0, 0)),
                pl.BlockSpec((1, Cout), lambda b, r: (0, 0)),
            ],
            out_specs=pl.BlockSpec((None, th * W, Cout), lambda b, r: (b, r, 0)),
            scratch_shapes=[
                pltpu.VMEM((2 * (th + 2), W + 2, Cin), x_nhwc.dtype),
                pltpu.SemaphoreType.DMA((2,)),
                pltpu.VMEM((th * W, Cout), jnp.float32),
            ],
        ),
        compiler_params=pltpu.CompilerParams(
            dimension_semantics=("parallel", "arbitrary"),
            vmem_limit_bytes=_VMEM_LIMIT),
        cost_estimate=pl.CostEstimate(flops=flops, transcendentals=0,
                                      bytes_accessed=bytes_accessed),
    )(xp, w, scale, shift)
    return y.reshape(B, H, W, Cout)


# ---------------------------------------------------------------------------
# Kernels 3a/3b: HW-streamed cross-class attention (two passes).
#   Pass A: cfl[c,k] = sum_hw branch[hw,c]*coarse[hw,k]  (HW reduction axis),
#           then softmax over c (torch dim=1) -> probabilities p.
#   Pass B: ccAtten^T[hw,c] = sum_k coarse[hw,k]*p[c,k], streamed over HW.
# ---------------------------------------------------------------------------
def _cca_logits_softmax_kernel(b_ref, c_ref, p_ref, acc_ref, *, approx):
    @pl.when(pl.program_id(1) == 0)
    def _init():
        acc_ref[...] = jnp.zeros_like(acc_ref)

    acc_ref[...] += jax.lax.dot_general(
        b_ref[...], c_ref[...],
        dimension_numbers=(((0,), (0,)), ((), ())),
        preferred_element_type=jnp.float32)                 # (C, Kp)

    @pl.when(pl.program_id(1) == pl.num_programs(1) - 1)
    def _finalize():
        cfl = acc_ref[...]
        m = jnp.max(cfl, axis=0, keepdims=True)
        e = jnp.exp(cfl - m)
        s = jnp.sum(e, axis=0, keepdims=True)
        if approx:  # EUP reciprocal in bf16 mode; exact divide in f32 mode.
            p_ref[...] = (e * pl.reciprocal(s, approx=True)).astype(p_ref.dtype)
        else:
            p_ref[...] = (e / s).astype(p_ref.dtype)


def _cca_apply_kernel(p_ref, c_ref, o_ref):
    cF = c_ref[...]                            # (thw, Kp)
    p = p_ref[...].astype(cF.dtype)            # (C, Kp)
    o_ref[...] = jax.lax.dot_general(
        cF, p, dimension_numbers=(((1,), (1,)), ((), ())),
        preferred_element_type=jnp.float32).astype(o_ref.dtype)


def cca_attention(branch_hwc, coarse_hwk, *, hw_tile=2048, approx=False):
    B, HW, C = branch_hwc.shape
    _, _, Kp = coarse_hwk.shape
    isz = jnp.dtype(branch_hwc.dtype).itemsize
    cap = max(8, _VMEM_BUDGET // (4 * (C + Kp) * isz))
    thw, HWp = _pick_tile(HW, min(hw_tile, cap), 8)
    if HWp != HW:  # zero HW padding is inert for the cfl accumulation
        branch_hwc = jnp.pad(branch_hwc, ((0, 0), (0, HWp - HW), (0, 0)))
        coarse_hwk = jnp.pad(coarse_hwk, ((0, 0), (0, HWp - HW), (0, 0)))
    nhw = HWp // thw

    ce_a = pl.CostEstimate(
        flops=2 * B * HWp * C * Kp, transcendentals=B * C * Kp,
        bytes_accessed=B * HWp * (C + Kp) * isz + B * C * Kp * 4)
    probs = pl.pallas_call(
        functools.partial(_cca_logits_softmax_kernel, approx=approx),
        out_shape=jax.ShapeDtypeStruct((B, C, Kp), jnp.float32),
        grid_spec=pltpu.PrefetchScalarGridSpec(
            num_scalar_prefetch=0,
            grid=(B, nhw),
            in_specs=[
                pl.BlockSpec((None, thw, C), lambda b, h: (b, h, 0)),
                pl.BlockSpec((None, thw, Kp), lambda b, h: (b, h, 0)),
            ],
            out_specs=pl.BlockSpec((None, C, Kp), lambda b, h: (b, 0, 0)),
            scratch_shapes=[pltpu.VMEM((C, Kp), jnp.float32)],
        ),
        compiler_params=pltpu.CompilerParams(
            dimension_semantics=("parallel", "arbitrary"),
            vmem_limit_bytes=_VMEM_LIMIT),
        cost_estimate=ce_a,
    )(branch_hwc, coarse_hwk)

    ce_b = pl.CostEstimate(
        flops=2 * B * HWp * C * Kp, transcendentals=0,
        bytes_accessed=B * C * Kp * 4 + B * HWp * Kp * isz + B * HWp * C * isz)
    atten = pl.pallas_call(
        _cca_apply_kernel,
        out_shape=jax.ShapeDtypeStruct((B, HWp, C), branch_hwc.dtype),
        grid_spec=pltpu.PrefetchScalarGridSpec(
            num_scalar_prefetch=0,
            grid=(B, nhw),
            in_specs=[
                pl.BlockSpec((None, C, Kp), lambda b, h: (b, 0, 0)),
                pl.BlockSpec((None, thw, Kp), lambda b, h: (b, h, 0)),
            ],
            out_specs=pl.BlockSpec((None, thw, C), lambda b, h: (b, h, 0)),
        ),
        compiler_params=pltpu.CompilerParams(
            dimension_semantics=("parallel", "parallel"),
            vmem_limit_bytes=_VMEM_LIMIT),
        cost_estimate=ce_b,
    )(probs, coarse_hwk)
    return atten[:, :HW] if HWp != HW else atten


# ---------------------------------------------------------------------------
# Parameters (eval-mode BatchNorm folded to scale/shift) and the full forward.
# ---------------------------------------------------------------------------
def _bn_fold(gamma, beta, mean, var):
    scale = gamma / jnp.sqrt(var + BN_EPS)
    shift = beta - mean * scale
    return scale.reshape(1, -1), shift.reshape(1, -1)


def make_params(key, in_channel, class_num):
    mid = in_channel // 2
    defs = {
        "coarse1": (1, in_channel, mid),
        "coarse2": (3, mid, in_channel),
        "coarse3": (1, in_channel, class_num),
        "branch1": (1, in_channel, mid),
        "branch2": (3, mid, in_channel),
        "w1": (1, in_channel, mid),
        "w2": (3, mid, in_channel),
    }
    params = {}
    for name, (ksz, cin, cout) in defs.items():
        key, kw, kg, kb, km, kv = jax.random.split(key, 6)
        fan_in = cin * ksz * ksz
        wshape = (cin, cout) if ksz == 1 else (ksz, ksz, cin, cout)
        w = jax.random.normal(kw, wshape, jnp.float32) * (2.0 / fan_in) ** 0.5
        gamma = 1.0 + 0.1 * jax.random.normal(kg, (cout,), jnp.float32)
        beta = 0.1 * jax.random.normal(kb, (cout,), jnp.float32)
        mean = 0.1 * jax.random.normal(km, (cout,), jnp.float32)
        var = 1.0 + 0.1 * jax.random.uniform(kv, (cout,), jnp.float32)
        scale, shift = _bn_fold(gamma, beta, mean, var)
        params[name] = {"w": w, "scale": scale, "shift": shift}
    return params


def cca_forward(params, x_nchw, *, compute_dtype=jnp.bfloat16,
                tm=2048, row_tile=32, hw_tile=2048):
    B, Cin, H, W = x_nchw.shape
    class_num = params["coarse3"]["w"].shape[-1]
    cd = compute_dtype
    x = jnp.transpose(x_nchw, (0, 2, 3, 1)).astype(cd)       # NCHW -> NHWC

    def conv1(name, inp, w=None, scale=None, shift=None):
        p = params[name]
        w = p["w"] if w is None else w
        scale = p["scale"] if scale is None else scale
        shift = p["shift"] if shift is None else shift
        Bh, Hh, Wh, Ci = inp.shape
        y = matmul_bn_lrelu(inp.reshape(Bh * Hh * Wh, Ci), w.astype(cd),
                            scale, shift, out_dtype=cd, tm=tm)
        return y.reshape(Bh, Hh, Wh, -1)

    def conv3(name, inp):
        p = params[name]
        return conv3x3_bn_lrelu(inp, p["w"].astype(cd), p["scale"], p["shift"],
                                out_dtype=cd, row_tile=row_tile)

    # coarseConv: 1x1 -> 3x3 -> 1x1 (class channels zero-padded to 128 lanes;
    # padded weight columns AND BN scale/shift are zero so padded outputs are
    # exactly 0 and contribute nothing downstream).
    c = conv1("coarse1", x)
    c = conv3("coarse2", c)
    Kp = _round_up(class_num, 128)
    p3 = params["coarse3"]
    w3 = jnp.zeros((p3["w"].shape[0], Kp), p3["w"].dtype
                   ).at[:, :class_num].set(p3["w"])
    s3 = jnp.zeros((1, Kp), jnp.float32).at[:, :class_num].set(p3["scale"])
    b3 = jnp.zeros((1, Kp), jnp.float32).at[:, :class_num].set(p3["shift"])
    coarse_p = conv1("coarse3", c, w=w3, scale=s3, shift=b3)  # (B,H,W,Kp)

    # branchConv: 1x1 -> 3x3
    b = conv1("branch1", x)
    branch = conv3("branch2", b)

    HW = H * W
    atten = cca_attention(branch.reshape(B, HW, Cin),
                          coarse_p.reshape(B, HW, Kp),
                          hw_tile=hw_tile,
                          approx=(cd != jnp.float32))
    atten = atten.reshape(B, H, W, Cin).astype(cd)

    # self.w: 1x1 -> 3x3
    a = conv1("w1", atten)
    a = conv3("w2", a)

    ccAtten = jnp.transpose(a, (0, 3, 1, 2)).astype(jnp.float32)
    coarseFeat = jnp.transpose(coarse_p[..., :class_num],
                               (0, 3, 1, 2)).astype(jnp.float32)
    return ccAtten, coarseFeat


# -------------------------- pure-jnp reference -----------------------------
def ref_forward(params, x_nchw):
    x = jnp.transpose(x_nchw, (0, 2, 3, 1)).astype(jnp.float32)

    def block1(name, inp):
        p = params[name]
        y = jnp.einsum("bhwc,cd->bhwd", inp, p["w"]) * p["scale"] + p["shift"]
        return _leaky_relu(y)

    def block3(name, inp):
        p = params[name]
        y = jax.lax.conv_general_dilated(
            inp, p["w"], window_strides=(1, 1), padding="SAME",
            dimension_numbers=("NHWC", "HWIO", "NHWC"))
        y = y * p["scale"] + p["shift"]
        return _leaky_relu(y)

    c = block1("coarse1", x)
    c = block3("coarse2", c)
    coarse = block1("coarse3", c)
    b = block1("branch1", x)
    branch = block3("branch2", b)

    B, H, W, Cin = x.shape
    HW = H * W
    bF = branch.reshape(B, HW, Cin)
    cF = coarse.reshape(B, HW, -1)
    cfl = jnp.einsum("bpc,bpk->bck", bF, cF)
    prob = jax.nn.softmax(cfl, axis=1)            # torch softmax dim=1
    atten = jnp.einsum("bck,bpk->bpc", prob, cF).reshape(B, H, W, Cin)
    a = block1("w1", atten)
    a = block3("w2", a)
    return (jnp.transpose(a, (0, 3, 1, 2)),
            jnp.transpose(coarse, (0, 3, 1, 2)))


if __name__ == "__main__":
    B, Cin, H, W = 2, 256, 16, 16
    class_num = 4

    key = jax.random.PRNGKey(0)
    kx, kp = jax.random.split(key)
    x = jax.random.normal(kx, (B, Cin, H, W), jnp.float32)
    params = make_params(kp, Cin, class_num)

    # f32 numerics check with small tiles so the toy shapes exercise the
    # multi-tile matmul grid, the manual halo double-buffering (nh > 1) and
    # the HW-reduction accumulator (nhw > 1).
    fwd_f32 = jax.jit(functools.partial(
        cca_forward, compute_dtype=jnp.float32,
        tm=128, row_tile=8, hw_tile=64))
    cc, coarse = fwd_f32(params, x)
    jax.block_until_ready((cc, coarse))

    ref_cc, ref_coarse = jax.jit(ref_forward)(params, x)
    jax.block_until_ready((ref_cc, ref_coarse))

    assert cc.shape == (B, Cin, H, W)
    assert coarse.shape == (B, class_num, H, W)
    assert jnp.allclose(cc, ref_cc, atol=2e-3, rtol=2e-3), \
        float(jnp.max(jnp.abs(cc - ref_cc)))
    assert jnp.allclose(coarse, ref_coarse, atol=2e-3, rtol=2e-3), \
        float(jnp.max(jnp.abs(coarse - ref_coarse)))

    # Default configuration: bf16 MXU operands (f32 accumulation / epilogue),
    # large auto-fitted tiles.  coarseFeat (conv-only) is checked numerically;
    # ccAtten goes through a very peaked softmax where bf16 logit rounding can
    # legitimately reshuffle near-ties, so it is checked for shape/finiteness.
    fwd_def = jax.jit(cca_forward)
    cc16, coarse16 = fwd_def(params, x)
    jax.block_until_ready((cc16, coarse16))
    assert cc16.shape == (B, Cin, H, W)
    assert bool(jnp.all(jnp.isfinite(cc16)))
    rel = float(jnp.linalg.norm(coarse16 - ref_coarse) /
                (jnp.linalg.norm(ref_coarse) + 1e-6))
    assert rel < 0.05, rel

    print("KERNEL_OK")
</pallas_src>

<mosaic_0001>
module attributes {stable_mosaic.version = 11 : i64} {
  func.func @_conv3x3_bn_lrelu_kernel(%arg0: i32, %arg1: i32, %arg2: memref<2x18x18x128xf32, #tpu.memory_space<any>>, %arg3: memref<3x3x128x256xf32, #tpu.memory_space<vmem>>, %arg4: memref<1x256xf32, #tpu.memory_space<vmem>>, %arg5: memref<1x256xf32, #tpu.memory_space<vmem>>, %arg6: memref<1x128x256xf32, #tpu.memory_space<vmem>>, %arg7: memref<20x18x128xf32, #tpu.memory_space<vmem>>, %arg8: memref<2x!tpu.dma_semaphore, #tpu.memory_space<semaphore_mem>>, %arg9: memref<128x256xf32, #tpu.memory_space<vmem>>) attributes {dimension_semantics = [#tpu.dimension_semantics<parallel>, #tpu.dimension_semantics<arbitrary>], iteration_bounds = array<i64: 2, 2>, scalar_prefetch = 0 : i64, scratch_operands = 3 : i64, tpu.core_type = #tpu.core_type<tc>, window_params = [{}, {pipeline_mode = #tpu.pipeline_mode<synchronous>, transform_indices = @transform_1, window_bounds = array<i64: 3, 3, 128, 256>}, {pipeline_mode = #tpu.pipeline_mode<synchronous>, transform_indices = @transform_2, window_bounds = array<i64: 1, 256>}, {pipeline_mode = #tpu.pipeline_mode<synchronous>, transform_indices = @transform_3, window_bounds = array<i64: 1, 256>}, {transform_indices = @transform_4, window_bounds = array<i64: 1, 128, 256>}]} {
    %c0_i32 = arith.constant 0 : i32
    %0 = arith.cmpi eq, %arg1, %c0_i32 : i32
    %1 = arith.extui %0 : i1 to i32
    %c0_i32_0 = arith.constant 0 : i32
    %2 = arith.cmpi ne, %1, %c0_i32_0 : i32
    scf.if %2 {
      %c0_i32_126 = arith.constant 0 : i32
      %c0_i32_127 = arith.constant 0 : i32
      %c0_i32_128 = arith.constant 0 : i32
      %c0_i32_129 = arith.constant 0 : i32
      %128 = tpu.memref_slice %arg2[%arg0, %c0_i32_127, %c0_i32_128, %c0_i32_129] : memref<2x18x18x128xf32, #tpu.memory_space<any>> -> memref<1x10x18x128xf32, #tpu.memory_space<any>>
      %129 = tpu.memref_squeeze %128 : memref<1x10x18x128xf32, #tpu.memory_space<any>> -> memref<10x18x128xf32, #tpu.memory_space<any>>
      %c0_i32_130 = arith.constant 0 : i32
      %c0_i32_131 = arith.constant 0 : i32
      %c0_i32_132 = arith.constant 0 : i32
      %130 = tpu.memref_slice %arg7[%c0_i32_130, %c0_i32_131, %c0_i32_132] : memref<20x18x128xf32, #tpu.memory_space<vmem>> -> memref<10x18x128xf32, #tpu.memory_space<vmem>>
      %131 = tpu.memref_slice %arg8[%c0_i32_126] : memref<2x!tpu.dma_semaphore, #tpu.memory_space<semaphore_mem>> -> memref<1x!tpu.dma_semaphore, #tpu.memory_space<semaphore_mem>>
      %132 = tpu.memref_squeeze %131 : memref<1x!tpu.dma_semaphore, #tpu.memory_space<semaphore_mem>> -> memref<!tpu.dma_semaphore, #tpu.memory_space<semaphore_mem>>
      tpu.enqueue_dma source(%129 : memref<10x18x128xf32, #tpu.memory_space<any>>) target(%130 : memref<10x18x128xf32, #tpu.memory_space<vmem>>) target_semaphore(%132 : memref<!tpu.dma_semaphore, #tpu.memory_space<semaphore_mem>>)
    } else {
    }
    %c2_i32 = arith.constant 2 : i32
    %c0_i32_1 = arith.constant 0 : i32
    %3 = arith.cmpi eq, %c2_i32, %c0_i32_1 : i32
    %c1_i32 = arith.constant 1 : i32
    %4 = arith.select %3, %c1_i32, %c2_i32 : i32
    %5 = arith.remsi %arg1, %4 : i32
    %c0_i32_2 = arith.constant 0 : i32
    %6 = arith.cmpi ne, %5, %c0_i32_2 : i32
    %c0_i32_3 = arith.constant 0 : i32
    %7 = arith.cmpi slt, %5, %c0_i32_3 : i32
    %c0_i32_4 = arith.constant 0 : i32
    %8 = arith.cmpi slt, %4, %c0_i32_4 : i32
    %9 = arith.xori %7, %8 : i1
    %10 = arith.andi %9, %6 : i1
    %11 = arith.addi %5, %4 : i32
    %12 = arith.select %10, %11, %5 : i32
    %c1_i32_5 = arith.constant 1 : i32
    %13 = arith.addi %arg1, %c1_i32_5 : i32
    %c2_i32_6 = arith.constant 2 : i32
    %14 = arith.cmpi slt, %13, %c2_i32_6 : i32
    %15 = arith.extui %14 : i1 to i32
    %c0_i32_7 = arith.constant 0 : i32
    %16 = arith.cmpi ne, %15, %c0_i32_7 : i32
    scf.if %16 {
      %c1_i32_126 = arith.constant 1 : i32
      %128 = arith.addi %arg1, %c1_i32_126 : i32
      %c1_i32_127 = arith.constant 1 : i32
      %129 = arith.subi %c1_i32_127, %12 : i32
      %c8_i32_128 = arith.constant 8 : i32
      %130 = arith.muli %128, %c8_i32_128 : i32
      %c10_i32_129 = arith.constant 10 : i32
      %131 = arith.muli %129, %c10_i32_129 : i32
      %c0_i32_130 = arith.constant 0 : i32
      %c0_i32_131 = arith.constant 0 : i32
      %132 = tpu.memref_slice %arg2[%arg0, %130, %c0_i32_130, %c0_i32_131] : memref<2x18x18x128xf32, #tpu.memory_space<any>> -> memref<1x10x18x128xf32, #tpu.memory_space<any>>
      %133 = tpu.memref_squeeze %132 : memref<1x10x18x128xf32, #tpu.memory_space<any>> -> memref<10x18x128xf32, #tpu.memory_space<any>>
      %c0_i32_132 = arith.constant 0 : i32
      %c0_i32_133 = arith.constant 0 : i32
      %134 = tpu.memref_slice %arg7[%131, %c0_i32_132, %c0_i32_133] : memref<20x18x128xf32, #tpu.memory_space<vmem>> -> memref<10x18x128xf32, #tpu.memory_space<vmem>>
      %135 = tpu.memref_slice %arg8[%129] : memref<2x!tpu.dma_semaphore, #tpu.memory_space<semaphore_mem>> -> memref<1x!tpu.dma_semaphore, #tpu.memory_space<semaphore_mem>>
      %136 = tpu.memref_squeeze %135 : memref<1x!tpu.dma_semaphore, #tpu.memory_space<semaphore_mem>> -> memref<!tpu.dma_semaphore, #tpu.memory_space<semaphore_mem>>
      tpu.enqueue_dma source(%133 : memref<10x18x128xf32, #tpu.memory_space<any>>) target(%134 : memref<10x18x128xf32, #tpu.memory_space<vmem>>) target_semaphore(%136 : memref<!tpu.dma_semaphore, #tpu.memory_space<semaphore_mem>>)
    } else {
    }
    %c8_i32 = arith.constant 8 : i32
    %17 = arith.muli %arg1, %c8_i32 : i32
    %c10_i32 = arith.constant 10 : i32
    %18 = arith.muli %12, %c10_i32 : i32
    %c0_i32_8 = arith.constant 0 : i32
    %c0_i32_9 = arith.constant 0 : i32
    %19 = tpu.memref_slice %arg2[%arg0, %17, %c0_i32_8, %c0_i32_9] : memref<2x18x18x128xf32, #tpu.memory_space<any>> -> memref<1x10x18x128xf32, #tpu.memory_space<any>>
    %20 = tpu.memref_squeeze %19 : memref<1x10x18x128xf32, #tpu.memory_space<any>> -> memref<10x18x128xf32, #tpu.memory_space<any>>
    %c0_i32_10 = arith.constant 0 : i32
    %c0_i32_11 = arith.constant 0 : i32
    %21 = tpu.memref_slice %arg7[%18, %c0_i32_10, %c0_i32_11] : memref<20x18x128xf32, #tpu.memory_space<vmem>> -> memref<10x18x128xf32, #tpu.memory_space<vmem>>
    %22 = tpu.memref_slice %arg8[%12] : memref<2x!tpu.dma_semaphore, #tpu.memory_space<semaphore_mem>> -> memref<1x!tpu.dma_semaphore, #tpu.memory_space<semaphore_mem>>
    %23 = tpu.memref_squeeze %22 : memref<1x!tpu.dma_semaphore, #tpu.memory_space<semaphore_mem>> -> memref<!tpu.dma_semaphore, #tpu.memory_space<semaphore_mem>>
    tpu.wait_dma2 semaphore(%23 : memref<!tpu.dma_semaphore, #tpu.memory_space<semaphore_mem>>) src(%20 : memref<10x18x128xf32, #tpu.memory_space<any>>) dst(%21 : memref<10x18x128xf32, #tpu.memory_space<vmem>>)
    %c10_i32_12 = arith.constant 10 : i32
    %24 = arith.muli %12, %c10_i32_12 : i32
    %c0_i32_13 = arith.constant 0 : i32
    %25 = arith.addi %24, %c0_i32_13 : i32
    %26 = arith.index_cast %25 : i32 to index
    %c0 = arith.constant 0 : index
    %c0_14 = arith.constant 0 : index
    %27 = vector.load %arg7[%26, %c0, %c0_14] : memref<20x18x128xf32, #tpu.memory_space<vmem>>, vector<8x16x128xf32>
    %28 = vector.shape_cast %27 : vector<8x16x128xf32> to vector<128x128xf32>
    %c0_15 = arith.constant 0 : index
    %c0_16 = arith.constant 0 : index
    %c0_17 = arith.constant 0 : index
    %c0_18 = arith.constant 0 : index
    %29 = vector.load %arg3[%c0_15, %c0_16, %c0_17, %c0_18] : memref<3x3x128x256xf32, #tpu.memory_space<vmem>>, vector<1x1x128x256xf32>
    %30 = vector.shape_cast %29 : vector<1x1x128x256xf32> to vector<128x256xf32>
    %cst = arith.constant dense<0.000000e+00> : vector<128x256xf32>
    %31 = tpu.matmul %28, %30, %cst {dimension_numbers = #tpu.dot_dimension_numbers<[1], [0], [0], [1], [0, 0, 1, 1], [], []>} : vector<128x128xf32>, vector<128x256xf32>, vector<128x256xf32> -> vector<128x256xf32>
    %c0_19 = arith.constant 0 : index
    %c0_20 = arith.constant 0 : index
    %32 = vector.load %arg9[%c0_19, %c0_20] : memref<128x256xf32, #tpu.memory_space<vmem>>, vector<128x256xf32>
    tpu.vector_store %arg9[%c0_19, %c0_20], %31 {strides = array<i32>} : memref<128x256xf32, #tpu.memory_space<vmem>>, vector<128x256xf32>,
    %c0_i32_21 = arith.constant 0 : i32
    %33 = arith.addi %24, %c0_i32_21 : i32
    %34 = arith.index_cast %33 : i32 to index
    %c1 = arith.constant 1 : index
    %c0_22 = arith.constant 0 : index
    %35 = vector.load %arg7[%34, %c1, %c0_22] : memref<20x18x128xf32, #tpu.memory_space<vmem>>, vector<8x16x128xf32>
    %36 = vector.shape_cast %35 : vector<8x16x128xf32> to vector<128x128xf32>
    %c0_23 = arith.constant 0 : index
    %c1_24 = arith.constant 1 : index
    %c0_25 = arith.constant 0 : index
    %c0_26 = arith.constant 0 : index
    %37 = vector.load %arg3[%c0_23, %c1_24, %c0_25, %c0_26] : memref<3x3x128x256xf32, #tpu.memory_space<vmem>>, vector<1x1x128x256xf32>
    %38 = vector.shape_cast %37 : vector<1x1x128x256xf32> to vector<128x256xf32>
    %cst_27 = arith.constant dense<0.000000e+00> : vector<128x256xf32>
    %39 = tpu.matmul %36, %38, %cst_27 {dimension_numbers = #tpu.dot_dimension_numbers<[1], [0], [0], [1], [0, 0, 1, 1], [], []>} : vector<128x128xf32>, vector<128x256xf32>, vector<128x256xf32> -> vector<128x256xf32>
    %c0_28 = arith.constant 0 : index
    %c0_29 = arith.constant 0 : index
    %40 = vector.load %arg9[%c0_28, %c0_29] : memref<128x256xf32, #tpu.memory_space<vmem>>, vector<128x256xf32>
    %41 = arith.addf %40, %39 : vector<128x256xf32>
    %c0_30 = arith.constant 0 : index
    %c0_31 = arith.constant 0 : index
    %42 = vector.load %arg9[%c0_30, %c0_31] : memref<128x256xf32, #tpu.memory_space<vmem>>, vector<128x256xf32>
    tpu.vector_store %arg9[%c0_30, %c0_31], %41 {strides = array<i32>} : memref<128x256xf32, #tpu.memory_space<vmem>>, vector<128x256xf32>,
    %c0_i32_32 = arith.constant 0 : i32
    %43 = arith.addi %24, %c0_i32_32 : i32
    %44 = arith.index_cast %43 : i32 to index
    %c2 = arith.constant 2 : index
    %c0_33 = arith.constant 0 : index
    %45 = vector.load %arg7[%44, %c2, %c0_33] : memref<20x18x128xf32, #tpu.memory_space<vmem>>, vector<8x16x128xf32>
    %46 = vector.shape_cast %45 : vector<8x16x128xf32> to vector<128x128xf32>
    %c0_34 = arith.constant 0 : index
    %c2_35 = arith.constant 2 : index
    %c0_36 = arith.constant 0 : index
    %c0_37 = arith.constant 0 : index
    %47 = vector.load %arg3[%c0_34, %c2_35, %c0_36, %c0_37] : memref<3x3x128x256xf32, #tpu.memory_space<vmem>>, vector<1x1x128x256xf32>
    %48 = vector.shape_cast %47 : vector<1x1x128x256xf32> to vector<128x256xf32>
    %cst_38 = arith.constant dense<0.000000e+00> : vector<128x256xf32>
    %49 = tpu.matmul %46, %48, %cst_38 {dimension_numbers = #tpu.dot_dimension_numbers<[1], [0], [0], [1], [0, 0, 1, 1], [], []>} : vector<128x128xf32>, vector<128x256xf32>, vector<128x256xf32> -> vector<128x256xf32>
    %c0_39 = arith.constant 0 : index
    %c0_40 = arith.constant 0 : index
    %50 = vector.load %arg9[%c0_39, %c0_40] : memref<128x256xf32, #tpu.memory_space<vmem>>, vector<128x256xf32>
    %51 = arith.addf %50, %49 : vector<128x256xf32>
    %c0_41 = arith.constant 0 : index
    %c0_42 = arith.constant 0 : index
    %52 = vector.load %arg9[%c0_41, %c0_42] : memref<128x256xf32, #tpu.memory_space<vmem>>, vector<128x256xf32>
    tpu.vector_store %arg9[%c0_41, %c0_42], %51 {strides = array<i32>} : memref<128x256xf32, #tpu.memory_space<vmem>>, vector<128x256xf32>,
    %c1_i32_43 = arith.constant 1 : i32
    %53 = arith.addi %24, %c1_i32_43 : i32
    %54 = arith.index_cast %53 : i32 to index
    %c0_44 = arith.constant 0 : index
    %c0_45 = arith.constant 0 : index
    %55 = vector.load %arg7[%54, %c0_44, %c0_45] : memref<20x18x128xf32, #tpu.memory_space<vmem>>, vector<8x16x128xf32>
    %56 = vector.shape_cast %55 : vector<8x16x128xf32> to vector<128x128xf32>
    %c1_46 = arith.constant 1 : index
    %c0_47 = arith.constant 0 : index
    %c0_48 = arith.constant 0 : index
    %c0_49 = arith.constant 0 : index
    %57 = vector.load %arg3[%c1_46, %c0_47, %c0_48, %c0_49] : memref<3x3x128x256xf32, #tpu.memory_space<vmem>>, vector<1x1x128x256xf32>
    %58 = vector.shape_cast %57 : vector<1x1x128x256xf32> to vector<128x256xf32>
    %cst_50 = arith.constant dense<0.000000e+00> : vector<128x256xf32>
    %59 = tpu.matmul %56, %58, %cst_50 {dimension_numbers = #tpu.dot_dimension_numbers<[1], [0], [0], [1], [0, 0, 1, 1], [], []>} : vector<128x128xf32>, vector<128x256xf32>, vector<128x256xf32> -> vector<128x256xf32>
    %c0_51 = arith.constant 0 : index
    %c0_52 = arith.constant 0 : index
    %60 = vector.load %arg9[%c0_51, %c0_52] : memref<128x256xf32, #tpu.memory_space<vmem>>, vector<128x256xf32>
    %61 = arith.addf %60, %59 : vector<128x256xf32>
    %c0_53 = arith.constant 0 : index
    %c0_54 = arith.constant 0 : index
    %62 = vector.load %arg9[%c0_53, %c0_54] : memref<128x256xf32, #tpu.memory_space<vmem>>, vector<128x256xf32>
    tpu.vector_store %arg9[%c0_53, %c0_54], %61 {strides = array<i32>} : memref<128x256xf32, #tpu.memory_space<vmem>>, vector<128x256xf32>,
    %c1_i32_55 = arith.constant 1 : i32
    %63 = arith.addi %24, %c1_i32_55 : i32
    %64 = arith.index_cast %63 : i32 to index
    %c1_56 = arith.constant 1 : index
    %c0_57 = arith.constant 0 : index
    %65 = vector.load %arg7[%64, %c1_56, %c0_57] : memref<20x18x128xf32, #tpu.memory_space<vmem>>, vector<8x16x128xf32>
    %66 = vector.shape_cast %65 : vector<8x16x128xf32> to vector<128x128xf32>
    %c1_58 = arith.constant 1 : index
    %c1_59 = arith.constant 1 : index
    %c0_60 = arith.constant 0 : index
    %c0_61 = arith.constant 0 : index
    %67 = vector.load %arg3[%c1_58, %c1_59, %c0_60, %c0_61] : memref<3x3x128x256xf32, #tpu.memory_space<vmem>>, vector<1x1x128x256xf32>
    %68 = vector.shape_cast %67 : vector<1x1x128x256xf32> to vector<128x256xf32>
    %cst_62 = arith.constant dense<0.000000e+00> : vector<128x256xf32>
    %69 = tpu.matmul %66, %68, %cst_62 {dimension_numbers = #tpu.dot_dimension_numbers<[1], [0], [0], [1], [0, 0, 1, 1], [], []>} : vector<128x128xf32>, vector<128x256xf32>, vector<128x256xf32> -> vector<128x256xf32>
    %c0_63 = arith.constant 0 : index
    %c0_64 = arith.constant 0 : index
    %70 = vector.load %arg9[%c0_63, %c0_64] : memref<128x256xf32, #tpu.memory_space<vmem>>, vector<128x256xf32>
    %71 = arith.addf %70, %69 : vector<128x256xf32>
    %c0_65 = arith.constant 0 : index
    %c0_66 = arith.constant 0 : index
    %72 = vector.load %arg9[%c0_65, %c0_66] : memref<128x256xf32, #tpu.memory_space<vmem>>, vector<128x256xf32>
    tpu.vector_store %arg9[%c0_65, %c0_66], %71 {strides = array<i32>} : memref<128x256xf32, #tpu.memory_space<vmem>>, vector<128x256xf32>,
    %c1_i32_67 = arith.constant 1 : i32
    %73 = arith.addi %24, %c1_i32_67 : i32
    %74 = arith.index_cast %73 : i32 to index
    %c2_68 = arith.constant 2 : index
    %c0_69 = arith.constant 0 : index
    %75 = vector.load %arg7[%74, %c2_68, %c0_69] : memref<20x18x128xf32, #tpu.memory_space<vmem>>, vector<8x16x128xf32>
    %76 = vector.shape_cast %75 : vector<8x16x128xf32> to vector<128x128xf32>
    %c1_70 = arith.constant 1 : index
    %c2_71 = arith.constant 2 : index
    %c0_72 = arith.constant 0 : index
    %c0_73 = arith.constant 0 : index
    %77 = vector.load %arg3[%c1_70, %c2_71, %c0_72, %c0_73] : memref<3x3x128x256xf32, #tpu.memory_space<vmem>>, vector<1x1x128x256xf32>
    %78 = vector.shape_cast %77 : vector<1x1x128x256xf32> to vector<128x256xf32>
    %cst_74 = arith.constant dense<0.000000e+00> : vector<128x256xf32>
    %79 = tpu.matmul %76, %78, %cst_74 {dimension_numbers = #tpu.dot_dimension_numbers<[1], [0], [0], [1], [0, 0, 1, 1], [], []>} : vector<128x128xf32>, vector<128x256xf32>, vector<128x256xf32> -> vector<128x256xf32>
    %c0_75 = arith.constant 0 : index
    %c0_76 = arith.constant 0 : index
    %80 = vector.load %arg9[%c0_75, %c0_76] : memref<128x256xf32, #tpu.memory_space<vmem>>, vector<128x256xf32>
    %81 = arith.addf %80, %79 : vector<128x256xf32>
    %c0_77 = arith.constant 0 : index
    %c0_78 = arith.constant 0 : index
    %82 = vector.load %arg9[%c0_77, %c0_78] : memref<128x256xf32, #tpu.memory_space<vmem>>, vector<128x256xf32>
    tpu.vector_store %arg9[%c0_77, %c0_78], %81 {strides = array<i32>} : memref<128x256xf32, #tpu.memory_space<vmem>>, vector<128x256xf32>,
    %c2_i32_79 = arith.constant 2 : i32
    %83 = arith.addi %24, %c2_i32_79 : i32
    %84 = arith.index_cast %83 : i32 to index
    %c0_80 = arith.constant 0 : index
    %c0_81 = arith.constant 0 : index
    %85 = vector.load %arg7[%84, %c0_80, %c0_81] : memref<20x18x128xf32, #tpu.memory_space<vmem>>, vector<8x16x128xf32>
    %86 = vector.shape_cast %85 : vector<8x16x128xf32> to vector<128x128xf32>
    %c2_82 = arith.constant 2 : index
    %c0_83 = arith.constant 0 : index
    %c0_84 = arith.constant 0 : index
    %c0_85 = arith.constant 0 : index
    %87 = vector.load %arg3[%c2_82, %c0_83, %c0_84, %c0_85] : memref<3x3x128x256xf32, #tpu.memory_space<vmem>>, vector<1x1x128x256xf32>
    %88 = vector.shape_cast %87 : vector<1x1x128x256xf32> to vector<128x256xf32>
    %cst_86 = arith.constant dense<0.000000e+00> : vector<128x256xf32>
    %89 = tpu.matmul %86, %88, %cst_86 {dimension_numbers = #tpu.dot_dimension_numbers<[1], [0], [0], [1], [0, 0, 1, 1], [], []>} : vector<128x128xf32>, vector<128x256xf32>, vector<128x256xf32> -> vector<128x256xf32>
    %c0_87 = arith.constant 0 : index
    %c0_88 = arith.constant 0 : index
    %90 = vector.load %arg9[%c0_87, %c0_88] : memref<128x256xf32, #tpu.memory_space<vmem>>, vector<128x256xf32>
    %91 = arith.addf %90, %89 : vector<128x256xf32>
    %c0_89 = arith.constant 0 : index
    %c0_90 = arith.constant 0 : index
    %92 = vector.load %arg9[%c0_89, %c0_90] : memref<128x256xf32, #tpu.memory_space<vmem>>, vector<128x256xf32>
    tpu.vector_store %arg9[%c0_89, %c0_90], %91 {strides = array<i32>} : memref<128x256xf32, #tpu.memory_space<vmem>>, vector<128x256xf32>,
    %c2_i32_91 = arith.constant 2 : i32
    %93 = arith.addi %24, %c2_i32_91 : i32
    %94 = arith.index_cast %93 : i32 to index
    %c1_92 = arith.constant 1 : index
    %c0_93 = arith.constant 0 : index
    %95 = vector.load %arg7[%94, %c1_92, %c0_93] : memref<20x18x128xf32, #tpu.memory_space<vmem>>, vector<8x16x128xf32>
    %96 = vector.shape_cast %95 : vector<8x16x128xf32> to vector<128x128xf32>
    %c2_94 = arith.constant 2 : index
    %c1_95 = arith.constant 1 : index
    %c0_96 = arith.constant 0 : index
    %c0_97 = arith.constant 0 : index
    %97 = vector.load %arg3[%c2_94, %c1_95, %c0_96, %c0_97] : memref<3x3x128x256xf32, #tpu.memory_space<vmem>>, vector<1x1x128x256xf32>
    %98 = vector.shape_cast %97 : vector<1x1x128x256xf32> to vector<128x256xf32>
    %cst_98 = arith.constant dense<0.000000e+00> : vector<128x256xf32>
    %99 = tpu.matmul %96, %98, %cst_98 {dimension_numbers = #tpu.dot_dimension_numbers<[1], [0], [0], [1], [0, 0, 1, 1], [], []>} : vector<128x128xf32>, vector<128x256xf32>, vector<128x256xf32> -> vector<128x256xf32>
    %c0_99 = arith.constant 0 : index
    %c0_100 = arith.constant 0 : index
    %100 = vector.load %arg9[%c0_99, %c0_100] : memref<128x256xf32, #tpu.memory_space<vmem>>, vector<128x256xf32>
    %101 = arith.addf %100, %99 : vector<128x256xf32>
    %c0_101 = arith.constant 0 : index
    %c0_102 = arith.constant 0 : index
    %102 = vector.load %arg9[%c0_101, %c0_102] : memref<128x256xf32, #tpu.memory_space<vmem>>, vector<128x256xf32>
    tpu.vector_store %arg9[%c0_101, %c0_102], %101 {strides = array<i32>} : memref<128x256xf32, #tpu.memory_space<vmem>>, vector<128x256xf32>,
    %c2_i32_103 = arith.constant 2 : i32
    %103 = arith.addi %24, %c2_i32_103 : i32
    %104 = arith.index_cast %103 : i32 to index
    %c2_104 = arith.constant 2 : index
    %c0_105 = arith.constant 0 : index
    %105 = vector.load %arg7[%104, %c2_104, %c0_105] : memref<20x18x128xf32, #tpu.memory_space<vmem>>, vector<8x16x128xf32>
    %106 = vector.shape_cast %105 : vector<8x16x128xf32> to vector<128x128xf32>
    %c2_106 = arith.constant 2 : index
    %c2_107 = arith.constant 2 : index
    %c0_108 = arith.constant 0 : index
    %c0_109 = arith.constant 0 : index
    %107 = vector.load %arg3[%c2_106, %c2_107, %c0_108, %c0_109] : memref<3x3x128x256xf32, #tpu.memory_space<vmem>>, vector<1x1x128x256xf32>
    %108 = vector.shape_cast %107 : vector<1x1x128x256xf32> to vector<128x256xf32>
    %cst_110 = arith.constant dense<0.000000e+00> : vector<128x256xf32>
    %109 = tpu.matmul %106, %108, %cst_110 {dimension_numbers = #tpu.dot_dimension_numbers<[1], [0], [0], [1], [0, 0, 1, 1], [], []>} : vector<128x128xf32>, vector<128x256xf32>, vector<128x256xf32> -> vector<128x256xf32>
    %c0_111 = arith.constant 0 : index
    %c0_112 = arith.constant 0 : index
    %110 = vector.load %arg9[%c0_111, %c0_112] : memref<128x256xf32, #tpu.memory_space<vmem>>, vector<128x256xf32>
    %111 = arith.addf %110, %109 : vector<128x256xf32>
    %c0_113 = arith.constant 0 : index
    %c0_114 = arith.constant 0 : index
    %112 = vector.load %arg9[%c0_113, %c0_114] : memref<128x256xf32, #tpu.memory_space<vmem>>, vector<128x256xf32>
    tpu.vector_store %arg9[%c0_113, %c0_114], %111 {strides = array<i32>} : memref<128x256xf32, #tpu.memory_space<vmem>>, vector<128x256xf32>,
    %c0_115 = arith.constant 0 : index
    %c0_116 = arith.constant 0 : index
    %113 = vector.load %arg9[%c0_115, %c0_116] : memref<128x256xf32, #tpu.memory_space<vmem>>, vector<128x256xf32>
    %c0_117 = arith.constant 0 : index
    %c0_118 = arith.constant 0 : index
    %114 = vector.load %arg4[%c0_117, %c0_118] : memref<1x256xf32, #tpu.memory_space<vmem>>, vector<1x256xf32>
    %115 = vector.broadcast %114 : vector<1x256xf32> to vector<128x256xf32>
    %116 = arith.mulf %113, %115 : vector<128x256xf32>
    %c0_119 = arith.constant 0 : index
    %c0_120 = arith.constant 0 : index
    %117 = vector.load %arg5[%c0_119, %c0_120] : memref<1x256xf32, #tpu.memory_space<vmem>>, vector<1x256xf32>
    %118 = vector.broadcast %117 : vector<1x256xf32> to vector<128x256xf32>
    %119 = arith.addf %116, %118 : vector<128x256xf32>
    %cst_121 = arith.constant 0.000000e+00 : f32
    %120 = vector.broadcast %cst_121 : f32 to vector<128x256xf32>
    %121 = arith.cmpf ogt, %119, %120 : vector<128x256xf32>
    %cst_122 = arith.constant 1.000000e-01 : f32
    %122 = vector.broadcast %cst_122 : f32 to vector<128x256xf32>
    %123 = arith.mulf %122, %119 : vector<128x256xf32>
    %124 = arith.select %121, %119, %123 : vector<128x256xi1>, vector<128x256xf32>
    %c0_123 = arith.constant 0 : index
    %c0_124 = arith.constant 0 : index
    %c0_125 = arith.constant 0 : index
    %125 = vector.load %arg6[%c0_123, %c0_124, %c0_125] : memref<1x128x256xf32, #tpu.memory_space<vmem>>, vector<1x128x256xf32>
    %126 = vector.shape_cast %125 : vector<1x128x256xf32> to vector<128x256xf32>
    %127 = vector.shape_cast %124 : vector<128x256xf32> to vector<1x128x256xf32>
    tpu.vector_store %arg6[%c0_123, %c0_124, %c0_125], %127 {strides = array<i32>} : memref<1x128x256xf32, #tpu.memory_space<vmem>>, vector<1x128x256xf32>,
    return
  }
  func.func @transform_1(%arg0: i32, %arg1: i32) -> (i32, i32, i32, i32) {
    %c0_i32 = arith.constant 0 : i32
    %c0_i32_0 = arith.constant 0 : i32
    %c0_i32_1 = arith.constant 0 : i32
    %c0_i32_2 = arith.constant 0 : i32
    %c0_i32_3 = arith.constant 0 : i32
    return %c0_i32, %c0_i32_0, %c0_i32_1, %c0_i32_2 : i32, i32, i32, i32
  }
  func.func @transform_2(%arg0: i32, %arg1: i32) -> (i32, i32) {
    %c0_i32 = arith.constant 0 : i32
    %c0_i32_0 = arith.constant 0 : i32
    %c0_i32_1 = arith.constant 0 : i32
    return %c0_i32, %c0_i32_0 : i32, i32
  }
  func.func @transform_3(%arg0: i32, %arg1: i32) -> (i32, i32) {
    %c0_i32 = arith.constant 0 : i32
    %c0_i32_0 = arith.constant 0 : i32
    %c0_i32_1 = arith.constant 0 : i32
    return %c0_i32, %c0_i32_0 : i32, i32
  }
  func.func @transform_4(%arg0: i32, %arg1: i32) -> (i32, i32, i32) {
    %c0_i32 = arith.constant 0 : i32
    %c0_i32_0 = arith.constant 0 : i32
    return %arg0, %arg1, %c0_i32 : i32, i32, i32
  }
}

module attributes {stable_mosaic.version = 11 : i64} {
  func.func @_matmul_bn_lrelu_kernel(%arg0: i32, %arg1: memref<128x256xf32, #tpu.memory_space<vmem>>, %arg2: memref<256x128xf32, #tpu.memory_space<vmem>>, %arg3: memref<1x128xf32, #tpu.memory_space<vmem>>, %arg4: memref<1x128xf32, #tpu.memory_space<vmem>>, %arg5: memref<128x128xf32, #tpu.memory_space<vmem>>) attributes {dimension_semantics = [#tpu.dimension_semantics<parallel>], iteration_bounds = array<i64: 4>, scalar_prefetch = 0 : i64, scratch_operands = 0 : i64, tpu.core_type = #tpu.core_type<tc>, window_params = [{transform_indices = @transform_0, window_bounds = array<i64: 128, 256>}, {pipeline_mode = #tpu.pipeline_mode<synchronous>, transform_indices = @transform_1, window_bounds = array<i64: 256, 128>}, {pipeline_mode = #tpu.pipeline_mode<synchronous>, transform_indices = @transform_2, window_bounds = array<i64: 1, 128>}, {pipeline_mode = #tpu.pipeline_mode<synchronous>, transform_indices = @transform_3, window_bounds = array<i64: 1, 128>}, {transform_indices = @transform_4, window_bounds = array<i64: 128, 128>}]} {
    %c0 = arith.constant 0 : index
    %c0_0 = arith.constant 0 : index
    %0 = vector.load %arg1[%c0, %c0_0] : memref<128x256xf32, #tpu.memory_space<vmem>>, vector<128x256xf32>
    %c0_1 = arith.constant 0 : index
    %c0_2 = arith.constant 0 : index
    %1 = vector.load %arg2[%c0_1, %c0_2] : memref<256x128xf32, #tpu.memory_space<vmem>>, vector<256x128xf32>
    %cst = arith.constant dense<0.000000e+00> : vector<128x128xf32>
    %2 = tpu.matmul %0, %1, %cst {dimension_numbers = #tpu.dot_dimension_numbers<[1], [0], [0], [1], [0, 0, 1, 1], [], []>} : vector<128x256xf32>, vector<256x128xf32>, vector<128x128xf32> -> vector<128x128xf32>
    %c0_3 = arith.constant 0 : index
    %c0_4 = arith.constant 0 : index
    %3 = vector.load %arg3[%c0_3, %c0_4] : memref<1x128xf32, #tpu.memory_space<vmem>>, vector<1x128xf32>
    %4 = vector.broadcast %3 : vector<1x128xf32> to vector<128x128xf32>
    %5 = arith.mulf %2, %4 : vector<128x128xf32>
    %c0_5 = arith.constant 0 : index
    %c0_6 = arith.constant 0 : index
    %6 = vector.load %arg4[%c0_5, %c0_6] : memref<1x128xf32, #tpu.memory_space<vmem>>, vector<1x128xf32>
    %7 = vector.broadcast %6 : vector<1x128xf32> to vector<128x128xf32>
    %8 = arith.addf %5, %7 : vector<128x128xf32>
    %cst_7 = arith.constant 0.000000e+00 : f32
    %9 = vector.broadcast %cst_7 : f32 to vector<128x128xf32>
    %10 = arith.cmpf ogt, %8, %9 : vector<128x128xf32>
    %cst_8 = arith.constant 1.000000e-01 : f32
    %11 = vector.broadcast %cst_8 : f32 to vector<128x128xf32>
    %12 = arith.mulf %11, %8 : vector<128x128xf32>
    %13 = arith.select %10, %8, %12 : vector<128x128xi1>, vector<128x128xf32>
    %c0_9 = arith.constant 0 : index
    %c0_10 = arith.constant 0 : index
    %14 = vector.load %arg5[%c0_9, %c0_10] : memref<128x128xf32, #tpu.memory_space<vmem>>, vector<128x128xf32>
    tpu.vector_store %arg5[%c0_9, %c0_10], %13 {strides = array<i32>} : memref<128x128xf32, #tpu.memory_space<vmem>>, vector<128x128xf32>,
    return
  }
  func.func @transform_0(%arg0: i32) -> (i32, i32) {
    %c0_i32 = arith.constant 0 : i32
    %c0_i32_0 = arith.constant 0 : i32
    return %arg0, %c0_i32 : i32, i32
  }
  func.func @transform_1(%arg0: i32) -> (i32, i32) {
    %c0_i32 = arith.constant 0 : i32
    %c0_i32_0 = arith.constant 0 : i32
    %c0_i32_1 = arith.constant 0 : i32
    return %c0_i32, %c0_i32_0 : i32, i32
  }
  func.func @transform_2(%arg0: i32) -> (i32, i32) {
    %c0_i32 = arith.constant 0 : i32
    %c0_i32_0 = arith.constant 0 : i32
    %c0_i32_1 = arith.constant 0 : i32
    return %c0_i32, %c0_i32_0 : i32, i32
  }
  func.func @transform_3(%arg0: i32) -> (i32, i32) {
    %c0_i32 = arith.constant 0 : i32
    %c0_i32_0 = arith.constant 0 : i32
    %c0_i32_1 = arith.constant 0 : i32
    return %c0_i32, %c0_i32_0 : i32, i32
  }
  func.func @transform_4(%arg0: i32) -> (i32, i32) {
    %c0_i32 = arith.constant 0 : i32
    %c0_i32_0 = arith.constant 0 : i32
    return %arg0, %c0_i32 : i32, i32
  }
}

module attributes {stable_mosaic.version = 11 : i64} {
  func.func @_matmul_bn_lrelu_kernel(%arg0: i32, %arg1: memref<128x256xf32, #tpu.memory_space<vmem>>, %arg2: memref<256x128xf32, #tpu.memory_space<vmem>>, %arg3: memref<1x128xf32, #tpu.memory_space<vmem>>, %arg4: memref<1x128xf32, #tpu.memory_space<vmem>>, %arg5: memref<128x128xf32, #tpu.memory_space<vmem>>) attributes {dimension_semantics = [#tpu.dimension_semantics<parallel>], iteration_bounds = array<i64: 4>, scalar_prefetch = 0 : i64, scratch_operands = 0 : i64, tpu.core_type = #tpu.core_type<tc>, window_params = [{transform_indices = @transform_0, window_bounds = array<i64: 128, 256>}, {pipeline_mode = #tpu.pipeline_mode<synchronous>, transform_indices = @transform_1, window_bounds = array<i64: 256, 128>}, {pipeline_mode = #tpu.pipeline_mode<synchronous>, transform_indices = @transform_2, window_bounds = array<i64: 1, 128>}, {pipeline_mode = #tpu.pipeline_mode<synchronous>, transform_indices = @transform_3, window_bounds = array<i64: 1, 128>}, {transform_indices = @transform_4, window_bounds = array<i64: 128, 128>}]} {
    %c0 = arith.constant 0 : index
    %c0_0 = arith.constant 0 : index
    %0 = vector.load %arg1[%c0, %c0_0] : memref<128x256xf32, #tpu.memory_space<vmem>>, vector<128x256xf32>
    %c0_1 = arith.constant 0 : index
    %c0_2 = arith.constant 0 : index
    %1 = vector.load %arg2[%c0_1, %c0_2] : memref<256x128xf32, #tpu.memory_space<vmem>>, vector<256x128xf32>
    %cst = arith.constant dense<0.000000e+00> : vector<128x128xf32>
    %2 = tpu.matmul %0, %1, %cst {dimension_numbers = #tpu.dot_dimension_numbers<[1], [0], [0], [1], [0, 0, 1, 1], [], []>} : vector<128x256xf32>, vector<256x128xf32>, vector<128x128xf32> -> vector<128x128xf32>
    %c0_3 = arith.constant 0 : index
    %c0_4 = arith.constant 0 : index
    %3 = vector.load %arg3[%c0_3, %c0_4] : memref<1x128xf32, #tpu.memory_space<vmem>>, vector<1x128xf32>
    %4 = vector.broadcast %3 : vector<1x128xf32> to vector<128x128xf32>
    %5 = arith.mulf %2, %4 : vector<128x128xf32>
    %c0_5 = arith.constant 0 : index
    %c0_6 = arith.constant 0 : index
    %6 = vector.load %arg4[%c0_5, %c0_6] : memref<1x128xf32, #tpu.memory_space<vmem>>, vector<1x128xf32>
    %7 = vector.broadcast %6 : vector<1x128xf32> to vector<128x128xf32>
    %8 = arith.addf %5, %7 : vector<128x128xf32>
    %cst_7 = arith.constant 0.000000e+00 : f32
    %9 = vector.broadcast %cst_7 : f32 to vector<128x128xf32>
    %10 = arith.cmpf ogt, %8, %9 : vector<128x128xf32>
    %cst_8 = arith.constant 1.000000e-01 : f32
    %11 = vector.broadcast %cst_8 : f32 to vector<128x128xf32>
    %12 = arith.mulf %11, %8 : vector<128x128xf32>
    %13 = arith.select %10, %8, %12 : vector<128x128xi1>, vector<128x128xf32>
    %c0_9 = arith.constant 0 : index
    %c0_10 = arith.constant 0 : index
    %14 = vector.load %arg5[%c0_9, %c0_10] : memref<128x128xf32, #tpu.memory_space<vmem>>, vector<128x128xf32>
    tpu.vector_store %arg5[%c0_9, %c0_10], %13 {strides = array<i32>} : memref<128x128xf32, #tpu.memory_space<vmem>>, vector<128x128xf32>,
    return
  }
  func.func @transform_0(%arg0: i32) -> (i32, i32) {
    %c0_i32 = arith.constant 0 : i32
    %c0_i32_0 = arith.constant 0 : i32
    return %arg0, %c0_i32 : i32, i32
  }
  func.func @transform_1(%arg0: i32) -> (i32, i32) {
    %c0_i32 = arith.constant 0 : i32
    %c0_i32_0 = arith.constant 0 : i32
    %c0_i32_1 = arith.constant 0 : i32
    return %c0_i32, %c0_i32_0 : i32, i32
  }
  func.func @transform_2(%arg0: i32) -> (i32, i32) {
    %c0_i32 = arith.constant 0 : i32
    %c0_i32_0 = arith.constant 0 : i32
    %c0_i32_1 = arith.constant 0 : i32
    return %c0_i32, %c0_i32_0 : i32, i32
  }
  func.func @transform_3(%arg0: i32) -> (i32, i32) {
    %c0_i32 = arith.constant 0 : i32
    %c0_i32_0 = arith.constant 0 : i32
    %c0_i32_1 = arith.constant 0 : i32
    return %c0_i32, %c0_i32_0 : i32, i32
  }
  func.func @transform_4(%arg0: i32) -> (i32, i32) {
    %c0_i32 = arith.constant 0 : i32
    %c0_i32_0 = arith.constant 0 : i32
    return %arg0, %c0_i32 : i32, i32
  }
}

module attributes {stable_mosaic.version = 11 : i64} {
  func.func @_cca_logits_softmax_kernel(%arg0: i32, %arg1: i32, %arg2: memref<1x64x256xf32, #tpu.memory_space<vmem>>, %arg3: memref<1x64x128xf32, #tpu.memory_space<vmem>>, %arg4: memref<1x256x128xf32, #tpu.memory_space<vmem>>, %arg5: memref<256x128xf32, #tpu.memory_space<vmem>>) attributes {dimension_semantics = [#tpu.dimension_semantics<parallel>, #tpu.dimension_semantics<arbitrary>], iteration_bounds = array<i64: 2, 4>, scalar_prefetch = 0 : i64, scratch_operands = 1 : i64, tpu.core_type = #tpu.core_type<tc>, window_params = [{transform_indices = @transform_0, window_bounds = array<i64: 1, 64, 256>}, {transform_indices = @transform_1, window_bounds = array<i64: 1, 64, 128>}, {transform_indices = @transform_2, window_bounds = array<i64: 1, 256, 128>}]} {
    %c0_i32 = arith.constant 0 : i32
    %0 = arith.cmpi eq, %arg1, %c0_i32 : i32
    %1 = arith.extui %0 : i1 to i32
    %c0_i32_0 = arith.constant 0 : i32
    %2 = arith.cmpi ne, %1, %c0_i32_0 : i32
    scf.if %2 {
      %cst_11 = arith.constant 0.000000e+00 : f32
      %14 = vector.broadcast %cst_11 : f32 to vector<256x128xf32>
      %c0_12 = arith.constant 0 : index
      %c0_13 = arith.constant 0 : index
      %15 = vector.load %arg5[%c0_12, %c0_13] : memref<256x128xf32, #tpu.memory_space<vmem>>, vector<256x128xf32>
      tpu.vector_store %arg5[%c0_12, %c0_13], %14 {strides = array<i32>} : memref<256x128xf32, #tpu.memory_space<vmem>>, vector<256x128xf32>,
    } else {
    }
    %c0 = arith.constant 0 : index
    %c0_1 = arith.constant 0 : index
    %3 = vector.load %arg5[%c0, %c0_1] : memref<256x128xf32, #tpu.memory_space<vmem>>, vector<256x128xf32>
    %c0_2 = arith.constant 0 : index
    %c0_3 = arith.constant 0 : index
    %c0_4 = arith.constant 0 : index
    %4 = vector.load %arg2[%c0_2, %c0_3, %c0_4] : memref<1x64x256xf32, #tpu.memory_space<vmem>>, vector<1x64x256xf32>
    %5 = vector.shape_cast %4 : vector<1x64x256xf32> to vector<64x256xf32>
    %c0_5 = arith.constant 0 : index
    %c0_6 = arith.constant 0 : index
    %c0_7 = arith.constant 0 : index
    %6 = vector.load %arg3[%c0_5, %c0_6, %c0_7] : memref<1x64x128xf32, #tpu.memory_space<vmem>>, vector<1x64x128xf32>
    %7 = vector.shape_cast %6 : vector<1x64x128xf32> to vector<64x128xf32>
    %cst = arith.constant dense<0.000000e+00> : vector<256x128xf32>
    %8 = tpu.matmul %5, %7, %cst {dimension_numbers = #tpu.dot_dimension_numbers<[0], [0], [1], [1], [0, 1, 1, 1], [], []>} : vector<64x256xf32>, vector<64x128xf32>, vector<256x128xf32> -> vector<256x128xf32>
    %9 = arith.addf %3, %8 : vector<256x128xf32>
    %c0_8 = arith.constant 0 : index
    %c0_9 = arith.constant 0 : index
    %10 = vector.load %arg5[%c0_8, %c0_9] : memref<256x128xf32, #tpu.memory_space<vmem>>, vector<256x128xf32>
    tpu.vector_store %arg5[%c0_8, %c0_9], %9 {strides = array<i32>} : memref<256x128xf32, #tpu.memory_space<vmem>>, vector<256x128xf32>,
    %c3_i32 = arith.constant 3 : i32
    %11 = arith.cmpi eq, %arg1, %c3_i32 : i32
    %12 = arith.extui %11 : i1 to i32
    %c0_i32_10 = arith.constant 0 : i32
    %13 = arith.cmpi ne, %12, %c0_i32_10 : i32
    scf.if %13 {
      %c0_11 = arith.constant 0 : index
      %c0_12 = arith.constant 0 : index
      %14 = vector.load %arg5[%c0_11, %c0_12] : memref<256x128xf32, #tpu.memory_space<vmem>>, vector<256x128xf32>
      %cst_13 = arith.constant dense<0xFF800000> : vector<128xf32>
      %15 = vector.multi_reduction <maximumf>, %14, %cst_13 [0] : vector<256x128xf32> to vector<128xf32>
      %16 = vector.shape_cast %15 : vector<128xf32> to vector<1x128xf32>
      %17 = vector.broadcast %16 : vector<1x128xf32> to vector<256x128xf32>
      %18 = arith.subf %14, %17 : vector<256x128xf32>
      %19 = math.exp %18 : vector<256x128xf32>
      %cst_14 = arith.constant dense<0.000000e+00> : vector<128xf32>
      %20 = vector.multi_reduction <add>, %19, %cst_14 [0] : vector<256x128xf32> to vector<128xf32>
      %21 = vector.shape_cast %20 : vector<128xf32> to vector<1x128xf32>
      %22 = vector.broadcast %21 : vector<1x128xf32> to vector<256x128xf32>
      %23 = arith.divf %19, %22 : vector<256x128xf32>
      %c0_15 = arith.constant 0 : index
      %c0_16 = arith.constant 0 : index
      %c0_17 = arith.constant 0 : index
      %24 = vector.load %arg4[%c0_15, %c0_16, %c0_17] : memref<1x256x128xf32, #tpu.memory_space<vmem>>, vector<1x256x128xf32>
      %25 = vector.shape_cast %24 : vector<1x256x128xf32> to vector<256x128xf32>
      %26 = vector.shape_cast %23 : vector<256x128xf32> to vector<1x256x128xf32>
      tpu.vector_store %arg4[%c0_15, %c0_16, %c0_17], %26 {strides = array<i32>} : memref<1x256x128xf32, #tpu.memory_space<vmem>>, vector<1x256x128xf32>,
    } else {
    }
    return
  }
  func.func @transform_0(%arg0: i32, %arg1: i32) -> (i32, i32, i32) {
    %c0_i32 = arith.constant 0 : i32
    %c0_i32_0 = arith.constant 0 : i32
    return %arg0, %arg1, %c0_i32 : i32, i32, i32
  }
  func.func @transform_1(%arg0: i32, %arg1: i32) -> (i32, i32, i32) {
    %c0_i32 = arith.constant 0 : i32
    %c0_i32_0 = arith.constant 0 : i32
    return %arg0, %arg1, %c0_i32 : i32, i32, i32
  }
  func.func @transform_2(%arg0: i32, %arg1: i32) -> (i32, i32, i32) {
    %c0_i32 = arith.constant 0 : i32
    %c0_i32_0 = arith.constant 0 : i32
    %c0_i32_1 = arith.constant 0 : i32
    return %arg0, %c0_i32, %c0_i32_0 : i32, i32, i32
  }
}

module attributes {stable_mosaic.version = 11 : i64} {
  func.func @_cca_apply_kernel(%arg0: i32, %arg1: i32, %arg2: memref<1x256x128xf32, #tpu.memory_space<vmem>>, %arg3: memref<1x64x128xf32, #tpu.memory_space<vmem>>, %arg4: memref<1x64x256xf32, #tpu.memory_space<vmem>>) attributes {dimension_semantics = [#tpu.dimension_semantics<parallel>, #tpu.dimension_semantics<parallel>], iteration_bounds = array<i64: 2, 4>, scalar_prefetch = 0 : i64, scratch_operands = 0 : i64, tpu.core_type = #tpu.core_type<tc>, window_params = [{transform_indices = @transform_0, window_bounds = array<i64: 1, 256, 128>}, {transform_indices = @transform_1, window_bounds = array<i64: 1, 64, 128>}, {transform_indices = @transform_2, window_bounds = array<i64: 1, 64, 256>}]} {
    %c0 = arith.constant 0 : index
    %c0_0 = arith.constant 0 : index
    %c0_1 = arith.constant 0 : index
    %0 = vector.load %arg3[%c0, %c0_0, %c0_1] : memref<1x64x128xf32, #tpu.memory_space<vmem>>, vector<1x64x128xf32>
    %1 = vector.shape_cast %0 : vector<1x64x128xf32> to vector<64x128xf32>
    %c0_2 = arith.constant 0 : index
    %c0_3 = arith.constant 0 : index
    %c0_4 = arith.constant 0 : index
    %2 = vector.load %arg2[%c0_2, %c0_3, %c0_4] : memref<1x256x128xf32, #tpu.memory_space<vmem>>, vector<1x256x128xf32>
    %3 = vector.shape_cast %2 : vector<1x256x128xf32> to vector<256x128xf32>
    %cst = arith.constant dense<0.000000e+00> : vector<64x256xf32>
    %4 = tpu.matmul %1, %3, %cst {dimension_numbers = #tpu.dot_dimension_numbers<[1], [1], [0], [0], [0, 0, 1, 0], [], []>} : vector<64x128xf32>, vector<256x128xf32>, vector<64x256xf32> -> vector<64x256xf32>
    %c0_5 = arith.constant 0 : index
    %c0_6 = arith.constant 0 : index
    %c0_7 = arith.constant 0 : index
    %5 = vector.load %arg4[%c0_5, %c0_6, %c0_7] : memref<1x64x256xf32, #tpu.memory_space<vmem>>, vector<1x64x256xf32>
    %6 = vector.shape_cast %5 : vector<1x64x256xf32> to vector<64x256xf32>
    %7 = vector.shape_cast %4 : vector<64x256xf32> to vector<1x64x256xf32>
    tpu.vector_store %arg4[%c0_5, %c0_6, %c0_7], %7 {strides = array<i32>} : memref<1x64x256xf32, #tpu.memory_space<vmem>>, vector<1x64x256xf32>,
    return
  }
  func.func @transform_0(%arg0: i32, %arg1: i32) -> (i32, i32, i32) {
    %c0_i32 = arith.constant 0 : i32
    %c0_i32_0 = arith.constant 0 : i32
    %c0_i32_1 = arith.constant 0 : i32
    return %arg0, %c0_i32, %c0_i32_0 : i32, i32, i32
  }
  func.func @transform_1(%arg0: i32, %arg1: i32) -> (i32, i32, i32) {
    %c0_i32 = arith.constant 0 : i32
    %c0_i32_0 = arith.constant 0 : i32
    return %arg0, %arg1, %c0_i32 : i32, i32, i32
  }
  func.func @transform_2(%arg0: i32, %arg1: i32) -> (i32, i32, i32) {
    %c0_i32 = arith.constant 0 : i32
    %c0_i32_0 = arith.constant 0 : i32
    return %arg0, %arg1, %c0_i32 : i32, i32, i32
  }
}

module attributes {stable_mosaic.version = 11 : i64} {
  func.func @_conv3x3_bn_lrelu_kernel(%arg0: i32, %arg1: i32, %arg2: memref<2x18x18x128xf32, #tpu.memory_space<any>>, %arg3: memref<3x3x128x256xf32, #tpu.memory_space<vmem>>, %arg4: memref<1x256xf32, #tpu.memory_space<vmem>>, %arg5: memref<1x256xf32, #tpu.memory_space<vmem>>, %arg6: memref<1x128x256xf32, #tpu.memory_space<vmem>>, %arg7: memref<20x18x128xf32, #tpu.memory_space<vmem>>, %arg8: memref<2x!tpu.dma_semaphore, #tpu.memory_space<semaphore_mem>>, %arg9: memref<128x256xf32, #tpu.memory_space<vmem>>) attributes {dimension_semantics = [#tpu.dimension_semantics<parallel>, #tpu.dimension_semantics<arbitrary>], iteration_bounds = array<i64: 2, 2>, scalar_prefetch = 0 : i64, scratch_operands = 3 : i64, tpu.core_type = #tpu.core_type<tc>, window_params = [{}, {pipeline_mode = #tpu.pipeline_mode<synchronous>, transform_indices = @transform_1, window_bounds = array<i64: 3, 3, 128, 256>}, {pipeline_mode = #tpu.pipeline_mode<synchronous>, transform_indices = @transform_2, window_bounds = array<i64: 1, 256>}, {pipeline_mode = #tpu.pipeline_mode<synchronous>, transform_indices = @transform_3, window_bounds = array<i64: 1, 256>}, {transform_indices = @transform_4, window_bounds = array<i64: 1, 128, 256>}]} {
    %c0_i32 = arith.constant 0 : i32
    %0 = arith.cmpi eq, %arg1, %c0_i32 : i32
    %1 = arith.extui %0 : i1 to i32
    %c0_i32_0 = arith.constant 0 : i32
    %2 = arith.cmpi ne, %1, %c0_i32_0 : i32
    scf.if %2 {
      %c0_i32_126 = arith.constant 0 : i32
      %c0_i32_127 = arith.constant 0 : i32
      %c0_i32_128 = arith.constant 0 : i32
      %c0_i32_129 = arith.constant 0 : i32
      %128 = tpu.memref_slice %arg2[%arg0, %c0_i32_127, %c0_i32_128, %c0_i32_129] : memref<2x18x18x128xf32, #tpu.memory_space<any>> -> memref<1x10x18x128xf32, #tpu.memory_space<any>>
      %129 = tpu.memref_squeeze %128 : memref<1x10x18x128xf32, #tpu.memory_space<any>> -> memref<10x18x128xf32, #tpu.memory_space<any>>
      %c0_i32_130 = arith.constant 0 : i32
      %c0_i32_131 = arith.constant 0 : i32
      %c0_i32_132 = arith.constant 0 : i32
      %130 = tpu.memref_slice %arg7[%c0_i32_130, %c0_i32_131, %c0_i32_132] : memref<20x18x128xf32, #tpu.memory_space<vmem>> -> memref<10x18x128xf32, #tpu.memory_space<vmem>>
      %131 = tpu.memref_slice %arg8[%c0_i32_126] : memref<2x!tpu.dma_semaphore, #tpu.memory_space<semaphore_mem>> -> memref<1x!tpu.dma_semaphore, #tpu.memory_space<semaphore_mem>>
      %132 = tpu.memref_squeeze %131 : memref<1x!tpu.dma_semaphore, #tpu.memory_space<semaphore_mem>> -> memref<!tpu.dma_semaphore, #tpu.memory_space<semaphore_mem>>
      tpu.enqueue_dma source(%129 : memref<10x18x128xf32, #tpu.memory_space<any>>) target(%130 : memref<10x18x128xf32, #tpu.memory_space<vmem>>) target_semaphore(%132 : memref<!tpu.dma_semaphore, #tpu.memory_space<semaphore_mem>>)
    } else {
    }
    %c2_i32 = arith.constant 2 : i32
    %c0_i32_1 = arith.constant 0 : i32
    %3 = arith.cmpi eq, %c2_i32, %c0_i32_1 : i32
    %c1_i32 = arith.constant 1 : i32
    %4 = arith.select %3, %c1_i32, %c2_i32 : i32
    %5 = arith.remsi %arg1, %4 : i32
    %c0_i32_2 = arith.constant 0 : i32
    %6 = arith.cmpi ne, %5, %c0_i32_2 : i32
    %c0_i32_3 = arith.constant 0 : i32
    %7 = arith.cmpi slt, %5, %c0_i32_3 : i32
    %c0_i32_4 = arith.constant 0 : i32
    %8 = arith.cmpi slt, %4, %c0_i32_4 : i32
    %9 = arith.xori %7, %8 : i1
    %10 = arith.andi %9, %6 : i1
    %11 = arith.addi %5, %4 : i32
    %12 = arith.select %10, %11, %5 : i32
    %c1_i32_5 = arith.constant 1 : i32
    %13 = arith.addi %arg1, %c1_i32_5 : i32
    %c2_i32_6 = arith.constant 2 : i32
    %14 = arith.cmpi slt, %13, %c2_i32_6 : i32
    %15 = arith.extui %14 : i1 to i32
    %c0_i32_7 = arith.constant 0 : i32
    %16 = arith.cmpi ne, %15, %c0_i32_7 : i32
    scf.if %16 {
      %c1_i32_126 = arith.constant 1 : i32
      %128 = arith.addi %arg1, %c1_i32_126 : i32
      %c1_i32_127 = arith.constant 1 : i32
      %129 = arith.subi %c1_i32_127, %12 : i32
      %c8_i32_128 = arith.constant 8 : i32
      %130 = arith.muli %128, %c8_i32_128 : i32
      %c10_i32_129 = arith.constant 10 : i32
      %131 = arith.muli %129, %c10_i32_129 : i32
      %c0_i32_130 = arith.constant 0 : i32
      %c0_i32_131 = arith.constant 0 : i32
      %132 = tpu.memref_slice %arg2[%arg0, %130, %c0_i32_130, %c0_i32_131] : memref<2x18x18x128xf32, #tpu.memory_space<any>> -> memref<1x10x18x128xf32, #tpu.memory_space<any>>
      %133 = tpu.memref_squeeze %132 : memref<1x10x18x128xf32, #tpu.memory_space<any>> -> memref<10x18x128xf32, #tpu.memory_space<any>>
      %c0_i32_132 = arith.constant 0 : i32
      %c0_i32_133 = arith.constant 0 : i32
      %134 = tpu.memref_slice %arg7[%131, %c0_i32_132, %c0_i32_133] : memref<20x18x128xf32, #tpu.memory_space<vmem>> -> memref<10x18x128xf32, #tpu.memory_space<vmem>>
      %135 = tpu.memref_slice %arg8[%129] : memref<2x!tpu.dma_semaphore, #tpu.memory_space<semaphore_mem>> -> memref<1x!tpu.dma_semaphore, #tpu.memory_space<semaphore_mem>>
      %136 = tpu.memref_squeeze %135 : memref<1x!tpu.dma_semaphore, #tpu.memory_space<semaphore_mem>> -> memref<!tpu.dma_semaphore, #tpu.memory_space<semaphore_mem>>
      tpu.enqueue_dma source(%133 : memref<10x18x128xf32, #tpu.memory_space<any>>) target(%134 : memref<10x18x128xf32, #tpu.memory_space<vmem>>) target_semaphore(%136 : memref<!tpu.dma_semaphore, #tpu.memory_space<semaphore_mem>>)
    } else {
    }
    %c8_i32 = arith.constant 8 : i32
    %17 = arith.muli %arg1, %c8_i32 : i32
    %c10_i32 = arith.constant 10 : i32
    %18 = arith.muli %12, %c10_i32 : i32
    %c0_i32_8 = arith.constant 0 : i32
    %c0_i32_9 = arith.constant 0 : i32
    %19 = tpu.memref_slice %arg2[%arg0, %17, %c0_i32_8, %c0_i32_9] : memref<2x18x18x128xf32, #tpu.memory_space<any>> -> memref<1x10x18x128xf32, #tpu.memory_space<any>>
    %20 = tpu.memref_squeeze %19 : memref<1x10x18x128xf32, #tpu.memory_space<any>> -> memref<10x18x128xf32, #tpu.memory_space<any>>
    %c0_i32_10 = arith.constant 0 : i32
    %c0_i32_11 = arith.constant 0 : i32
    %21 = tpu.memref_slice %arg7[%18, %c0_i32_10, %c0_i32_11] : memref<20x18x128xf32, #tpu.memory_space<vmem>> -> memref<10x18x128xf32, #tpu.memory_space<vmem>>
    %22 = tpu.memref_slice %arg8[%12] : memref<2x!tpu.dma_semaphore, #tpu.memory_space<semaphore_mem>> -> memref<1x!tpu.dma_semaphore, #tpu.memory_space<semaphore_mem>>
    %23 = tpu.memref_squeeze %22 : memref<1x!tpu.dma_semaphore, #tpu.memory_space<semaphore_mem>> -> memref<!tpu.dma_semaphore, #tpu.memory_space<semaphore_mem>>
    tpu.wait_dma2 semaphore(%23 : memref<!tpu.dma_semaphore, #tpu.memory_space<semaphore_mem>>) src(%20 : memref<10x18x128xf32, #tpu.memory_space<any>>) dst(%21 : memref<10x18x128xf32, #tpu.memory_space<vmem>>)
    %c10_i32_12 = arith.constant 10 : i32
    %24 = arith.muli %12, %c10_i32_12 : i32
    %c0_i32_13 = arith.constant 0 : i32
    %25 = arith.addi %24, %c0_i32_13 : i32
    %26 = arith.index_cast %25 : i32 to index
    %c0 = arith.constant 0 : index
    %c0_14 = arith.constant 0 : index
    %27 = vector.load %arg7[%26, %c0, %c0_14] : memref<20x18x128xf32, #tpu.memory_space<vmem>>, vector<8x16x128xf32>
    %28 = vector.shape_cast %27 : vector<8x16x128xf32> to vector<128x128xf32>
    %c0_15 = arith.constant 0 : index
    %c0_16 = arith.constant 0 : index
    %c0_17 = arith.constant 0 : index
    %c0_18 = arith.constant 0 : index
    %29 = vector.load %arg3[%c0_15, %c0_16, %c0_17, %c0_18] : memref<3x3x128x256xf32, #tpu.memory_space<vmem>>, vector<1x1x128x256xf32>
    %30 = vector.shape_cast %29 : vector<1x1x128x256xf32> to vector<128x256xf32>
    %cst = arith.constant dense<0.000000e+00> : vector<128x256xf32>
    %31 = tpu.matmul %28, %30, %cst {dimension_numbers = #tpu.dot_dimension_numbers<[1], [0], [0], [1], [0, 0, 1, 1], [], []>} : vector<128x128xf32>, vector<128x256xf32>, vector<128x256xf32> -> vector<128x256xf32>
    %c0_19 = arith.constant 0 : index
    %c0_20 = arith.constant 0 : index
    %32 = vector.load %arg9[%c0_19, %c0_20] : memref<128x256xf32, #tpu.memory_space<vmem>>, vector<128x256xf32>
    tpu.vector_store %arg9[%c0_19, %c0_20], %31 {strides = array<i32>} : memref<128x256xf32, #tpu.memory_space<vmem>>, vector<128x256xf32>,
    %c0_i32_21 = arith.constant 0 : i32
    %33 = arith.addi %24, %c0_i32_21 : i32
    %34 = arith.index_cast %33 : i32 to index
    %c1 = arith.constant 1 : index
    %c0_22 = arith.constant 0 : index
    %35 = vector.load %arg7[%34, %c1, %c0_22] : memref<20x18x128xf32, #tpu.memory_space<vmem>>, vector<8x16x128xf32>
    %36 = vector.shape_cast %35 : vector<8x16x128xf32> to vector<128x128xf32>
    %c0_23 = arith.constant 0 : index
    %c1_24 = arith.constant 1 : index
    %c0_25 = arith.constant 0 : index
    %c0_26 = arith.constant 0 : index
    %37 = vector.load %arg3[%c0_23, %c1_24, %c0_25, %c0_26] : memref<3x3x128x256xf32, #tpu.memory_space<vmem>>, vector<1x1x128x256xf32>
    %38 = vector.shape_cast %37 : vector<1x1x128x256xf32> to vector<128x256xf32>
    %cst_27 = arith.constant dense<0.000000e+00> : vector<128x256xf32>
    %39 = tpu.matmul %36, %38, %cst_27 {dimension_numbers = #tpu.dot_dimension_numbers<[1], [0], [0], [1], [0, 0, 1, 1], [], []>} : vector<128x128xf32>, vector<128x256xf32>, vector<128x256xf32> -> vector<128x256xf32>
    %c0_28 = arith.constant 0 : index
    %c0_29 = arith.constant 0 : index
    %40 = vector.load %arg9[%c0_28, %c0_29] : memref<128x256xf32, #tpu.memory_space<vmem>>, vector<128x256xf32>
    %41 = arith.addf %40, %39 : vector<128x256xf32>
    %c0_30 = arith.constant 0 : index
    %c0_31 = arith.constant 0 : index
    %42 = vector.load %arg9[%c0_30, %c0_31] : memref<128x256xf32, #tpu.memory_space<vmem>>, vector<128x256xf32>
    tpu.vector_store %arg9[%c0_30, %c0_31], %41 {strides = array<i32>} : memref<128x256xf32, #tpu.memory_space<vmem>>, vector<128x256xf32>,
    %c0_i32_32 = arith.constant 0 : i32
    %43 = arith.addi %24, %c0_i32_32 : i32
    %44 = arith.index_cast %43 : i32 to index
    %c2 = arith.constant 2 : index
    %c0_33 = arith.constant 0 : index
    %45 = vector.load %arg7[%44, %c2, %c0_33] : memref<20x18x128xf32, #tpu.memory_space<vmem>>, vector<8x16x128xf32>
    %46 = vector.shape_cast %45 : vector<8x16x128xf32> to vector<128x128xf32>
    %c0_34 = arith.constant 0 : index
    %c2_35 = arith.constant 2 : index
    %c0_36 = arith.constant 0 : index
    %c0_37 = arith.constant 0 : index
    %47 = vector.load %arg3[%c0_34, %c2_35, %c0_36, %c0_37] : memref<3x3x128x256xf32, #tpu.memory_space<vmem>>, vector<1x1x128x256xf32>
    %48 = vector.shape_cast %47 : vector<1x1x128x256xf32> to vector<128x256xf32>
    %cst_38 = arith.constant dense<0.000000e+00> : vector<128x256xf32>
    %49 = tpu.matmul %46, %48, %cst_38 {dimension_numbers = #tpu.dot_dimension_numbers<[1], [0], [0], [1], [0, 0, 1, 1], [], []>} : vector<128x128xf32>, vector<128x256xf32>, vector<128x256xf32> -> vector<128x256xf32>
    %c0_39 = arith.constant 0 : index
    %c0_40 = arith.constant 0 : index
    %50 = vector.load %arg9[%c0_39, %c0_40] : memref<128x256xf32, #tpu.memory_space<vmem>>, vector<128x256xf32>
    %51 = arith.addf %50, %49 : vector<128x256xf32>
    %c0_41 = arith.constant 0 : index
    %c0_42 = arith.constant 0 : index
    %52 = vector.load %arg9[%c0_41, %c0_42] : memref<128x256xf32, #tpu.memory_space<vmem>>, vector<128x256xf32>
    tpu.vector_store %arg9[%c0_41, %c0_42], %51 {strides = array<i32>} : memref<128x256xf32, #tpu.memory_space<vmem>>, vector<128x256xf32>,
    %c1_i32_43 = arith.constant 1 : i32
    %53 = arith.addi %24, %c1_i32_43 : i32
    %54 = arith.index_cast %53 : i32 to index
    %c0_44 = arith.constant 0 : index
    %c0_45 = arith.constant 0 : index
    %55 = vector.load %arg7[%54, %c0_44, %c0_45] : memref<20x18x128xf32, #tpu.memory_space<vmem>>, vector<8x16x128xf32>
    %56 = vector.shape_cast %55 : vector<8x16x128xf32> to vector<128x128xf32>
    %c1_46 = arith.constant 1 : index
    %c0_47 = arith.constant 0 : index
    %c0_48 = arith.constant 0 : index
    %c0_49 = arith.constant 0 : index
    %57 = vector.load %arg3[%c1_46, %c0_47, %c0_48, %c0_49] : memref<3x3x128x256xf32, #tpu.memory_space<vmem>>, vector<1x1x128x256xf32>
    %58 = vector.shape_cast %57 : vector<1x1x128x256xf32> to vector<128x256xf32>
    %cst_50 = arith.constant dense<0.000000e+00> : vector<128x256xf32>
    %59 = tpu.matmul %56, %58, %cst_50 {dimension_numbers = #tpu.dot_dimension_numbers<[1], [0], [0], [1], [0, 0, 1, 1], [], []>} : vector<128x128xf32>, vector<128x256xf32>, vector<128x256xf32> -> vector<128x256xf32>
    %c0_51 = arith.constant 0 : index
    %c0_52 = arith.constant 0 : index
    %60 = vector.load %arg9[%c0_51, %c0_52] : memref<128x256xf32, #tpu.memory_space<vmem>>, vector<128x256xf32>
    %61 = arith.addf %60, %59 : vector<128x256xf32>
    %c0_53 = arith.constant 0 : index
    %c0_54 = arith.constant 0 : index
    %62 = vector.load %arg9[%c0_53, %c0_54] : memref<128x256xf32, #tpu.memory_space<vmem>>, vector<128x256xf32>
    tpu.vector_store %arg9[%c0_53, %c0_54], %61 {strides = array<i32>} : memref<128x256xf32, #tpu.memory_space<vmem>>, vector<128x256xf32>,
    %c1_i32_55 = arith.constant 1 : i32
    %63 = arith.addi %24, %c1_i32_55 : i32
    %64 = arith.index_cast %63 : i32 to index
    %c1_56 = arith.constant 1 : index
    %c0_57 = arith.constant 0 : index
    %65 = vector.load %arg7[%64, %c1_56, %c0_57] : memref<20x18x128xf32, #tpu.memory_space<vmem>>, vector<8x16x128xf32>
    %66 = vector.shape_cast %65 : vector<8x16x128xf32> to vector<128x128xf32>
    %c1_58 = arith.constant 1 : index
    %c1_59 = arith.constant 1 : index
    %c0_60 = arith.constant 0 : index
    %c0_61 = arith.constant 0 : index
    %67 = vector.load %arg3[%c1_58, %c1_59, %c0_60, %c0_61] : memref<3x3x128x256xf32, #tpu.memory_space<vmem>>, vector<1x1x128x256xf32>
    %68 = vector.shape_cast %67 : vector<1x1x128x256xf32> to vector<128x256xf32>
    %cst_62 = arith.constant dense<0.000000e+00> : vector<128x256xf32>
    %69 = tpu.matmul %66, %68, %cst_62 {dimension_numbers = #tpu.dot_dimension_numbers<[1], [0], [0], [1], [0, 0, 1, 1], [], []>} : vector<128x128xf32>, vector<128x256xf32>, vector<128x256xf32> -> vector<128x256xf32>
    %c0_63 = arith.constant 0 : index
    %c0_64 = arith.constant 0 : index
    %70 = vector.load %arg9[%c0_63, %c0_64] : memref<128x256xf32, #tpu.memory_space<vmem>>, vector<128x256xf32>
    %71 = arith.addf %70, %69 : vector<128x256xf32>
    %c0_65 = arith.constant 0 : index
    %c0_66 = arith.constant 0 : index
    %72 = vector.load %arg9[%c0_65, %c0_66] : memref<128x256xf32, #tpu.memory_space<vmem>>, vector<128x256xf32>
    tpu.vector_store %arg9[%c0_65, %c0_66], %71 {strides = array<i32>} : memref<128x256xf32, #tpu.memory_space<vmem>>, vector<128x256xf32>,
    %c1_i32_67 = arith.constant 1 : i32
    %73 = arith.addi %24, %c1_i32_67 : i32
    %74 = arith.index_cast %73 : i32 to index
    %c2_68 = arith.constant 2 : index
    %c0_69 = arith.constant 0 : index
    %75 = vector.load %arg7[%74, %c2_68, %c0_69] : memref<20x18x128xf32, #tpu.memory_space<vmem>>, vector<8x16x128xf32>
    %76 = vector.shape_cast %75 : vector<8x16x128xf32> to vector<128x128xf32>
    %c1_70 = arith.constant 1 : index
    %c2_71 = arith.constant 2 : index
    %c0_72 = arith.constant 0 : index
    %c0_73 = arith.constant 0 : index
    %77 = vector.load %arg3[%c1_70, %c2_71, %c0_72, %c0_73] : memref<3x3x128x256xf32, #tpu.memory_space<vmem>>, vector<1x1x128x256xf32>
    %78 = vector.shape_cast %77 : vector<1x1x128x256xf32> to vector<128x256xf32>
    %cst_74 = arith.constant dense<0.000000e+00> : vector<128x256xf32>
    %79 = tpu.matmul %76, %78, %cst_74 {dimension_numbers = #tpu.dot_dimension_numbers<[1], [0], [0], [1], [0, 0, 1, 1], [], []>} : vector<128x128xf32>, vector<128x256xf32>, vector<128x256xf32> -> vector<128x256xf32>
    %c0_75 = arith.constant 0 : index
    %c0_76 = arith.constant 0 : index
    %80 = vector.load %arg9[%c0_75, %c0_76] : memref<128x256xf32, #tpu.memory_space<vmem>>, vector<128x256xf32>
    %81 = arith.addf %80, %79 : vector<128x256xf32>
    %c0_77 = arith.constant 0 : index
    %c0_78 = arith.constant 0 : index
    %82 = vector.load %arg9[%c0_77, %c0_78] : memref<128x256xf32, #tpu.memory_space<vmem>>, vector<128x256xf32>
    tpu.vector_store %arg9[%c0_77, %c0_78], %81 {strides = array<i32>} : memref<128x256xf32, #tpu.memory_space<vmem>>, vector<128x256xf32>,
    %c2_i32_79 = arith.constant 2 : i32
    %83 = arith.addi %24, %c2_i32_79 : i32
    %84 = arith.index_cast %83 : i32 to index
    %c0_80 = arith.constant 0 : index
    %c0_81 = arith.constant 0 : index
    %85 = vector.load %arg7[%84, %c0_80, %c0_81] : memref<20x18x128xf32, #tpu.memory_space<vmem>>, vector<8x16x128xf32>
    %86 = vector.shape_cast %85 : vector<8x16x128xf32> to vector<128x128xf32>
    %c2_82 = arith.constant 2 : index
    %c0_83 = arith.constant 0 : index
    %c0_84 = arith.constant 0 : index
    %c0_85 = arith.constant 0 : index
    %87 = vector.load %arg3[%c2_82, %c0_83, %c0_84, %c0_85] : memref<3x3x128x256xf32, #tpu.memory_space<vmem>>, vector<1x1x128x256xf32>
    %88 = vector.shape_cast %87 : vector<1x1x128x256xf32> to vector<128x256xf32>
    %cst_86 = arith.constant dense<0.000000e+00> : vector<128x256xf32>
    %89 = tpu.matmul %86, %88, %cst_86 {dimension_numbers = #tpu.dot_dimension_numbers<[1], [0], [0], [1], [0, 0, 1, 1], [], []>} : vector<128x128xf32>, vector<128x256xf32>, vector<128x256xf32> -> vector<128x256xf32>
    %c0_87 = arith.constant 0 : index
    %c0_88 = arith.constant 0 : index
    %90 = vector.load %arg9[%c0_87, %c0_88] : memref<128x256xf32, #tpu.memory_space<vmem>>, vector<128x256xf32>
    %91 = arith.addf %90, %89 : vector<128x256xf32>
    %c0_89 = arith.constant 0 : index
    %c0_90 = arith.constant 0 : index
    %92 = vector.load %arg9[%c0_89, %c0_90] : memref<128x256xf32, #tpu.memory_space<vmem>>, vector<128x256xf32>
    tpu.vector_store %arg9[%c0_89, %c0_90], %91 {strides = array<i32>} : memref<128x256xf32, #tpu.memory_space<vmem>>, vector<128x256xf32>,
    %c2_i32_91 = arith.constant 2 : i32
    %93 = arith.addi %24, %c2_i32_91 : i32
    %94 = arith.index_cast %93 : i32 to index
    %c1_92 = arith.constant 1 : index
    %c0_93 = arith.constant 0 : index
    %95 = vector.load %arg7[%94, %c1_92, %c0_93] : memref<20x18x128xf32, #tpu.memory_space<vmem>>, vector<8x16x128xf32>
    %96 = vector.shape_cast %95 : vector<8x16x128xf32> to vector<128x128xf32>
    %c2_94 = arith.constant 2 : index
    %c1_95 = arith.constant 1 : index
    %c0_96 = arith.constant 0 : index
    %c0_97 = arith.constant 0 : index
    %97 = vector.load %arg3[%c2_94, %c1_95, %c0_96, %c0_97] : memref<3x3x128x256xf32, #tpu.memory_space<vmem>>, vector<1x1x128x256xf32>
    %98 = vector.shape_cast %97 : vector<1x1x128x256xf32> to vector<128x256xf32>
    %cst_98 = arith.constant dense<0.000000e+00> : vector<128x256xf32>
    %99 = tpu.matmul %96, %98, %cst_98 {dimension_numbers = #tpu.dot_dimension_numbers<[1], [0], [0], [1], [0, 0, 1, 1], [], []>} : vector<128x128xf32>, vector<128x256xf32>, vector<128x256xf32> -> vector<128x256xf32>
    %c0_99 = arith.constant 0 : index
    %c0_100 = arith.constant 0 : index
    %100 = vector.load %arg9[%c0_99, %c0_100] : memref<128x256xf32, #tpu.memory_space<vmem>>, vector<128x256xf32>
    %101 = arith.addf %100, %99 : vector<128x256xf32>
    %c0_101 = arith.constant 0 : index
    %c0_102 = arith.constant 0 : index
    %102 = vector.load %arg9[%c0_101, %c0_102] : memref<128x256xf32, #tpu.memory_space<vmem>>, vector<128x256xf32>
    tpu.vector_store %arg9[%c0_101, %c0_102], %101 {strides = array<i32>} : memref<128x256xf32, #tpu.memory_space<vmem>>, vector<128x256xf32>,
    %c2_i32_103 = arith.constant 2 : i32
    %103 = arith.addi %24, %c2_i32_103 : i32
    %104 = arith.index_cast %103 : i32 to index
    %c2_104 = arith.constant 2 : index
    %c0_105 = arith.constant 0 : index
    %105 = vector.load %arg7[%104, %c2_104, %c0_105] : memref<20x18x128xf32, #tpu.memory_space<vmem>>, vector<8x16x128xf32>
    %106 = vector.shape_cast %105 : vector<8x16x128xf32> to vector<128x128xf32>
    %c2_106 = arith.constant 2 : index
    %c2_107 = arith.constant 2 : index
    %c0_108 = arith.constant 0 : index
    %c0_109 = arith.constant 0 : index
    %107 = vector.load %arg3[%c2_106, %c2_107, %c0_108, %c0_109] : memref<3x3x128x256xf32, #tpu.memory_space<vmem>>, vector<1x1x128x256xf32>
    %108 = vector.shape_cast %107 : vector<1x1x128x256xf32> to vector<128x256xf32>
    %cst_110 = arith.constant dense<0.000000e+00> : vector<128x256xf32>
    %109 = tpu.matmul %106, %108, %cst_110 {dimension_numbers = #tpu.dot_dimension_numbers<[1], [0], [0], [1], [0, 0, 1, 1], [], []>} : vector<128x128xf32>, vector<128x256xf32>, vector<128x256xf32> -> vector<128x256xf32>
    %c0_111 = arith.constant 0 : index
    %c0_112 = arith.constant 0 : index
    %110 = vector.load %arg9[%c0_111, %c0_112] : memref<128x256xf32, #tpu.memory_space<vmem>>, vector<128x256xf32>
    %111 = arith.addf %110, %109 : vector<128x256xf32>
    %c0_113 = arith.constant 0 : index
    %c0_114 = arith.constant 0 : index
    %112 = vector.load %arg9[%c0_113, %c0_114] : memref<128x256xf32, #tpu.memory_space<vmem>>, vector<128x256xf32>
    tpu.vector_store %arg9[%c0_113, %c0_114], %111 {strides = array<i32>} : memref<128x256xf32, #tpu.memory_space<vmem>>, vector<128x256xf32>,
    %c0_115 = arith.constant 0 : index
    %c0_116 = arith.constant 0 : index
    %113 = vector.load %arg9[%c0_115, %c0_116] : memref<128x256xf32, #tpu.memory_space<vmem>>, vector<128x256xf32>
    %c0_117 = arith.constant 0 : index
    %c0_118 = arith.constant 0 : index
    %114 = vector.load %arg4[%c0_117, %c0_118] : memref<1x256xf32, #tpu.memory_space<vmem>>, vector<1x256xf32>
    %115 = vector.broadcast %114 : vector<1x256xf32> to vector<128x256xf32>
    %116 = arith.mulf %113, %115 : vector<128x256xf32>
    %c0_119 = arith.constant 0 : index
    %c0_120 = arith.constant 0 : index
    %117 = vector.load %arg5[%c0_119, %c0_120] : memref<1x256xf32, #tpu.memory_space<vmem>>, vector<1x256xf32>
    %118 = vector.broadcast %117 : vector<1x256xf32> to vector<128x256xf32>
    %119 = arith.addf %116, %118 : vector<128x256xf32>
    %cst_121 = arith.constant 0.000000e+00 : f32
    %120 = vector.broadcast %cst_121 : f32 to vector<128x256xf32>
    %121 = arith.cmpf ogt, %119, %120 : vector<128x256xf32>
    %cst_122 = arith.constant 1.000000e-01 : f32
    %122 = vector.broadcast %cst_122 : f32 to vector<128x256xf32>
    %123 = arith.mulf %122, %119 : vector<128x256xf32>
    %124 = arith.select %121, %119, %123 : vector<128x256xi1>, vector<128x256xf32>
    %c0_123 = arith.constant 0 : index
    %c0_124 = arith.constant 0 : index
    %c0_125 = arith.constant 0 : index
    %125 = vector.load %arg6[%c0_123, %c0_124, %c0_125] : memref<1x128x256xf32, #tpu.memory_space<vmem>>, vector<1x128x256xf32>
    %126 = vector.shape_cast %125 : vector<1x128x256xf32> to vector<128x256xf32>
    %127 = vector.shape_cast %124 : vector<128x256xf32> to vector<1x128x256xf32>
    tpu.vector_store %arg6[%c0_123, %c0_124, %c0_125], %127 {strides = array<i32>} : memref<1x128x256xf32, #tpu.memory_space<vmem>>, vector<1x128x256xf32>,
    return
  }
  func.func @transform_1(%arg0: i32, %arg1: i32) -> (i32, i32, i32, i32) {
    %c0_i32 = arith.constant 0 : i32
    %c0_i32_0 = arith.constant 0 : i32
    %c0_i32_1 = arith.constant 0 : i32
    %c0_i32_2 = arith.constant 0 : i32
    %c0_i32_3 = arith.constant 0 : i32
    return %c0_i32, %c0_i32_0, %c0_i32_1, %c0_i32_2 : i32, i32, i32, i32
  }
  func.func @transform_2(%arg0: i32, %arg1: i32) -> (i32, i32) {
    %c0_i32 = arith.constant 0 : i32
    %c0_i32_0 = arith.constant 0 : i32
    %c0_i32_1 = arith.constant 0 : i32
    return %c0_i32, %c0_i32_0 : i32, i32
  }
  func.func @transform_3(%arg0: i32, %arg1: i32) -> (i32, i32) {
    %c0_i32 = arith.constant 0 : i32
    %c0_i32_0 = arith.constant 0 : i32
    %c0_i32_1 = arith.constant 0 : i32
    return %c0_i32, %c0_i32_0 : i32, i32
  }
  func.func @transform_4(%arg0: i32, %arg1: i32) -> (i32, i32, i32) {
    %c0_i32 = arith.constant 0 : i32
    %c0_i32_0 = arith.constant 0 : i32
    return %arg0, %arg1, %c0_i32 : i32, i32, i32
  }
}

</mosaic_0001>

<bundles_post_ra>
// kernel: cca_forward.9
= control target key start
LH: loop header
LB: loop body
LE: loop exit
PB: predicated region body
PF: predicated region fallthrough
CT: control target
= control target key end

     0   :  { %9 = vsyncpa [#allocation3], 0  ;;  %s1392_s0 = inlined_call_operand.hbm [shape: f32[512,256], index: 0, kind: input, shape index: {}]   ;;  %s1393_s1 = inlined_call_operand.hbm [shape: f32[256,128], index: 1, kind: input, shape index: {}]   ;;  %s1394_s2 = inlined_call_operand.hbm [shape: f32[1,128], index: 2, kind: input, shape index: {}]   ;;  %s1395_s3 = inlined_call_operand.hbm [shape: f32[1,128], index: 3, kind: input, shape index: {}]   ;;  %s1396_s4 = inlined_call_operand.vmem [shape: f32[512,128], index: 4, kind: output, shape index: {}]  }
   0x1   :  { %11 = vsyncpa [#allocation3 + $0x1], 0 }
   0x2   :  { %12 = vsyncpa [#allocation5], 0 }
   0x3   :  { %13 = vsyncpa [#allocation8], 0  ;;  %s1093_s15 = smov 0   ;;  %s1095_s16 = smov 0  }
   0x4   :  { %s1097_s17 = smov 0   ;;  %s1099_s18 = smov 0  }
   0x5 LB: > { %s676_s19 = sadd.s32 4294967295, %s1058_s18   ;;  %p39_p0 = scmp.ne.s32.totalorder %s1050_s16, %s1046_s15  ;;  %s1058_s18 = sphi %s1099_s18, %s1413_s18   ;;  %s1054_s17 = sphi %s1097_s17, %s1412_s17   ;;  %s1050_s16 = sphi %s1095_s16, %s1411_s16   ;;  %s1046_s15 = sphi %s1093_s15, %s1410_s15  }
   0x6   : > { %p1115_p1 = scmp.eq.s32.totalorder %s676_s19, 0  ;;  %p678_p2 = scmp.ge.s32.totalorder %s1058_s18, 1 }
   0x7   : > { %p139_p3 = scmp.lt.s32.totalorder %s1058_s18, 5  ;;  %s1060_s23 = smov [#allocation4]  }
   0x8   : > { %s1401_s20 = scalar_select %p1115_p1, 1, 0 }
   0x9   : > { %p1123_p4 = por %p1115_p1, %p39_p0  ;;  %p1127_p5 = pnand %p678_p2, %p139_p3 }
   0xa   : > { %s151_s24 = sshll.u32 %s1060_s23, 4  ;;  %s1061_s26 = smov [#allocation6]   ;;  %s1131_s24 = int_to_ptr.vmem [resolvable:$true] %s151_s24 }
   0xb   : > { %s1402_s21 = scalar_select %p1123_p4, 1, 0 }
   0xc   : > { %s1403_s22 = scalar_select %p1127_p5, 1, 0 }
   0xd   : > { %p842_p6 = pneg %p1127_p5  ;;  %s165_s27 = sshll.u32 %s1061_s26, 4  ;;  %s1141_s27 = int_to_ptr.vmem [resolvable:$true] %s165_s27 }
   0xe   : > { %s1062_s28 = smov [#allocation7]   ;;  %s902_s6 = scalar_lea.hbm %s1393_s1, 4096 }
   0xf   : > { %p1137_p7 = pnand %p842_p6, %p1115_p1  ;;  %s1143_s29 = sshll.u32 %s1062_s28, 4  ;;  %s177_s29 = int_to_ptr.vmem [resolvable:$true] %s1143_s29 }
  0x10   : > { %p903_p8 = scmp.ne.s32.totalorder %s1393_s1, %s902_s6  ;;  %p909_p12 = scmp.lt.u32.totalorder %s902_s6, %s1393_s1 }
  0x11   : > { %p1153_p9 = pneg %p1137_p7 }
  0x13   : > { %p905_p10 = pnand %p1153_p9, %p903_p8 }
  0x15   : > { %p906_p11 = pneg %p905_p10 }
  0x17   : > { %p911_p13 = pnand %p909_p12, %p906_p11 }
  0x19   : > { %914 = shalt.err (!%p911_p13)
}
  0x1a   : > { %s915_s12 = scalar_lea.vmem %s1131_s24, 4096  ;;  %p923_p6 = scmp.lt.s32.totalorder %s1131_s24, %s1131_s24 }
  0x1b   : > { %p916_p0 = scmp.ne.s32.totalorder %s1131_s24, %s915_s12  ;;  %p924_p1 = scmp.lt.s32.totalorder %s915_s12, %s915_s12 }
  0x1d   : > { %p918_p2 = pnand %p916_p0, %p1153_p9  ;;  %p925_p8 = por %p924_p1, %p923_p6 }
  0x1f   : > { %p919_p3 = pneg %p918_p2 }
  0x21   : > { %p926_p10 = pnand %p925_p8, %p919_p3 }
  0x23   : > { %929 = shalt.err (!%p926_p10)
}
  0x24   : > { %s1063_s13 = smov 128   ;;  %s1064_s14 = smov 8  }
  0x25   : > { %845 = dma.hbm_to_vmem [thread:$0]  (!%p1137_p7), %s1393_s1, 4096, %s1131_s24, [#allocation5], %s1063_s13, %s1063_s13, %s1064_s14  }
  0x26   : > { %s930_s30 = scalar_lea.hbm %s1394_s2, 16 }
  0x27   : > { %p931_p1 = scmp.ne.s32.totalorder %s1394_s2, %s930_s30  ;;  %p937_p13 = scmp.lt.u32.totalorder %s930_s30, %s1394_s2 }
  0x29   : > { %p933_p11 = pnand %p931_p1, %p1153_p9 }
  0x2b   : > { %p934_p12 = pneg %p933_p11 }
  0x2d   : > { %p939_p0 = pnand %p937_p13, %p934_p12 }
  0x2f   : > { %942 = shalt.err (!%p939_p0)
}
  0x30   : > { %s943_s24 = scalar_lea.vmem %s1141_s27, 16  ;;  %s950_s10 = scalar_lea.vmem %s1141_s27, 32 }
  0x31   : > { %p944_p2 = scmp.ne.s32.totalorder %s1141_s27, %s943_s24  ;;  %p951_p8 = scmp.lt.s32.totalorder %s1141_s27, %s1141_s27 }
  0x32   : > { %p952_p10 = scmp.lt.s32.totalorder %s950_s10, %s943_s24 }
  0x33   : > { %p946_p3 = pnand %p944_p2, %p1153_p9 }
  0x34   : > { %p953_p1 = por %p952_p10, %p951_p8 }
  0x35   : > { %p947_p6 = pneg %p946_p3 }
  0x37   : > { %p954_p11 = pnand %p953_p1, %p947_p6 }
  0x39   : > { %957 = shalt.err (!%p954_p11)
}
  0x3a   : > { %848 = dma.hbm_to_vmem [thread:$0]  (!%p1137_p7), %s1394_s2, 16, %s1141_s27, [#allocation5]  }
  0x3b   : > { %s958_s15 = scalar_lea.hbm %s1395_s3, 16 }
  0x3c   : > { %p959_p12 = scmp.ne.s32.totalorder %s1395_s3, %s958_s15  ;;  %p965_p2 = scmp.lt.u32.totalorder %s958_s15, %s1395_s3 }
  0x3e   : > { %p961_p13 = pnand %p959_p12, %p1153_p9 }
  0x40   : > { %p962_p0 = pneg %p961_p13 }
  0x42   : > { %p967_p3 = pnand %p965_p2, %p962_p0 }
  0x44   : > { %970 = shalt.err (!%p967_p3)
}
  0x45   : > { %s971_s5 = scalar_lea.vmem %s177_s29, 16  ;;  %s978_s27 = scalar_lea.vmem %s177_s29, 32 }
  0x46   : > { %p972_p6 = scmp.ne.s32.totalorder %s177_s29, %s971_s5  ;;  %p979_p1 = scmp.lt.s32.totalorder %s177_s29, %s177_s29 }
  0x47   : > { %p980_p11 = scmp.lt.s32.totalorder %s978_s27, %s971_s5 }
  0x48   : > { %p974_p8 = pnand %p972_p6, %p1153_p9 }
  0x49   : > { %p981_p4 = por %p980_p11, %p979_p1 }
  0x4a   : > { %p975_p10 = pneg %p974_p8 }
  0x4c   : > { %p982_p5 = pnand %p981_p4, %p975_p10 }
  0x4e   : > { %985 = shalt.err (!%p982_p5)
}
  0x4f   : > { %851 = dma.hbm_to_vmem [thread:$0]  (!%p1137_p7), %s1395_s3, 16, %s177_s29, [#allocation8]  }
  0x50   : > { %s1218_s9 = sadd.s32 1, %s1058_s18   ;;  %s26_s24 = sadd.s32 1, %s1054_s17 }
  0x51   : > { %s23_s8 = ssub.s32 %s1058_s18, %s1218_s9  ;;  %p33_p5 = scmp.ne.s32.totalorder %s1054_s17, %s1050_s16 }
  0x52   : > { %p24_p4 = scmp.eq.s32.totalorder %s23_s8, 0  ;;  %p34_p9 = scmp.eq.s32.totalorder %s1058_s18, 0 }
  0x53   : > { %p859_p12 = scmp.lt.s32.totalorder %s1058_s18, 4  ;;  %s187_s10 = sand.u32 1, %s1054_s17  }
  0x54   : > { %s1228_s25 = scalar_select %p24_p4, %s1054_s17, %s26_s24  }
  0x55   : > { %p35_p13 = por %p34_p9, %p33_p5  ;;  %s683_s11 = sshll.u32 %s187_s10, 8 }
  0x56   : > { %s699_s12 = sshll.u32 %s1058_s18, 12  ;;  %s191_s29 = scalar_lea.vmem [#allocation2], %s683_s11 }
  0x57   : > { %s1235_s15 = scalar_lea.hbm %s1392_s0, %s699_s12  ;;  %s199_s23 = sshll.u32 %s191_s29, 4  ;;  %s1237_s23 = int_to_ptr.vmem [resolvable:$true] %s199_s23 }
  0x58   : > { %p1239_p7 = pnand %p859_p12, %p35_p13  ;;  %s1243_s28 = scalar_lea.sflag [#allocation3], %s187_s10 }
  0x59   : > { %s986_s30 = scalar_lea.hbm %s1235_s15, 4096  ;;  %s991_s6 = scalar_lea.hbm %s1392_s0, 16384 }
  0x5a   : > { %p987_p0 = scmp.ne.s32.totalorder %s1235_s15, %s986_s30  ;;  %p988_p2 = pneg %p1239_p7 }
  0x5b   : > { %p992_p8 = scmp.lt.u32.totalorder %s1235_s15, %s1392_s0  ;;  %p993_p10 = scmp.lt.u32.totalorder %s991_s6, %s986_s30 }
  0x5c   : > { %p989_p3 = pnand %p988_p2, %p987_p0  ;;  %p995_p11 = scmp.lt.u32.totalorder %s986_s30, %s1235_s15 }
  0x5d   : > { %p994_p1 = por %p993_p10, %p992_p8 }
  0x5e   : > { %p990_p6 = pneg %p989_p3 }
  0x5f   : > { %p996_p4 = por %p995_p11, %p994_p1 }
  0x61   : > { %p997_p5 = pnand %p996_p4, %p990_p6 }
  0x63   : > { %1000 = shalt.err (!%p997_p5)
}
  0x64   : > { %s1001_s24 = scalar_lea.vmem %s1237_s23, 4096  ;;  %s1065_s10 = smov [#allocation2]  }
  0x65   : > { %p1002_p9 = scmp.ne.s32.totalorder %s1237_s23, %s1001_s24  ;;  %s1006_s11 = sshll.u32 %s1065_s10, 4  ;;  %s1007_s11 = int_to_ptr.vmem [resolvable:$false] %s1006_s11 }
  0x66   : > { %s1008_s12 = scalar_lea.vmem %s1007_s11, 8192  ;;  %p1009_p0 = scmp.lt.s32.totalorder %s1237_s23, %s1007_s11 }
  0x67   : > { %p1004_p12 = pnand %p1002_p9, %p988_p2  ;;  %p1010_p3 = scmp.lt.s32.totalorder %s1008_s12, %s1001_s24 }
  0x69   : > { %p1005_p13 = pneg %p1004_p12  ;;  %p1011_p8 = por %p1010_p3, %p1009_p0 }
  0x6b   : > { %p1012_p10 = pnand %p1011_p8, %p1005_p13 }
  0x6d   : > { %1015 = shalt.err (!%p1012_p10)
}
  0x6e   : > { %s1066_s13 = smov 256   ;;  %s1067_s14 = smov 16  }
  0x6f   : > { %855 = dma.hbm_to_vmem [thread:$0]  (!%p1239_p7), %s1235_s15, 4096, %s1237_s23, %s1243_s28, %s1066_s13, %s1066_s13, %s1067_s14  }
  0x70   : > { %p1407_p2 = scmp.ne.s32.totalorder %s1403_s22, 0 }
  0x71   : > { %s213_s29 = sand.u32 (!%p1407_p2), 1, %s1050_s16   ;;  %p1408_p6 = scmp.ne.s32.totalorder (!%p1407_p2), %s1402_s21, 0 }
  0x72   : > { %211 = sbr.rel (%p1407_p2) target bundleno = 414 (0x19e), region = 36  ;;  %s688_s30 = sshll.u32 (!%p1407_p2), %s213_s29, 8 }
  0x73   : > { %s214_s5 = scalar_lea.sflag (!%p1407_p2), [#allocation3], %s213_s29  ;;  %s1274_s27 = scalar_lea.vmem (!%p1407_p2), [#allocation2], %s688_s30 }
  0x79   : > { %1033 = dma.done.wait (%p1408_p6), %s214_s5, 4096  }
  0x7a   : > { %1035 = vsyncadd (%p1408_p6), %s214_s5, 4294963200  ;;  %p1409_p1 = scmp.ne.s32.totalorder %s1401_s20, 0 }
  0x7c   : > { %1037 = dma.done.wait (%p1409_p1), [#allocation5], 4112  }
  0x7d   : > { %1039 = vsyncadd (%p1409_p1), [#allocation5], 4294963184 }
  0x7e   : > { %1041 = dma.done.wait (%p1409_p1), [#allocation8], 16  }
  0x7f   : > { %1043 = vsyncadd (%p1409_p1), [#allocation8], 4294967280  ;;  %v309_v0 = vld [vmem:[#allocation4 + $0x80] sm:$0xff]  ;;  %v310_v1 = vld [vmem:[#allocation4 + $0x88] sm:$0xff]  ;;  %s692_s20 = sshll.u32 %s676_s19, 4 }
  0x80   : > { %v293_v2 = vld [vmem:[#allocation4] sm:$0xff]  ;;  %v780_v3 = vpack.c.bf16 %v310_v1, %v309_v0  ;;  %v294_v4 = vld [vmem:[#allocation4 + $0x8] sm:$0xff]  ;;  %v311_v5 = vld [vmem:[#allocation4 + $0x90] sm:$0xff]  ;;  %p256_p7 = scmp.lt.s32.totalorder %s692_s20, 63 }
  0x81   : > { %v312_v6 = vld [vmem:[#allocation4 + $0x98] sm:$0xff]  ;;  %v782_v7 = vpack.c.bf16 %v294_v4, %v293_v2  ;;  %v295_v9 = vld [vmem:[#allocation4 + $0x10] sm:$0xff]  ;;  %v313_v11 = vld [vmem:[#allocation4 + $0xa0] sm:$0xff] }
  0x82   : > { %v784_v8 = vpack.c.bf16 %v312_v6, %v311_v5  ;;  %v296_v10 = vld [vmem:[#allocation4 + $0x18] sm:$0xff]  ;;  %781 = vmatprep.subr.bf16.mxu0 %v780_v3  ;;  %812 = vmatprep.subr.bf16.mxu1 %v780_v3  ;;  %v314_v12 = vld [vmem:[#allocation4 + $0xa8] sm:$0xff]  ;;  %v297_v15 = vld [vmem:[#allocation4 + $0x20] sm:$0xff]  ;;  %s1415_s20 = smov (!%p256_p7, %s692_s20), 63 }
  0x83   : > { %783 = vmatpush3.bf16.msra.mxu0 %v782_v7  ;;  %820 = vmatpush3.bf16.msra.mxu1 %v782_v7  ;;  %v786_v13 = vpack.c.bf16 %v296_v10, %v295_v9  ;;  %v788_v14 = vpack.c.bf16 %v314_v12, %v313_v11  ;;  %v298_v16 = vld [vmem:[#allocation4 + $0x28] sm:$0xff]  ;;  %v315_v17 = vld [vmem:[#allocation4 + $0xb0] sm:$0xff]  ;;  %v316_v18 = vld [vmem:[#allocation4 + $0xb8] sm:$0xff]  ;;  %s693_s18 = sshll.u32 %s1415_s20, 3 }
  0x84   : > { %785 = vmatprep.subr.bf16.mxu0 %v784_v8  ;;  %813 = vmatprep.subr.bf16.mxu1 %v784_v8  ;;  %v790_v19 = vpack.c.bf16 %v298_v16, %v297_v15  ;;  %v792_v20 = vpack.c.bf16 %v316_v18, %v315_v17  ;;  %v299_v21 = vld [vmem:[#allocation4 + $0x30] sm:$0xff]  ;;  %v300_v22 = vld [vmem:[#allocation4 + $0x38] sm:$0xff]  ;;  %v317_v23 = vld [vmem:[#allocation4 + $0xc0] sm:$0xff]  ;;  %s1333_s22 = scalar_lea.vmem %s1396_s4, %s693_s18 }
  0x85   : > { %v318_v24 = vld [vmem:[#allocation4 + $0xc8] sm:$0xff]  ;;  %v794_v27 = vpack.c.bf16 %v300_v22, %v299_v21  ;;  %v301_v29 = vld [vmem:[#allocation4 + $0x40] sm:$0xff]  ;;  %v319_v31 = vld [vmem:[#allocation4 + $0xd0] sm:$0xff] }
  0x86   : > { %v262_v25 = vld [vmem:[%s1274_s27 + $0x8] sm:$0xff]  ;;  %v796_v28 = vpack.c.bf16 %v318_v24, %v317_v23  ;;  %v320_v32 = vld [vmem:[#allocation4 + $0xd8] sm:$0xff]  ;;  %v303_v35 = vld [vmem:[#allocation4 + $0x50] sm:$0xff] }
  0x87   : > { %787 = vmatpush3.bf16.msra.mxu0 %v786_v13  ;;  %821 = vmatpush3.bf16.msra.mxu1 %v786_v13  ;;  %v278_v26 = vld [vmem:[%s1274_s27 + $0x88] sm:$0xff]  ;;  %v800_v34 = vpack.c.bf16 %v320_v32, %v319_v31  ;;  %v304_v36 = vld [vmem:[#allocation4 + $0x58] sm:$0xff]  ;;  %v321_v37 = vld [vmem:[#allocation4 + $0xe0] sm:$0xff] }
  0x88   : > { %789 = vmatprep.subr.bf16.mxu0 %v788_v14  ;;  %814 = vmatprep.subr.bf16.mxu1 %v788_v14  ;;  %v302_v30 = vld [vmem:[#allocation4 + $0x48] sm:$0xff]  ;;  %v802_v39 = vpack.c.bf16 %v304_v36, %v303_v35  ;;  %v305_v41 = vld [vmem:[#allocation4 + $0x60] sm:$0xff]  ;;  %v323_v43 = vld [vmem:[#allocation4 + $0xf0] sm:$0xff] }
  0x89   : > { %389 = vmatprep.mubr.f32.mxu0 %v262_v25  ;;  %429 = vmatprep.mubr.f32.mxu1 %v278_v26  ;;  %v798_v33 = vpack.c.bf16 %v302_v30, %v301_v29  ;;  %v322_v38 = vld [vmem:[#allocation4 + $0xe8] sm:$0xff]  ;;  %v324_v44 = vld [vmem:[#allocation4 + $0xf8] sm:$0xff]  ;;  %v307_v47 = vld [vmem:[#allocation4 + $0x70] sm:$0xff] }
  0x8a   : > { %v804_v40 = vpack.c.bf16 %v322_v38, %v321_v37  ;;  %v306_v42 = vld [vmem:[#allocation4 + $0x68] sm:$0xff]  ;;  %v808_v46 = vpack.c.bf16 %v324_v44, %v323_v43  ;;  %v308_v48 = vld [vmem:[#allocation4 + $0x78] sm:$0xff]  ;;  %v261_v50 = vld [vmem:[%s1274_s27] sm:$0xff] }
  0x8b   : > { %791 = vmatpush3.bf16.msra.mxu0 %v790_v19  ;;  %822 = vmatpush3.bf16.msra.mxu1 %v790_v19  ;;  %v806_v45 = vpack.c.bf16 %v306_v42, %v305_v41  ;;  %v810_v49 = vpack.c.bf16 %v308_v48, %v307_v47  ;;  %v277_v51 = vld [vmem:[%s1274_s27 + $0x80] sm:$0xff]  ;;  %v264_v52 = vld [vmem:[%s1274_s27 + $0x18] sm:$0xff]  ;;  %v263_v54 = vld [vmem:[%s1274_s27 + $0x10] sm:$0xff] }
  0x8c   : > { %793 = vmatprep.subr.bf16.mxu0 %v792_v20  ;;  %815 = vmatprep.subr.bf16.mxu1 %v792_v20  ;;  %v280_v53 = vld [vmem:[%s1274_s27 + $0x98] sm:$0xff]  ;;  %v279_v55 = vld [vmem:[%s1274_s27 + $0x90] sm:$0xff]  ;;  %v266_v56 = vld [vmem:[%s1274_s27 + $0x28] sm:$0xff] }
  0x8d   : > { %v282_v57 = vld [vmem:[%s1274_s27 + $0xa8] sm:$0xff]  ;;  %v265_v58 = vld [vmem:[%s1274_s27 + $0x20] sm:$0xff]  ;;  %v268_v60 = vld [vmem:[%s1274_s27 + $0x38] sm:$0xff] }
  0x8e   : > { %v281_v59 = vld [vmem:[%s1274_s27 + $0xa0] sm:$0xff]  ;;  %v284_v61 = vld [vmem:[%s1274_s27 + $0xb8] sm:$0xff]  ;;  %v267_v62 = vld [vmem:[%s1274_s27 + $0x30] sm:$0xff] }
  0x8f   : > { %795 = vmatpush3.bf16.msra.mxu0 %v794_v27  ;;  %823 = vmatpush3.bf16.msra.mxu1 %v794_v27  ;;  %v283_v63 = vld [vmem:[%s1274_s27 + $0xb0] sm:$0xff]  ;;  %v270_v0 = vld [vmem:[%s1274_s27 + $0x48] sm:$0xff]  ;;  %v269_v2 = vld [vmem:[%s1274_s27 + $0x40] sm:$0xff] }
  0x90   : > { %797 = vmatprep.subr.bf16.mxu0 %v796_v28  ;;  %816 = vmatprep.subr.bf16.mxu1 %v796_v28  ;;  %v286_v1 = vld [vmem:[%s1274_s27 + $0xc8] sm:$0xff]  ;;  %v285_v3 = vld [vmem:[%s1274_s27 + $0xc0] sm:$0xff]  ;;  %v272_v4 = vld [vmem:[%s1274_s27 + $0x58] sm:$0xff] }
  0x91   : > { %v288_v5 = vld [vmem:[%s1274_s27 + $0xd8] sm:$0xff]  ;;  %v271_v6 = vld [vmem:[%s1274_s27 + $0x50] sm:$0xff]  ;;  %v274_v8 = vld [vmem:[%s1274_s27 + $0x68] sm:$0xff] }
  0x92   : > { %v287_v7 = vld [vmem:[%s1274_s27 + $0xd0] sm:$0xff]  ;;  %v290_v9 = vld [vmem:[%s1274_s27 + $0xe8] sm:$0xff]  ;;  %v273_v10 = vld [vmem:[%s1274_s27 + $0x60] sm:$0xff] }
  0x93   : > { %799 = vmatpush3.bf16.msra.mxu0 %v798_v33  ;;  %824 = vmatpush3.bf16.msra.mxu1 %v798_v33  ;;  %v289_v11 = vld [vmem:[%s1274_s27 + $0xe0] sm:$0xff]  ;;  %v276_v12 = vld [vmem:[%s1274_s27 + $0x78] sm:$0xff]  ;;  %v275_v14 = vld [vmem:[%s1274_s27 + $0x70] sm:$0xff] }
  0x94   : > { %801 = vmatprep.subr.bf16.mxu0 %v800_v34  ;;  %817 = vmatprep.subr.bf16.mxu1 %v800_v34  ;;  %v292_v13 = vld [vmem:[%s1274_s27 + $0xf8] sm:$0xff]  ;;  %v291_v15 = vld [vmem:[%s1274_s27 + $0xf0] sm:$0xff]  ;;  %v1322_v19 = vld [vmem:[#allocation6] ss:$0 sm:$0xff] }
  0x95   : > { %v1324_v23 = vld [vmem:[#allocation7] ss:$0 sm:$0xff] }
  0x97   : > { %803 = vmatpush3.bf16.msra.mxu0 %v802_v39  ;;  %825 = vmatpush3.bf16.msra.mxu1 %v802_v39 }
  0x98   : > { %805 = vmatprep.subr.bf16.mxu0 %v804_v40  ;;  %818 = vmatprep.subr.bf16.mxu1 %v804_v40 }
  0x9b   : > { %807 = vmatpush3.bf16.msra.mxu0 %v806_v45  ;;  %826 = vmatpush3.bf16.msra.mxu1 %v806_v45 }
  0x9c   : > { %809 = vmatprep.subr.bf16.mxu0 %v808_v46  ;;  %819 = vmatprep.subr.bf16.mxu1 %v808_v46 }
  0x9f   : > { %811 = vmatpush3.bf16.msra.mxu0 %v810_v49  ;;  %827 = vmatpush3.bf16.msra.mxu1 %v810_v49 }
  0xa2   : > { %390 = vmatmul.mubr.f32.vlgmr.msra.gmra.mrb[0].mxu0 %v261_v50  ;;  %430 = vmatmul.mubr.f32.vlgmr.msra.gmra.mrb[0].mxu1 %v277_v51 }
  0xa3   : > { %394 = vmatprep.mubr.f32.mxu0 %v264_v52  ;;  %434 = vmatprep.mubr.f32.mxu1 %v280_v53 }
  0xa6   : > { %395 = vmatmul.mubr.f32.gmra.mrb[2].mxu0 %v263_v54  ;;  %435 = vmatmul.mubr.f32.gmra.mrb[2].mxu1 %v279_v55 }
  0xa7   : > { %399 = vmatprep.mubr.f32.mxu0 %v266_v56  ;;  %439 = vmatprep.mubr.f32.mxu1 %v282_v57 }
  0xaa   : > { %400 = vmatmul.mubr.f32.gmra.mrb[4].mxu0 %v265_v58  ;;  %440 = vmatmul.mubr.f32.gmra.mrb[4].mxu1 %v281_v59 }
  0xab   : > { %404 = vmatprep.mubr.f32.mxu0 %v268_v60  ;;  %444 = vmatprep.mubr.f32.mxu1 %v284_v61 }
  0xae   : > { %405 = vmatmul.mubr.f32.gmra.mrb[6].mxu0 %v267_v62  ;;  %445 = vmatmul.mubr.f32.gmra.mrb[6].mxu1 %v283_v63 }
  0xaf   : > { %409 = vmatprep.mubr.f32.mxu0 %v270_v0  ;;  %449 = vmatprep.mubr.f32.mxu1 %v286_v1 }
  0xb2   : > { %410 = vmatmul.mubr.f32.gmra.mrb[8].mxu0 %v269_v2  ;;  %450 = vmatmul.mubr.f32.gmra.mrb[8].mxu1 %v285_v3 }
  0xb3   : > { %414 = vmatprep.mubr.f32.mxu0 %v272_v4  ;;  %454 = vmatprep.mubr.f32.mxu1 %v288_v5 }
  0xb6   : > { %415 = vmatmul.mubr.f32.gmra.mrb[10].mxu0 %v271_v6  ;;  %455 = vmatmul.mubr.f32.gmra.mrb[10].mxu1 %v287_v7 }
  0xb7   : > { %419 = vmatprep.mubr.f32.mxu0 %v274_v8  ;;  %459 = vmatprep.mubr.f32.mxu1 %v290_v9 }
  0xba   : > { %420 = vmatmul.mubr.f32.gmra.mrb[12].mxu0 %v273_v10  ;;  %460 = vmatmul.mubr.f32.gmra.mrb[12].mxu1 %v289_v11 }
  0xbb   : > { %424 = vmatprep.mubr.f32.mxu0 %v276_v12  ;;  %464 = vmatprep.mubr.f32.mxu1 %v292_v13 }
  0xbe   : > { %425 = vmatmul.mubr.f32.gmra.mrb[14].mxu0 %v275_v14  ;;  %465 = vmatmul.mubr.f32.gmra.mrb[14].mxu1 %v291_v15 }
 0x175   : > { %v732_v16 = vpop.f32.mrb[0].mxu0  ;;  %v756_v17 = vpop.f32.mrb[0].mxu1 }
 0x176   : > { %v733_v18 = vpop.f32.mrb[1].mxu0  ;;  %v757_v20 = vpop.f32.mrb[1].mxu1 }
 0x177   : > { %v734_v21 = vadd.f32 %v733_v18, %v732_v16  ;;  %v758_v22 = vadd.f32 %v757_v20, %v756_v17 }
 0x179   : > { %v477_v24 = vmul.f32 %v734_v21, %v1322_v19  ;;  %v485_v25 = vmul.f32 %v758_v22, %v1322_v19  ;;  %v735_v26 = vpop.f32.mrb[2].mxu0  ;;  %v759_v27 = vpop.f32.mrb[2].mxu1 }
 0x17a   : > { %v736_v28 = vpop.f32.mrb[3].mxu0  ;;  %v760_v29 = vpop.f32.mrb[3].mxu1 }
 0x17b   : > { %v500_v30 = vadd.f32 %v1324_v23, %v477_v24  ;;  %v508_v31 = vadd.f32 %v1324_v23, %v485_v25  ;;  %v737_v32 = vadd.f32 %v736_v28, %v735_v26  ;;  %v761_v33 = vadd.f32 %v760_v29, %v759_v27 }
 0x17d   : > { %vm516_vm0 = vcmp.gt.f32.partialorder %v500_v30, 0.0  ;;  %v532_v34 = vmul.f32 0.1, %v500_v30  ;;  %vm524_vm1 = vcmp.gt.f32.partialorder %v508_v31, 0.0  ;;  %v540_v35 = vmul.f32 0.1, %v508_v31 }
 0x17e   : > { %v478_v36 = vmul.f32 %v737_v32, %v1322_v19  ;;  %v486_v37 = vmul.f32 %v761_v33, %v1322_v19  ;;  %v738_v38 = vpop.f32.mrb[4].mxu0  ;;  %v762_v39 = vpop.f32.mrb[4].mxu1 }
 0x17f   : > { %v548_v40 = vsel %vm516_vm0, %v500_v30, %v532_v34  ;;  %v556_v41 = vsel %vm524_vm1, %v508_v31, %v540_v35  ;;  %v739_v42 = vpop.f32.mrb[5].mxu0  ;;  %v763_v43 = vpop.f32.mrb[5].mxu1 }
 0x180   : > { %564 = vst [vmem:[%s1333_s22] sm:$0xff] %v548_v40  ;;  %572 = vst [vmem:[%s1333_s22 + $0x40] sm:$0xff] %v556_v41  ;;  %v501_v44 = vadd.f32 %v1324_v23, %v478_v36  ;;  %v509_v45 = vadd.f32 %v1324_v23, %v486_v37  ;;  %v740_v46 = vadd.f32 %v739_v42, %v738_v38 }
 0x181   : > { %v764_v47 = vadd.f32 %v763_v43, %v762_v39  ;;  %v741_v48 = vpop.f32.mrb[6].mxu0  ;;  %v765_v49 = vpop.f32.mrb[6].mxu1 }
 0x182   : > { %vm517_vm2 = vcmp.gt.f32.partialorder %v501_v44, 0.0  ;;  %v533_v50 = vmul.f32 0.1, %v501_v44  ;;  %vm525_vm3 = vcmp.gt.f32.partialorder %v509_v45, 0.0  ;;  %v541_v51 = vmul.f32 0.1, %v509_v45 }
 0x183   : > { %v479_v52 = vmul.f32 %v740_v46, %v1322_v19  ;;  %v487_v53 = vmul.f32 %v764_v47, %v1322_v19  ;;  %v742_v54 = vpop.f32.mrb[7].mxu0  ;;  %v766_v55 = vpop.f32.mrb[7].mxu1 }
 0x184   : > { %v549_v56 = vsel %vm517_vm2, %v501_v44, %v533_v50  ;;  %v557_v57 = vsel %vm525_vm3, %v509_v45, %v541_v51  ;;  %v743_v58 = vadd.f32 %v742_v54, %v741_v48  ;;  %v767_v59 = vadd.f32 %v766_v55, %v765_v49 }
 0x185   : > { %565 = vst [vmem:[%s1333_s22 + $0x8] sm:$0xff] %v549_v56  ;;  %573 = vst [vmem:[%s1333_s22 + $0x48] sm:$0xff] %v557_v57  ;;  %v502_v60 = vadd.f32 %v1324_v23, %v479_v52  ;;  %v510_v61 = vadd.f32 %v1324_v23, %v487_v53  ;;  %v744_v62 = vpop.f32.mrb[8].mxu0  ;;  %v768_v63 = vpop.f32.mrb[8].mxu1 }
 0x186   : > { %v480_v0 = vmul.f32 %v743_v58, %v1322_v19  ;;  %v488_v1 = vmul.f32 %v767_v59, %v1322_v19  ;;  %v745_v2 = vpop.f32.mrb[9].mxu0  ;;  %v769_v3 = vpop.f32.mrb[9].mxu1 }
 0x187   : > { %vm518_vm4 = vcmp.gt.f32.partialorder %v502_v60, 0.0  ;;  %v534_v4 = vmul.f32 0.1, %v502_v60  ;;  %vm526_vm5 = vcmp.gt.f32.partialorder %v510_v61, 0.0  ;;  %v542_v5 = vmul.f32 0.1, %v510_v61 }
 0x188   : > { %v503_v6 = vadd.f32 %v1324_v23, %v480_v0  ;;  %v511_v7 = vadd.f32 %v1324_v23, %v488_v1  ;;  %v746_v8 = vadd.f32 %v745_v2, %v744_v62  ;;  %v770_v9 = vadd.f32 %v769_v3, %v768_v63 }
 0x189   : > { %v550_v10 = vsel %vm518_vm4, %v502_v60, %v534_v4  ;;  %v558_v11 = vsel %vm526_vm5, %v510_v61, %v542_v5  ;;  %v747_v12 = vpop.f32.mrb[10].mxu0  ;;  %v771_v13 = vpop.f32.mrb[10].mxu1 }
 0x18a   : > { %566 = vst [vmem:[%s1333_s22 + $0x10] sm:$0xff] %v550_v10  ;;  %574 = vst [vmem:[%s1333_s22 + $0x50] sm:$0xff] %v558_v11  ;;  %vm519_vm6 = vcmp.gt.f32.partialorder %v503_v6, 0.0  ;;  %v535_v14 = vmul.f32 0.1, %v503_v6  ;;  %vm527_vm7 = vcmp.gt.f32.partialorder %v511_v7, 0.0  ;;  %v481_v16 = vmul.f32 %v746_v8, %v1322_v19 }
 0x18b   : > { %v543_v15 = vmul.f32 0.1, %v511_v7  ;;  %v489_v17 = vmul.f32 %v770_v9, %v1322_v19  ;;  %v748_v18 = vpop.f32.mrb[11].mxu0  ;;  %v772_v20 = vpop.f32.mrb[11].mxu1 }
 0x18c   : > { %v551_v21 = vsel %vm519_vm6, %v503_v6, %v535_v14  ;;  %v749_v24 = vadd.f32 %v748_v18, %v747_v12  ;;  %v773_v25 = vadd.f32 %v772_v20, %v771_v13  ;;  %v504_v26 = vadd.f32 %v1324_v23, %v481_v16 }
 0x18d   : > { %v559_v22 = vsel %vm527_vm7, %v511_v7, %v543_v15  ;;  %567 = vst [vmem:[%s1333_s22 + $0x18] sm:$0xff] %v551_v21  ;;  %v512_v27 = vadd.f32 %v1324_v23, %v489_v17  ;;  %v750_v28 = vpop.f32.mrb[12].mxu0  ;;  %v774_v29 = vpop.f32.mrb[12].mxu1 }
 0x18e   : > { %575 = vst [vmem:[%s1333_s22 + $0x58] sm:$0xff] %v559_v22  ;;  %v482_v30 = vmul.f32 %v749_v24, %v1322_v19  ;;  %v490_v31 = vmul.f32 %v773_v25, %v1322_v19  ;;  %v751_v32 = vpop.f32.mrb[13].mxu0  ;;  %v775_v33 = vpop.f32.mrb[13].mxu1  ;;  %vm520_vm8 = vcmp.gt.f32.partialorder %v504_v26, 0.0  ;;  %v536_v34 = vmul.f32 0.1, %v504_v26 }
 0x18f   : > { %vm528_vm9 = vcmp.gt.f32.partialorder %v512_v27, 0.0  ;;  %v544_v35 = vmul.f32 0.1, %v512_v27  ;;  %v752_v38 = vadd.f32 %v751_v32, %v750_v28  ;;  %v776_v39 = vadd.f32 %v775_v33, %v774_v29 }
 0x190   : > { %v505_v36 = vadd.f32 %v1324_v23, %v482_v30  ;;  %v513_v37 = vadd.f32 %v1324_v23, %v490_v31  ;;  %v552_v40 = vsel %vm520_vm8, %v504_v26, %v536_v34 }
 0x191   : > { %v560_v41 = vsel %vm528_vm9, %v512_v27, %v544_v35  ;;  %v753_v42 = vpop.f32.mrb[14].mxu0  ;;  %v777_v43 = vpop.f32.mrb[14].mxu1  ;;  %568 = vst [vmem:[%s1333_s22 + $0x20] sm:$0xff] %v552_v40  ;;  %v483_v46 = vmul.f32 %v752_v38, %v1322_v19  ;;  %v491_v47 = vmul.f32 %v776_v39, %v1322_v19 }
 0x192   : > { %576 = vst [vmem:[%s1333_s22 + $0x60] sm:$0xff] %v560_v41  ;;  %vm521_vm10 = vcmp.gt.f32.partialorder %v505_v36, 0.0  ;;  %v537_v44 = vmul.f32 0.1, %v505_v36  ;;  %vm529_vm11 = vcmp.gt.f32.partialorder %v513_v37, 0.0  ;;  %v754_v48 = vpop.f32.mrb[15].mxu0 }
 0x193   : > { %v545_v45 = vmul.f32 0.1, %v513_v37  ;;  %v778_v49 = vpop.f32.mrb[15].mxu1  ;;  %v755_v52 = vadd.f32 %v754_v48, %v753_v42  ;;  %v506_v54 = vadd.f32 %v1324_v23, %v483_v46  ;;  %v514_v55 = vadd.f32 %v1324_v23, %v491_v47 }
 0x194   : > { %v553_v50 = vsel %vm521_vm10, %v505_v36, %v537_v44  ;;  %v779_v53 = vadd.f32 %v778_v49, %v777_v43 }
 0x195   : > { %v561_v51 = vsel %vm529_vm11, %v513_v37, %v545_v45  ;;  %569 = vst [vmem:[%s1333_s22 + $0x28] sm:$0xff] %v553_v50  ;;  %v484_v56 = vmul.f32 %v755_v52, %v1322_v19  ;;  %vm522_vm12 = vcmp.gt.f32.partialorder %v506_v54, 0.0  ;;  %v538_v58 = vmul.f32 0.1, %v506_v54 }
 0x196   : > { %577 = vst [vmem:[%s1333_s22 + $0x68] sm:$0xff] %v561_v51  ;;  %v492_v57 = vmul.f32 %v779_v53, %v1322_v19  ;;  %vm530_vm13 = vcmp.gt.f32.partialorder %v514_v55, 0.0  ;;  %v546_v59 = vmul.f32 0.1, %v514_v55 }
 0x197   : > { %v507_v60 = vadd.f32 %v1324_v23, %v484_v56  ;;  %v554_v62 = vsel %vm522_vm12, %v506_v54, %v538_v58 }
 0x198   : > { %v515_v61 = vadd.f32 %v1324_v23, %v492_v57  ;;  %v562_v63 = vsel %vm530_vm13, %v514_v55, %v546_v59  ;;  %570 = vst [vmem:[%s1333_s22 + $0x30] sm:$0xff] %v554_v62 }
 0x199   : > { %578 = vst [vmem:[%s1333_s22 + $0x70] sm:$0xff] %v562_v63  ;;  %vm523_vm14 = vcmp.gt.f32.partialorder %v507_v60, 0.0  ;;  %v539_v0 = vmul.f32 0.1, %v507_v60 }
 0x19a   : > { %vm531_vm15 = vcmp.gt.f32.partialorder %v515_v61, 0.0  ;;  %v547_v1 = vmul.f32 0.1, %v515_v61 }
 0x19b   : > { %v555_v2 = vsel %vm523_vm14, %v507_v60, %v539_v0 }
 0x19c   : > { %v563_v19 = vsel %vm531_vm15, %v515_v61, %v547_v1  ;;  %571 = vst [vmem:[%s1333_s22 + $0x38] sm:$0xff] %v555_v2 }
 0x19d   : > { %579 = vst [vmem:[%s1333_s22 + $0x78] sm:$0xff] %v563_v19 }
 0x19e PF: > { %p16_p11 = scmp.ge.s32.totalorder %s1218_s9, 6   ;;  %s1410_s15 = smov %s1050_s16 }
 0x19f   : > { %s1411_s16 = smov %s1054_s17  ;;  %s1412_s17 = smov %s1228_s25 }
 0x1a0   : > { %s1413_s18 = smov %s1218_s9  ;;  %18 = sbr.rel (!%p16_p11) target bundleno = 5 (0x5), region = 88 }
 0x1a7   :  { %602 = vsyncpa [#allocation3], 1 }
 0x1a8   :  { %604 = vsyncpa [#allocation3 + $0x1], 1 }
 0x1a9   :  { %605 = vsyncpa [#allocation5], 1 }
 0x1aa   :  { %606 = vsyncpa [#allocation8], 1 }

// kernel: cca_forward.11
= control target key start
LH: loop header
LB: loop body
LE: loop exit
PB: predicated region body
PF: predicated region fallthrough
CT: control target
= control target key end

     0   :  { %s763_s15 = smov 0   ;;  %s974_s0 = inlined_call_operand.vmem [shape: f32[512,256], index: 0, kind: input, shape index: {}]   ;;  %s975_s1 = inlined_call_operand.vmem [shape: f32[256,128], index: 1, kind: input, shape index: {}]   ;;  %s976_s2 = inlined_call_operand.vmem [shape: f32[1,128], index: 2, kind: input, shape index: {}]   ;;  %s977_s3 = inlined_call_operand.vmem [shape: f32[1,128], index: 3, kind: input, shape index: {}]   ;;  %s978_s4 = inlined_call_operand.vmem [shape: f32[512,128], index: 4, kind: output, shape index: {}]  }
   0x1 LB: > { %s579_s16 = sadd.s32 4294967295, %s736_s15   ;;  %p583_p0 = scmp.ge.s32.totalorder %s736_s15, 1  ;;  %s736_s15 = sphi %s763_s15, %s14_s15  }
   0x2   : > { %p164_p1 = scmp.lt.s32.totalorder %s736_s15, 5 }
   0x4   : > { %p165_p2 = pnand %p583_p0, %p164_p1 }
   0x5   : > { %v252_v0 = vld [vmem:[%s975_s1 + $0x80] sm:$0xff] (!%p165_p2)  ;;  %v253_v1 = vld [vmem:[%s975_s1 + $0x88] sm:$0xff] (!%p165_p2)  ;;  %s584_s23 = sshll.u32 (!%p165_p2), %s579_s16, 4  ;;  %v254_v5 = vld [vmem:[%s975_s1 + $0x90] sm:$0xff] (!%p165_p2) }
   0x6   : > { %168 = sbr.rel (%p165_p2) target bundleno = 292 (0x124), region = 36  ;;  %v236_v2 = vld [vmem:[%s975_s1] sm:$0xff] (!%p165_p2)  ;;  %v674_v3 = vpack.c.bf16 (!%p165_p2), %v253_v1, %v252_v0  ;;  %v237_v4 = vld [vmem:[%s975_s1 + $0x8] sm:$0xff] (!%p165_p2)  ;;  %v255_v6 = vld [vmem:[%s975_s1 + $0x98] sm:$0xff] (!%p165_p2)  ;;  %p192_p3 = scmp.lt.s32.totalorder (!%p165_p2), %s584_s23, 63 }
   0x7   : > { %v676_v7 = vpack.c.bf16 (!%p165_p2), %v237_v4, %v236_v2  ;;  %v678_v8 = vpack.c.bf16 (!%p165_p2), %v255_v6, %v254_v5  ;;  %v238_v9 = vld [vmem:[%s975_s1 + $0x10] sm:$0xff] (!%p165_p2)  ;;  %v239_v10 = vld [vmem:[%s975_s1 + $0x18] sm:$0xff] (!%p165_p2)  ;;  %v256_v11 = vld [vmem:[%s975_s1 + $0xa0] sm:$0xff] (!%p165_p2) }
   0x8   : > { %675 = vmatprep.subr.bf16.mxu0 (!%p165_p2), %v674_v3  ;;  %706 = vmatprep.subr.bf16.mxu1 (!%p165_p2), %v674_v3  ;;  %v257_v12 = vld [vmem:[%s975_s1 + $0xa8] sm:$0xff] (!%p165_p2)  ;;  %v680_v13 = vpack.c.bf16 (!%p165_p2), %v239_v10, %v238_v9  ;;  %v240_v15 = vld [vmem:[%s975_s1 + $0x20] sm:$0xff] (!%p165_p2)  ;;  %v258_v17 = vld [vmem:[%s975_s1 + $0xb0] sm:$0xff] (!%p165_p2) }
   0x9   : > { %677 = vmatpush3.bf16.msra.mxu0 (!%p165_p2), %v676_v7  ;;  %714 = vmatpush3.bf16.msra.mxu1 (!%p165_p2), %v676_v7  ;;  %v682_v14 = vpack.c.bf16 (!%p165_p2), %v257_v12, %v256_v11  ;;  %v241_v16 = vld [vmem:[%s975_s1 + $0x28] sm:$0xff] (!%p165_p2)  ;;  %v259_v18 = vld [vmem:[%s975_s1 + $0xb8] sm:$0xff] (!%p165_p2)  ;;  %v242_v21 = vld [vmem:[%s975_s1 + $0x30] sm:$0xff] (!%p165_p2) }
   0xa   : > { %679 = vmatprep.subr.bf16.mxu0 (!%p165_p2), %v678_v8  ;;  %707 = vmatprep.subr.bf16.mxu1 (!%p165_p2), %v678_v8  ;;  %v684_v19 = vpack.c.bf16 (!%p165_p2), %v241_v16, %v240_v15  ;;  %v686_v20 = vpack.c.bf16 (!%p165_p2), %v259_v18, %v258_v17  ;;  %v243_v22 = vld [vmem:[%s975_s1 + $0x38] sm:$0xff] (!%p165_p2)  ;;  %v260_v23 = vld [vmem:[%s975_s1 + $0xc0] sm:$0xff] (!%p165_p2)  ;;  %v261_v24 = vld [vmem:[%s975_s1 + $0xc8] sm:$0xff] (!%p165_p2) }
   0xb   : > { %v688_v27 = vpack.c.bf16 (!%p165_p2), %v243_v22, %v242_v21  ;;  %v690_v28 = vpack.c.bf16 (!%p165_p2), %v261_v24, %v260_v23  ;;  %v244_v29 = vld [vmem:[%s975_s1 + $0x40] sm:$0xff] (!%p165_p2)  ;;  %v245_v30 = vld [vmem:[%s975_s1 + $0x48] sm:$0xff] (!%p165_p2)  ;;  %v262_v31 = vld [vmem:[%s975_s1 + $0xd0] sm:$0xff] (!%p165_p2) }
   0xc   : > { %v263_v32 = vld [vmem:[%s975_s1 + $0xd8] sm:$0xff] (!%p165_p2)  ;;  %v692_v33 = vpack.c.bf16 (!%p165_p2), %v245_v30, %v244_v29  ;;  %v246_v35 = vld [vmem:[%s975_s1 + $0x50] sm:$0xff] (!%p165_p2)  ;;  %v264_v37 = vld [vmem:[%s975_s1 + $0xe0] sm:$0xff] (!%p165_p2) }
   0xd   : > { %s980_s23 = smov (!%p192_p3, %s584_s23), 63  ;;  %681 = vmatpush3.bf16.msra.mxu0 %v680_v13  ;;  %715 = vmatpush3.bf16.msra.mxu1 %v680_v13  ;;  %v694_v34 = vpack.c.bf16 %v263_v32, %v262_v31  ;;  %v247_v36 = vld [vmem:[%s975_s1 + $0x58] sm:$0xff]  ;;  %v265_v38 = vld [vmem:[%s975_s1 + $0xe8] sm:$0xff]  ;;  %v248_v41 = vld [vmem:[%s975_s1 + $0x60] sm:$0xff] }
   0xe   : > { %s593_s17 = sshll.u32 %s980_s23, 4  ;;  %683 = vmatprep.subr.bf16.mxu0 %v682_v14  ;;  %708 = vmatprep.subr.bf16.mxu1 %v682_v14  ;;  %v696_v39 = vpack.c.bf16 %v247_v36, %v246_v35  ;;  %v698_v40 = vpack.c.bf16 %v265_v38, %v264_v37  ;;  %v249_v42 = vld [vmem:[%s975_s1 + $0x68] sm:$0xff]  ;;  %v266_v43 = vld [vmem:[%s975_s1 + $0xf0] sm:$0xff]  ;;  %v267_v44 = vld [vmem:[%s975_s1 + $0xf8] sm:$0xff] }
   0xf   : > { %s819_s25 = scalar_lea.vmem %s974_s0, %s593_s17  ;;  %v700_v45 = vpack.c.bf16 %v249_v42, %v248_v41  ;;  %v702_v46 = vpack.c.bf16 %v267_v44, %v266_v43  ;;  %v250_v47 = vld [vmem:[%s975_s1 + $0x70] sm:$0xff]  ;;  %v251_v48 = vld [vmem:[%s975_s1 + $0x78] sm:$0xff]  ;;  %v915_v23 = vld [vmem:[%s977_s3] ss:$0 sm:$0xff] }
  0x10   : > { %v205_v25 = vld [vmem:[%s819_s25 + $0x8] sm:$0xff]  ;;  %v704_v49 = vpack.c.bf16 %v251_v48, %v250_v47  ;;  %v204_v50 = vld [vmem:[%s819_s25] sm:$0xff]  ;;  %v207_v52 = vld [vmem:[%s819_s25 + $0x18] sm:$0xff] }
  0x11   : > { %332 = vmatprep.mubr.f32.mxu0 %v205_v25  ;;  %v221_v26 = vld [vmem:[%s819_s25 + $0x88] sm:$0xff]  ;;  %685 = vmatpush3.bf16.msra.mxu0 %v684_v19  ;;  %v220_v51 = vld [vmem:[%s819_s25 + $0x80] sm:$0xff]  ;;  %v223_v53 = vld [vmem:[%s819_s25 + $0x98] sm:$0xff] }
  0x12   : > { %716 = vmatpush3.bf16.msra.mxu1 %v684_v19  ;;  %687 = vmatprep.subr.bf16.mxu0 %v686_v20  ;;  %v206_v54 = vld [vmem:[%s819_s25 + $0x10] sm:$0xff]  ;;  %v209_v56 = vld [vmem:[%s819_s25 + $0x28] sm:$0xff]  ;;  %v208_v58 = vld [vmem:[%s819_s25 + $0x20] sm:$0xff] }
  0x13   : > { %709 = vmatprep.subr.bf16.mxu1 %v686_v20  ;;  %372 = vmatprep.mubr.f32.mxu1 %v221_v26  ;;  %v222_v55 = vld [vmem:[%s819_s25 + $0x90] sm:$0xff]  ;;  %v225_v57 = vld [vmem:[%s819_s25 + $0xa8] sm:$0xff]  ;;  %v224_v59 = vld [vmem:[%s819_s25 + $0xa0] sm:$0xff] }
  0x14   : > { %v211_v60 = vld [vmem:[%s819_s25 + $0x38] sm:$0xff]  ;;  %v210_v62 = vld [vmem:[%s819_s25 + $0x30] sm:$0xff]  ;;  %v213_v0 = vld [vmem:[%s819_s25 + $0x48] sm:$0xff] }
  0x15   : > { %689 = vmatpush3.bf16.msra.mxu0 %v688_v27  ;;  %v227_v61 = vld [vmem:[%s819_s25 + $0xb8] sm:$0xff]  ;;  %v226_v63 = vld [vmem:[%s819_s25 + $0xb0] sm:$0xff]  ;;  %v229_v1 = vld [vmem:[%s819_s25 + $0xc8] sm:$0xff] }
  0x16   : > { %717 = vmatpush3.bf16.msra.mxu1 %v688_v27  ;;  %691 = vmatprep.subr.bf16.mxu0 %v690_v28  ;;  %v212_v2 = vld [vmem:[%s819_s25 + $0x40] sm:$0xff]  ;;  %v215_v4 = vld [vmem:[%s819_s25 + $0x58] sm:$0xff]  ;;  %v214_v6 = vld [vmem:[%s819_s25 + $0x50] sm:$0xff] }
  0x17   : > { %710 = vmatprep.subr.bf16.mxu1 %v690_v28  ;;  %v228_v3 = vld [vmem:[%s819_s25 + $0xc0] sm:$0xff]  ;;  %v231_v5 = vld [vmem:[%s819_s25 + $0xd8] sm:$0xff]  ;;  %v230_v7 = vld [vmem:[%s819_s25 + $0xd0] sm:$0xff] }
  0x18   : > { %v217_v8 = vld [vmem:[%s819_s25 + $0x68] sm:$0xff]  ;;  %v216_v10 = vld [vmem:[%s819_s25 + $0x60] sm:$0xff]  ;;  %v219_v12 = vld [vmem:[%s819_s25 + $0x78] sm:$0xff] }
  0x19   : > { %693 = vmatpush3.bf16.msra.mxu0 %v692_v33  ;;  %v233_v9 = vld [vmem:[%s819_s25 + $0xe8] sm:$0xff]  ;;  %v232_v11 = vld [vmem:[%s819_s25 + $0xe0] sm:$0xff]  ;;  %v235_v13 = vld [vmem:[%s819_s25 + $0xf8] sm:$0xff] }
  0x1a   : > { %718 = vmatpush3.bf16.msra.mxu1 %v692_v33  ;;  %695 = vmatprep.subr.bf16.mxu0 %v694_v34  ;;  %v218_v14 = vld [vmem:[%s819_s25 + $0x70] sm:$0xff]  ;;  %v910_v19 = vld [vmem:[%s976_s2] ss:$0 sm:$0xff] }
  0x1b   : > { %711 = vmatprep.subr.bf16.mxu1 %v694_v34  ;;  %v234_v15 = vld [vmem:[%s819_s25 + $0xf0] sm:$0xff]  ;;  %s588_s25 = sshll.u32 %s980_s23, 3 }
  0x1c   : > { %s925_s20 = scalar_lea.vmem %s978_s4, %s588_s25 }
  0x1d   : > { %697 = vmatpush3.bf16.msra.mxu0 %v696_v39 }
  0x1e   : > { %719 = vmatpush3.bf16.msra.mxu1 %v696_v39  ;;  %699 = vmatprep.subr.bf16.mxu0 %v698_v40 }
  0x1f   : > { %712 = vmatprep.subr.bf16.mxu1 %v698_v40 }
  0x21   : > { %701 = vmatpush3.bf16.msra.mxu0 %v700_v45 }
  0x22   : > { %720 = vmatpush3.bf16.msra.mxu1 %v700_v45  ;;  %703 = vmatprep.subr.bf16.mxu0 %v702_v46 }
  0x23   : > { %713 = vmatprep.subr.bf16.mxu1 %v702_v46 }
  0x25   : > { %705 = vmatpush3.bf16.msra.mxu0 %v704_v49 }
  0x26   : > { %721 = vmatpush3.bf16.msra.mxu1 %v704_v49 }
  0x28   : > { %333 = vmatmul.mubr.f32.vlgmr.msra.gmra.mrb[0].mxu0 %v204_v50 }
  0x29   : > { %373 = vmatmul.mubr.f32.vlgmr.msra.gmra.mrb[0].mxu1 %v220_v51  ;;  %337 = vmatprep.mubr.f32.mxu0 %v207_v52 }
  0x2a   : > { %377 = vmatprep.mubr.f32.mxu1 %v223_v53 }
  0x2c   : > { %338 = vmatmul.mubr.f32.gmra.mrb[2].mxu0 %v206_v54 }
  0x2d   : > { %378 = vmatmul.mubr.f32.gmra.mrb[2].mxu1 %v222_v55  ;;  %342 = vmatprep.mubr.f32.mxu0 %v209_v56 }
  0x2e   : > { %382 = vmatprep.mubr.f32.mxu1 %v225_v57 }
  0x30   : > { %343 = vmatmul.mubr.f32.gmra.mrb[4].mxu0 %v208_v58 }
  0x31   : > { %383 = vmatmul.mubr.f32.gmra.mrb[4].mxu1 %v224_v59  ;;  %347 = vmatprep.mubr.f32.mxu0 %v211_v60 }
  0x32   : > { %387 = vmatprep.mubr.f32.mxu1 %v227_v61 }
  0x34   : > { %348 = vmatmul.mubr.f32.gmra.mrb[6].mxu0 %v210_v62 }
  0x35   : > { %388 = vmatmul.mubr.f32.gmra.mrb[6].mxu1 %v226_v63  ;;  %352 = vmatprep.mubr.f32.mxu0 %v213_v0 }
  0x36   : > { %392 = vmatprep.mubr.f32.mxu1 %v229_v1 }
  0x38   : > { %353 = vmatmul.mubr.f32.gmra.mrb[8].mxu0 %v212_v2 }
  0x39   : > { %393 = vmatmul.mubr.f32.gmra.mrb[8].mxu1 %v228_v3  ;;  %357 = vmatprep.mubr.f32.mxu0 %v215_v4 }
  0x3a   : > { %397 = vmatprep.mubr.f32.mxu1 %v231_v5 }
  0x3c   : > { %358 = vmatmul.mubr.f32.gmra.mrb[10].mxu0 %v214_v6 }
  0x3d   : > { %398 = vmatmul.mubr.f32.gmra.mrb[10].mxu1 %v230_v7  ;;  %362 = vmatprep.mubr.f32.mxu0 %v217_v8 }
  0x3e   : > { %402 = vmatprep.mubr.f32.mxu1 %v233_v9 }
  0x40   : > { %363 = vmatmul.mubr.f32.gmra.mrb[12].mxu0 %v216_v10 }
  0x41   : > { %403 = vmatmul.mubr.f32.gmra.mrb[12].mxu1 %v232_v11  ;;  %367 = vmatprep.mubr.f32.mxu0 %v219_v12 }
  0x42   : > { %407 = vmatprep.mubr.f32.mxu1 %v235_v13 }
  0x44   : > { %368 = vmatmul.mubr.f32.gmra.mrb[14].mxu0 %v218_v14 }
  0x45   : > { %408 = vmatmul.mubr.f32.gmra.mrb[14].mxu1 %v234_v15 }
  0xfb   : > { %v626_v16 = vpop.f32.mrb[0].mxu0 }
  0xfc   : > { %v650_v17 = vpop.f32.mrb[0].mxu1  ;;  %v627_v18 = vpop.f32.mrb[1].mxu0 }
  0xfd   : > { %v651_v20 = vpop.f32.mrb[1].mxu1  ;;  %v628_v21 = vadd.f32 %v627_v18, %v626_v16 }
  0xfe   : > { %v652_v22 = vadd.f32 %v651_v20, %v650_v17 }
  0xff   : > { %v420_v24 = vmul.f32 %v628_v21, %v910_v19  ;;  %v629_v26 = vpop.f32.mrb[2].mxu0 }
 0x100   : > { %v428_v25 = vmul.f32 %v652_v22, %v910_v19  ;;  %v653_v27 = vpop.f32.mrb[2].mxu1  ;;  %v630_v28 = vpop.f32.mrb[3].mxu0 }
 0x101   : > { %v654_v29 = vpop.f32.mrb[3].mxu1  ;;  %v443_v30 = vadd.f32 %v915_v23, %v420_v24  ;;  %v631_v32 = vadd.f32 %v630_v28, %v629_v26 }
 0x102   : > { %v451_v31 = vadd.f32 %v915_v23, %v428_v25  ;;  %v655_v33 = vadd.f32 %v654_v29, %v653_v27 }
 0x103   : > { %vm459_vm0 = vcmp.gt.f32.partialorder %v443_v30, 0.0  ;;  %v475_v34 = vmul.f32 0.1, %v443_v30  ;;  %v421_v36 = vmul.f32 %v631_v32, %v910_v19  ;;  %v632_v38 = vpop.f32.mrb[4].mxu0 }
 0x104   : > { %vm467_vm1 = vcmp.gt.f32.partialorder %v451_v31, 0.0  ;;  %v483_v35 = vmul.f32 0.1, %v451_v31  ;;  %v429_v37 = vmul.f32 %v655_v33, %v910_v19  ;;  %v656_v39 = vpop.f32.mrb[4].mxu1  ;;  %v633_v42 = vpop.f32.mrb[5].mxu0 }
 0x105   : > { %v491_v40 = vsel %vm459_vm0, %v443_v30, %v475_v34  ;;  %v657_v43 = vpop.f32.mrb[5].mxu1  ;;  %v444_v44 = vadd.f32 %v915_v23, %v421_v36  ;;  %v634_v46 = vadd.f32 %v633_v42, %v632_v38 }
 0x106   : > { %v499_v41 = vsel %vm467_vm1, %v451_v31, %v483_v35  ;;  %507 = vst [vmem:[%s925_s20] sm:$0xff] %v491_v40  ;;  %v452_v45 = vadd.f32 %v915_v23, %v429_v37  ;;  %v658_v47 = vadd.f32 %v657_v43, %v656_v39 }
 0x107   : > { %515 = vst [vmem:[%s925_s20 + $0x40] sm:$0xff] %v499_v41  ;;  %v635_v48 = vpop.f32.mrb[6].mxu0  ;;  %vm460_vm2 = vcmp.gt.f32.partialorder %v444_v44, 0.0  ;;  %v476_v50 = vmul.f32 0.1, %v444_v44  ;;  %v422_v52 = vmul.f32 %v634_v46, %v910_v19 }
 0x108   : > { %v659_v49 = vpop.f32.mrb[6].mxu1  ;;  %vm468_vm3 = vcmp.gt.f32.partialorder %v452_v45, 0.0  ;;  %v484_v51 = vmul.f32 0.1, %v452_v45  ;;  %v430_v53 = vmul.f32 %v658_v47, %v910_v19  ;;  %v636_v54 = vpop.f32.mrb[7].mxu0 }
 0x109   : > { %v660_v55 = vpop.f32.mrb[7].mxu1  ;;  %v492_v56 = vsel %vm460_vm2, %v444_v44, %v476_v50  ;;  %v637_v58 = vadd.f32 %v636_v54, %v635_v48  ;;  %v445_v60 = vadd.f32 %v915_v23, %v422_v52 }
 0x10a   : > { %v500_v57 = vsel %vm468_vm3, %v452_v45, %v484_v51  ;;  %v661_v59 = vadd.f32 %v660_v55, %v659_v49  ;;  %508 = vst [vmem:[%s925_s20 + $0x8] sm:$0xff] %v492_v56  ;;  %v453_v61 = vadd.f32 %v915_v23, %v430_v53 }
 0x10b   : > { %516 = vst [vmem:[%s925_s20 + $0x48] sm:$0xff] %v500_v57  ;;  %v638_v62 = vpop.f32.mrb[8].mxu0  ;;  %v423_v0 = vmul.f32 %v637_v58, %v910_v19  ;;  %vm461_vm4 = vcmp.gt.f32.partialorder %v445_v60, 0.0  ;;  %v477_v4 = vmul.f32 0.1, %v445_v60 }
 0x10c   : > { %v662_v63 = vpop.f32.mrb[8].mxu1  ;;  %v431_v1 = vmul.f32 %v661_v59, %v910_v19  ;;  %v639_v2 = vpop.f32.mrb[9].mxu0  ;;  %vm469_vm5 = vcmp.gt.f32.partialorder %v453_v61, 0.0  ;;  %v485_v5 = vmul.f32 0.1, %v453_v61 }
 0x10d   : > { %v663_v3 = vpop.f32.mrb[9].mxu1  ;;  %v446_v6 = vadd.f32 %v915_v23, %v423_v0  ;;  %v640_v8 = vadd.f32 %v639_v2, %v638_v62  ;;  %v493_v10 = vsel %vm461_vm4, %v445_v60, %v477_v4 }
 0x10e   : > { %v454_v7 = vadd.f32 %v915_v23, %v431_v1  ;;  %v664_v9 = vadd.f32 %v663_v3, %v662_v63  ;;  %v501_v11 = vsel %vm469_vm5, %v453_v61, %v485_v5  ;;  %509 = vst [vmem:[%s925_s20 + $0x10] sm:$0xff] %v493_v10 }
 0x10f   : > { %v641_v12 = vpop.f32.mrb[10].mxu0  ;;  %517 = vst [vmem:[%s925_s20 + $0x50] sm:$0xff] %v501_v11  ;;  %vm462_vm6 = vcmp.gt.f32.partialorder %v446_v6, 0.0  ;;  %v478_v14 = vmul.f32 0.1, %v446_v6  ;;  %v424_v16 = vmul.f32 %v640_v8, %v910_v19 }
 0x110   : > { %v665_v13 = vpop.f32.mrb[10].mxu1  ;;  %vm470_vm7 = vcmp.gt.f32.partialorder %v454_v7, 0.0  ;;  %v486_v15 = vmul.f32 0.1, %v454_v7  ;;  %v432_v17 = vmul.f32 %v664_v9, %v910_v19  ;;  %v642_v18 = vpop.f32.mrb[11].mxu0 }
 0x111   : > { %v666_v20 = vpop.f32.mrb[11].mxu1  ;;  %v494_v21 = vsel %vm462_vm6, %v446_v6, %v478_v14  ;;  %v643_v24 = vadd.f32 %v642_v18, %v641_v12  ;;  %v447_v26 = vadd.f32 %v915_v23, %v424_v16 }
 0x112   : > { %v502_v22 = vsel %vm470_vm7, %v454_v7, %v486_v15  ;;  %v667_v25 = vadd.f32 %v666_v20, %v665_v13  ;;  %510 = vst [vmem:[%s925_s20 + $0x18] sm:$0xff] %v494_v21  ;;  %v455_v27 = vadd.f32 %v915_v23, %v432_v17 }
 0x113   : > { %518 = vst [vmem:[%s925_s20 + $0x58] sm:$0xff] %v502_v22  ;;  %v644_v28 = vpop.f32.mrb[12].mxu0  ;;  %v425_v30 = vmul.f32 %v643_v24, %v910_v19  ;;  %vm463_vm8 = vcmp.gt.f32.partialorder %v447_v26, 0.0  ;;  %v479_v34 = vmul.f32 0.1, %v447_v26 }
 0x114   : > { %v668_v29 = vpop.f32.mrb[12].mxu1  ;;  %v433_v31 = vmul.f32 %v667_v25, %v910_v19  ;;  %v645_v32 = vpop.f32.mrb[13].mxu0  ;;  %vm471_vm9 = vcmp.gt.f32.partialorder %v455_v27, 0.0  ;;  %v487_v35 = vmul.f32 0.1, %v455_v27 }
 0x115   : > { %v669_v33 = vpop.f32.mrb[13].mxu1  ;;  %v448_v36 = vadd.f32 %v915_v23, %v425_v30  ;;  %v646_v38 = vadd.f32 %v645_v32, %v644_v28  ;;  %v495_v40 = vsel %vm463_vm8, %v447_v26, %v479_v34 }
 0x116   : > { %v456_v37 = vadd.f32 %v915_v23, %v433_v31  ;;  %v670_v39 = vadd.f32 %v669_v33, %v668_v29  ;;  %v503_v41 = vsel %vm471_vm9, %v455_v27, %v487_v35  ;;  %511 = vst [vmem:[%s925_s20 + $0x20] sm:$0xff] %v495_v40 }
 0x117   : > { %v647_v42 = vpop.f32.mrb[14].mxu0  ;;  %519 = vst [vmem:[%s925_s20 + $0x60] sm:$0xff] %v503_v41  ;;  %vm464_vm10 = vcmp.gt.f32.partialorder %v448_v36, 0.0  ;;  %v480_v44 = vmul.f32 0.1, %v448_v36  ;;  %v426_v46 = vmul.f32 %v646_v38, %v910_v19 }
 0x118   : > { %v671_v43 = vpop.f32.mrb[14].mxu1  ;;  %vm472_vm11 = vcmp.gt.f32.partialorder %v456_v37, 0.0  ;;  %v488_v45 = vmul.f32 0.1, %v456_v37  ;;  %v434_v47 = vmul.f32 %v670_v39, %v910_v19  ;;  %v648_v48 = vpop.f32.mrb[15].mxu0 }
 0x119   : > { %v672_v49 = vpop.f32.mrb[15].mxu1  ;;  %v496_v50 = vsel %vm464_vm10, %v448_v36, %v480_v44  ;;  %v649_v52 = vadd.f32 %v648_v48, %v647_v42  ;;  %v449_v54 = vadd.f32 %v915_v23, %v426_v46 }
 0x11a   : > { %v504_v51 = vsel %vm472_vm11, %v456_v37, %v488_v45  ;;  %v673_v53 = vadd.f32 %v672_v49, %v671_v43  ;;  %512 = vst [vmem:[%s925_s20 + $0x28] sm:$0xff] %v496_v50  ;;  %v457_v55 = vadd.f32 %v915_v23, %v434_v47 }
 0x11b   : > { %520 = vst [vmem:[%s925_s20 + $0x68] sm:$0xff] %v504_v51  ;;  %v427_v56 = vmul.f32 %v649_v52, %v910_v19  ;;  %vm465_vm12 = vcmp.gt.f32.partialorder %v449_v54, 0.0  ;;  %v481_v58 = vmul.f32 0.1, %v449_v54 }
 0x11c   : > { %v435_v57 = vmul.f32 %v673_v53, %v910_v19  ;;  %vm473_vm13 = vcmp.gt.f32.partialorder %v457_v55, 0.0  ;;  %v489_v59 = vmul.f32 0.1, %v457_v55 }
 0x11d   : > { %v450_v60 = vadd.f32 %v915_v23, %v427_v56  ;;  %v497_v62 = vsel %vm465_vm12, %v449_v54, %v481_v58 }
 0x11e   : > { %v458_v61 = vadd.f32 %v915_v23, %v435_v57  ;;  %v505_v63 = vsel %vm473_vm13, %v457_v55, %v489_v59  ;;  %513 = vst [vmem:[%s925_s20 + $0x30] sm:$0xff] %v497_v62 }
 0x11f   : > { %521 = vst [vmem:[%s925_s20 + $0x70] sm:$0xff] %v505_v63  ;;  %vm466_vm14 = vcmp.gt.f32.partialorder %v450_v60, 0.0  ;;  %v482_v0 = vmul.f32 0.1, %v450_v60 }
 0x120   : > { %vm474_vm15 = vcmp.gt.f32.partialorder %v458_v61, 0.0  ;;  %v490_v1 = vmul.f32 0.1, %v458_v61 }
 0x121   : > { %v498_v2 = vsel %vm466_vm14, %v450_v60, %v482_v0 }
 0x122   : > { %v506_v19 = vsel %vm474_vm15, %v458_v61, %v490_v1  ;;  %514 = vst [vmem:[%s925_s20 + $0x38] sm:$0xff] %v498_v2 }
 0x123   : > { %522 = vst [vmem:[%s925_s20 + $0x78] sm:$0xff] %v506_v19 }
 0x124 PF: > { %s14_s15 = sadd.s32 1, %s736_s15  }
 0x125   : > { %p11_p4 = scmp.ge.s32.totalorder %s14_s15, 6  }
 0x127   :  { %13 = sbr.rel (!%p11_p4) target bundleno = 1 (0x1), region = 66 }

// kernel: cca_forward.14
= control target key start
LH: loop header
LB: loop body
LE: loop exit
PB: predicated region body
PF: predicated region fallthrough
CT: control target
= control target key end

     0   :  { %s1460_s9 = smov 0   ;;  %s1462_s10 = smov 0   ;;  %s1903_s0 = inlined_call_operand.vmem [shape: f32[2,256,256], index: 0, kind: input, shape index: {}]   ;;  %s1904_s1 = inlined_call_operand.vmem [shape: f32[2,256,128], index: 1, kind: input, shape index: {}]   ;;  %s1905_s2 = inlined_call_operand.vmem [shape: f32[2,256,128], index: 2, kind: output, shape index: {}]  }
   0x1   :  { %s1464_s11 = smov 0   ;;  %s1466_s12 = smov 0  }
   0x2   :  { %s1468_s13 = smov 0  }
   0x3 LB: > { %s21_s14 = sadd.s32 1, %s1434_s11  ;;  %s24_s15 = sadd.s32 1, %s1438_s12  ;;  %s1442_s13 = sphi %s1468_s13, %s12_s13   ;;  %s1438_s12 = sphi %s1466_s12, %s1909_s12   ;;  %s1434_s11 = sphi %s1464_s11, %s1908_s11   ;;  %s1430_s10 = sphi %s1462_s10, %s1907_s10   ;;  %s1426_s9 = sphi %s1460_s9, %s1906_s9  }
   0x4   : > { %p22_p0 = scmp.ge.s32.totalorder %s21_s14, 4  ;;  %p1121_p1 = scmp.ge.s32.totalorder %s1442_s13, 1 }
   0x5   : > { %p149_p2 = scmp.lt.s32.totalorder %s1442_s13, 9 }
   0x6   : > { %s1911_s14 = smov (%p22_p0, %s21_s14), 0  ;;  %s1913_s15 = smov (!%p22_p0, %s24_s15), %s1438_s12 }
   0x7   : > { %p150_p3 = pnand %p1121_p1, %p149_p2  ;;  %p26_p4 = scmp.ge.s32.totalorder %s1913_s15, 2 }
   0x8   : > { %s1122_s16 = sshll.u32 (!%p150_p3), %s1426_s9, 3  ;;  %p186_p5 = scmp.lt.s32.totalorder (!%p150_p3), %s1430_s10, 1 }
   0x9   : > { %s1915_s15 = smov (%p26_p4, %s1913_s15), 0  ;;  %153 = sbr.rel (%p150_p3) target bundleno = 592 (0x250), region = 28 }
   0xa   : > { %p188_p6 = scmp.lt.s32.totalorder (!%p150_p3), %s1122_s16, 31  ;;  %p1131_p7 = scmp.ne.s32.totalorder (!%p150_p3), %s1426_s9, 0 }
  0x10   : > { %s1917_s10 = smov (!%p186_p5, %s1430_s10), 1  ;;  %s1919_s16 = smov (!%p188_p6, %s1122_s16), 31 }
  0x11   : > { %s1124_s17 = sshll.u32 %s1917_s10, 6  ;;  %s1127_s18 = sshll.u32 %s1917_s10, 5  ;;  %v1444_v0 = vmov (!%p1131_p7), 0.0  }
  0x12   : > { %s1123_s19 = sshll.u32 %s1919_s16, 1  ;;  %s202_s20 = sadd.s32 %s1127_s18, %s1919_s16  ;;  %215 = vst [vmem:[#allocation2] sm:$0xff] (!%p1131_p7), %v1444_v0  ;;  %216 = vst [vmem:[#allocation2 + $0x8] sm:$0xff] (!%p1131_p7), %v1444_v0 }
  0x13   : > { %s192_s21 = sadd.s32 %s1124_s17, %s1123_s19  ;;  %s1128_s22 = sshll.u32 %s202_s20, 3  ;;  %217 = vst [vmem:[#allocation2 + $0x10] sm:$0xff] (!%p1131_p7), %v1444_v0  ;;  %218 = vst [vmem:[#allocation2 + $0x18] sm:$0xff] (!%p1131_p7), %v1444_v0 }
  0x14   : > { %s1125_s23 = sshll.u32 %s192_s21, 3  ;;  %s1496_s26 = scalar_lea.vmem %s1904_s1, %s1128_s22  ;;  %219 = vst [vmem:[#allocation2 + $0x20] sm:$0xff] (!%p1131_p7), %v1444_v0  ;;  %220 = vst [vmem:[#allocation2 + $0x28] sm:$0xff] (!%p1131_p7), %v1444_v0 }
  0x15   : > { %s1501_s29 = scalar_lea.vmem %s1903_s0, %s1125_s23  ;;  %s1167_s30 = sshll.u32 %s1917_s10, 8  ;;  %221 = vst [vmem:[#allocation2 + $0x30] sm:$0xff] (!%p1131_p7), %v1444_v0  ;;  %222 = vst [vmem:[#allocation2 + $0x38] sm:$0xff] (!%p1131_p7), %v1444_v0 }
  0x16   : > { %s1506_s5 = scalar_lea.vmem %s1905_s2, %s1167_s30  ;;  %214 = sbr.rel (%p1131_p7) target bundleno = 34 (0x22), region = 32  ;;  %223 = vst [vmem:[#allocation2 + $0x40] sm:$0xff] (!%p1131_p7), %v1444_v0  ;;  %224 = vst [vmem:[#allocation2 + $0x48] sm:$0xff] (!%p1131_p7), %v1444_v0 }
  0x17   : > { %225 = vst [vmem:[#allocation2 + $0x50] sm:$0xff] (!%p1131_p7), %v1444_v0  ;;  %226 = vst [vmem:[#allocation2 + $0x58] sm:$0xff] (!%p1131_p7), %v1444_v0 }
  0x18   : > { %227 = vst [vmem:[#allocation2 + $0x60] sm:$0xff] (!%p1131_p7), %v1444_v0  ;;  %228 = vst [vmem:[#allocation2 + $0x68] sm:$0xff] (!%p1131_p7), %v1444_v0 }
  0x19   : > { %229 = vst [vmem:[#allocation2 + $0x70] sm:$0xff] (!%p1131_p7), %v1444_v0  ;;  %230 = vst [vmem:[#allocation2 + $0x78] sm:$0xff] (!%p1131_p7), %v1444_v0 }
  0x1a   : > { %231 = vst [vmem:[#allocation2 + $0x80] sm:$0xff] (!%p1131_p7), %v1444_v0  ;;  %232 = vst [vmem:[#allocation2 + $0x88] sm:$0xff] (!%p1131_p7), %v1444_v0 }
  0x1b   : > { %233 = vst [vmem:[#allocation2 + $0x90] sm:$0xff] (!%p1131_p7), %v1444_v0  ;;  %234 = vst [vmem:[#allocation2 + $0x98] sm:$0xff] (!%p1131_p7), %v1444_v0 }
  0x1c   : > { %235 = vst [vmem:[#allocation2 + $0xa0] sm:$0xff] (!%p1131_p7), %v1444_v0  ;;  %236 = vst [vmem:[#allocation2 + $0xa8] sm:$0xff] (!%p1131_p7), %v1444_v0 }
  0x1d   : > { %237 = vst [vmem:[#allocation2 + $0xb0] sm:$0xff] %v1444_v0  ;;  %238 = vst [vmem:[#allocation2 + $0xb8] sm:$0xff] %v1444_v0 }
  0x1e   : > { %239 = vst [vmem:[#allocation2 + $0xc0] sm:$0xff] %v1444_v0  ;;  %240 = vst [vmem:[#allocation2 + $0xc8] sm:$0xff] %v1444_v0 }
  0x1f   : > { %241 = vst [vmem:[#allocation2 + $0xd0] sm:$0xff] %v1444_v0  ;;  %242 = vst [vmem:[#allocation2 + $0xd8] sm:$0xff] %v1444_v0 }
  0x20   : > { %243 = vst [vmem:[#allocation2 + $0xe0] sm:$0xff] %v1444_v0  ;;  %244 = vst [vmem:[#allocation2 + $0xe8] sm:$0xff] %v1444_v0 }
  0x21   : > { %245 = vst [vmem:[#allocation2 + $0xf0] sm:$0xff] %v1444_v0  ;;  %246 = vst [vmem:[#allocation2 + $0xf8] sm:$0xff] %v1444_v0 }
  0x22 PF: > { %v280_v1 = vld [vmem:[%s1501_s29 + $0x8] sm:$0xff]  ;;  %v279_v2 = vld [vmem:[%s1501_s29] sm:$0xff]  ;;  %v282_v3 = vld [vmem:[%s1501_s29 + $0x18] sm:$0xff]  ;;  %vm367_vm0 = vcmask 523264   ;;  %p1164_p8 = scmp.ne.s32.totalorder %s1426_s9, 3 }
  0x23   : > { %335 = vxpose.xlu1.b32.start [1/8] (short) %v280_v1, 128  ;;  %303 = vxpose.xlu0.b32.start [1/8] (short) %v279_v2, 128  ;;  %v281_v4 = vld [vmem:[%s1501_s29 + $0x10] sm:$0xff]  ;;  %v284_v5 = vld [vmem:[%s1501_s29 + $0x28] sm:$0xff]  ;;  %v295_v6 = vld [vmem:[%s1496_s26] sm:$0xff] }
  0x24   : > { %v296_v7 = vld [vmem:[%s1496_s26 + $0x8] sm:$0xff]  ;;  %v283_v8 = vld [vmem:[%s1501_s29 + $0x20] sm:$0xff]  ;;  %v297_v10 = vld [vmem:[%s1496_s26 + $0x10] sm:$0xff] }
  0x25   : > { %v1272_v9 = vpack.c.bf16 %v296_v7, %v295_v6  ;;  %v298_v11 = vld [vmem:[%s1496_s26 + $0x18] sm:$0xff]  ;;  %v299_v13 = vld [vmem:[%s1496_s26 + $0x20] sm:$0xff]  ;;  %v300_v14 = vld [vmem:[%s1496_s26 + $0x28] sm:$0xff] }
  0x26   : > { %v1276_v12 = vpack.c.bf16 %v298_v11, %v297_v10  ;;  %v286_v15 = vld [vmem:[%s1501_s29 + $0x38] sm:$0xff]  ;;  %v285_v16 = vld [vmem:[%s1501_s29 + $0x30] sm:$0xff]  ;;  %v1280_v17 = vpack.c.bf16 %v300_v14, %v299_v13  ;;  %v288_v20 = vld [vmem:[%s1501_s29 + $0x48] sm:$0xff] }
  0x27   : > { %336 = vxpose.xlu1.b32.cont [2/8] (short) %v282_v3, 128  ;;  %304 = vxpose.xlu0.b32.cont [2/8] (short) %v281_v4, 128  ;;  %v301_v18 = vld [vmem:[%s1496_s26 + $0x30] sm:$0xff]  ;;  %v302_v19 = vld [vmem:[%s1496_s26 + $0x38] sm:$0xff]  ;;  %v287_v21 = vld [vmem:[%s1501_s29 + $0x40] sm:$0xff] }
  0x28   : > { %1273 = vmatprep.subr.bf16.mxu0 %v1272_v9  ;;  %1288 = vmatprep.subr.bf16.mxu1 %v1272_v9  ;;  %v1284_v22 = vpack.c.bf16 %v302_v19, %v301_v18  ;;  %v290_v23 = vld [vmem:[%s1501_s29 + $0x58] sm:$0xff]  ;;  %v289_v24 = vld [vmem:[%s1501_s29 + $0x50] sm:$0xff]  ;;  %v292_v25 = vld [vmem:[%s1501_s29 + $0x68] sm:$0xff] }
  0x29   : > { %1275 = vmatpush3.bf16.msra.mxu0 %v1272_v9  ;;  %1292 = vmatpush3.bf16.msra.mxu1 %v1272_v9  ;;  %v291_v26 = vld [vmem:[%s1501_s29 + $0x60] sm:$0xff]  ;;  %v294_v27 = vld [vmem:[%s1501_s29 + $0x78] sm:$0xff]  ;;  %v293_v28 = vld [vmem:[%s1501_s29 + $0x70] sm:$0xff] }
  0x2a   : > { %1277 = vmatprep.subr.bf16.mxu0 %v1276_v12  ;;  %1289 = vmatprep.subr.bf16.mxu1 %v1276_v12  ;;  %v248_v61 = vld [vmem:[#allocation2 + $0x8] sm:$0xff]  ;;  %v247_v63 = vld [vmem:[#allocation2] sm:$0xff]  ;;  %v250_v9 = vld [vmem:[#allocation2 + $0x18] sm:$0xff] }
  0x2b   : > { %337 = vxpose.xlu1.b32.cont [3/8] (short) %v284_v5, 128  ;;  %305 = vxpose.xlu0.b32.cont [3/8] (short) %v283_v8, 128  ;;  %v264_v62 = vld [vmem:[#allocation2 + $0x88] sm:$0xff]  ;;  %v263_v0 = vld [vmem:[#allocation2 + $0x80] sm:$0xff]  ;;  %v266_v10 = vld [vmem:[#allocation2 + $0x98] sm:$0xff] }
  0x2c   : > { %v249_v11 = vld [vmem:[#allocation2 + $0x10] sm:$0xff] }
  0x2d   : > { %1279 = vmatpush3.bf16.msra.mxu0 %v1276_v12  ;;  %1293 = vmatpush3.bf16.msra.mxu1 %v1276_v12  ;;  %v265_v12 = vld [vmem:[#allocation2 + $0x90] sm:$0xff] }
  0x2e   : > { %1281 = vmatprep.subr.bf16.mxu0 %v1280_v17  ;;  %1290 = vmatprep.subr.bf16.mxu1 %v1280_v17 }
  0x2f   : > { %338 = vxpose.xlu1.b32.cont [4/8] (short) %v286_v15, 128  ;;  %306 = vxpose.xlu0.b32.cont [4/8] (short) %v285_v16, 128 }
  0x31   : > { %1283 = vmatpush3.bf16.msra.mxu0 %v1280_v17  ;;  %1294 = vmatpush3.bf16.msra.mxu1 %v1280_v17 }
  0x32   : > { %1285 = vmatprep.subr.bf16.mxu0 %v1284_v22  ;;  %1291 = vmatprep.subr.bf16.mxu1 %v1284_v22 }
  0x33   : > { %339 = vxpose.xlu1.b32.cont [5/8] (short) %v288_v20, 128  ;;  %307 = vxpose.xlu0.b32.cont [5/8] (short) %v287_v21, 128  ;;  %v252_v21 = vld [vmem:[#allocation2 + $0x28] sm:$0xff] }
  0x35   : > { %1287 = vmatpush3.bf16.msra.mxu0 %v1284_v22  ;;  %1295 = vmatpush3.bf16.msra.mxu1 %v1284_v22  ;;  %v268_v22 = vld [vmem:[#allocation2 + $0xa8] sm:$0xff] }
  0x37   : > { %340 = vxpose.xlu1.b32.cont [6/8] (short) %v290_v23, 128  ;;  %308 = vxpose.xlu0.b32.cont [6/8] (short) %v289_v24, 128  ;;  %v251_v23 = vld [vmem:[#allocation2 + $0x20] sm:$0xff] }
  0x38   : > { %v267_v24 = vld [vmem:[#allocation2 + $0xa0] sm:$0xff] }
  0x3b   : > { %341 = vxpose.xlu1.b32.cont [7/8] (short) %v292_v25, 128  ;;  %309 = vxpose.xlu0.b32.cont [7/8] (short) %v291_v26, 128 }
  0x3f   : > { %342 = vxpose.xlu1.b32.end [8/8] (short) %v294_v27, 128  ;;  %310 = vxpose.xlu0.b32.end [8/8] (short) %v293_v28, 128 }
  0xa3   : > { %v351_v29 = vpop.trf.xlu1  ;;  %v319_v30 = vpop.trf.xlu0 }
  0xa4   : > { %1224 = vmatprep.mubr.msk.f32.mxu0 %vm367_vm0, %v319_v30  ;;  %1248 = vmatprep.mubr.msk.f32.mxu1 %vm367_vm0, %v351_v29 }
  0xa7   : > { %v352_v31 = vpop.trf.xlu1  ;;  %v320_v32 = vpop.trf.xlu0 }
  0xa8   : > { %1225 = vmatmul.mubr.msk.f32.vlgmr.msra.gmra.mrb[0].mxu0 %vm367_vm0, %v320_v32  ;;  %1249 = vmatmul.mubr.msk.f32.vlgmr.msra.gmra.mrb[0].mxu1 %vm367_vm0, %v352_v31 }
  0xab   : > { %v353_v33 = vpop.trf.xlu1  ;;  %v321_v34 = vpop.trf.xlu0 }
  0xac   : > { %1227 = vmatprep.mubr.msk.f32.mxu0 %vm367_vm0, %v321_v34  ;;  %1251 = vmatprep.mubr.msk.f32.mxu1 %vm367_vm0, %v353_v33  ;;  %v254_v33 = vld [vmem:[#allocation2 + $0x38] sm:$0xff] }
  0xad   : > { %v270_v34 = vld [vmem:[#allocation2 + $0xb8] sm:$0xff] }
  0xaf   : > { %v354_v35 = vpop.trf.xlu1  ;;  %v322_v36 = vpop.trf.xlu0 }
  0xb0   : > { %1228 = vmatmul.mubr.msk.f32.gmra.mrb[2].mxu0 %vm367_vm0, %v322_v36  ;;  %1252 = vmatmul.mubr.msk.f32.gmra.mrb[2].mxu1 %vm367_vm0, %v354_v35  ;;  %v253_v35 = vld [vmem:[#allocation2 + $0x30] sm:$0xff] }
  0xb1   : > { %v269_v36 = vld [vmem:[#allocation2 + $0xb0] sm:$0xff] }
  0xb3   : > { %v355_v37 = vpop.trf.xlu1  ;;  %v323_v38 = vpop.trf.xlu0 }
  0xb4   : > { %1230 = vmatprep.mubr.msk.f32.mxu0 %vm367_vm0, %v323_v38  ;;  %1254 = vmatprep.mubr.msk.f32.mxu1 %vm367_vm0, %v355_v37 }
  0xb7   : > { %v356_v39 = vpop.trf.xlu1  ;;  %v324_v40 = vpop.trf.xlu0 }
  0xb8   : > { %1231 = vmatmul.mubr.msk.f32.gmra.mrb[4].mxu0 %vm367_vm0, %v324_v40  ;;  %1255 = vmatmul.mubr.msk.f32.gmra.mrb[4].mxu1 %vm367_vm0, %v356_v39 }
  0xbb   : > { %v357_v41 = vpop.trf.xlu1  ;;  %v325_v42 = vpop.trf.xlu0 }
  0xbc   : > { %1233 = vmatprep.mubr.msk.f32.mxu0 %vm367_vm0, %v325_v42  ;;  %1257 = vmatprep.mubr.msk.f32.mxu1 %vm367_vm0, %v357_v41 }
  0xbf   : > { %v358_v43 = vpop.trf.xlu1  ;;  %v326_v44 = vpop.trf.xlu0 }
  0xc0   : > { %1234 = vmatmul.mubr.msk.f32.gmra.mrb[6].mxu0 %vm367_vm0, %v326_v44  ;;  %1258 = vmatmul.mubr.msk.f32.gmra.mrb[6].mxu1 %vm367_vm0, %v358_v43 }
  0xc3   : > { %v359_v45 = vpop.trf.xlu1  ;;  %v327_v46 = vpop.trf.xlu0 }
  0xc4   : > { %1236 = vmatprep.mubr.msk.f32.mxu0 %vm367_vm0, %v327_v46  ;;  %1260 = vmatprep.mubr.msk.f32.mxu1 %vm367_vm0, %v359_v45  ;;  %v256_v45 = vld [vmem:[#allocation2 + $0x48] sm:$0xff] }
  0xc5   : > { %v272_v46 = vld [vmem:[#allocation2 + $0xc8] sm:$0xff] }
  0xc7   : > { %v360_v47 = vpop.trf.xlu1  ;;  %v328_v48 = vpop.trf.xlu0 }
  0xc8   : > { %1237 = vmatmul.mubr.msk.f32.gmra.mrb[8].mxu0 %vm367_vm0, %v328_v48  ;;  %1261 = vmatmul.mubr.msk.f32.gmra.mrb[8].mxu1 %vm367_vm0, %v360_v47  ;;  %v255_v47 = vld [vmem:[#allocation2 + $0x40] sm:$0xff] }
  0xc9   : > { %v271_v48 = vld [vmem:[#allocation2 + $0xc0] sm:$0xff] }
  0xcb   : > { %v361_v49 = vpop.trf.xlu1  ;;  %v329_v50 = vpop.trf.xlu0 }
  0xcc   : > { %1239 = vmatprep.mubr.msk.f32.mxu0 %vm367_vm0, %v329_v50  ;;  %1263 = vmatprep.mubr.msk.f32.mxu1 %vm367_vm0, %v361_v49 }
  0xcf   : > { %v362_v51 = vpop.trf.xlu1  ;;  %v330_v52 = vpop.trf.xlu0 }
  0xd0   : > { %1240 = vmatmul.mubr.msk.f32.gmra.mrb[10].mxu0 %vm367_vm0, %v330_v52  ;;  %1264 = vmatmul.mubr.msk.f32.gmra.mrb[10].mxu1 %vm367_vm0, %v362_v51 }
  0xd3   : > { %v363_v53 = vpop.trf.xlu1  ;;  %v331_v54 = vpop.trf.xlu0 }
  0xd4   : > { %1242 = vmatprep.mubr.msk.f32.mxu0 %vm367_vm0, %v331_v54  ;;  %1266 = vmatprep.mubr.msk.f32.mxu1 %vm367_vm0, %v363_v53 }
  0xd7   : > { %v364_v55 = vpop.trf.xlu1  ;;  %v332_v56 = vpop.trf.xlu0 }
  0xd8   : > { %1243 = vmatmul.mubr.msk.f32.gmra.mrb[12].mxu0 %vm367_vm0, %v332_v56  ;;  %1267 = vmatmul.mubr.msk.f32.gmra.mrb[12].mxu1 %vm367_vm0, %v364_v55 }
  0xdb   : > { %v365_v57 = vpop.trf.xlu1  ;;  %v333_v58 = vpop.trf.xlu0 }
  0xdc   : > { %1245 = vmatprep.mubr.msk.f32.mxu0 %vm367_vm0, %v333_v58  ;;  %1269 = vmatprep.mubr.msk.f32.mxu1 %vm367_vm0, %v365_v57  ;;  %v258_v57 = vld [vmem:[#allocation2 + $0x58] sm:$0xff] }
  0xdd   : > { %v274_v58 = vld [vmem:[#allocation2 + $0xd8] sm:$0xff] }
  0xdf   : > { %v366_v59 = vpop.trf.xlu1  ;;  %v334_v60 = vpop.trf.xlu0 }
  0xe0   : > { %1246 = vmatmul.mubr.msk.f32.gmra.mrb[14].mxu0 %vm367_vm0, %v334_v60  ;;  %1270 = vmatmul.mubr.msk.f32.gmra.mrb[14].mxu1 %vm367_vm0, %v366_v59  ;;  %v257_v59 = vld [vmem:[#allocation2 + $0x50] sm:$0xff] }
  0xe1   : > { %v273_v60 = vld [vmem:[#allocation2 + $0xd0] sm:$0xff] }
 0x17b   : > { %v1226_v1 = vpop.f32.mrb[0].mxu0  ;;  %v1250_v2 = vpop.f32.mrb[0].mxu1 }
 0x17c   : > { %v690_v3 = vadd.f32 %v1226_v1, %v248_v61  ;;  %v706_v4 = vadd.f32 %v1250_v2, %v264_v62  ;;  %v530_v5 = vpop.f32.mrb[1].mxu0  ;;  %v610_v6 = vpop.f32.mrb[1].mxu1 }
 0x17d   : > { %v689_v7 = vadd.f32 %v530_v5, %v247_v63  ;;  %v705_v8 = vadd.f32 %v610_v6, %v263_v0  ;;  %v260_v5 = vld [vmem:[#allocation2 + $0x68] sm:$0xff] }
 0x17e   : > { %722 = vst [vmem:[#allocation2 + $0x8] sm:$0xff] %v690_v3  ;;  %738 = vst [vmem:[#allocation2 + $0x88] sm:$0xff] %v706_v4  ;;  %v276_v6 = vld [vmem:[#allocation2 + $0xe8] sm:$0xff] }
 0x17f   : > { %721 = vst [vmem:[#allocation2] sm:$0xff] %v689_v7  ;;  %737 = vst [vmem:[#allocation2 + $0x80] sm:$0xff] %v705_v8  ;;  %v259_v7 = vld [vmem:[#allocation2 + $0x60] sm:$0xff] }
 0x180   : > { %v275_v8 = vld [vmem:[#allocation2 + $0xe0] sm:$0xff] }
 0x183   : > { %v1229_v13 = vpop.f32.mrb[2].mxu0  ;;  %v1253_v14 = vpop.f32.mrb[2].mxu1 }
 0x184   : > { %v692_v15 = vadd.f32 %v1229_v13, %v250_v9  ;;  %v708_v16 = vadd.f32 %v1253_v14, %v266_v10  ;;  %v540_v17 = vpop.f32.mrb[3].mxu0  ;;  %v620_v18 = vpop.f32.mrb[3].mxu1 }
 0x185   : > { %v691_v19 = vadd.f32 %v540_v17, %v249_v11  ;;  %v707_v20 = vadd.f32 %v620_v18, %v265_v12  ;;  %v262_v17 = vld [vmem:[#allocation2 + $0x78] sm:$0xff] }
 0x186   : > { %724 = vst [vmem:[#allocation2 + $0x18] sm:$0xff] %v692_v15  ;;  %740 = vst [vmem:[#allocation2 + $0x98] sm:$0xff] %v708_v16  ;;  %v278_v18 = vld [vmem:[#allocation2 + $0xf8] sm:$0xff] }
 0x187   : > { %723 = vst [vmem:[#allocation2 + $0x10] sm:$0xff] %v691_v19  ;;  %739 = vst [vmem:[#allocation2 + $0x90] sm:$0xff] %v707_v20  ;;  %v261_v19 = vld [vmem:[#allocation2 + $0x70] sm:$0xff] }
 0x188   : > { %v277_v20 = vld [vmem:[#allocation2 + $0xf0] sm:$0xff] }
 0x18b   : > { %v1232_v25 = vpop.f32.mrb[4].mxu0  ;;  %v1256_v26 = vpop.f32.mrb[4].mxu1 }
 0x18c   : > { %v694_v27 = vadd.f32 %v1232_v25, %v252_v21  ;;  %v710_v28 = vadd.f32 %v1256_v26, %v268_v22  ;;  %v550_v29 = vpop.f32.mrb[5].mxu0  ;;  %v630_v30 = vpop.f32.mrb[5].mxu1 }
 0x18d   : > { %v693_v31 = vadd.f32 %v550_v29, %v251_v23  ;;  %v709_v32 = vadd.f32 %v630_v30, %v267_v24  ;;  %v1566_v29 = vld [vmem:[#allocation2] sm:$0xff] (!%p1164_p8)  ;;  %v1568_v30 = vld [vmem:[#allocation2 + $0x8] sm:$0xff] (!%p1164_p8) }
 0x18e   : > { %726 = vst [vmem:[#allocation2 + $0x28] sm:$0xff] %v694_v27  ;;  %742 = vst [vmem:[#allocation2 + $0xa8] sm:$0xff] %v710_v28 }
 0x18f   : > { %725 = vst [vmem:[#allocation2 + $0x20] sm:$0xff] %v693_v31  ;;  %741 = vst [vmem:[#allocation2 + $0xa0] sm:$0xff] %v709_v32  ;;  %v1570_v31 = vld [vmem:[#allocation2 + $0x10] sm:$0xff] (!%p1164_p8)  ;;  %v1572_v32 = vld [vmem:[#allocation2 + $0x18] sm:$0xff] (!%p1164_p8) }
 0x193   : > { %v1235_v37 = vpop.f32.mrb[6].mxu0  ;;  %v1259_v38 = vpop.f32.mrb[6].mxu1 }
 0x194   : > { %v696_v39 = vadd.f32 %v1235_v37, %v254_v33  ;;  %v712_v40 = vadd.f32 %v1259_v38, %v270_v34  ;;  %v560_v41 = vpop.f32.mrb[7].mxu0  ;;  %v640_v42 = vpop.f32.mrb[7].mxu1 }
 0x195   : > { %v695_v43 = vadd.f32 %v560_v41, %v253_v35  ;;  %v711_v44 = vadd.f32 %v640_v42, %v269_v36  ;;  %v1576_v34 = vld [vmem:[#allocation2 + $0x28] sm:$0xff] (!%p1164_p8) }
 0x196   : > { %728 = vst [vmem:[#allocation2 + $0x38] sm:$0xff] %v696_v39  ;;  %744 = vst [vmem:[#allocation2 + $0xb8] sm:$0xff] %v712_v40  ;;  %v1574_v33 = vld [vmem:[#allocation2 + $0x20] sm:$0xff] (!%p1164_p8)  ;;  %v790_v39 = vmax.f32 (!%p1164_p8), %v1568_v30, %v1576_v34 }
 0x197   : > { %727 = vst [vmem:[#allocation2 + $0x30] sm:$0xff] %v695_v43  ;;  %743 = vst [vmem:[#allocation2 + $0xb0] sm:$0xff] %v711_v44  ;;  %v789_v38 = vmax.f32 (!%p1164_p8), %v1566_v29, %v1574_v33 }
 0x19b   : > { %v1238_v49 = vpop.f32.mrb[8].mxu0  ;;  %v1262_v50 = vpop.f32.mrb[8].mxu1 }
 0x19c   : > { %v698_v51 = vadd.f32 %v1238_v49, %v256_v45  ;;  %v714_v52 = vadd.f32 %v1262_v50, %v272_v46  ;;  %v570_v53 = vpop.f32.mrb[9].mxu0  ;;  %v650_v54 = vpop.f32.mrb[9].mxu1 }
 0x19d   : > { %v697_v55 = vadd.f32 %v570_v53, %v255_v47  ;;  %v713_v56 = vadd.f32 %v650_v54, %v271_v48  ;;  %v1580_v36 = vld [vmem:[#allocation2 + $0x38] sm:$0xff] (!%p1164_p8) }
 0x19e   : > { %730 = vst [vmem:[#allocation2 + $0x48] sm:$0xff] %v698_v51  ;;  %746 = vst [vmem:[#allocation2 + $0xc8] sm:$0xff] %v714_v52  ;;  %v1578_v35 = vld [vmem:[#allocation2 + $0x30] sm:$0xff] (!%p1164_p8)  ;;  %v792_v44 = vmax.f32 (!%p1164_p8), %v1572_v32, %v1580_v36  ;;  %v1608_v51 = vld [vmem:[#allocation2 + $0x80] sm:$0xff] (!%p1164_p8) }
 0x19f   : > { %729 = vst [vmem:[#allocation2 + $0x40] sm:$0xff] %v697_v55  ;;  %745 = vst [vmem:[#allocation2 + $0xc0] sm:$0xff] %v713_v56  ;;  %v791_v43 = vmax.f32 (!%p1164_p8), %v1570_v31, %v1578_v35  ;;  %v1610_v52 = vld [vmem:[#allocation2 + $0x88] sm:$0xff] (!%p1164_p8)  ;;  %v1614_v55 = vld [vmem:[#allocation2 + $0x90] sm:$0xff] (!%p1164_p8) }
 0x1a0   : > { %v1616_v56 = vld [vmem:[#allocation2 + $0x98] sm:$0xff] (!%p1164_p8) }
 0x1a3   : > { %v1241_v61 = vpop.f32.mrb[10].mxu0  ;;  %v1265_v62 = vpop.f32.mrb[10].mxu1 }
 0x1a4   : > { %v700_v63 = vadd.f32 %v1241_v61, %v258_v57  ;;  %v716_v0 = vadd.f32 %v1265_v62, %v274_v58  ;;  %v580_v1 = vpop.f32.mrb[11].mxu0  ;;  %v660_v2 = vpop.f32.mrb[11].mxu1 }
 0x1a5   : > { %v699_v3 = vadd.f32 %v580_v1, %v257_v59  ;;  %v715_v4 = vadd.f32 %v660_v2, %v273_v60  ;;  %v1588_v40 = vld [vmem:[#allocation2 + $0x48] sm:$0xff] (!%p1164_p8)  ;;  %v1620_v59 = vld [vmem:[#allocation2 + $0xa0] sm:$0xff] (!%p1164_p8) }
 0x1a6   : > { %732 = vst [vmem:[#allocation2 + $0x58] sm:$0xff] %v700_v63  ;;  %748 = vst [vmem:[#allocation2 + $0xd8] sm:$0xff] %v716_v0  ;;  %v1582_v37 = vld [vmem:[#allocation2 + $0x40] sm:$0xff] (!%p1164_p8)  ;;  %v794_v49 = vmax.f32 (!%p1164_p8), %v790_v39, %v1588_v40  ;;  %v1622_v60 = vld [vmem:[#allocation2 + $0xa8] sm:$0xff] (!%p1164_p8) }
 0x1a7   : > { %731 = vst [vmem:[#allocation2 + $0x50] sm:$0xff] %v699_v3  ;;  %747 = vst [vmem:[#allocation2 + $0xd0] sm:$0xff] %v715_v4  ;;  %v793_v48 = vmax.f32 (!%p1164_p8), %v789_v38, %v1582_v37  ;;  %v1626_v63 = vld [vmem:[#allocation2 + $0xb0] sm:$0xff] (!%p1164_p8)  ;;  %v1628_v0 = vld [vmem:[#allocation2 + $0xb8] sm:$0xff] (!%p1164_p8) }
 0x1a8   : > { %v1632_v3 = vld [vmem:[#allocation2 + $0xc0] sm:$0xff] (!%p1164_p8)  ;;  %v1634_v4 = vld [vmem:[#allocation2 + $0xc8] sm:$0xff] (!%p1164_p8) }
 0x1ab   : > { %v1244_v9 = vpop.f32.mrb[12].mxu0  ;;  %v1268_v10 = vpop.f32.mrb[12].mxu1 }
 0x1ac   : > { %v702_v11 = vadd.f32 %v1244_v9, %v260_v5  ;;  %v718_v12 = vadd.f32 %v1268_v10, %v276_v6  ;;  %v590_v13 = vpop.f32.mrb[13].mxu0  ;;  %v670_v14 = vpop.f32.mrb[13].mxu1 }
 0x1ad   : > { %v701_v15 = vadd.f32 %v590_v13, %v259_v7  ;;  %v717_v16 = vadd.f32 %v670_v14, %v275_v8  ;;  %v1592_v42 = vld [vmem:[#allocation2 + $0x58] sm:$0xff] (!%p1164_p8) }
 0x1ae   : > { %734 = vst [vmem:[#allocation2 + $0x68] sm:$0xff] %v702_v11  ;;  %750 = vst [vmem:[#allocation2 + $0xe8] sm:$0xff] %v718_v12  ;;  %v1590_v41 = vld [vmem:[#allocation2 + $0x50] sm:$0xff] (!%p1164_p8)  ;;  %v796_v54 = vmax.f32 (!%p1164_p8), %v792_v44, %v1592_v42  ;;  %v1640_v8 = vld [vmem:[#allocation2 + $0xd8] sm:$0xff] (!%p1164_p8) }
 0x1af   : > { %733 = vst [vmem:[#allocation2 + $0x60] sm:$0xff] %v701_v15  ;;  %749 = vst [vmem:[#allocation2 + $0xe0] sm:$0xff] %v717_v16  ;;  %v795_v53 = vmax.f32 (!%p1164_p8), %v791_v43, %v1590_v41  ;;  %v1638_v7 = vld [vmem:[#allocation2 + $0xd0] sm:$0xff] (!%p1164_p8) }
 0x1b1   : > { %756 = sbr.rel (%p1164_p8) target bundleno = 592 (0x250), region = 36 }
 0x1b3   : > { %v1247_v21 = vpop.f32.mrb[14].mxu0  ;;  %v1271_v22 = vpop.f32.mrb[14].mxu1 }
 0x1b4   : > { %v704_v23 = vadd.f32 %v1247_v21, %v262_v17  ;;  %v720_v24 = vadd.f32 %v1271_v22, %v278_v18  ;;  %v600_v25 = vpop.f32.mrb[15].mxu0  ;;  %v680_v26 = vpop.f32.mrb[15].mxu1 }
 0x1b5   : > { %v703_v27 = vadd.f32 %v600_v25, %v261_v19  ;;  %v719_v28 = vadd.f32 %v680_v26, %v277_v20  ;;  %v1600_v46 = vld [vmem:[#allocation2 + $0x68] sm:$0xff] (!%p1164_p8) }
 0x1b6   : > { %736 = vst [vmem:[#allocation2 + $0x78] sm:$0xff] %v704_v23  ;;  %752 = vst [vmem:[#allocation2 + $0xf8] sm:$0xff] %v720_v24  ;;  %v1598_v45 = vld [vmem:[#allocation2 + $0x60] sm:$0xff] (!%p1164_p8)  ;;  %v798_v58 = vmax.f32 (!%p1164_p8), %v794_v49, %v1600_v46  ;;  %v1646_v12 = vld [vmem:[#allocation2 + $0xe8] sm:$0xff] (!%p1164_p8) }
 0x1b7   : > { %735 = vst [vmem:[#allocation2 + $0x70] sm:$0xff] %v703_v27  ;;  %751 = vst [vmem:[#allocation2 + $0xf0] sm:$0xff] %v719_v28  ;;  %v797_v57 = vmax.f32 (!%p1164_p8), %v793_v48, %v1598_v45  ;;  %v1644_v11 = vld [vmem:[#allocation2 + $0xe0] sm:$0xff] (!%p1164_p8) }
 0x1b8   : > { %v802_v2 = vmax.f32 %v798_v58, %v1610_v52 }
 0x1b9   : > { %v801_v1 = vmax.f32 %v797_v57, %v1608_v51 }
 0x1ba   : > { %v806_v10 = vmax.f32 %v802_v2, %v1622_v60 }
 0x1bb   : > { %v805_v9 = vmax.f32 %v801_v1, %v1620_v59 }
 0x1bc   : > { %v810_v18 = vmax.f32 %v806_v10, %v1634_v4 }
 0x1bd   : > { %v1606_v50 = vld [vmem:[#allocation2 + $0x78] sm:$0xff]  ;;  %v809_v17 = vmax.f32 %v805_v9, %v1632_v3 }
 0x1be   : > { %v1602_v47 = vld [vmem:[#allocation2 + $0x70] sm:$0xff]  ;;  %v800_v62 = vmax.f32 %v796_v54, %v1606_v50  ;;  %v1652_v16 = vld [vmem:[#allocation2 + $0xf8] sm:$0xff]  ;;  %v814_v22 = vmax.f32 %v810_v18, %v1646_v12 }
 0x1bf   : > { %v799_v61 = vmax.f32 %v795_v53, %v1602_v47  ;;  %v1650_v15 = vld [vmem:[#allocation2 + $0xf0] sm:$0xff]  ;;  %v813_v21 = vmax.f32 %v809_v17, %v1644_v11 }
 0x1c0   : > { %v804_v6 = vmax.f32 %v800_v62, %v1616_v56 }
 0x1c1   : > { %v803_v5 = vmax.f32 %v799_v61, %v1614_v55  ;;  %v817_v25 = vmax.f32 %v813_v21, %v814_v22 }
 0x1c2   : > { %v808_v14 = vmax.f32 %v804_v6, %v1628_v0 }
 0x1c3   : > { %v807_v13 = vmax.f32 %v803_v5, %v1626_v63 }
 0x1c4   : > { %v812_v20 = vmax.f32 %v808_v14, %v1640_v8 }
 0x1c5   : > { %v811_v19 = vmax.f32 %v807_v13, %v1638_v7 }
 0x1c6   : > { %v816_v24 = vmax.f32 %v812_v20, %v1652_v16 }
 0x1c7   : > { %v815_v23 = vmax.f32 %v811_v19, %v1650_v15 }
 0x1c9   : > { %v818_v26 = vmax.f32 %v815_v23, %v816_v24 }
 0x1cb   : > { %v819_v27 = vmax.f32 %v817_v25, %v818_v26 }
 0x1cd   : > { %v820_v28 = vrot.slane %v819_v27, 4 }
 0x1cf   : > { %v821_v38 = vmax.f32 %v819_v27, %v820_v28 }
 0x1d1   : > { %v822_v39 = vrot.slane %v821_v38, 2 }
 0x1d3   : > { %v823_v43 = vmax.f32 %v821_v38, %v822_v39 }
 0x1d5   : > { %v824_v44 = vrot.slane %v823_v43, 1 }
 0x1d7   : > { %v1662_v48 = vmax.f32 %v823_v43, %v824_v44 }
 0x1d9   : > { %v826_v49 = vsub.f32 %v1566_v29, %v1662_v48  ;;  %v827_v53 = vsub.f32 %v1568_v30, %v1662_v48  ;;  %v828_v54 = vsub.f32 %v1570_v31, %v1662_v48  ;;  %v829_v57 = vsub.f32 %v1572_v32, %v1662_v48 }
 0x1da   : > { %v830_v58 = vsub.f32 %v1574_v33, %v1662_v48  ;;  %v831_v2 = vsub.f32 %v1576_v34, %v1662_v48  ;;  %v832_v29 = vsub.f32 %v1578_v35, %v1662_v48  ;;  %v833_v31 = vsub.f32 %v1580_v36, %v1662_v48 }
 0x1db   : > { %v858_v61 = vmul.f32 1.442695, %v826_v49  ;;  %v860_v62 = vmul.f32 1.442695, %v827_v53  ;;  %v862_v1 = vmul.f32 1.442695, %v828_v54  ;;  %v834_v33 = vsub.f32 %v1582_v37, %v1662_v48 }
 0x1dc   : > { %v864_v5 = vmul.f32 1.442695, %v829_v57  ;;  %v866_v30 = vmul.f32 1.442695, %v830_v58  ;;  %v868_v32 = vmul.f32 1.442695, %v831_v2  ;;  %v835_v34 = vsub.f32 %v1588_v40, %v1662_v48 }
 0x1dd   : > { %1338 = vpow2.f32 %v858_v61  ;;  %v870_v6 = vmul.f32 1.442695, %v832_v29  ;;  %v872_v9 = vmul.f32 1.442695, %v833_v31  ;;  %v836_v35 = vsub.f32 %v1590_v41, %v1662_v48 }
 0x1de   : > { %1340 = vpow2.f32 %v860_v62  ;;  %v874_v10 = vmul.f32 1.442695, %v834_v33  ;;  %v837_v14 = vsub.f32 %v1592_v42, %v1662_v48  ;;  %v876_v37 = vmul.f32 1.442695, %v835_v34 }
 0x1df   : > { %1342 = vpow2.f32 %v862_v1  ;;  %v838_v41 = vsub.f32 %v1598_v45, %v1662_v48  ;;  %v878_v19 = vmul.f32 1.442695, %v836_v35  ;;  %v839_v42 = vsub.f32 %v1600_v46, %v1662_v48 }
 0x1e0   : > { %1344 = vpow2.f32 %v864_v5  ;;  %v880_v22 = vmul.f32 1.442695, %v837_v14  ;;  %v840_v25 = vsub.f32 %v1602_v47, %v1662_v48  ;;  %v841_v28 = vsub.f32 %v1606_v50, %v1662_v48 }
 0x1e1   : > { %1346 = vpow2.f32 %v866_v30  ;;  %v882_v45 = vmul.f32 1.442695, %v838_v41  ;;  %v884_v46 = vmul.f32 1.442695, %v839_v42  ;;  %v842_v43 = vsub.f32 %v1608_v51, %v1662_v48 }
 0x1e2   : > { %1348 = vpow2.f32 %v868_v32  ;;  %v886_v47 = vmul.f32 1.442695, %v840_v25  ;;  %v843_v53 = vsub.f32 %v1610_v52, %v1662_v48  ;;  %v888_v50 = vmul.f32 1.442695, %v841_v28 }
 0x1e3   : > { %1350 = vpow2.f32 %v870_v6  ;;  %v844_v58 = vsub.f32 %v1614_v55, %v1662_v48  ;;  %v890_v51 = vmul.f32 1.442695, %v842_v43  ;;  %v845_v1 = vsub.f32 %v1616_v56, %v1662_v48 }
 0x1e4   : > { %1352 = vpow2.f32 %v872_v9  ;;  %v892_v52 = vmul.f32 1.442695, %v843_v53  ;;  %v846_v29 = vsub.f32 %v1620_v59, %v1662_v48  ;;  %v847_v32 = vsub.f32 %v1622_v60, %v1662_v48 }
 0x1e5   : > { %1354 = vpow2.f32 %v874_v10  ;;  %v894_v55 = vmul.f32 1.442695, %v844_v58  ;;  %v896_v56 = vmul.f32 1.442695, %v845_v1  ;;  %v848_v34 = vsub.f32 %v1626_v63, %v1662_v48 }
 0x1e6   : > { %1356 = vpow2.f32 %v876_v37  ;;  %v898_v59 = vmul.f32 1.442695, %v846_v29  ;;  %v849_v10 = vsub.f32 %v1628_v0, %v1662_v48  ;;  %v900_v60 = vmul.f32 1.442695, %v847_v32 }
 0x1e7   : > { %v1686_v13 = vpop.eup %1338  ;;  %1358 = vpow2.f32 %v878_v19  ;;  %v902_v63 = vmul.f32 1.442695, %v848_v34 }
 0x1e8   : > { %v1688_v36 = vpop.eup %1340  ;;  %1360 = vpow2.f32 %v880_v22  ;;  %v904_v0 = vmul.f32 1.442695, %v849_v10 }
 0x1e9   : > { %v1692_v17 = vpop.eup %1342  ;;  %v922_v40 = vadd.f32 %v1688_v36, %v1686_v13  ;;  %1362 = vpow2.f32 %v882_v45 }
 0x1ea   : > { %v1696_v18 = vpop.eup %1344  ;;  %1364 = vpow2.f32 %v884_v46 }
 0x1eb   : > { %v923_v20 = vadd.f32 %v1692_v17, %v922_v40  ;;  %v1701_v21 = vpop.eup %1346  ;;  %1366 = vpow2.f32 %v886_v47  ;;  %v850_v40 = vsub.f32 %v1632_v3, %v1662_v48 }
 0x1ec   : > { %v1706_v24 = vpop.eup %1348  ;;  %1368 = vpow2.f32 %v888_v50 }
 0x1ed   : > { %v924_v23 = vadd.f32 %v1696_v18, %v923_v20  ;;  %v1711_v27 = vpop.eup %1350  ;;  %1370 = vpow2.f32 %v890_v51  ;;  %v851_v20 = vsub.f32 %v1634_v4, %v1662_v48  ;;  %v906_v3 = vmul.f32 1.442695, %v850_v40 }
 0x1ee   : > { %v1716_v39 = vpop.eup %1352  ;;  %1372 = vpow2.f32 %v892_v52 }
 0x1ef   : > { %v925_v26 = vadd.f32 %v1701_v21, %v924_v23  ;;  %v1721_v49 = vpop.eup %1354  ;;  %1374 = vpow2.f32 %v894_v55  ;;  %v852_v23 = vsub.f32 %v1638_v7, %v1662_v48  ;;  %v908_v4 = vmul.f32 1.442695, %v851_v20 }
 0x1f0   : > { %v1726_v57 = vpop.eup %1356  ;;  %1376 = vpow2.f32 %v896_v56 }
 0x1f1   : > { %v926_v38 = vadd.f32 %v1706_v24, %v925_v26  ;;  %v1731_v62 = vpop.eup %1358  ;;  %1378 = vpow2.f32 %v898_v59  ;;  %v853_v26 = vsub.f32 %v1640_v8, %v1662_v48  ;;  %v910_v7 = vmul.f32 1.442695, %v852_v23 }
 0x1f2   : > { %v1736_v5 = vpop.eup %1360  ;;  %1380 = vpow2.f32 %v900_v60 }
 0x1f3   : > { %v927_v44 = vadd.f32 %v1711_v27, %v926_v38  ;;  %v1741_v31 = vpop.eup %1362  ;;  %1382 = vpow2.f32 %v902_v63  ;;  %v854_v38 = vsub.f32 %v1644_v11, %v1662_v48  ;;  %v912_v8 = vmul.f32 1.442695, %v853_v26 }
 0x1f4   : > { %v1746_v6 = vpop.eup %1364  ;;  %1384 = vpow2.f32 %v904_v0 }
 0x1f5   : > { %v928_v54 = vadd.f32 %v1716_v39, %v927_v44  ;;  %v1751_v35 = vpop.eup %1366  ;;  %1386 = vpow2.f32 %v906_v3  ;;  %v855_v44 = vsub.f32 %v1646_v12, %v1662_v48  ;;  %v914_v11 = vmul.f32 1.442695, %v854_v38 }
 0x1f6   : > { %v1756_v37 = vpop.eup %1368  ;;  %1388 = vpow2.f32 %v908_v4 }
 0x1f7   : > { %v929_v61 = vadd.f32 %v1721_v49, %v928_v54  ;;  %v1761_v19 = vpop.eup %1370  ;;  %v856_v54 = vsub.f32 %v1650_v15, %v1662_v48  ;;  %1390 = vpow2.f32 %v910_v7  ;;  %v916_v12 = vmul.f32 1.442695, %v855_v44 }
 0x1f8   : > { %v1766_v22 = vpop.eup %1372  ;;  %1392 = vpow2.f32 %v912_v8 }
 0x1f9   : > { %v930_v2 = vadd.f32 %v1726_v57, %v929_v61  ;;  %v1771_v45 = vpop.eup %1374  ;;  %v857_v61 = vsub.f32 %v1652_v16, %v1662_v48  ;;  %1394 = vpow2.f32 %v914_v11 }
 0x1fa   : > { %v1776_v46 = vpop.eup %1376  ;;  %1396 = vpow2.f32 %v916_v12 }
 0x1fb   : > { %v931_v30 = vadd.f32 %v1731_v62, %v930_v2  ;;  %v1781_v47 = vpop.eup %1378  ;;  %v918_v2 = vmul.f32 1.442695, %v856_v54  ;;  %v920_v55 = vmul.f32 1.442695, %v857_v61 }
 0x1fc   : > { %v1786_v50 = vpop.eup %1380 }
 0x1fd   : > { %v932_v33 = vadd.f32 %v1736_v5, %v931_v30  ;;  %v1791_v51 = vpop.eup %1382  ;;  %1398 = vpow2.f32 %v918_v2 }
 0x1fe   : > { %v1796_v52 = vpop.eup %1384  ;;  %1400 = vpow2.f32 %v920_v55 }
 0x1ff   : > { %v933_v9 = vadd.f32 %v1741_v31, %v932_v33  ;;  %v1799_v15 = vpop.eup %1386 }
 0x200   : > { %v1802_v32 = vpop.eup %1388 }
 0x201   : > { %v934_v14 = vadd.f32 %v1746_v6, %v933_v9  ;;  %v1805_v48 = vpop.eup %1390 }
 0x202   : > { %v1808_v33 = vpop.eup %1392 }
 0x203   : > { %v935_v41 = vadd.f32 %v1751_v35, %v934_v14  ;;  %v1811_v59 = vpop.eup %1394 }
 0x204   : > { %v1814_v10 = vpop.eup %1396 }
 0x205   : > { %v936_v42 = vadd.f32 %v1756_v37, %v935_v41 }
 0x207   : > { %v937_v25 = vadd.f32 %v1761_v19, %v936_v42  ;;  %v1817_v14 = vpop.eup %1398 }
 0x208   : > { %v1820_v63 = vpop.eup %1400 }
 0x209   : > { %v938_v28 = vadd.f32 %v1766_v22, %v937_v25 }
 0x20b   : > { %v939_v43 = vadd.f32 %v1771_v45, %v938_v28 }
 0x20d   : > { %v940_v53 = vadd.f32 %v1776_v46, %v939_v43 }
 0x20f   : > { %v941_v58 = vadd.f32 %v1781_v47, %v940_v53 }
 0x211   : > { %v942_v1 = vadd.f32 %v1786_v50, %v941_v58 }
 0x213   : > { %v943_v29 = vadd.f32 %v1791_v51, %v942_v1 }
 0x215   : > { %v944_v30 = vadd.f32 %v1796_v52, %v943_v29 }
 0x217   : > { %v945_v16 = vadd.f32 %v1799_v15, %v944_v30 }
 0x219   : > { %v946_v56 = vadd.f32 %v1802_v32, %v945_v16 }
 0x21b   : > { %v947_v34 = vadd.f32 %v1805_v48, %v946_v56 }
 0x21d   : > { %v948_v9 = vadd.f32 %v1808_v33, %v947_v34 }
 0x21f   : > { %v949_v60 = vadd.f32 %v1811_v59, %v948_v9 }
 0x221   : > { %v950_v40 = vadd.f32 %v1814_v10, %v949_v60 }
 0x223   : > { %v951_v41 = vadd.f32 %v1817_v14, %v950_v40 }
 0x225   : > { %v952_v20 = vadd.f32 %v1820_v63, %v951_v41 }
 0x227   : > { %v953_v0 = vrot.slane %v952_v20, 4 }
 0x229   : > { %v954_v42 = vadd.f32 %v953_v0, %v952_v20 }
 0x22b   : > { %v955_v23 = vrot.slane %v954_v42, 2 }
 0x22d   : > { %v956_v3 = vadd.f32 %v955_v23, %v954_v42 }
 0x22f   : > { %v957_v25 = vrot.slane %v956_v3, 1 }
 0x231   : > { %v958_v26 = vadd.f32 %v957_v25, %v956_v3 }
 0x233   : > { %1402 = vrcp.f32 %v958_v26 }
 0x23d   : > { %v1403_v4 = vpop.eup %1402 }
 0x23e   : > { %v960_v28 = vmul.f32 %v1403_v4, %v1686_v13  ;;  %v961_v38 = vmul.f32 %v1403_v4, %v1688_v36  ;;  %v962_v7 = vmul.f32 %v1403_v4, %v1692_v17  ;;  %v963_v43 = vmul.f32 %v1403_v4, %v1696_v18 }
 0x23f   : > { %v964_v44 = vmul.f32 %v1403_v4, %v1701_v21  ;;  %v965_v8 = vmul.f32 %v1403_v4, %v1706_v24  ;;  %v966_v53 = vmul.f32 %v1403_v4, %v1711_v27  ;;  %v967_v54 = vmul.f32 %v1403_v4, %v1716_v39 }
 0x240   : > { %992 = vst [vmem:[%s1506_s5] sm:$0xff] %v960_v28  ;;  %993 = vst [vmem:[%s1506_s5 + $0x8] sm:$0xff] %v961_v38  ;;  %v968_v13 = vmul.f32 %v1403_v4, %v1721_v49  ;;  %v969_v36 = vmul.f32 %v1403_v4, %v1726_v57  ;;  %v970_v17 = vmul.f32 %v1403_v4, %v1731_v62 }
 0x241   : > { %994 = vst [vmem:[%s1506_s5 + $0x10] sm:$0xff] %v962_v7  ;;  %995 = vst [vmem:[%s1506_s5 + $0x18] sm:$0xff] %v963_v43  ;;  %v971_v18 = vmul.f32 %v1403_v4, %v1736_v5  ;;  %v972_v21 = vmul.f32 %v1403_v4, %v1741_v31  ;;  %v973_v24 = vmul.f32 %v1403_v4, %v1746_v6 }
 0x242   : > { %996 = vst [vmem:[%s1506_s5 + $0x20] sm:$0xff] %v964_v44  ;;  %997 = vst [vmem:[%s1506_s5 + $0x28] sm:$0xff] %v965_v8  ;;  %v974_v27 = vmul.f32 %v1403_v4, %v1751_v35  ;;  %v975_v39 = vmul.f32 %v1403_v4, %v1756_v37  ;;  %v976_v49 = vmul.f32 %v1403_v4, %v1761_v19 }
 0x243   : > { %998 = vst [vmem:[%s1506_s5 + $0x30] sm:$0xff] %v966_v53  ;;  %999 = vst [vmem:[%s1506_s5 + $0x38] sm:$0xff] %v967_v54  ;;  %v977_v57 = vmul.f32 %v1403_v4, %v1766_v22  ;;  %v978_v62 = vmul.f32 %v1403_v4, %v1771_v45  ;;  %v979_v5 = vmul.f32 %v1403_v4, %v1776_v46 }
 0x244   : > { %1000 = vst [vmem:[%s1506_s5 + $0x40] sm:$0xff] %v968_v13  ;;  %1001 = vst [vmem:[%s1506_s5 + $0x48] sm:$0xff] %v969_v36  ;;  %v980_v31 = vmul.f32 %v1403_v4, %v1781_v47  ;;  %v981_v6 = vmul.f32 %v1403_v4, %v1786_v50  ;;  %v982_v35 = vmul.f32 %v1403_v4, %v1791_v51 }
 0x245   : > { %1002 = vst [vmem:[%s1506_s5 + $0x50] sm:$0xff] %v970_v17  ;;  %1003 = vst [vmem:[%s1506_s5 + $0x58] sm:$0xff] %v971_v18  ;;  %v983_v37 = vmul.f32 %v1403_v4, %v1796_v52  ;;  %v984_v19 = vmul.f32 %v1403_v4, %v1799_v15  ;;  %v985_v22 = vmul.f32 %v1403_v4, %v1802_v32 }
 0x246   : > { %1004 = vst [vmem:[%s1506_s5 + $0x60] sm:$0xff] %v972_v21  ;;  %1005 = vst [vmem:[%s1506_s5 + $0x68] sm:$0xff] %v973_v24  ;;  %v986_v45 = vmul.f32 %v1403_v4, %v1805_v48  ;;  %v987_v46 = vmul.f32 %v1403_v4, %v1808_v33  ;;  %v988_v47 = vmul.f32 %v1403_v4, %v1811_v59 }
 0x247   : > { %1006 = vst [vmem:[%s1506_s5 + $0x70] sm:$0xff] %v974_v27  ;;  %1007 = vst [vmem:[%s1506_s5 + $0x78] sm:$0xff] %v975_v39  ;;  %v989_v50 = vmul.f32 %v1403_v4, %v1814_v10  ;;  %v990_v11 = vmul.f32 %v1403_v4, %v1817_v14  ;;  %v991_v58 = vmul.f32 %v1403_v4, %v1820_v63 }
 0x248   : > { %1008 = vst [vmem:[%s1506_s5 + $0x80] sm:$0xff] %v976_v49  ;;  %1009 = vst [vmem:[%s1506_s5 + $0x88] sm:$0xff] %v977_v57 }
 0x249   : > { %1010 = vst [vmem:[%s1506_s5 + $0x90] sm:$0xff] %v978_v62  ;;  %1011 = vst [vmem:[%s1506_s5 + $0x98] sm:$0xff] %v979_v5 }
 0x24a   : > { %1012 = vst [vmem:[%s1506_s5 + $0xa0] sm:$0xff] %v980_v31  ;;  %1013 = vst [vmem:[%s1506_s5 + $0xa8] sm:$0xff] %v981_v6 }
 0x24b   : > { %1014 = vst [vmem:[%s1506_s5 + $0xb0] sm:$0xff] %v982_v35  ;;  %1015 = vst [vmem:[%s1506_s5 + $0xb8] sm:$0xff] %v983_v37 }
 0x24c   : > { %1016 = vst [vmem:[%s1506_s5 + $0xc0] sm:$0xff] %v984_v19  ;;  %1017 = vst [vmem:[%s1506_s5 + $0xc8] sm:$0xff] %v985_v22 }
 0x24d   : > { %1018 = vst [vmem:[%s1506_s5 + $0xd0] sm:$0xff] %v986_v45  ;;  %1019 = vst [vmem:[%s1506_s5 + $0xd8] sm:$0xff] %v987_v46 }
 0x24e   : > { %1020 = vst [vmem:[%s1506_s5 + $0xe0] sm:$0xff] %v988_v47  ;;  %1021 = vst [vmem:[%s1506_s5 + $0xe8] sm:$0xff] %v989_v50 }
 0x24f   : > { %1022 = vst [vmem:[%s1506_s5 + $0xf0] sm:$0xff] %v990_v11  ;;  %1023 = vst [vmem:[%s1506_s5 + $0xf8] sm:$0xff] %v991_v58 }
 0x250 PF: > { %s12_s13 = sadd.s32 1, %s1442_s13   ;;  %s1906_s9 = smov %s1434_s11 }
 0x251   : > { %p9_p9 = scmp.ge.s32.totalorder %s12_s13, 10   ;;  %s1907_s10 = smov %s1438_s12 }
 0x252   : > { %s1908_s11 = smov %s1911_s14  ;;  %s1909_s12 = smov %s1915_s15 }
 0x253   :  { %11 = sbr.rel (!%p9_p9) target bundleno = 3 (0x3), region = 69 }

// kernel: cca_forward.10
= control target key start
LH: loop header
LB: loop body
LE: loop exit
PB: predicated region body
PF: predicated region fallthrough
CT: control target
= control target key end

     0   :  { %s4661_s15 = smov 0   ;;  %s4663_s16 = smov 0   ;;  %s6321_s0 = inlined_call_operand.vmem [shape: f32[2,18,18,128], index: 0, kind: input, shape index: {}]   ;;  %s6322_s1 = inlined_call_operand.vmem [shape: f32[3,3,128,256], index: 1, kind: input, shape index: {}]   ;;  %s6323_s2 = inlined_call_operand.vmem [shape: f32[1,256], index: 2, kind: input, shape index: {}]   ;;  %s6324_s3 = inlined_call_operand.vmem [shape: f32[1,256], index: 3, kind: input, shape index: {}]   ;;  %s6325_s4 = inlined_call_operand.vmem [shape: f32[2,256,256], index: 4, kind: output, shape index: {}]  }
   0x1   :  { %s4665_s17 = smov 0   ;;  %s4667_s18 = smov 0  }
   0x2   :  { %s4669_s19 = smov 0  }
   0x3 LB: > { %s23_s20 = sadd.s32 1, %s4625_s17  ;;  %s26_s21 = sadd.s32 1, %s4629_s18  ;;  %s4633_s19 = sphi %s4669_s19, %s14_s19   ;;  %s4629_s18 = sphi %s4667_s18, %s6329_s18   ;;  %s4625_s17 = sphi %s4665_s17, %s6328_s17   ;;  %s4621_s16 = sphi %s4663_s16, %s6327_s16   ;;  %s4617_s15 = sphi %s4661_s15, %s6326_s15  }
   0x4   : > { %p24_p0 = scmp.ge.s32.totalorder %s23_s20, 2  ;;  %p3561_p1 = scmp.ge.s32.totalorder %s4633_s19, 1 }
   0x5   : > { %p142_p2 = scmp.lt.s32.totalorder %s4633_s19, 5 }
   0x6   : > { %s6331_s20 = smov (%p24_p0, %s23_s20), 0  ;;  %s6333_s21 = smov (!%p24_p0, %s26_s21), %s4629_s18 }
   0x7   : > { %p143_p3 = pnand %p3561_p1, %p142_p2  ;;  %p28_p4 = scmp.ge.s32.totalorder %s6333_s21, 2 }
   0x8   : > { %s3562_s22 = sshll.u32 (!%p143_p3), %s4617_s15, 4  ;;  %p167_p5 = scmp.lt.s32.totalorder (!%p143_p3), %s4621_s16, 1 }
   0x9   : > { %s6335_s21 = smov (%p28_p4, %s6333_s21), 0  ;;  %146 = sbr.rel (%p143_p3) target bundleno = 614 (0x266), region = 32 }
   0xa   : > { %p169_p6 = scmp.lt.s32.totalorder (!%p143_p3), %s3562_s22, 31  ;;  %p3566_p7 = scmp.ne.s32.totalorder (!%p143_p3), %s4617_s15, 0 }
  0x10   : > { %s168_s23 = scalar_select %p167_p5, %s4621_s16, 1 }
  0x11   : > { %s6337_s22 = smov (!%p169_p6, %s3562_s22), 31  ;;  %180 = sbr.rel (%p3566_p7) target bundleno = 40 (0x28), region = 36 }
  0x12   : > { %s3564_s24 = sshll.u32 %s168_s23, 6  ;;  %s3563_s25 = sshll.u32 %s6337_s22, 1 }
  0x13   : > { %s173_s26 = sadd.s32 %s3564_s24, %s3563_s25  ;;  %s181_s5 = smul.u32 (!%p3566_p7), 432, %s4621_s16 }
  0x14   : > { %s3565_s27 = sshll.u32 %s173_s26, 3 }
  0x15   : > { %s4701_s30 = scalar_lea.vmem %s6325_s4, %s3565_s27  ;;  %s4708_s8 = scalar_lea.vmem (!%p3566_p7), %s6321_s0, %s181_s5 }
  0x16   : > { %v238_v0 = vld [vmem:[%s4708_s8] sm:$0xff] (!%p3566_p7)  ;;  %v240_v1 = vld [vmem:[%s4708_s8 + $0x8] sm:$0xff] (!%p3566_p7)  ;;  %v242_v2 = vld [vmem:[%s4708_s8 + $0x18] sm:$0xff] (!%p3566_p7) }
  0x17   : > { %239 = vst [vmem:[#allocation2] sm:$0xff] (!%p3566_p7), %v238_v0  ;;  %241 = vst [vmem:[#allocation2 + $0x8] sm:$0xff] (!%p3566_p7), %v240_v1  ;;  %v244_v3 = vld [vmem:[%s4708_s8 + $0x20] sm:$0xff] (!%p3566_p7)  ;;  %v246_v4 = vld [vmem:[%s4708_s8 + $0x30] sm:$0xff] (!%p3566_p7) }
  0x18   : > { %243 = vst [vmem:[#allocation2 + $0x18] sm:$0xff] %v242_v2  ;;  %v248_v5 = vld [vmem:[%s4708_s8 + $0x38] sm:$0xff]  ;;  %245 = vst [vmem:[#allocation2 + $0x20] sm:$0xff] %v244_v3  ;;  %v250_v6 = vld [vmem:[%s4708_s8 + $0x48] sm:$0xff] }
  0x19   : > { %247 = vst [vmem:[#allocation2 + $0x30] sm:$0xff] %v246_v4  ;;  %249 = vst [vmem:[#allocation2 + $0x38] sm:$0xff] %v248_v5  ;;  %v252_v7 = vld [vmem:[%s4708_s8 + $0x50] sm:$0xff]  ;;  %v254_v8 = vld [vmem:[%s4708_s8 + $0x60] sm:$0xff] }
  0x1a   : > { %251 = vst [vmem:[#allocation2 + $0x48] sm:$0xff] %v250_v6  ;;  %253 = vst [vmem:[#allocation2 + $0x50] sm:$0xff] %v252_v7  ;;  %v256_v9 = vld [vmem:[%s4708_s8 + $0x68] sm:$0xff]  ;;  %v258_v10 = vld [vmem:[%s4708_s8 + $0x78] sm:$0xff] }
  0x1b   : > { %255 = vst [vmem:[#allocation2 + $0x60] sm:$0xff] %v254_v8  ;;  %v260_v11 = vld [vmem:[%s4708_s8 + $0x80] sm:$0xff]  ;;  %257 = vst [vmem:[#allocation2 + $0x68] sm:$0xff] %v256_v9  ;;  %v262_v12 = vld [vmem:[%s4708_s8 + $0x90] sm:$0xff] }
  0x1c   : > { %259 = vst [vmem:[#allocation2 + $0x78] sm:$0xff] %v258_v10  ;;  %261 = vst [vmem:[#allocation2 + $0x80] sm:$0xff] %v260_v11  ;;  %v264_v13 = vld [vmem:[%s4708_s8 + $0x98] sm:$0xff]  ;;  %v266_v14 = vld [vmem:[%s4708_s8 + $0xa8] sm:$0xff] }
  0x1d   : > { %263 = vst [vmem:[#allocation2 + $0x90] sm:$0xff] %v262_v12  ;;  %265 = vst [vmem:[#allocation2 + $0x98] sm:$0xff] %v264_v13  ;;  %v268_v15 = vld [vmem:[%s4708_s8 + $0xb0] sm:$0xff]  ;;  %v270_v16 = vld [vmem:[%s4708_s8 + $0xc0] sm:$0xff] }
  0x1e   : > { %267 = vst [vmem:[#allocation2 + $0xa8] sm:$0xff] %v266_v14  ;;  %v272_v17 = vld [vmem:[%s4708_s8 + $0xc8] sm:$0xff]  ;;  %269 = vst [vmem:[#allocation2 + $0xb0] sm:$0xff] %v268_v15  ;;  %v274_v18 = vld [vmem:[%s4708_s8 + $0xd8] sm:$0xff] }
  0x1f   : > { %271 = vst [vmem:[#allocation2 + $0xc0] sm:$0xff] %v270_v16  ;;  %273 = vst [vmem:[#allocation2 + $0xc8] sm:$0xff] %v272_v17  ;;  %v276_v19 = vld [vmem:[%s4708_s8 + $0xe0] sm:$0xff]  ;;  %v3567_v20 = vld [vmem:[%s4708_s8 + $0x10] sm:$0x3] }
  0x20   : > { %275 = vst [vmem:[#allocation2 + $0xd8] sm:$0xff] %v274_v18  ;;  %277 = vst [vmem:[#allocation2 + $0xe0] sm:$0xff] %v276_v19  ;;  %v3568_v21 = vld [vmem:[%s4708_s8 + $0x28] sm:$0x3]  ;;  %v3569_v22 = vld [vmem:[%s4708_s8 + $0x40] sm:$0x3] }
  0x21   : > { %288 = vst [vmem:[#allocation2 + $0x10] sm:$0x3] %v3567_v20  ;;  %v3570_v23 = vld [vmem:[%s4708_s8 + $0x58] sm:$0x3]  ;;  %290 = vst [vmem:[#allocation2 + $0x28] sm:$0x3] %v3568_v21 }
  0x22   : > { %292 = vst [vmem:[#allocation2 + $0x40] sm:$0x3] %v3569_v22  ;;  %294 = vst [vmem:[#allocation2 + $0x58] sm:$0x3] %v3570_v23  ;;  %v3571_v24 = vld [vmem:[%s4708_s8 + $0x70] sm:$0x3] }
  0x23   : > { %v3572_v25 = vld [vmem:[%s4708_s8 + $0x88] sm:$0x3]  ;;  %v3573_v26 = vld [vmem:[%s4708_s8 + $0xa0] sm:$0x3]  ;;  %296 = vst [vmem:[#allocation2 + $0x70] sm:$0x3] %v3571_v24 }
  0x24   : > { %298 = vst [vmem:[#allocation2 + $0x88] sm:$0x3] %v3572_v25  ;;  %300 = vst [vmem:[#allocation2 + $0xa0] sm:$0x3] %v3573_v26  ;;  %v3574_v27 = vld [vmem:[%s4708_s8 + $0xb8] sm:$0x3] }
  0x25   : > { %v3575_v28 = vld [vmem:[%s4708_s8 + $0xd0] sm:$0x3]  ;;  %v3576_v29 = vld [vmem:[%s4708_s8 + $0xe8] sm:$0x3]  ;;  %302 = vst [vmem:[#allocation2 + $0xb8] sm:$0x3] %v3574_v27 }
  0x26   : > { %304 = vst [vmem:[#allocation2 + $0xd0] sm:$0x3] %v3575_v28  ;;  %306 = vst [vmem:[#allocation2 + $0xe8] sm:$0x3] %v3576_v29 }
  0x27   : > { %310 = vsyncadd [#allocation3], 2880 }
  0x28 PF: > { %p311_p8 = scmp.lt.s32.totalorder %s4617_s15, 0  ;;  %s312_s9 = ssub.s32 0, %s4617_s15 }
  0x29   : > { %s3577_s10 = smin.u32 %s4617_s15, %s312_s9  ;;  %s323_s11 = sadd.s32 1, %s4617_s15 }
  0x2a   : > { %s314_s12 = sand.u32 1, %s3577_s10   ;;  %p3580_p10 = scmp.ge.s32.totalorder %s323_s11, 2 }
  0x2b   : > { %s315_s13 = ssub.s32 0, %s314_s12  ;;  %s3476_s23 = smul.u32 (!%p3580_p10), 192, %s4617_s15 }
  0x2c   : > { %s6339_s13 = smov (!%p311_p8, %s315_s13), %s314_s12  ;;  %327 = sbr.rel (%p3580_p10) target bundleno = 68 (0x44), region = 77 }
  0x2d   : > { %p3579_p9 = scmp.lt.s32.totalorder %s6339_s13, 0  ;;  %s321_s14 = sadd.s32 2, %s6339_s13 }
  0x2e   : > { %s3477_s24 = smul.u32 (!%p3580_p10), 432, %s4621_s16 }
  0x2f   : > { %s6341_s14 = smov (!%p3579_p9, %s321_s14), %s6339_s13 }
  0x30   : > { %s328_s22 = ssub.s32 (!%p3580_p10), 1, %s6341_s14  ;;  %s3478_s26 = sadd.s32 (!%p3580_p10), %s3477_s24, %s3476_s23 }
  0x31   : > { %s3581_s25 = smul.u32 (!%p3580_p10), 240, %s328_s22  ;;  %s4754_s29 = scalar_lea.vmem (!%p3580_p10), %s6321_s0, %s3478_s26 }
  0x32   : > { %v3583_v30 = vld [vmem:[%s4754_s29 + $0xc0] sm:$0xff] (!%p3580_p10)  ;;  %v3584_v31 = vld [vmem:[%s4754_s29 + $0xc8] sm:$0xff] (!%p3580_p10)  ;;  %v3585_v32 = vld [vmem:[%s4754_s29 + $0xd8] sm:$0xff] (!%p3580_p10)  ;;  %s337_s16 = scalar_lea.sflag (!%p3580_p10), [#allocation3], %s328_s22 }
  0x33   : > { %s4759_s15 = scalar_lea.vmem [#allocation2], %s3581_s25  ;;  %v3586_v33 = vld [vmem:[%s4754_s29 + $0xe0] sm:$0xff]  ;;  %v3587_v34 = vld [vmem:[%s4754_s29 + $0xf0] sm:$0xff]  ;;  %v3588_v35 = vld [vmem:[%s4754_s29 + $0xf8] sm:$0xff] }
  0x34   : > { %394 = vst [vmem:[%s4759_s15] sm:$0xff] %v3583_v30  ;;  %396 = vst [vmem:[%s4759_s15 + $0x8] sm:$0xff] %v3584_v31  ;;  %v3589_v36 = vld [vmem:[%s4754_s29 + $0x108] sm:$0xff]  ;;  %v3590_v37 = vld [vmem:[%s4754_s29 + $0x110] sm:$0xff] }
  0x35   : > { %398 = vst [vmem:[%s4759_s15 + $0x18] sm:$0xff] %v3585_v32  ;;  %400 = vst [vmem:[%s4759_s15 + $0x20] sm:$0xff] %v3586_v33  ;;  %v3591_v38 = vld [vmem:[%s4754_s29 + $0x120] sm:$0xff]  ;;  %v3592_v39 = vld [vmem:[%s4754_s29 + $0x128] sm:$0xff] }
  0x36   : > { %402 = vst [vmem:[%s4759_s15 + $0x30] sm:$0xff] %v3587_v34  ;;  %404 = vst [vmem:[%s4759_s15 + $0x38] sm:$0xff] %v3588_v35  ;;  %v3593_v40 = vld [vmem:[%s4754_s29 + $0x138] sm:$0xff]  ;;  %v3594_v41 = vld [vmem:[%s4754_s29 + $0x140] sm:$0xff] }
  0x37   : > { %406 = vst [vmem:[%s4759_s15 + $0x48] sm:$0xff] %v3589_v36  ;;  %408 = vst [vmem:[%s4759_s15 + $0x50] sm:$0xff] %v3590_v37  ;;  %v3595_v42 = vld [vmem:[%s4754_s29 + $0x150] sm:$0xff]  ;;  %v3596_v43 = vld [vmem:[%s4754_s29 + $0x158] sm:$0xff] }
  0x38   : > { %410 = vst [vmem:[%s4759_s15 + $0x60] sm:$0xff] %v3591_v38  ;;  %412 = vst [vmem:[%s4759_s15 + $0x68] sm:$0xff] %v3592_v39  ;;  %v3597_v44 = vld [vmem:[%s4754_s29 + $0x168] sm:$0xff]  ;;  %v3598_v45 = vld [vmem:[%s4754_s29 + $0x170] sm:$0xff] }
  0x39   : > { %414 = vst [vmem:[%s4759_s15 + $0x78] sm:$0xff] %v3593_v40  ;;  %416 = vst [vmem:[%s4759_s15 + $0x80] sm:$0xff] %v3594_v41  ;;  %v3599_v46 = vld [vmem:[%s4754_s29 + $0x180] sm:$0xff]  ;;  %v3600_v47 = vld [vmem:[%s4754_s29 + $0x188] sm:$0xff] }
  0x3a   : > { %418 = vst [vmem:[%s4759_s15 + $0x90] sm:$0xff] %v3595_v42  ;;  %420 = vst [vmem:[%s4759_s15 + $0x98] sm:$0xff] %v3596_v43  ;;  %v3601_v48 = vld [vmem:[%s4754_s29 + $0x198] sm:$0xff]  ;;  %v3602_v49 = vld [vmem:[%s4754_s29 + $0x1a0] sm:$0xff] }
  0x3b   : > { %422 = vst [vmem:[%s4759_s15 + $0xa8] sm:$0xff] %v3597_v44  ;;  %424 = vst [vmem:[%s4759_s15 + $0xb0] sm:$0xff] %v3598_v45  ;;  %v3603_v50 = vld [vmem:[%s4754_s29 + $0xd0] sm:$0x3]  ;;  %v3605_v51 = vld [vmem:[%s4754_s29 + $0xe8] sm:$0x3] }
  0x3c   : > { %426 = vst [vmem:[%s4759_s15 + $0xc0] sm:$0xff] %v3599_v46  ;;  %428 = vst [vmem:[%s4759_s15 + $0xc8] sm:$0xff] %v3600_v47  ;;  %v3607_v52 = vld [vmem:[%s4754_s29 + $0x100] sm:$0x3]  ;;  %v3609_v53 = vld [vmem:[%s4754_s29 + $0x118] sm:$0x3] }
  0x3d   : > { %430 = vst [vmem:[%s4759_s15 + $0xd8] sm:$0xff] %v3601_v48  ;;  %432 = vst [vmem:[%s4759_s15 + $0xe0] sm:$0xff] %v3602_v49  ;;  %v3611_v54 = vld [vmem:[%s4754_s29 + $0x130] sm:$0x3]  ;;  %v3613_v55 = vld [vmem:[%s4754_s29 + $0x148] sm:$0x3] }
  0x3e   : > { %3604 = vst [vmem:[%s4759_s15 + $0x10] sm:$0x3] %v3603_v50  ;;  %3606 = vst [vmem:[%s4759_s15 + $0x28] sm:$0x3] %v3605_v51  ;;  %v3615_v56 = vld [vmem:[%s4754_s29 + $0x160] sm:$0x3] }
  0x3f   : > { %3608 = vst [vmem:[%s4759_s15 + $0x40] sm:$0x3] %v3607_v52  ;;  %3610 = vst [vmem:[%s4759_s15 + $0x58] sm:$0x3] %v3609_v53  ;;  %v3617_v57 = vld [vmem:[%s4754_s29 + $0x178] sm:$0x3] }
  0x40   : > { %3612 = vst [vmem:[%s4759_s15 + $0x70] sm:$0x3] %v3611_v54  ;;  %3614 = vst [vmem:[%s4759_s15 + $0x88] sm:$0x3] %v3613_v55  ;;  %v3619_v58 = vld [vmem:[%s4754_s29 + $0x190] sm:$0x3] }
  0x41   : > { %3616 = vst [vmem:[%s4759_s15 + $0xa0] sm:$0x3] %v3615_v56  ;;  %v3621_v59 = vld [vmem:[%s4754_s29 + $0x1a8] sm:$0x3]  ;;  %3618 = vst [vmem:[%s4759_s15 + $0xb8] sm:$0x3] %v3617_v57 }
  0x42   : > { %3620 = vst [vmem:[%s4759_s15 + $0xd0] sm:$0x3] %v3619_v58  ;;  %3622 = vst [vmem:[%s4759_s15 + $0xe8] sm:$0x3] %v3621_v59 }
  0x43   : > { %465 = vsyncadd %s337_s16, 2880 }
  0x44 PF: > { %s467_s5 = scalar_lea.sflag [#allocation3], %s6341_s14 }
  0x45   : > { %4613 = dma.done.wait %s467_s5, 2880 }
  0x46   : > { %4614 = vsyncadd %s467_s5, 4294964416  ;;  %v4635_v60 = vmov 0.0   ;;  %v491_v61 = vld [vmem:[%s6322_s1 + $0x8] sm:$0xff]  ;;  %v493_v62 = vld [vmem:[%s6322_s1 + $0x18] sm:$0xff]  ;;  %s3633_s26 = smul.u32 240, %s6341_s14 }
  0x47   : > { %586 = vmatprep.mubr.f32.mxu1 %v4635_v60  ;;  %1749 = vmatprep.mubr.f32.mxu0 %v4635_v60  ;;  %v3764_v63 = vld [vmem:[%s6322_s1 + $0x408] sm:$0xff]  ;;  %v3992_v0 = vpack.c.bf16 %v493_v62, %v491_v61  ;;  %v3766_v1 = vld [vmem:[%s6322_s1 + $0x418] sm:$0xff]  ;;  %v490_v2 = vld [vmem:[%s6322_s1] sm:$0xff] }
  0x48   : > { %v492_v3 = vld [vmem:[%s6322_s1 + $0x10] sm:$0xff]  ;;  %v4841_v4 = vpack.c.bf16 %v3766_v1, %v3764_v63  ;;  %v3763_v6 = vld [vmem:[%s6322_s1 + $0x400] sm:$0xff]  ;;  %v495_v8 = vld [vmem:[%s6322_s1 + $0x28] sm:$0xff]  ;;  %s5093_s15 = scalar_lea.vmem [#allocation2], %s3633_s26 }
  0x49   : > { %v3994_v5 = vpack.c.bf16 %v492_v3, %v490_v2  ;;  %v3765_v7 = vld [vmem:[%s6322_s1 + $0x410] sm:$0xff]  ;;  %3993 = vmatprep.subr.bf16.mxu1 %v3992_v0  ;;  %v497_v10 = vld [vmem:[%s6322_s1 + $0x38] sm:$0xff]  ;;  %v3768_v11 = vld [vmem:[%s6322_s1 + $0x428] sm:$0xff] }
  0x4a   : > { %v4852_v9 = vpack.c.bf16 %v3765_v7, %v3763_v6  ;;  %v3770_v12 = vld [vmem:[%s6322_s1 + $0x438] sm:$0xff]  ;;  %4121 = vmatprep.subr.bf16.mxu0 %v4841_v4  ;;  %v3996_v13 = vpack.c.bf16 %v497_v10, %v495_v8  ;;  %v494_v15 = vld [vmem:[%s6322_s1 + $0x20] sm:$0xff]  ;;  %v496_v16 = vld [vmem:[%s6322_s1 + $0x30] sm:$0xff] }
  0x4b   : > { %3995 = vmatpush1.bf16.msra.mxu1 %v3994_v5  ;;  %v4864_v14 = vpack.c.bf16 %v3770_v12, %v3768_v11  ;;  %v3767_v17 = vld [vmem:[%s6322_s1 + $0x420] sm:$0xff]  ;;  %v3998_v18 = vpack.c.bf16 %v496_v16, %v494_v15  ;;  %v3769_v19 = vld [vmem:[%s6322_s1 + $0x430] sm:$0xff]  ;;  %v499_v20 = vld [vmem:[%s6322_s1 + $0x48] sm:$0xff] }
  0x4c   : > { %4123 = vmatpush1.bf16.msra.mxu0 %v4852_v9  ;;  %v501_v21 = vld [vmem:[%s6322_s1 + $0x58] sm:$0xff]  ;;  %3997 = vmatprep.subr.bf16.mxu1 %v3996_v13  ;;  %v4886_v22 = vpack.c.bf16 %v3769_v19, %v3767_v17  ;;  %v3772_v24 = vld [vmem:[%s6322_s1 + $0x448] sm:$0xff]  ;;  %v498_v26 = vld [vmem:[%s6322_s1 + $0x40] sm:$0xff] }
  0x4d   : > { %4125 = vmatprep.subr.bf16.mxu0 %v4864_v14  ;;  %v4000_v23 = vpack.c.bf16 %v501_v21, %v499_v20  ;;  %v3774_v25 = vld [vmem:[%s6322_s1 + $0x458] sm:$0xff]  ;;  %v500_v28 = vld [vmem:[%s6322_s1 + $0x50] sm:$0xff]  ;;  %v3771_v29 = vld [vmem:[%s6322_s1 + $0x440] sm:$0xff] }
  0x4e   : > { %v4897_v27 = vpack.c.bf16 %v3774_v25, %v3772_v24  ;;  %v3773_v30 = vld [vmem:[%s6322_s1 + $0x450] sm:$0xff]  ;;  %v4002_v31 = vpack.c.bf16 %v500_v28, %v498_v26  ;;  %v503_v32 = vld [vmem:[%s6322_s1 + $0x68] sm:$0xff]  ;;  %v505_v33 = vld [vmem:[%s6322_s1 + $0x78] sm:$0xff] }
  0x4f   : > { %3999 = vmatpush1.bf16.msra.mxu1 %v3998_v18  ;;  %v3776_v34 = vld [vmem:[%s6322_s1 + $0x468] sm:$0xff]  ;;  %v4918_v35 = vpack.c.bf16 %v3773_v30, %v3771_v29  ;;  %v4004_v36 = vpack.c.bf16 %v505_v33, %v503_v32  ;;  %v3778_v37 = vld [vmem:[%s6322_s1 + $0x478] sm:$0xff]  ;;  %v502_v38 = vld [vmem:[%s6322_s1 + $0x60] sm:$0xff] }
  0x50   : > { %4127 = vmatpush1.bf16.msra.mxu0 %v4886_v22  ;;  %4001 = vmatprep.subr.bf16.mxu1 %v4000_v23  ;;  %v504_v39 = vld [vmem:[%s6322_s1 + $0x70] sm:$0xff]  ;;  %v4930_v40 = vpack.c.bf16 %v3778_v37, %v3776_v34  ;;  %v3775_v41 = vld [vmem:[%s6322_s1 + $0x460] sm:$0xff]  ;;  %v507_v43 = vld [vmem:[%s6322_s1 + $0x88] sm:$0xff] }
  0x51   : > { %4129 = vmatprep.subr.bf16.mxu0 %v4897_v27  ;;  %v3777_v42 = vld [vmem:[%s6322_s1 + $0x470] sm:$0xff]  ;;  %v509_v44 = vld [vmem:[%s6322_s1 + $0x98] sm:$0xff]  ;;  %v3780_v45 = vld [vmem:[%s6322_s1 + $0x488] sm:$0xff]  ;;  %v4006_v47 = vpack.c.bf16 %v504_v39, %v502_v38 }
  0x52   : > { %v3782_v46 = vld [vmem:[%s6322_s1 + $0x498] sm:$0xff]  ;;  %v4951_v48 = vpack.c.bf16 %v3777_v42, %v3775_v41  ;;  %v4008_v49 = vpack.c.bf16 %v509_v44, %v507_v43  ;;  %v506_v50 = vld [vmem:[%s6322_s1 + $0x80] sm:$0xff]  ;;  %v508_v51 = vld [vmem:[%s6322_s1 + $0x90] sm:$0xff] }
  0x53   : > { %4003 = vmatpush1.bf16.msra.mxu1 %v4002_v31  ;;  %v3779_v52 = vld [vmem:[%s6322_s1 + $0x480] sm:$0xff]  ;;  %v4963_v53 = vpack.c.bf16 %v3782_v46, %v3780_v45  ;;  %v3781_v54 = vld [vmem:[%s6322_s1 + $0x490] sm:$0xff]  ;;  %v511_v55 = vld [vmem:[%s6322_s1 + $0xa8] sm:$0xff]  ;;  %v4010_v59 = vpack.c.bf16 %v508_v51, %v506_v50 }
  0x54   : > { %4131 = vmatpush1.bf16.msra.mxu0 %v4918_v35  ;;  %4005 = vmatprep.subr.bf16.mxu1 %v4004_v36  ;;  %v513_v56 = vld [vmem:[%s6322_s1 + $0xb8] sm:$0xff]  ;;  %v3784_v57 = vld [vmem:[%s6322_s1 + $0x4a8] sm:$0xff]  ;;  %v4981_v61 = vpack.c.bf16 %v3781_v54, %v3779_v52  ;;  %v510_v63 = vld [vmem:[%s6322_s1 + $0xa0] sm:$0xff] }
  0x55   : > { %4133 = vmatprep.subr.bf16.mxu0 %v4930_v40  ;;  %v3786_v58 = vld [vmem:[%s6322_s1 + $0x4b8] sm:$0xff]  ;;  %v4012_v62 = vpack.c.bf16 %v513_v56, %v511_v55  ;;  %v512_v0 = vld [vmem:[%s6322_s1 + $0xb0] sm:$0xff]  ;;  %v3783_v1 = vld [vmem:[%s6322_s1 + $0x4a0] sm:$0xff] }
  0x56   : > { %v4993_v2 = vpack.c.bf16 %v3786_v58, %v3784_v57  ;;  %v3785_v3 = vld [vmem:[%s6322_s1 + $0x4b0] sm:$0xff]  ;;  %v515_v5 = vld [vmem:[%s6322_s1 + $0xc8] sm:$0xff]  ;;  %v517_v6 = vld [vmem:[%s6322_s1 + $0xd8] sm:$0xff]  ;;  %v4014_v10 = vpack.c.bf16 %v512_v0, %v510_v63 }
  0x57   : > { %4007 = vmatpush1.bf16.msra.mxu1 %v4006_v47  ;;  %v3788_v7 = vld [vmem:[%s6322_s1 + $0x4c8] sm:$0xff]  ;;  %v3790_v8 = vld [vmem:[%s6322_s1 + $0x4d8] sm:$0xff]  ;;  %v5011_v11 = vpack.c.bf16 %v3785_v3, %v3783_v1  ;;  %v4016_v12 = vpack.c.bf16 %v517_v6, %v515_v5  ;;  %v514_v13 = vld [vmem:[%s6322_s1 + $0xc0] sm:$0xff] }
  0x58   : > { %4135 = vmatpush1.bf16.msra.mxu0 %v4951_v48  ;;  %4009 = vmatprep.subr.bf16.mxu1 %v4008_v49  ;;  %v516_v15 = vld [vmem:[%s6322_s1 + $0xd0] sm:$0xff]  ;;  %v3787_v16 = vld [vmem:[%s6322_s1 + $0x4c0] sm:$0xff]  ;;  %v5023_v17 = vpack.c.bf16 %v3790_v8, %v3788_v7  ;;  %v519_v19 = vld [vmem:[%s6322_s1 + $0xe8] sm:$0xff] }
  0x59   : > { %4137 = vmatprep.subr.bf16.mxu0 %v4963_v53  ;;  %v3789_v18 = vld [vmem:[%s6322_s1 + $0x4d0] sm:$0xff]  ;;  %v521_v20 = vld [vmem:[%s6322_s1 + $0xf8] sm:$0xff]  ;;  %v3792_v21 = vld [vmem:[%s6322_s1 + $0x4e8] sm:$0xff]  ;;  %v4018_v24 = vpack.c.bf16 %v516_v15, %v514_v13 }
  0x5a   : > { %v3794_v23 = vld [vmem:[%s6322_s1 + $0x4f8] sm:$0xff]  ;;  %v5041_v25 = vpack.c.bf16 %v3789_v18, %v3787_v16  ;;  %v4020_v26 = vpack.c.bf16 %v521_v20, %v519_v19  ;;  %v518_v28 = vld [vmem:[%s6322_s1 + $0xe0] sm:$0xff]  ;;  %v520_v29 = vld [vmem:[%s6322_s1 + $0xf0] sm:$0xff] }
  0x5b   : > { %4011 = vmatpush1.bf16.msra.mxu1 %v4010_v59  ;;  %v3791_v30 = vld [vmem:[%s6322_s1 + $0x4e0] sm:$0xff]  ;;  %v5054_v31 = vpack.c.bf16 %v3794_v23, %v3792_v21  ;;  %v3793_v32 = vld [vmem:[%s6322_s1 + $0x4f0] sm:$0xff]  ;;  %v3635_v33 = vld [vmem:[%s6322_s1 + $0x108] sm:$0xff]  ;;  %v4022_v38 = vpack.c.bf16 %v520_v29, %v518_v28 }
  0x5c   : > { %4139 = vmatpush1.bf16.msra.mxu0 %v4981_v61  ;;  %4013 = vmatprep.subr.bf16.mxu1 %v4012_v62  ;;  %v3637_v34 = vld [vmem:[%s6322_s1 + $0x118] sm:$0xff]  ;;  %v3812_v36 = vld [vmem:[%s6322_s1 + $0x508] sm:$0xff]  ;;  %v5072_v39 = vpack.c.bf16 %v3793_v32, %v3791_v30  ;;  %v3634_v42 = vld [vmem:[%s6322_s1 + $0x100] sm:$0xff] }
  0x5d   : > { %4141 = vmatprep.subr.bf16.mxu0 %v4993_v2  ;;  %v3814_v37 = vld [vmem:[%s6322_s1 + $0x518] sm:$0xff]  ;;  %v4024_v41 = vpack.c.bf16 %v3637_v34, %v3635_v33  ;;  %v3636_v43 = vld [vmem:[%s6322_s1 + $0x110] sm:$0xff]  ;;  %v3811_v45 = vld [vmem:[%s6322_s1 + $0x500] sm:$0xff] }
  0x5e   : > { %v4152_v44 = vpack.c.bf16 %v3814_v37, %v3812_v36  ;;  %v3813_v46 = vld [vmem:[%s6322_s1 + $0x510] sm:$0xff]  ;;  %v3816_v47 = vld [vmem:[%s6322_s1 + $0x528] sm:$0xff]  ;;  %v3818_v49 = vld [vmem:[%s6322_s1 + $0x538] sm:$0xff]  ;;  %v4026_v51 = vpack.c.bf16 %v3636_v43, %v3634_v42 }
  0x5f   : > { %4015 = vmatpush1.bf16.msra.mxu1 %v4014_v10  ;;  %v474_v50 = vld [vmem:[%s5093_s15] sm:$0xff]  ;;  %v3639_v52 = vld [vmem:[%s6322_s1 + $0x128] sm:$0xff]  ;;  %v3641_v54 = vld [vmem:[%s6322_s1 + $0x138] sm:$0xff]  ;;  %v4154_v56 = vpack.c.bf16 %v3813_v46, %v3811_v45  ;;  %v4156_v57 = vpack.c.bf16 %v3818_v49, %v3816_v47 }
  0x60   : > { %4143 = vmatpush1.bf16.msra.mxu0 %v5011_v11  ;;  %4017 = vmatprep.subr.bf16.mxu1 %v4016_v12  ;;  %v5104_v55 = vld [vmem:[%s5093_s15 + $0x19] sm:$0xff]  ;;  %v4028_v63 = vpack.c.bf16 %v3641_v54, %v3639_v52  ;;  %v475_v5 = vld [vmem:[%s5093_s15 + $0x8] sm:$0xff]  ;;  %v5166_v29 = vld [vmem:[%s5093_s15 + $0x31] sm:$0xff] }
  0x61   : > { %4145 = vmatprep.subr.bf16.mxu0 %v5023_v17  ;;  %v3815_v58 = vld [vmem:[%s6322_s1 + $0x520] sm:$0xff]  ;;  %v3817_v59 = vld [vmem:[%s6322_s1 + $0x530] sm:$0xff]  ;;  %v3820_v62 = vld [vmem:[%s6322_s1 + $0x548] sm:$0xff] }
  0x62   : > { %v3822_v0 = vld [vmem:[%s6322_s1 + $0x558] sm:$0xff]  ;;  %v3638_v1 = vld [vmem:[%s6322_s1 + $0x120] sm:$0xff]  ;;  %v3640_v3 = vld [vmem:[%s6322_s1 + $0x130] sm:$0xff]  ;;  %v4158_v10 = vpack.c.bf16 %v3817_v59, %v3815_v58 }
  0x63   : > { %4019 = vmatpush1.bf16.msra.mxu1 %v4018_v24  ;;  %v3643_v6 = vld [vmem:[%s6322_s1 + $0x148] sm:$0xff]  ;;  %v3645_v7 = vld [vmem:[%s6322_s1 + $0x158] sm:$0xff]  ;;  %v4160_v12 = vpack.c.bf16 %v3822_v0, %v3820_v62  ;;  %v4030_v13 = vpack.c.bf16 %v3640_v3, %v3638_v1  ;;  %v3819_v15 = vld [vmem:[%s6322_s1 + $0x540] sm:$0xff] }
  0x64   : > { %4147 = vmatpush1.bf16.msra.mxu0 %v5041_v25  ;;  %4021 = vmatprep.subr.bf16.mxu1 %v4020_v26  ;;  %v5134_v8 = vld [vmem:[%s5093_s15 + $0x21] sm:$0xff]  ;;  %v4032_v20 = vpack.c.bf16 %v3645_v7, %v3643_v6  ;;  %v476_v24 = vld [vmem:[%s5093_s15 + $0x18] sm:$0xff]  ;;  %v5230_v3 = vld [vmem:[%s5093_s15 + $0x49] sm:$0xff] }
  0x65   : > { %4149 = vmatprep.subr.bf16.mxu0 %v5054_v31  ;;  %v3821_v16 = vld [vmem:[%s6322_s1 + $0x550] sm:$0xff]  ;;  %v3824_v18 = vld [vmem:[%s6322_s1 + $0x568] sm:$0xff]  ;;  %v3826_v19 = vld [vmem:[%s6322_s1 + $0x578] sm:$0xff] }
  0x66   : > { %v3642_v21 = vld [vmem:[%s6322_s1 + $0x140] sm:$0xff]  ;;  %v3644_v23 = vld [vmem:[%s6322_s1 + $0x150] sm:$0xff]  ;;  %v3647_v26 = vld [vmem:[%s6322_s1 + $0x168] sm:$0xff]  ;;  %v4162_v30 = vpack.c.bf16 %v3821_v16, %v3819_v15  ;;  %v4164_v32 = vpack.c.bf16 %v3826_v19, %v3824_v18 }
  0x67   : > { %4023 = vmatpush1.bf16.msra.mxu1 %v4022_v38  ;;  %v3649_v28 = vld [vmem:[%s6322_s1 + $0x178] sm:$0xff]  ;;  %v3823_v33 = vld [vmem:[%s6322_s1 + $0x560] sm:$0xff]  ;;  %v3825_v34 = vld [vmem:[%s6322_s1 + $0x570] sm:$0xff]  ;;  %v4034_v37 = vpack.c.bf16 %v3644_v23, %v3642_v21 }
  0x68   : > { %4151 = vmatpush1.bf16.msra.mxu0 %v5072_v39  ;;  %4025 = vmatprep.subr.bf16.mxu1 %v4024_v41  ;;  %v3828_v36 = vld [vmem:[%s6322_s1 + $0x588] sm:$0xff]  ;;  %v3830_v38 = vld [vmem:[%s6322_s1 + $0x598] sm:$0xff]  ;;  %v4036_v41 = vpack.c.bf16 %v3649_v28, %v3647_v26  ;;  %v3646_v42 = vld [vmem:[%s6322_s1 + $0x160] sm:$0xff]  ;;  %v4166_v49 = vpack.c.bf16 %v3825_v34, %v3823_v33 }
  0x69   : > { %4153 = vmatprep.subr.bf16.mxu0 %v4152_v44  ;;  %v3648_v43 = vld [vmem:[%s6322_s1 + $0x170] sm:$0xff]  ;;  %v3651_v45 = vld [vmem:[%s6322_s1 + $0x188] sm:$0xff]  ;;  %v3653_v46 = vld [vmem:[%s6322_s1 + $0x198] sm:$0xff] }
  0x6a   : > { %587 = vmatmul.mubr.f32.vlgmr.msra.gmra.mrb[0].mxu1 %v474_v50  ;;  %v477_v44 = vld [vmem:[%s5093_s15 + $0x20] sm:$0xff]  ;;  %v4168_v50 = vpack.c.bf16 %v3830_v38, %v3828_v36  ;;  %v3832_v54 = vld [vmem:[%s6322_s1 + $0x5a8] sm:$0xff]  ;;  %v4040_v58 = vpack.c.bf16 %v3653_v46, %v3651_v45  ;;  %v3657_v1 = vld [vmem:[%s6322_s1 + $0x1b8] sm:$0xff] }
  0x6b   : > { %1750 = vmatmul.mubr.f32.vlgmr.msra.gmra.mrb[0].mxu0 %v5104_v55  ;;  %4027 = vmatpush1.bf16.msra.mxu1 %v4026_v51  ;;  %v5197_v47 = vld [vmem:[%s5093_s15 + $0x39] sm:$0xff]  ;;  %v5298_v45 = vld [vmem:[%s5093_s15 + $0x61] sm:$0xff] }
  0x6c   : > { %4155 = vmatpush1.bf16.msra.mxu0 %v4154_v56  ;;  %592 = vmatprep.mubr.f32.mxu1 %v4635_v60  ;;  %v3827_v51 = vld [vmem:[%s6322_s1 + $0x580] sm:$0xff]  ;;  %v3829_v52 = vld [vmem:[%s6322_s1 + $0x590] sm:$0xff]  ;;  %v4038_v56 = vpack.c.bf16 %v3648_v43, %v3646_v42  ;;  %v3655_v0 = vld [vmem:[%s6322_s1 + $0x1a8] sm:$0xff] }
  0x6d   : > { %1755 = vmatprep.mubr.f32.mxu0 %v4635_v60  ;;  %4157 = vmatprep.subr.bf16.mxu0 %v4156_v57  ;;  %v3834_v57 = vld [vmem:[%s6322_s1 + $0x5b8] sm:$0xff]  ;;  %v3650_v59 = vld [vmem:[%s6322_s1 + $0x180] sm:$0xff]  ;;  %v3652_v62 = vld [vmem:[%s6322_s1 + $0x190] sm:$0xff]  ;;  %v4044_v16 = vpack.c.bf16 %v3657_v1, %v3655_v0 }
  0x6e   : > { %593 = vmatmul.mubr.f32.gmra.mrb[2].mxu1 %v475_v5  ;;  %4029 = vmatprep.subr.bf16.mxu1 %v4028_v63  ;;  %v5220_v63 = vld [vmem:[%s5093_s15 + $0x30] sm:$0xff]  ;;  %v4170_v5 = vpack.c.bf16 %v3829_v52, %v3827_v51  ;;  %v4172_v6 = vpack.c.bf16 %v3834_v57, %v3832_v54  ;;  %v3838_v15 = vld [vmem:[%s6322_s1 + $0x5d8] sm:$0xff]  ;;  %v3659_v21 = vld [vmem:[%s6322_s1 + $0x1c8] sm:$0xff] }
  0x6f   : > { %1756 = vmatmul.mubr.f32.gmra.mrb[2].mxu0 %v5134_v8  ;;  %598 = vmatprep.mubr.f32.mxu1 %v4635_v60  ;;  %v3831_v7 = vld [vmem:[%s6322_s1 + $0x5a0] sm:$0xff]  ;;  %v3656_v19 = vld [vmem:[%s6322_s1 + $0x1b0] sm:$0xff]  ;;  %v3661_v23 = vld [vmem:[%s6322_s1 + $0x1d8] sm:$0xff] }
  0x70   : > { %4159 = vmatpush1.bf16.msra.mxu0 %v4158_v10  ;;  %1761 = vmatprep.mubr.f32.mxu0 %v4635_v60  ;;  %v3833_v10 = vld [vmem:[%s6322_s1 + $0x5b0] sm:$0xff]  ;;  %v3654_v18 = vld [vmem:[%s6322_s1 + $0x1a0] sm:$0xff]  ;;  %v3840_v33 = vld [vmem:[%s6322_s1 + $0x5e8] sm:$0xff] }
  0x71   : > { %4161 = vmatprep.subr.bf16.mxu0 %v4160_v12  ;;  %4031 = vmatpush1.bf16.msra.mxu1 %v4030_v13  ;;  %v3836_v12 = vld [vmem:[%s6322_s1 + $0x5c8] sm:$0xff]  ;;  %v4042_v13 = vpack.c.bf16 %v3652_v62, %v3650_v59  ;;  %v4174_v26 = vpack.c.bf16 %v3833_v10, %v3831_v7  ;;  %v4046_v34 = vpack.c.bf16 %v3656_v19, %v3654_v18  ;;  %v3842_v36 = vld [vmem:[%s6322_s1 + $0x5f8] sm:$0xff]  ;;  %v3658_v38 = vld [vmem:[%s6322_s1 + $0x1c0] sm:$0xff] }
  0x72   : > { %599 = vmatmul.mubr.f32.gmra.mrb[4].mxu1 %v476_v24  ;;  %4033 = vmatprep.subr.bf16.mxu1 %v4032_v20  ;;  %v5254_v20 = vld [vmem:[%s5093_s15 + $0x38] sm:$0xff]  ;;  %v4176_v28 = vpack.c.bf16 %v3838_v15, %v3836_v12  ;;  %v5288_v42 = vld [vmem:[%s5093_s15 + $0x48] sm:$0xff]  ;;  %v3841_v51 = vld [vmem:[%s6322_s1 + $0x5f0] sm:$0xff] }
  0x73   : > { %1762 = vmatmul.mubr.f32.gmra.mrb[4].mxu0 %v5166_v29  ;;  %604 = vmatprep.mubr.f32.mxu1 %v4635_v60  ;;  %v5264_v24 = vld [vmem:[%s5093_s15 + $0x51] sm:$0xff]  ;;  %v5350_v19 = vld [vmem:[%s5093_s15 + $0x60] sm:$0xff] }
  0x74   : > { %4163 = vmatpush1.bf16.msra.mxu0 %v4162_v30  ;;  %1767 = vmatprep.mubr.f32.mxu0 %v4635_v60  ;;  %v3835_v30 = vld [vmem:[%s6322_s1 + $0x5c0] sm:$0xff]  ;;  %v3663_v43 = vld [vmem:[%s6322_s1 + $0x1e8] sm:$0xff]  ;;  %v3664_v59 = vld [vmem:[%s6322_s1 + $0x1f0] sm:$0xff] }
  0x75   : > { %4165 = vmatprep.subr.bf16.mxu0 %v4164_v32  ;;  %4035 = vmatpush1.bf16.msra.mxu1 %v4034_v37  ;;  %v3837_v32 = vld [vmem:[%s6322_s1 + $0x5d0] sm:$0xff]  ;;  %v4048_v37 = vpack.c.bf16 %v3661_v23, %v3659_v21  ;;  %v3861_v52 = vld [vmem:[%s6322_s1 + $0x608] sm:$0xff]  ;;  %v3669_v1 = vld [vmem:[%s6322_s1 + $0x218] sm:$0xff] }
  0x76   : > { %605 = vmatmul.mubr.f32.gmra.mrb[6].mxu1 %v477_v44  ;;  %4037 = vmatprep.subr.bf16.mxu1 %v4036_v41  ;;  %v3660_v41 = vld [vmem:[%s6322_s1 + $0x1d0] sm:$0xff]  ;;  %v3665_v44 = vld [vmem:[%s6322_s1 + $0x1f8] sm:$0xff]  ;;  %v4178_v46 = vpack.c.bf16 %v3837_v32, %v3835_v30  ;;  %v3667_v0 = vld [vmem:[%s6322_s1 + $0x208] sm:$0xff] }
  0x77   : > { %1768 = vmatmul.mubr.f32.gmra.mrb[6].mxu0 %v5197_v47  ;;  %610 = vmatprep.mubr.f32.mxu1 %v4635_v60  ;;  %v4050_v54 = vpack.c.bf16 %v3660_v41, %v3658_v38  ;;  %v4052_v57 = vpack.c.bf16 %v3665_v44, %v3663_v43  ;;  %v5322_v62 = vld [vmem:[%s5093_s15 + $0x50] sm:$0xff]  ;;  %v3865_v15 = vld [vmem:[%s6322_s1 + $0x628] sm:$0xff]  ;;  %v4056_v18 = vpack.c.bf16 %v3669_v1, %v3667_v0 }
  0x78   : > { %4167 = vmatpush1.bf16.msra.mxu0 %v4166_v49  ;;  %1773 = vmatprep.mubr.f32.mxu0 %v4635_v60  ;;  %v4180_v49 = vpack.c.bf16 %v3842_v36, %v3840_v33  ;;  %v3860_v10 = vld [vmem:[%s6322_s1 + $0x600] sm:$0xff]  ;;  %v3862_v12 = vld [vmem:[%s6322_s1 + $0x610] sm:$0xff]  ;;  %v3869_v32 = vld [vmem:[%s6322_s1 + $0x648] sm:$0xff] }
  0x79   : > { %4169 = vmatprep.subr.bf16.mxu0 %v4168_v50  ;;  %4039 = vmatpush1.bf16.msra.mxu1 %v4038_v56  ;;  %v3839_v50 = vld [vmem:[%s6322_s1 + $0x5e0] sm:$0xff]  ;;  %v3863_v56 = vld [vmem:[%s6322_s1 + $0x618] sm:$0xff]  ;;  %v4186_v23 = vpack.c.bf16 %v3862_v12, %v3860_v10  ;;  %v3866_v30 = vld [vmem:[%s6322_s1 + $0x630] sm:$0xff] }
  0x7a   : > { %611 = vmatmul.mubr.f32.gmra.mrb[8].mxu1 %v5220_v63  ;;  %4041 = vmatprep.subr.bf16.mxu1 %v4040_v58  ;;  %v3662_v58 = vld [vmem:[%s6322_s1 + $0x1e0] sm:$0xff]  ;;  %v4184_v7 = vpack.c.bf16 %v3863_v56, %v3861_v52  ;;  %v3871_v33 = vld [vmem:[%s6322_s1 + $0x658] sm:$0xff]  ;;  %v3870_v43 = vld [vmem:[%s6322_s1 + $0x650] sm:$0xff] }
  0x7b   : > { %1774 = vmatmul.mubr.f32.gmra.mrb[8].mxu0 %v5230_v3  ;;  %616 = vmatprep.mubr.f32.mxu1 %v4635_v60  ;;  %v5354_v21 = vld [vmem:[%s5093_s15 + $0x1a] sm:$0xff]  ;;  %v5376_v36 = vld [vmem:[%s5093_s15 + $0x22] sm:$0xff]  ;;  %v4192_v38 = vpack.c.bf16 %v3871_v33, %v3869_v32 }
  0x7c   : > { %4171 = vmatpush1.bf16.msra.mxu0 %v4170_v5  ;;  %1779 = vmatprep.mubr.f32.mxu0 %v4635_v60  ;;  %v5332_v5 = vld [vmem:[%s5093_s15 + $0x69] sm:$0xff]  ;;  %v5420_v0 = vld [vmem:[%s5093_s15 + $0x3a] sm:$0xff] }
  0x7d   : > { %4173 = vmatprep.subr.bf16.mxu0 %v4172_v6  ;;  %4043 = vmatpush1.bf16.msra.mxu1 %v4042_v13  ;;  %v4182_v6 = vpack.c.bf16 %v3841_v51, %v3839_v50  ;;  %v4054_v13 = vpack.c.bf16 %v3664_v59, %v3662_v58  ;;  %v3868_v41 = vld [vmem:[%s6322_s1 + $0x640] sm:$0xff]  ;;  %v3873_v44 = vld [vmem:[%s6322_s1 + $0x668] sm:$0xff]  ;;  %v3874_v56 = vld [vmem:[%s6322_s1 + $0x670] sm:$0xff] }
  0x7e   : > { %617 = vmatmul.mubr.f32.gmra.mrb[10].mxu1 %v5254_v20  ;;  %4045 = vmatprep.subr.bf16.mxu1 %v4044_v16  ;;  %v3867_v16 = vld [vmem:[%s6322_s1 + $0x638] sm:$0xff]  ;;  %v4194_v51 = vpack.c.bf16 %v3870_v43, %v3868_v41  ;;  %v5416_v59 = vld [vmem:[%s5093_s15 + $0x80] sm:$0xff]  ;;  %v3881_v12 = vld [vmem:[%s6322_s1 + $0x6a8] sm:$0xff] }
  0x7f   : > { %1780 = vmatmul.mubr.f32.gmra.mrb[10].mxu0 %v5264_v24  ;;  %622 = vmatprep.mubr.f32.mxu1 %v4635_v60  ;;  %v5398_v50 = vld [vmem:[%s5093_s15 + $0x32] sm:$0xff] }
  0x80   : > { %4175 = vmatpush1.bf16.msra.mxu0 %v4174_v26  ;;  %1785 = vmatprep.mubr.f32.mxu0 %v4635_v60  ;;  %v4188_v26 = vpack.c.bf16 %v3867_v16, %v3865_v15  ;;  %v3879_v58 = vld [vmem:[%s6322_s1 + $0x698] sm:$0xff]  ;;  %v3878_v10 = vld [vmem:[%s6322_s1 + $0x690] sm:$0xff]  ;;  %v3884_v43 = vld [vmem:[%s6322_s1 + $0x6c0] sm:$0xff] }
  0x81   : > { %4177 = vmatprep.subr.bf16.mxu0 %v4176_v28  ;;  %4047 = vmatpush1.bf16.msra.mxu1 %v4046_v34  ;;  %v3864_v28 = vld [vmem:[%s6322_s1 + $0x620] sm:$0xff]  ;;  %v5372_v34 = vld [vmem:[%s5093_s15 + $0x68] sm:$0xff]  ;;  %v5460_v33 = vld [vmem:[%s5093_s15 + $0x98] sm:$0xff] }
  0x82   : > { %623 = vmatmul.mubr.f32.gmra.mrb[12].mxu1 %v5288_v42  ;;  %4049 = vmatprep.subr.bf16.mxu1 %v4048_v37  ;;  %v4190_v37 = vpack.c.bf16 %v3866_v30, %v3864_v28  ;;  %v5438_v15 = vld [vmem:[%s5093_s15 + $0x90] sm:$0xff]  ;;  %v3885_v30 = vld [vmem:[%s6322_s1 + $0x6c8] sm:$0xff]  ;;  %v3887_v32 = vld [vmem:[%s6322_s1 + $0x6d8] sm:$0xff] }
  0x83   : > { %1786 = vmatmul.mubr.f32.gmra.mrb[12].mxu0 %v5298_v45  ;;  %628 = vmatprep.mubr.f32.mxu1 %v4635_v60  ;;  %v5442_v16 = vld [vmem:[%s5093_s15 + $0x4a] sm:$0xff]  ;;  %v4208_v41 = vpack.c.bf16 %v3887_v32, %v3885_v30  ;;  %v715_v32 = vld [vmem:[%s5093_s15 + $0x1] sm:$0xff] }
  0x84   : > { %4179 = vmatpush1.bf16.msra.mxu0 %v4178_v46  ;;  %1791 = vmatprep.mubr.f32.mxu0 %v4635_v60  ;;  %v3875_v46 = vld [vmem:[%s6322_s1 + $0x678] sm:$0xff]  ;;  %v3882_v28 = vld [vmem:[%s6322_s1 + $0x6b0] sm:$0xff] }
  0x85   : > { %4181 = vmatprep.subr.bf16.mxu0 %v4180_v49  ;;  %4051 = vmatpush1.bf16.msra.mxu1 %v4050_v54  ;;  %v5394_v49 = vld [vmem:[%s5093_s15 + $0x78] sm:$0xff]  ;;  %v4196_v52 = vpack.c.bf16 %v3875_v46, %v3873_v44  ;;  %v3872_v54 = vld [vmem:[%s6322_s1 + $0x660] sm:$0xff]  ;;  %v3886_v44 = vld [vmem:[%s6322_s1 + $0x6d0] sm:$0xff] }
  0x86   : > { %629 = vmatmul.mubr.f32.gmra.mrb[14].mxu1 %v5322_v62  ;;  %4053 = vmatprep.subr.bf16.mxu1 %v4052_v57  ;;  %v3877_v57 = vld [vmem:[%s6322_s1 + $0x688] sm:$0xff]  ;;  %v4198_v1 = vpack.c.bf16 %v3874_v56, %v3872_v54  ;;  %v4210_v56 = vpack.c.bf16 %v3886_v44, %v3884_v43  ;;  %v3673_v30 = vld [vmem:[%s6322_s1 + $0x238] sm:$0xff]  ;;  %v3670_v44 = vld [vmem:[%s6322_s1 + $0x220] sm:$0xff] }
  0x87   : > { %1792 = vmatmul.mubr.f32.gmra.mrb[14].mxu0 %v5332_v5  ;;  %634 = vmatprep.mubr.f32.mxu1 %v4635_v60  ;;  %v3889_v46 = vld [vmem:[%s6322_s1 + $0x6e8] sm:$0xff] }
  0x88   : > { %4183 = vmatpush1.bf16.msra.mxu0 %v4182_v6  ;;  %2055 = vmatprep.mubr.f32.mxu0 %v4635_v60  ;;  %v4200_v6 = vpack.c.bf16 %v3879_v58, %v3877_v57  ;;  %v5486_v54 = vld [vmem:[%s5093_s15 + $0x62] sm:$0xff] }
  0x89   : > { %4185 = vmatprep.subr.bf16.mxu0 %v4184_v7  ;;  %4055 = vmatpush1.bf16.msra.mxu1 %v4054_v13  ;;  %v3876_v7 = vld [vmem:[%s6322_s1 + $0x680] sm:$0xff]  ;;  %v3883_v13 = vld [vmem:[%s6322_s1 + $0x6b8] sm:$0xff] }
  0x8a   : > { %635 = vmatmul.mubr.f32.gmra.mrb[16].mxu1 %v5350_v19  ;;  %4057 = vmatprep.subr.bf16.mxu1 %v4056_v18  ;;  %v4202_v18 = vpack.c.bf16 %v3878_v10, %v3876_v7  ;;  %v3888_v58 = vld [vmem:[%s6322_s1 + $0x6e0] sm:$0xff]  ;;  %v3911_v7 = vld [vmem:[%s6322_s1 + $0x718] sm:$0xff] }
  0x8b   : > { %2056 = vmatmul.mubr.f32.vlgmr.msra.gmra.mrb[0].mxu0 %v5354_v21  ;;  %640 = vmatprep.mubr.f32.mxu1 %v4635_v60  ;;  %v5504_v10 = vld [vmem:[%s5093_s15 + $0xb0] sm:$0xff] }
  0x8c   : > { %4187 = vmatpush1.bf16.msra.mxu0 %v4186_v23  ;;  %2061 = vmatprep.mubr.f32.mxu0 %v4635_v60  ;;  %v4204_v23 = vpack.c.bf16 %v3883_v13, %v3881_v12  ;;  %v5508_v12 = vld [vmem:[%s5093_s15 + $0x6a] sm:$0xff] }
  0x8d   : > { %4189 = vmatprep.subr.bf16.mxu0 %v4188_v26  ;;  %v3880_v26 = vld [vmem:[%s6322_s1 + $0x6a0] sm:$0xff] }
  0x8e   : > { %641 = vmatmul.mubr.f32.gmra.mrb[18].mxu1 %v5372_v34  ;;  %v3666_v13 = vld [vmem:[%s6322_s1 + $0x200] sm:$0xff] }
  0x8f   : > { %2062 = vmatmul.mubr.f32.gmra.mrb[2].mxu0 %v5376_v36  ;;  %646 = vmatprep.mubr.f32.mxu1 %v4635_v60 }
  0x90   : > { %2067 = vmatprep.mubr.f32.mxu0 %v4635_v60  ;;  %4191 = vmatpush1.bf16.msra.mxu0 %v4190_v37  ;;  %v5464_v37 = vld [vmem:[%s5093_s15 + $0x52] sm:$0xff] }
  0x91   : > { %4193 = vmatprep.subr.bf16.mxu0 %v4192_v38  ;;  %v4206_v38 = vpack.c.bf16 %v3882_v28, %v3880_v26  ;;  %v3671_v28 = vld [vmem:[%s6322_s1 + $0x228] sm:$0xff] }
  0x92   : > { %647 = vmatmul.mubr.f32.gmra.mrb[20].mxu1 %v5394_v49  ;;  %v4060_v43 = vpack.c.bf16 %v3673_v30, %v3671_v28 }
  0x93   : > { %2068 = vmatmul.mubr.f32.gmra.mrb[4].mxu0 %v5398_v50  ;;  %652 = vmatprep.mubr.f32.mxu1 %v4635_v60 }
  0x94   : > { %2073 = vmatprep.mubr.f32.mxu0 %v4635_v60  ;;  %4195 = vmatpush1.bf16.msra.mxu0 %v4194_v51  ;;  %v3891_v51 = vld [vmem:[%s6322_s1 + $0x6f8] sm:$0xff] }
  0x95   : > { %4197 = vmatprep.subr.bf16.mxu0 %v4196_v52  ;;  %v5482_v52 = vld [vmem:[%s5093_s15 + $0xa8] sm:$0xff]  ;;  %v4212_v57 = vpack.c.bf16 %v3891_v51, %v3889_v46  ;;  %v3672_v46 = vld [vmem:[%s6322_s1 + $0x230] sm:$0xff] }
  0x96   : > { %653 = vmatmul.mubr.f32.gmra.mrb[22].mxu1 %v5416_v59  ;;  %v3675_v51 = vld [vmem:[%s6322_s1 + $0x248] sm:$0xff] }
  0x97   : > { %2074 = vmatmul.mubr.f32.gmra.mrb[6].mxu0 %v5420_v0  ;;  %658 = vmatprep.mubr.f32.mxu1 %v4635_v60 }
  0x98   : > { %2079 = vmatprep.mubr.f32.mxu0 %v4635_v60  ;;  %4199 = vmatpush1.bf16.msra.mxu0 %v4198_v1  ;;  %v3890_v1 = vld [vmem:[%s6322_s1 + $0x6f0] sm:$0xff] }
  0x99   : > { %4201 = vmatprep.subr.bf16.mxu0 %v4200_v6  ;;  %v3909_v6 = vld [vmem:[%s6322_s1 + $0x708] sm:$0xff] }
  0x9a   : > { %659 = vmatmul.mubr.f32.gmra.mrb[24].mxu1 %v5438_v15  ;;  %v4216_v26 = vpack.c.bf16 %v3911_v7, %v3909_v6  ;;  %v3674_v7 = vld [vmem:[%s6322_s1 + $0x240] sm:$0xff] }
  0x9b   : > { %2080 = vmatmul.mubr.f32.gmra.mrb[8].mxu0 %v5442_v16  ;;  %664 = vmatprep.mubr.f32.mxu1 %v4635_v60 }
  0x9c   : > { %2085 = vmatprep.mubr.f32.mxu0 %v4635_v60  ;;  %4203 = vmatpush1.bf16.msra.mxu0 %v4202_v18  ;;  %v3668_v18 = vld [vmem:[%s6322_s1 + $0x210] sm:$0xff] }
  0x9d   : > { %4205 = vmatprep.subr.bf16.mxu0 %v4204_v23  ;;  %v4214_v23 = vpack.c.bf16 %v3890_v1, %v3888_v58  ;;  %v5547_v58 = vld [vmem:[%s5093_s15 + $0x82] sm:$0xff]  ;;  %v4062_v1 = vpack.c.bf16 %v3672_v46, %v3670_v44  ;;  %v5584_v46 = vld [vmem:[%s5093_s15 + $0x9a] sm:$0xff] }
  0x9e   : > { %665 = vmatmul.mubr.f32.gmra.mrb[26].mxu1 %v5460_v33  ;;  %v3685_v44 = vld [vmem:[%s6322_s1 + $0x298] sm:$0xff] }
  0x9f   : > { %2086 = vmatmul.mubr.f32.gmra.mrb[10].mxu0 %v5464_v37  ;;  %670 = vmatprep.mubr.f32.mxu1 %v4635_v60 }
  0xa0   : > { %2091 = vmatprep.mubr.f32.mxu0 %v4635_v60  ;;  %4207 = vmatpush1.bf16.msra.mxu0 %v4206_v38  ;;  %v4058_v38 = vpack.c.bf16 %v3668_v18, %v3666_v13  ;;  %v3676_v13 = vld [vmem:[%s6322_s1 + $0x250] sm:$0xff]  ;;  %v3679_v18 = vld [vmem:[%s6322_s1 + $0x268] sm:$0xff] }
  0xa1   : > { %4209 = vmatprep.subr.bf16.mxu0 %v4208_v41  ;;  %v5528_v41 = vld [vmem:[%s5093_s15 + $0x7a] sm:$0xff]  ;;  %v4066_v28 = vpack.c.bf16 %v3676_v13, %v3674_v7  ;;  %v5603_v7 = vld [vmem:[%s5093_s15 + $0xaa] sm:$0xff] }
  0xa2   : > { %671 = vmatmul.mubr.f32.gmra.mrb[28].mxu1 %v5482_v52 }
  0xa3   : > { %2092 = vmatmul.mubr.f32.gmra.mrb[12].mxu0 %v5486_v54  ;;  %676 = vmatprep.mubr.f32.mxu1 %v4635_v60 }
  0xa4   : > { %2097 = vmatprep.mubr.f32.mxu0 %v4635_v60  ;;  %4211 = vmatpush1.bf16.msra.mxu0 %v4210_v56  ;;  %v3677_v56 = vld [vmem:[%s6322_s1 + $0x258] sm:$0xff] }
  0xa5   : > { %4213 = vmatprep.subr.bf16.mxu0 %v4212_v57  ;;  %v716_v57 = vld [vmem:[%s5093_s15 + $0x9] sm:$0xff]  ;;  %v4064_v6 = vpack.c.bf16 %v3677_v56, %v3675_v51 }
  0xa6   : > { %677 = vmatmul.mubr.f32.gmra.mrb[30].mxu1 %v5504_v10  ;;  %v3682_v56 = vld [vmem:[%s6322_s1 + $0x280] sm:$0xff] }
  0xa7   : > { %2098 = vmatmul.mubr.f32.gmra.mrb[14].mxu0 %v5508_v12  ;;  %828 = vmatprep.mubr.f32.mxu1 %v4635_v60 }
  0xa8   : > { %2103 = vmatprep.mubr.f32.mxu0 %v4635_v60  ;;  %4215 = vmatpush1.bf16.msra.mxu0 %v4214_v23  ;;  %v3681_v23 = vld [vmem:[%s6322_s1 + $0x278] sm:$0xff] }
  0xa9   : > { %4217 = vmatprep.subr.bf16.mxu0 %v4216_v26  ;;  %v5565_v26 = vld [vmem:[%s5093_s15 + $0x92] sm:$0xff]  ;;  %v4068_v30 = vpack.c.bf16 %v3681_v23, %v3679_v18 }
  0xaa   : > { %829 = vmatmul.mubr.f32.vlgmr.msra.gmra.mrb[0].mxu1 %v715_v32  ;;  %v3678_v32 = vld [vmem:[%s6322_s1 + $0x260] sm:$0xff]  ;;  %v3688_v23 = vld [vmem:[%s6322_s1 + $0x2b0] sm:$0xff] }
  0xab   : > { %2104 = vmatmul.mubr.f32.gmra.mrb[16].mxu0 %v5528_v41  ;;  %4059 = vmatpush1.bf16.msra.mxu1 %v4058_v38  ;;  %v3680_v38 = vld [vmem:[%s6322_s1 + $0x270] sm:$0xff]  ;;  %v3686_v18 = vld [vmem:[%s6322_s1 + $0x2a0] sm:$0xff] }
  0xac   : > { %834 = vmatprep.mubr.f32.mxu1 %v4635_v60  ;;  %2109 = vmatprep.mubr.f32.mxu0 %v4635_v60  ;;  %v4070_v51 = vpack.c.bf16 %v3680_v38, %v3678_v32  ;;  %v5622_v32 = vld [vmem:[%s5093_s15 + $0xb2] sm:$0xff]  ;;  %v4078_v38 = vpack.c.bf16 %v3688_v23, %v3686_v18  ;;  %v3810_v18 = vld [vmem:[%s5093_s15 + $0xca] sm:$0xff] }
  0xad   : > { %4061 = vmatprep.subr.bf16.mxu1 %v4060_v43  ;;  %v3683_v43 = vld [vmem:[%s6322_s1 + $0x288] sm:$0xff] }
  0xae   : > { %835 = vmatmul.mubr.f32.gmra.mrb[2].mxu1 %v716_v57  ;;  %v3684_v57 = vld [vmem:[%s6322_s1 + $0x290] sm:$0xff] }
  0xaf   : > { %2110 = vmatmul.mubr.f32.gmra.mrb[18].mxu0 %v5547_v58  ;;  %840 = vmatprep.mubr.f32.mxu1 %v4635_v60  ;;  %v4074_v13 = vpack.c.bf16 %v3684_v57, %v3682_v56  ;;  %v3809_v56 = vld [vmem:[%s5093_s15 + $0xc2] sm:$0xff] }
  0xb0   : > { %2115 = vmatprep.mubr.f32.mxu0 %v4635_v60  ;;  %4063 = vmatpush1.bf16.msra.mxu1 %v4062_v1  ;;  %v3687_v1 = vld [vmem:[%s6322_s1 + $0x2a8] sm:$0xff] }
  0xb1   : > { %4065 = vmatprep.subr.bf16.mxu1 %v4064_v6  ;;  %v3689_v6 = vld [vmem:[%s6322_s1 + $0x2b8] sm:$0xff] }
  0xb2   : > { %841 = vmatmul.mubr.f32.gmra.mrb[4].mxu1 %v5104_v55  ;;  %v4072_v55 = vpack.c.bf16 %v3685_v44, %v3683_v43  ;;  %v3690_v43 = vld [vmem:[%s6322_s1 + $0x2c0] sm:$0xff]  ;;  %v3692_v44 = vld [vmem:[%s6322_s1 + $0x2d0] sm:$0xff] }
  0xb3   : > { %2116 = vmatmul.mubr.f32.gmra.mrb[20].mxu0 %v5565_v26  ;;  %846 = vmatprep.mubr.f32.mxu1 %v4635_v60  ;;  %v4082_v57 = vpack.c.bf16 %v3692_v44, %v3690_v43 }
  0xb4   : > { %2121 = vmatprep.mubr.f32.mxu0 %v4635_v60  ;;  %4067 = vmatpush1.bf16.msra.mxu1 %v4066_v28  ;;  %v3691_v28 = vld [vmem:[%s6322_s1 + $0x2c8] sm:$0xff] }
  0xb5   : > { %4069 = vmatprep.subr.bf16.mxu1 %v4068_v30  ;;  %v3693_v30 = vld [vmem:[%s6322_s1 + $0x2d8] sm:$0xff] }
  0xb6   : > { %847 = vmatmul.mubr.f32.gmra.mrb[6].mxu1 %v5134_v8  ;;  %v4076_v8 = vpack.c.bf16 %v3689_v6, %v3687_v1  ;;  %v3694_v1 = vld [vmem:[%s6322_s1 + $0x2e0] sm:$0xff]  ;;  %v3696_v6 = vld [vmem:[%s6322_s1 + $0x2f0] sm:$0xff] }
  0xb7   : > { %2122 = vmatmul.mubr.f32.gmra.mrb[22].mxu0 %v5584_v46  ;;  %852 = vmatprep.mubr.f32.mxu1 %v4635_v60  ;;  %v4086_v23 = vpack.c.bf16 %v3696_v6, %v3694_v1  ;;  %v3918_v1 = vld [vmem:[%s6322_s1 + $0x750] sm:$0xff]  ;;  %v3923_v6 = vld [vmem:[%s6322_s1 + $0x778] sm:$0xff] }
  0xb8   : > { %2127 = vmatprep.mubr.f32.mxu0 %v4635_v60  ;;  %4071 = vmatpush1.bf16.msra.mxu1 %v4070_v51  ;;  %v3695_v51 = vld [vmem:[%s6322_s1 + $0x2e8] sm:$0xff] }
  0xb9   : > { %4073 = vmatprep.subr.bf16.mxu1 %v4072_v55  ;;  %v3697_v55 = vld [vmem:[%s6322_s1 + $0x2f8] sm:$0xff] }
  0xba   : > { %853 = vmatmul.mubr.f32.gmra.mrb[8].mxu1 %v5166_v29  ;;  %v4080_v29 = vpack.c.bf16 %v3693_v30, %v3691_v28  ;;  %v3910_v28 = vld [vmem:[%s6322_s1 + $0x710] sm:$0xff] }
  0xbb   : > { %2128 = vmatmul.mubr.f32.gmra.mrb[24].mxu0 %v5603_v7  ;;  %858 = vmatprep.mubr.f32.mxu1 %v4635_v60 }
  0xbc   : > { %2133 = vmatprep.mubr.f32.mxu0 %v4635_v60  ;;  %4075 = vmatpush1.bf16.msra.mxu1 %v4074_v13  ;;  %v3716_v13 = vld [vmem:[%s6322_s1 + $0x308] sm:$0xff] }
  0xbd   : > { %4077 = vmatprep.subr.bf16.mxu1 %v4076_v8  ;;  %v3718_v8 = vld [vmem:[%s6322_s1 + $0x318] sm:$0xff] }
  0xbe   : > { %859 = vmatmul.mubr.f32.gmra.mrb[10].mxu1 %v5197_v47  ;;  %v4084_v47 = vpack.c.bf16 %v3697_v55, %v3695_v51  ;;  %v4088_v30 = vpack.c.bf16 %v3718_v8, %v3716_v13  ;;  %v3914_v51 = vld [vmem:[%s6322_s1 + $0x730] sm:$0xff]  ;;  %v3917_v55 = vld [vmem:[%s6322_s1 + $0x748] sm:$0xff] }
  0xbf   : > { %2134 = vmatmul.mubr.f32.gmra.mrb[26].mxu0 %v5622_v32  ;;  %864 = vmatprep.mubr.f32.mxu1 %v4635_v60  ;;  %v5704_v13 = vld [vmem:[%s5093_s15 + $0x79] sm:$0xff] }
  0xc0   : > { %2139 = vmatprep.mubr.f32.mxu0 %v4635_v60  ;;  %4079 = vmatpush1.bf16.msra.mxu1 %v4078_v38  ;;  %v3913_v38 = vld [vmem:[%s6322_s1 + $0x728] sm:$0xff] }
  0xc1   : > { %4081 = vmatprep.subr.bf16.mxu1 %v4080_v29  ;;  %v3915_v29 = vld [vmem:[%s6322_s1 + $0x738] sm:$0xff] }
  0xc2   : > { %865 = vmatmul.mubr.f32.gmra.mrb[12].mxu1 %v5230_v3  ;;  %v3908_v3 = vld [vmem:[%s6322_s1 + $0x700] sm:$0xff]  ;;  %v4220_v44 = vpack.c.bf16 %v3915_v29, %v3913_v38 }
  0xc3   : > { %2140 = vmatmul.mubr.f32.gmra.mrb[28].mxu0 %v3809_v56  ;;  %870 = vmatprep.mubr.f32.mxu1 %v4635_v60  ;;  %v4218_v43 = vpack.c.bf16 %v3910_v28, %v3908_v3  ;;  %v3919_v56 = vld [vmem:[%s6322_s1 + $0x758] sm:$0xff]  ;;  %v3924_v29 = vld [vmem:[%s6322_s1 + $0x780] sm:$0xff] }
  0xc4   : > { %2145 = vmatprep.mubr.f32.mxu0 %v4635_v60  ;;  %4083 = vmatpush1.bf16.msra.mxu1 %v4082_v57  ;;  %v3927_v3 = vld [vmem:[%s6322_s1 + $0x798] sm:$0xff] }
  0xc5   : > { %4085 = vmatprep.subr.bf16.mxu1 %v4084_v47  ;;  %v4224_v47 = vpack.c.bf16 %v3919_v56, %v3917_v55  ;;  %v5723_v28 = vld [vmem:[%s5093_s15 + $0x81] sm:$0xff] }
  0xc6   : > { %871 = vmatmul.mubr.f32.gmra.mrb[14].mxu1 %v5264_v24  ;;  %v3912_v24 = vld [vmem:[%s6322_s1 + $0x720] sm:$0xff] }
  0xc7   : > { %2146 = vmatmul.mubr.f32.gmra.mrb[30].mxu0 %v3810_v18  ;;  %876 = vmatprep.mubr.f32.mxu1 %v4635_v60  ;;  %v4222_v57 = vpack.c.bf16 %v3914_v51, %v3912_v24  ;;  %v3920_v18 = vld [vmem:[%s6322_s1 + $0x760] sm:$0xff] }
  0xc8   : > { %2364 = vmatprep.mubr.f32.mxu0 %v4635_v60  ;;  %4087 = vmatpush1.bf16.msra.mxu1 %v4086_v23  ;;  %v3922_v23 = vld [vmem:[%s6322_s1 + $0x770] sm:$0xff]  ;;  %v3928_v56 = vld [vmem:[%s6322_s1 + $0x7a0] sm:$0xff] }
  0xc9   : > { %4089 = vmatprep.subr.bf16.mxu1 %v4088_v30  ;;  %v4230_v30 = vpack.c.bf16 %v3922_v23, %v3920_v18  ;;  %v5742_v24 = vld [vmem:[%s5093_s15 + $0x91] sm:$0xff]  ;;  %v5780_v18 = vld [vmem:[%s5093_s15 + $0xa9] sm:$0xff] }
  0xca   : > { %877 = vmatmul.mubr.f32.gmra.mrb[16].mxu1 %v5298_v45  ;;  %v3916_v45 = vld [vmem:[%s6322_s1 + $0x740] sm:$0xff] }
  0xcb   : > { %2365 = vmatmul.mubr.f32.vlgmr.msra.gmra.mrb[0].mxu0 %v5220_v63  ;;  %882 = vmatprep.mubr.f32.mxu1 %v4635_v60  ;;  %v3921_v63 = vld [vmem:[%s6322_s1 + $0x768] sm:$0xff]  ;;  %v4226_v8 = vpack.c.bf16 %v3918_v1, %v3916_v45 }
  0xcc   : > { %4219 = vmatpush1.bf16.msra.mxu0 %v4218_v43  ;;  %2370 = vmatprep.mubr.f32.mxu0 %v4635_v60  ;;  %v3926_v43 = vld [vmem:[%s6322_s1 + $0x790] sm:$0xff] }
  0xcd   : > { %4221 = vmatprep.subr.bf16.mxu0 %v4220_v44  ;;  %v3931_v44 = vld [vmem:[%s6322_s1 + $0x7b8] sm:$0xff]  ;;  %v4234_v51 = vpack.c.bf16 %v3926_v43, %v3924_v29  ;;  %v3715_v43 = vld [vmem:[%s6322_s1 + $0x300] sm:$0xff] }
  0xce   : > { %883 = vmatmul.mubr.f32.gmra.mrb[18].mxu1 %v5332_v5  ;;  %v4228_v5 = vpack.c.bf16 %v3923_v6, %v3921_v63  ;;  %v5761_v45 = vld [vmem:[%s5093_s15 + $0x99] sm:$0xff]  ;;  %v5799_v29 = vld [vmem:[%s5093_s15 + $0xb1] sm:$0xff] }
  0xcf   : > { %2371 = vmatmul.mubr.f32.gmra.mrb[2].mxu0 %v5254_v20  ;;  %888 = vmatprep.mubr.f32.mxu1 %v4635_v60  ;;  %v3925_v20 = vld [vmem:[%s6322_s1 + $0x788] sm:$0xff]  ;;  %v3932_v6 = vld [vmem:[%s6322_s1 + $0x7c0] sm:$0xff] }
  0xd0   : > { %2376 = vmatprep.mubr.f32.mxu0 %v4635_v60  ;;  %4223 = vmatpush1.bf16.msra.mxu0 %v4222_v57  ;;  %v4232_v38 = vpack.c.bf16 %v3927_v3, %v3925_v20  ;;  %v3930_v57 = vld [vmem:[%s6322_s1 + $0x7b0] sm:$0xff]  ;;  %v3936_v3 = vld [vmem:[%s6322_s1 + $0x7e0] sm:$0xff] }
  0xd1   : > { %4225 = vmatprep.subr.bf16.mxu0 %v4224_v47  ;;  %v3935_v47 = vld [vmem:[%s6322_s1 + $0x7d8] sm:$0xff]  ;;  %v4238_v1 = vpack.c.bf16 %v3930_v57, %v3928_v56 }
  0xd2   : > { %889 = vmatmul.mubr.f32.gmra.mrb[20].mxu1 %v5704_v13  ;;  %v1021_v56 = vld [vmem:[%s5093_s15 + $0x2] sm:$0xff] }
  0xd3   : > { %2377 = vmatmul.mubr.f32.gmra.mrb[4].mxu0 %v5288_v42  ;;  %894 = vmatprep.mubr.f32.mxu1 %v4635_v60  ;;  %v3929_v42 = vld [vmem:[%s6322_s1 + $0x7a8] sm:$0xff] }
  0xd4   : > { %2382 = vmatprep.mubr.f32.mxu0 %v4635_v60  ;;  %4227 = vmatpush1.bf16.msra.mxu0 %v4226_v8  ;;  %v4236_v55 = vpack.c.bf16 %v3931_v44, %v3929_v42  ;;  %v3934_v8 = vld [vmem:[%s6322_s1 + $0x7d0] sm:$0xff] }
  0xd5   : > { %4229 = vmatprep.subr.bf16.mxu0 %v4228_v5  ;;  %v3939_v5 = vld [vmem:[%s6322_s1 + $0x7f8] sm:$0xff]  ;;  %v4242_v23 = vpack.c.bf16 %v3934_v8, %v3932_v6  ;;  %v3717_v42 = vld [vmem:[%s6322_s1 + $0x310] sm:$0xff] }
  0xd6   : > { %895 = vmatmul.mubr.f32.gmra.mrb[22].mxu1 %v5723_v28  ;;  %v4090_v57 = vpack.c.bf16 %v3717_v42, %v3715_v43  ;;  %v1022_v6 = vld [vmem:[%s5093_s15 + $0xa] sm:$0xff] }
  0xd7   : > { %2383 = vmatmul.mubr.f32.gmra.mrb[6].mxu0 %v5322_v62  ;;  %900 = vmatprep.mubr.f32.mxu1 %v4635_v60  ;;  %v3933_v62 = vld [vmem:[%s6322_s1 + $0x7c8] sm:$0xff]  ;;  %v3734_v43 = vld [vmem:[%s6322_s1 + $0x398] sm:$0xff] }
  0xd8   : > { %2388 = vmatprep.mubr.f32.mxu0 %v4635_v60  ;;  %4231 = vmatpush1.bf16.msra.mxu0 %v4230_v30  ;;  %v4240_v63 = vpack.c.bf16 %v3935_v47, %v3933_v62  ;;  %v3938_v30 = vld [vmem:[%s6322_s1 + $0x7f0] sm:$0xff]  ;;  %v3719_v47 = vld [vmem:[%s6322_s1 + $0x320] sm:$0xff] }
  0xd9   : > { %4233 = vmatprep.subr.bf16.mxu0 %v4232_v38  ;;  %v3959_v38 = vld [vmem:[%s6322_s1 + $0x818] sm:$0xff]  ;;  %v4246_v44 = vpack.c.bf16 %v3938_v30, %v3936_v3 }
  0xda   : > { %901 = vmatmul.mubr.f32.gmra.mrb[24].mxu1 %v5742_v24 }
  0xdb   : > { %2389 = vmatmul.mubr.f32.gmra.mrb[8].mxu0 %v5350_v19  ;;  %906 = vmatprep.mubr.f32.mxu1 %v4635_v60  ;;  %v3937_v19 = vld [vmem:[%s6322_s1 + $0x7e8] sm:$0xff] }
  0xdc   : > { %2394 = vmatprep.mubr.f32.mxu0 %v4635_v60  ;;  %4235 = vmatpush1.bf16.msra.mxu0 %v4234_v51  ;;  %v4244_v20 = vpack.c.bf16 %v3939_v5, %v3937_v19  ;;  %v3723_v5 = vld [vmem:[%s6322_s1 + $0x340] sm:$0xff] }
  0xdd   : > { %4237 = vmatprep.subr.bf16.mxu0 %v4236_v55  ;;  %v3722_v55 = vld [vmem:[%s6322_s1 + $0x338] sm:$0xff] }
  0xde   : > { %907 = vmatmul.mubr.f32.gmra.mrb[26].mxu1 %v5761_v45 }
  0xdf   : > { %2395 = vmatmul.mubr.f32.gmra.mrb[10].mxu0 %v5372_v34  ;;  %912 = vmatprep.mubr.f32.mxu1 %v4635_v60  ;;  %v3957_v34 = vld [vmem:[%s6322_s1 + $0x808] sm:$0xff] }
  0xe0   : > { %2400 = vmatprep.mubr.f32.mxu0 %v4635_v60  ;;  %4239 = vmatpush1.bf16.msra.mxu0 %v4238_v1  ;;  %v4248_v51 = vpack.c.bf16 %v3959_v38, %v3957_v34  ;;  %v3721_v1 = vld [vmem:[%s6322_s1 + $0x330] sm:$0xff]  ;;  %v3727_v34 = vld [vmem:[%s6322_s1 + $0x360] sm:$0xff] }
  0xe1   : > { %4241 = vmatprep.subr.bf16.mxu0 %v4240_v63  ;;  %v3726_v63 = vld [vmem:[%s6322_s1 + $0x358] sm:$0xff]  ;;  %v4094_v8 = vpack.c.bf16 %v3721_v1, %v3719_v47  ;;  %v3729_v38 = vld [vmem:[%s6322_s1 + $0x370] sm:$0xff] }
  0xe2   : > { %913 = vmatmul.mubr.f32.gmra.mrb[28].mxu1 %v5780_v18  ;;  %v4102_v42 = vpack.c.bf16 %v3729_v38, %v3727_v34  ;;  %v3742_v47 = vld [vmem:[%s6322_s1 + $0x3d8] sm:$0xff]  ;;  %v3956_v34 = vld [vmem:[%s6322_s1 + $0x800] sm:$0xff]  ;;  %v3958_v38 = vld [vmem:[%s6322_s1 + $0x810] sm:$0xff] }
  0xe3   : > { %2401 = vmatmul.mubr.f32.gmra.mrb[12].mxu0 %v5394_v49  ;;  %918 = vmatprep.mubr.f32.mxu1 %v4635_v60  ;;  %v3720_v49 = vld [vmem:[%s6322_s1 + $0x328] sm:$0xff] }
  0xe4   : > { %2406 = vmatprep.mubr.f32.mxu0 %v4635_v60  ;;  %4243 = vmatpush1.bf16.msra.mxu0 %v4242_v23  ;;  %v4092_v62 = vpack.c.bf16 %v3722_v55, %v3720_v49  ;;  %v3725_v23 = vld [vmem:[%s6322_s1 + $0x350] sm:$0xff]  ;;  %v3738_v49 = vld [vmem:[%s6322_s1 + $0x3b8] sm:$0xff] }
  0xe5   : > { %4245 = vmatprep.subr.bf16.mxu0 %v4244_v20  ;;  %v3730_v20 = vld [vmem:[%s6322_s1 + $0x378] sm:$0xff]  ;;  %v4098_v3 = vpack.c.bf16 %v3725_v23, %v3723_v5  ;;  %v5883_v55 = vld [vmem:[%s5093_s15 + $0xc0] sm:$0xff] }
  0xe6   : > { %919 = vmatmul.mubr.f32.gmra.mrb[30].mxu1 %v5799_v29  ;;  %v5902_v1 = vld [vmem:[%s5093_s15 + $0xc8] sm:$0xff]  ;;  %v3858_v5 = vld [vmem:[%s5093_s15 + $0xd8] sm:$0xff] }
  0xe7   : > { %2407 = vmatmul.mubr.f32.gmra.mrb[14].mxu0 %v5416_v59  ;;  %1134 = vmatprep.mubr.f32.mxu1 %v4635_v60  ;;  %v3724_v59 = vld [vmem:[%s6322_s1 + $0x348] sm:$0xff] }
  0xe8   : > { %2412 = vmatprep.mubr.f32.mxu0 %v4635_v60  ;;  %4247 = vmatpush1.bf16.msra.mxu0 %v4246_v44  ;;  %v4096_v19 = vpack.c.bf16 %v3726_v63, %v3724_v59  ;;  %v3739_v63 = vld [vmem:[%s6322_s1 + $0x3c0] sm:$0xff] }
  0xe9   : > { %4249 = vmatprep.subr.bf16.mxu0 %v4248_v51  ;;  %v3733_v51 = vld [vmem:[%s6322_s1 + $0x390] sm:$0xff] }
  0xea   : > { %1135 = vmatmul.mubr.f32.vlgmr.msra.gmra.mrb[0].mxu1 %v1021_v56 }
  0xeb   : > { %2413 = vmatmul.mubr.f32.gmra.mrb[16].mxu0 %v5438_v15  ;;  %4091 = vmatpush1.bf16.msra.mxu1 %v4090_v57  ;;  %v3728_v15 = vld [vmem:[%s6322_s1 + $0x368] sm:$0xff]  ;;  %v3735_v57 = vld [vmem:[%s6322_s1 + $0x3a0] sm:$0xff] }
  0xec   : > { %1140 = vmatprep.mubr.f32.mxu1 %v4635_v60  ;;  %2418 = vmatprep.mubr.f32.mxu0 %v4635_v60  ;;  %v4100_v30 = vpack.c.bf16 %v3730_v20, %v3728_v15  ;;  %v3743_v15 = vld [vmem:[%s6322_s1 + $0x3e0] sm:$0xff]  ;;  %v3745_v20 = vld [vmem:[%s6322_s1 + $0x3f0] sm:$0xff] }
  0xed   : > { %4093 = vmatprep.subr.bf16.mxu1 %v4092_v62  ;;  %v3737_v62 = vld [vmem:[%s6322_s1 + $0x3b0] sm:$0xff] }
  0xee   : > { %1141 = vmatmul.mubr.f32.gmra.mrb[2].mxu1 %v1022_v6  ;;  %v4110_v59 = vpack.c.bf16 %v3737_v62, %v3735_v57  ;;  %v3741_v6 = vld [vmem:[%s6322_s1 + $0x3d0] sm:$0xff]  ;;  %v3969_v57 = vld [vmem:[%s6322_s1 + $0x868] sm:$0xff]  ;;  %v3971_v62 = vld [vmem:[%s6322_s1 + $0x878] sm:$0xff] }
  0xef   : > { %2419 = vmatmul.mubr.f32.gmra.mrb[18].mxu0 %v5460_v33  ;;  %1146 = vmatprep.mubr.f32.mxu1 %v4635_v60  ;;  %v3732_v33 = vld [vmem:[%s6322_s1 + $0x388] sm:$0xff]  ;;  %v4114_v23 = vpack.c.bf16 %v3741_v6, %v3739_v63  ;;  %v3975_v6 = vld [vmem:[%s6322_s1 + $0x898] sm:$0xff] }
  0xf0   : > { %2424 = vmatprep.mubr.f32.mxu0 %v4635_v60  ;;  %4095 = vmatpush1.bf16.msra.mxu1 %v4094_v8  ;;  %v4104_v44 = vpack.c.bf16 %v3734_v43, %v3732_v33  ;;  %v3744_v8 = vld [vmem:[%s6322_s1 + $0x3e8] sm:$0xff]  ;;  %v3963_v33 = vld [vmem:[%s6322_s1 + $0x838] sm:$0xff] }
  0xf1   : > { %4097 = vmatprep.subr.bf16.mxu1 %v4096_v19  ;;  %v3746_v19 = vld [vmem:[%s6322_s1 + $0x3f8] sm:$0xff]  ;;  %v3973_v63 = vld [vmem:[%s6322_s1 + $0x888] sm:$0xff] }
  0xf2   : > { %1147 = vmatmul.mubr.f32.gmra.mrb[4].mxu1 %v5354_v21  ;;  %v3731_v21 = vld [vmem:[%s6322_s1 + $0x380] sm:$0xff] }
  0xf3   : > { %2425 = vmatmul.mubr.f32.gmra.mrb[20].mxu0 %v5482_v52  ;;  %1152 = vmatprep.mubr.f32.mxu1 %v4635_v60  ;;  %v3736_v52 = vld [vmem:[%s6322_s1 + $0x3a8] sm:$0xff]  ;;  %v4106_v56 = vpack.c.bf16 %v3733_v51, %v3731_v21  ;;  %v3962_v21 = vld [vmem:[%s6322_s1 + $0x830] sm:$0xff] }
  0xf4   : > { %2430 = vmatprep.mubr.f32.mxu0 %v4635_v60  ;;  %4099 = vmatpush1.bf16.msra.mxu1 %v4098_v3  ;;  %v3859_v3 = vld [vmem:[%s5093_s15 + $0xe0] sm:$0xff]  ;;  %v3892_v43 = vld [vmem:[%s5093_s15 + $0x31] sm:$0xff] }
  0xf5   : > { %4101 = vmatprep.subr.bf16.mxu1 %v4100_v30  ;;  %v4118_v30 = vpack.c.bf16 %v3745_v20, %v3743_v15  ;;  %v3965_v51 = vld [vmem:[%s6322_s1 + $0x848] sm:$0xff]  ;;  %v3979_v15 = vld [vmem:[%s6322_s1 + $0x8b8] sm:$0xff] }
  0xf6   : > { %1153 = vmatmul.mubr.f32.gmra.mrb[6].mxu1 %v5376_v36  ;;  %v4108_v36 = vpack.c.bf16 %v3738_v49, %v3736_v52  ;;  %v3967_v52 = vld [vmem:[%s6322_s1 + $0x858] sm:$0xff] }
  0xf7   : > { %2431 = vmatmul.mubr.f32.gmra.mrb[22].mxu0 %v5504_v10  ;;  %1158 = vmatprep.mubr.f32.mxu1 %v4635_v60  ;;  %v3740_v10 = vld [vmem:[%s6322_s1 + $0x3c8] sm:$0xff] }
  0xf8   : > { %2436 = vmatprep.mubr.f32.mxu0 %v4635_v60  ;;  %4103 = vmatpush1.bf16.msra.mxu1 %v4102_v42  ;;  %v4250_v42 = vpack.c.bf16 %v3958_v38, %v3956_v34  ;;  %v3893_v49 = vld [vmem:[%s5093_s15 + $0x39] sm:$0xff]  ;;  %v3896_v20 = vld [vmem:[%s5093_s15 + $0x61] sm:$0xff] }
  0xf9   : > { %4105 = vmatprep.subr.bf16.mxu1 %v4104_v44  ;;  %v3978_v34 = vld [vmem:[%s6322_s1 + $0x8b0] sm:$0xff]  ;;  %v3981_v38 = vld [vmem:[%s6322_s1 + $0x8c8] sm:$0xff] }
  0xfa   : > { %1159 = vmatmul.mubr.f32.gmra.mrb[8].mxu1 %v5398_v50  ;;  %v4112_v50 = vpack.c.bf16 %v3742_v47, %v3740_v10  ;;  %v3894_v10 = vld [vmem:[%s5093_s15 + $0x49] sm:$0xff] }
  0xfb   : > { %2437 = vmatmul.mubr.f32.gmra.mrb[24].mxu0 %v5883_v55  ;;  %1164 = vmatprep.mubr.f32.mxu1 %v4635_v60 }
  0xfc   : > { %2442 = vmatprep.mubr.f32.mxu0 %v4635_v60  ;;  %4107 = vmatpush1.bf16.msra.mxu1 %v4106_v56 }
  0xfd   : > { %4109 = vmatprep.subr.bf16.mxu1 %v4108_v36  ;;  %v3966_v36 = vld [vmem:[%s6322_s1 + $0x850] sm:$0xff] }
  0xfe   : > { %1165 = vmatmul.mubr.f32.gmra.mrb[10].mxu1 %v5420_v0  ;;  %v4116_v0 = vpack.c.bf16 %v3746_v19, %v3744_v8  ;;  %v3895_v8 = vld [vmem:[%s5093_s15 + $0x51] sm:$0xff] }
  0xff   : > { %2443 = vmatmul.mubr.f32.gmra.mrb[26].mxu0 %v5902_v1  ;;  %1170 = vmatprep.mubr.f32.mxu1 %v4635_v60 }
 0x100   : > { %2448 = vmatprep.mubr.f32.mxu0 %v4635_v60  ;;  %4111 = vmatpush1.bf16.msra.mxu1 %v4110_v59  ;;  %v4260_v59 = vpack.c.bf16 %v3971_v62, %v3969_v57  ;;  %v3711_v57 = vld [vmem:[%s5093_s15 + $0xa8] sm:$0xff] }
 0x101   : > { %4113 = vmatprep.subr.bf16.mxu1 %v4112_v50  ;;  %v3970_v50 = vld [vmem:[%s6322_s1 + $0x870] sm:$0xff] }
 0x102   : > { %1171 = vmatmul.mubr.f32.gmra.mrb[12].mxu1 %v5442_v16  ;;  %v3961_v16 = vld [vmem:[%s6322_s1 + $0x828] sm:$0xff] }
 0x103   : > { %2449 = vmatmul.mubr.f32.gmra.mrb[28].mxu0 %v3858_v5  ;;  %1176 = vmatprep.mubr.f32.mxu1 %v4635_v60  ;;  %v4252_v44 = vpack.c.bf16 %v3963_v33, %v3961_v16  ;;  %v4264_v5 = vpack.c.bf16 %v3975_v6, %v3973_v63  ;;  %v3983_v16 = vld [vmem:[%s6322_s1 + $0x8d8] sm:$0xff] }
 0x104   : > { %2454 = vmatprep.mubr.f32.mxu0 %v4635_v60  ;;  %4115 = vmatpush1.bf16.msra.mxu1 %v4114_v23  ;;  %v3974_v23 = vld [vmem:[%s6322_s1 + $0x890] sm:$0xff] }
 0x105   : > { %4117 = vmatprep.subr.bf16.mxu1 %v4116_v0  ;;  %v3977_v0 = vld [vmem:[%s6322_s1 + $0x8a8] sm:$0xff] }
 0x106   : > { %1177 = vmatmul.mubr.f32.gmra.mrb[14].mxu1 %v5464_v37  ;;  %v3960_v37 = vld [vmem:[%s6322_s1 + $0x820] sm:$0xff] }
 0x107   : > { %2455 = vmatmul.mubr.f32.gmra.mrb[30].mxu0 %v3859_v3  ;;  %1182 = vmatprep.mubr.f32.mxu1 %v4635_v60  ;;  %v4254_v56 = vpack.c.bf16 %v3962_v21, %v3960_v37  ;;  %v3897_v33 = vld [vmem:[%s5093_s15 + $0x69] sm:$0xff] }
 0x108   : > { %2670 = vmatprep.mubr.f32.mxu0 %v4635_v60  ;;  %4119 = vmatpush1.bf16.msra.mxu1 %v4118_v30  ;;  %v4268_v30 = vpack.c.bf16 %v3979_v15, %v3977_v0  ;;  %v3985_v37 = vld [vmem:[%s6322_s1 + $0x8e8] sm:$0xff]  ;;  %v3987_v21 = vld [vmem:[%s6322_s1 + $0x8f8] sm:$0xff] }
 0x109   : > { %4280 = vmatprep.subr.bf16.mxu1 %v4841_v4  ;;  %v4256_v4 = vpack.c.bf16 %v3967_v52, %v3965_v51  ;;  %v4276_v52 = vpack.c.bf16 %v3987_v21, %v3985_v37  ;;  %v3944_v62 = vld [vmem:[%s5093_s15 + $0x62] sm:$0xff] }
 0x10a   : > { %1183 = vmatmul.mubr.f32.gmra.mrb[16].mxu1 %v5486_v54  ;;  %v3964_v54 = vld [vmem:[%s6322_s1 + $0x840] sm:$0xff] }
 0x10b   : > { %2671 = vmatmul.mubr.f32.vlgmr.msra.gmra.mrb[0].mxu0 %v3892_v43  ;;  %1188 = vmatprep.mubr.f32.mxu1 %v4635_v60  ;;  %v4258_v47 = vpack.c.bf16 %v3966_v36, %v3964_v54  ;;  %v3710_v54 = vld [vmem:[%s5093_s15 + $0x98] sm:$0xff] }
 0x10c   : > { %4251 = vmatpush1.bf16.msra.mxu0 %v4250_v42  ;;  %2676 = vmatprep.mubr.f32.mxu0 %v4635_v60  ;;  %v4272_v42 = vpack.c.bf16 %v3983_v16, %v3981_v38  ;;  %v3943_v36 = vld [vmem:[%s5093_s15 + $0x52] sm:$0xff] }
 0x10d   : > { %4253 = vmatprep.subr.bf16.mxu0 %v4252_v44  ;;  %v3982_v44 = vld [vmem:[%s6322_s1 + $0x8d0] sm:$0xff] }
 0x10e   : > { %1189 = vmatmul.mubr.f32.gmra.mrb[18].mxu1 %v5508_v12  ;;  %v3968_v12 = vld [vmem:[%s6322_s1 + $0x860] sm:$0xff] }
 0x10f   : > { %2677 = vmatmul.mubr.f32.gmra.mrb[2].mxu0 %v3893_v49  ;;  %1194 = vmatprep.mubr.f32.mxu1 %v4635_v60  ;;  %v4262_v19 = vpack.c.bf16 %v3970_v50, %v3968_v12  ;;  %v3986_v49 = vld [vmem:[%s6322_s1 + $0x8f0] sm:$0xff] }
 0x110   : > { %2682 = vmatprep.mubr.f32.mxu0 %v4635_v60  ;;  %4255 = vmatpush1.bf16.msra.mxu0 %v4254_v56  ;;  %v3947_v12 = vld [vmem:[%s5093_s15 + $0x82] sm:$0xff]  ;;  %v3948_v50 = vld [vmem:[%s5093_s15 + $0x92] sm:$0xff] }
 0x111   : > { %4257 = vmatprep.subr.bf16.mxu0 %v4256_v4  ;;  %v3699_v4 = vld [vmem:[%s5093_s15 + $0x18] sm:$0xff] }
 0x112   : > { %1195 = vmatmul.mubr.f32.gmra.mrb[20].mxu1 %v5528_v41  ;;  %v3972_v41 = vld [vmem:[%s6322_s1 + $0x880] sm:$0xff] }
 0x113   : > { %2683 = vmatmul.mubr.f32.gmra.mrb[4].mxu0 %v3894_v10  ;;  %1200 = vmatprep.mubr.f32.mxu1 %v4635_v60  ;;  %v4266_v3 = vpack.c.bf16 %v3974_v23, %v3972_v41  ;;  %v3712_v10 = vld [vmem:[%s5093_s15 + $0xb0] sm:$0xff] }
 0x114   : > { %2688 = vmatprep.mubr.f32.mxu0 %v4635_v60  ;;  %4259 = vmatpush1.bf16.msra.mxu0 %v4258_v47  ;;  %v3945_v47 = vld [vmem:[%s5093_s15 + $0x6a] sm:$0xff] }
 0x115   : > { %4261 = vmatprep.subr.bf16.mxu0 %v4260_v59  ;;  %v3946_v59 = vld [vmem:[%s5093_s15 + $0x7a] sm:$0xff] }
 0x116   : > { %1201 = vmatmul.mubr.f32.gmra.mrb[22].mxu1 %v5547_v58  ;;  %v3976_v58 = vld [vmem:[%s6322_s1 + $0x8a0] sm:$0xff] }
 0x117   : > { %2689 = vmatmul.mubr.f32.gmra.mrb[6].mxu0 %v3895_v8  ;;  %1206 = vmatprep.mubr.f32.mxu1 %v4635_v60  ;;  %v4270_v43 = vpack.c.bf16 %v3978_v34, %v3976_v58 }
 0x118   : > { %2694 = vmatprep.mubr.f32.mxu0 %v4635_v60  ;;  %4263 = vmatpush1.bf16.msra.mxu0 %v4262_v19 }
 0x119   : > { %4265 = vmatprep.subr.bf16.mxu0 %v4264_v5 }
 0x11a   : > { %1207 = vmatmul.mubr.f32.gmra.mrb[24].mxu1 %v5565_v26  ;;  %v3980_v26 = vld [vmem:[%s6322_s1 + $0x8c0] sm:$0xff] }
 0x11b   : > { %2695 = vmatmul.mubr.f32.gmra.mrb[8].mxu0 %v3896_v20  ;;  %1212 = vmatprep.mubr.f32.mxu1 %v4635_v60  ;;  %v4274_v51 = vpack.c.bf16 %v3982_v44, %v3980_v26  ;;  %v3245_v26 = vld [vmem:[%s6324_s3] sm:$0x3] }
 0x11c   : > { %2700 = vmatprep.mubr.f32.mxu0 %v4635_v60  ;;  %4267 = vmatpush1.bf16.msra.mxu0 %v4266_v3  ;;  %v3203_v3 = vlaneseq }
 0x11d   : > { %4269 = vmatprep.subr.bf16.mxu0 %v4268_v30 }
 0x11e   : > { %1213 = vmatmul.mubr.f32.gmra.mrb[26].mxu1 %v5584_v46  ;;  %v3984_v46 = vld [vmem:[%s6322_s1 + $0x8e0] sm:$0xff]  ;;  %v3204_v58 = vshrl.u32 %v3203_v3, 7 }
 0x11f   : > { %2701 = vmatmul.mubr.f32.gmra.mrb[10].mxu0 %v3897_v33  ;;  %1218 = vmatprep.mubr.f32.mxu1 %v4635_v60  ;;  %v4278_v56 = vpack.c.bf16 %v3986_v49, %v3984_v46 }
 0x120   : > { %2706 = vmatprep.mubr.f32.mxu0 %v4635_v60  ;;  %4271 = vmatpush1.bf16.msra.mxu0 %v4270_v43  ;;  %v3205_v16 = vsub.s32 0, %v3204_v58  ;;  %v3201_v43 = vld [vmem:[%s6323_s2] sm:$0x3] }
 0x121   : > { %4273 = vmatprep.subr.bf16.mxu0 %v4272_v42  ;;  %v3209_v42 = vsub.s32 1, %v3204_v58 }
 0x122   : > { %1219 = vmatmul.mubr.f32.gmra.mrb[28].mxu1 %v5603_v7  ;;  %v3700_v7 = vld [vmem:[%s5093_s15 + $0x20] sm:$0xff]  ;;  %v6194_v44 = vrot.slane %v3201_v43, %v3205_v16 }
 0x123   : > { %2707 = vmatmul.mubr.f32.gmra.mrb[12].mxu0 %v5704_v13  ;;  %1224 = vmatprep.mubr.f32.mxu1 %v4635_v60  ;;  %v6196_v21 = vrot.slane %v3201_v43, %v3209_v42 }
 0x124   : > { %2712 = vmatprep.mubr.f32.mxu0 %v4635_v60  ;;  %4275 = vmatpush1.bf16.msra.mxu0 %v4274_v51 }
 0x125   : > { %4277 = vmatprep.subr.bf16.mxu0 %v4276_v52  ;;  %v6198_v52 = vrot.slane %v3245_v26, %v3205_v16 }
 0x126   : > { %1225 = vmatmul.mubr.f32.gmra.mrb[30].mxu1 %v5622_v32  ;;  %v3701_v32 = vld [vmem:[%s5093_s15 + $0x30] sm:$0xff] }
 0x127   : > { %2713 = vmatmul.mubr.f32.gmra.mrb[14].mxu0 %v5723_v28  ;;  %1443 = vmatprep.mubr.f32.mxu1 %v4635_v60 }
 0x128   : > { %2718 = vmatprep.mubr.f32.mxu0 %v4635_v60  ;;  %4279 = vmatpush1.bf16.msra.mxu0 %v4278_v56  ;;  %v6200_v56 = vrot.slane %v3245_v26, %v3209_v42 }
 0x12a   : > { %1444 = vmatmul.mubr.f32.vlgmr.msra.gmra.mrb[0].mxu1 %v3699_v4 }
 0x12b   : > { %2719 = vmatmul.mubr.f32.gmra.mrb[16].mxu0 %v5742_v24  ;;  %4288 = vmatpush1.bf16.msra.mxu1 %v4852_v9  ;;  %v3702_v9 = vld [vmem:[%s5093_s15 + $0x38] sm:$0xff] }
 0x12c   : > { %1449 = vmatprep.mubr.f32.mxu1 %v4635_v60  ;;  %2724 = vmatprep.mubr.f32.mxu0 %v4635_v60 }
 0x12d   : > { %4281 = vmatprep.subr.bf16.mxu1 %v4864_v14  ;;  %v3703_v14 = vld [vmem:[%s5093_s15 + $0x48] sm:$0xff] }
 0x12e   : > { %1450 = vmatmul.mubr.f32.gmra.mrb[2].mxu1 %v3700_v7 }
 0x12f   : > { %2725 = vmatmul.mubr.f32.gmra.mrb[18].mxu0 %v5761_v45  ;;  %1455 = vmatprep.mubr.f32.mxu1 %v4635_v60 }
 0x130   : > { %2730 = vmatprep.mubr.f32.mxu0 %v4635_v60  ;;  %4289 = vmatpush1.bf16.msra.mxu1 %v4886_v22  ;;  %v6081_v22 = vld [vmem:[%s5093_s15 + $0xc1] sm:$0xff] }
 0x131   : > { %4282 = vmatprep.subr.bf16.mxu1 %v4897_v27  ;;  %v3704_v27 = vld [vmem:[%s5093_s15 + $0x50] sm:$0xff] }
 0x132   : > { %1456 = vmatmul.mubr.f32.gmra.mrb[4].mxu1 %v3701_v32 }
 0x133   : > { %2731 = vmatmul.mubr.f32.gmra.mrb[20].mxu0 %v5780_v18  ;;  %1461 = vmatprep.mubr.f32.mxu1 %v4635_v60 }
 0x134   : > { %2736 = vmatprep.mubr.f32.mxu0 %v4635_v60  ;;  %4290 = vmatpush1.bf16.msra.mxu1 %v4918_v35  ;;  %v6090_v35 = vld [vmem:[%s5093_s15 + $0xc9] sm:$0xff] }
 0x135   : > { %4283 = vmatprep.subr.bf16.mxu1 %v4930_v40  ;;  %v3705_v40 = vld [vmem:[%s5093_s15 + $0x60] sm:$0xff] }
 0x136   : > { %1462 = vmatmul.mubr.f32.gmra.mrb[6].mxu1 %v3702_v9 }
 0x137   : > { %2737 = vmatmul.mubr.f32.gmra.mrb[22].mxu0 %v5799_v29  ;;  %1467 = vmatprep.mubr.f32.mxu1 %v4635_v60 }
 0x138   : > { %2742 = vmatprep.mubr.f32.mxu0 %v4635_v60  ;;  %4291 = vmatpush1.bf16.msra.mxu1 %v4951_v48  ;;  %v3906_v48 = vld [vmem:[%s5093_s15 + $0xd9] sm:$0xff] }
 0x139   : > { %4284 = vmatprep.subr.bf16.mxu1 %v4963_v53  ;;  %v3706_v53 = vld [vmem:[%s5093_s15 + $0x68] sm:$0xff] }
 0x13a   : > { %1468 = vmatmul.mubr.f32.gmra.mrb[8].mxu1 %v3703_v14 }
 0x13b   : > { %2743 = vmatmul.mubr.f32.gmra.mrb[24].mxu0 %v6081_v22  ;;  %1473 = vmatprep.mubr.f32.mxu1 %v4635_v60 }
 0x13c   : > { %2748 = vmatprep.mubr.f32.mxu0 %v4635_v60  ;;  %4292 = vmatpush1.bf16.msra.mxu1 %v4981_v61  ;;  %v3907_v61 = vld [vmem:[%s5093_s15 + $0xe1] sm:$0xff] }
 0x13d   : > { %4285 = vmatprep.subr.bf16.mxu1 %v4993_v2  ;;  %v3707_v2 = vld [vmem:[%s5093_s15 + $0x78] sm:$0xff] }
 0x13e   : > { %1474 = vmatmul.mubr.f32.gmra.mrb[10].mxu1 %v3704_v27 }
 0x13f   : > { %2749 = vmatmul.mubr.f32.gmra.mrb[26].mxu0 %v6090_v35  ;;  %1479 = vmatprep.mubr.f32.mxu1 %v4635_v60 }
 0x140   : > { %2754 = vmatprep.mubr.f32.mxu0 %v4635_v60  ;;  %4293 = vmatpush1.bf16.msra.mxu1 %v5011_v11  ;;  %v3940_v11 = vld [vmem:[%s5093_s15 + $0x32] sm:$0xff] }
 0x141   : > { %4286 = vmatprep.subr.bf16.mxu1 %v5023_v17  ;;  %v3708_v17 = vld [vmem:[%s5093_s15 + $0x80] sm:$0xff] }
 0x142   : > { %1480 = vmatmul.mubr.f32.gmra.mrb[12].mxu1 %v3705_v40 }
 0x143   : > { %2755 = vmatmul.mubr.f32.gmra.mrb[28].mxu0 %v3906_v48  ;;  %1485 = vmatprep.mubr.f32.mxu1 %v4635_v60 }
 0x144   : > { %2760 = vmatprep.mubr.f32.mxu0 %v4635_v60  ;;  %4294 = vmatpush1.bf16.msra.mxu1 %v5041_v25  ;;  %v3941_v25 = vld [vmem:[%s5093_s15 + $0x3a] sm:$0xff] }
 0x145   : > { %4287 = vmatprep.subr.bf16.mxu1 %v5054_v31  ;;  %v3709_v31 = vld [vmem:[%s5093_s15 + $0x90] sm:$0xff] }
 0x146   : > { %1486 = vmatmul.mubr.f32.gmra.mrb[14].mxu1 %v3706_v53 }
 0x147   : > { %2761 = vmatmul.mubr.f32.gmra.mrb[30].mxu0 %v3907_v61  ;;  %1491 = vmatprep.mubr.f32.mxu1 %v4635_v60 }
 0x148   : > { %2976 = vmatprep.mubr.f32.mxu0 %v4635_v60  ;;  %4295 = vmatpush1.bf16.msra.mxu1 %v5072_v39  ;;  %v3942_v39 = vld [vmem:[%s5093_s15 + $0x4a] sm:$0xff] }
 0x14a   : > { %1492 = vmatmul.mubr.f32.gmra.mrb[16].mxu1 %v3707_v2 }
 0x14b   : > { %2977 = vmatmul.mubr.f32.vlgmr.msra.gmra.mrb[0].mxu0 %v3940_v11  ;;  %1497 = vmatprep.mubr.f32.mxu1 %v4635_v60 }
 0x14c   : > { %2982 = vmatprep.mubr.f32.mxu0 %v4635_v60 }
 0x14e   : > { %1498 = vmatmul.mubr.f32.gmra.mrb[18].mxu1 %v3708_v17 }
 0x14f   : > { %2983 = vmatmul.mubr.f32.gmra.mrb[2].mxu0 %v3941_v25  ;;  %1503 = vmatprep.mubr.f32.mxu1 %v4635_v60 }
 0x150   : > { %2988 = vmatprep.mubr.f32.mxu0 %v4635_v60 }
 0x152   : > { %1504 = vmatmul.mubr.f32.gmra.mrb[20].mxu1 %v3709_v31 }
 0x153   : > { %2989 = vmatmul.mubr.f32.gmra.mrb[4].mxu0 %v3942_v39  ;;  %1509 = vmatprep.mubr.f32.mxu1 %v4635_v60 }
 0x154   : > { %2994 = vmatprep.mubr.f32.mxu0 %v4635_v60 }
 0x156   : > { %1510 = vmatmul.mubr.f32.gmra.mrb[22].mxu1 %v3710_v54 }
 0x157   : > { %2995 = vmatmul.mubr.f32.gmra.mrb[6].mxu0 %v3943_v36  ;;  %1515 = vmatprep.mubr.f32.mxu1 %v4635_v60 }
 0x158   : > { %3000 = vmatprep.mubr.f32.mxu0 %v4635_v60 }
 0x15a   : > { %1516 = vmatmul.mubr.f32.gmra.mrb[24].mxu1 %v3711_v57 }
 0x15b   : > { %3001 = vmatmul.mubr.f32.gmra.mrb[8].mxu0 %v3944_v62  ;;  %1521 = vmatprep.mubr.f32.mxu1 %v4635_v60 }
 0x15c   : > { %3006 = vmatprep.mubr.f32.mxu0 %v4635_v60 }
 0x15e   : > { %1522 = vmatmul.mubr.f32.gmra.mrb[26].mxu1 %v3712_v10 }
 0x15f   : > { %3007 = vmatmul.mubr.f32.gmra.mrb[10].mxu0 %v3945_v47  ;;  %1527 = vmatprep.mubr.f32.mxu1 %v4635_v60 }
 0x160   : > { %3012 = vmatprep.mubr.f32.mxu0 %v4635_v60 }
 0x162   : > { %1528 = vmatmul.mubr.f32.gmra.mrb[28].mxu1 %v5883_v55  ;;  %v3949_v55 = vld [vmem:[%s5093_s15 + $0x9a] sm:$0xff] }
 0x163   : > { %3013 = vmatmul.mubr.f32.gmra.mrb[12].mxu0 %v3946_v59  ;;  %1533 = vmatprep.mubr.f32.mxu1 %v4635_v60 }
 0x164   : > { %3018 = vmatprep.mubr.f32.mxu0 %v4635_v60 }
 0x166   : > { %1534 = vmatmul.mubr.f32.gmra.mrb[30].mxu1 %v5902_v1  ;;  %v3950_v1 = vld [vmem:[%s5093_s15 + $0xaa] sm:$0xff] }
 0x167   : > { %3019 = vmatmul.mubr.f32.gmra.mrb[14].mxu0 %v3947_v12  ;;  %1797 = vmatprep.mubr.f32.mxu1 %v4635_v60 }
 0x168   : > { %3024 = vmatprep.mubr.f32.mxu0 %v4635_v60 }
 0x16a   : > { %1798 = vmatmul.mubr.f32.vlgmr.msra.gmra.mrb[16].mxu1 %v5704_v13  ;;  %v3951_v13 = vld [vmem:[%s5093_s15 + $0xb2] sm:$0xff] }
 0x16b   : > { %3025 = vmatmul.mubr.f32.gmra.mrb[16].mxu0 %v3948_v50  ;;  %1803 = vmatprep.mubr.f32.mxu1 %v4635_v60 }
 0x16c   : > { %3030 = vmatprep.mubr.f32.mxu0 %v4635_v60 }
 0x16e   : > { %1804 = vmatmul.mubr.f32.gmra.mrb[18].mxu1 %v5723_v28  ;;  %v3952_v28 = vld [vmem:[%s5093_s15 + $0xc2] sm:$0xff] }
 0x16f   : > { %3031 = vmatmul.mubr.f32.gmra.mrb[18].mxu0 %v3949_v55  ;;  %1809 = vmatprep.mubr.f32.mxu1 %v4635_v60 }
 0x170   : > { %3036 = vmatprep.mubr.f32.mxu0 %v4635_v60 }
 0x172   : > { %1810 = vmatmul.mubr.f32.gmra.mrb[20].mxu1 %v5742_v24  ;;  %v3953_v24 = vld [vmem:[%s5093_s15 + $0xca] sm:$0xff] }
 0x173   : > { %3037 = vmatmul.mubr.f32.gmra.mrb[20].mxu0 %v3950_v1  ;;  %1815 = vmatprep.mubr.f32.mxu1 %v4635_v60 }
 0x174   : > { %3042 = vmatprep.mubr.f32.mxu0 %v4635_v60 }
 0x176   : > { %1816 = vmatmul.mubr.f32.gmra.mrb[22].mxu1 %v5761_v45  ;;  %v3954_v45 = vld [vmem:[%s5093_s15 + $0xda] sm:$0xff] }
 0x177   : > { %3043 = vmatmul.mubr.f32.gmra.mrb[22].mxu0 %v3951_v13  ;;  %1821 = vmatprep.mubr.f32.mxu1 %v4635_v60 }
 0x178   : > { %3048 = vmatprep.mubr.f32.mxu0 %v4635_v60 }
 0x17a   : > { %1822 = vmatmul.mubr.f32.gmra.mrb[24].mxu1 %v5780_v18  ;;  %v3955_v18 = vld [vmem:[%s5093_s15 + $0xe2] sm:$0xff] }
 0x17b   : > { %3049 = vmatmul.mubr.f32.gmra.mrb[24].mxu0 %v3952_v28  ;;  %1827 = vmatprep.mubr.f32.mxu1 %v4635_v60 }
 0x17c   : > { %3054 = vmatprep.mubr.f32.mxu0 %v4635_v60 }
 0x17e   : > { %1828 = vmatmul.mubr.f32.gmra.mrb[26].mxu1 %v5799_v29 }
 0x17f   : > { %3055 = vmatmul.mubr.f32.gmra.mrb[26].mxu0 %v3953_v24  ;;  %1833 = vmatprep.mubr.f32.mxu1 %v4635_v60 }
 0x180   : > { %3060 = vmatprep.mubr.f32.mxu0 %v4635_v60 }
 0x182   : > { %1834 = vmatmul.mubr.f32.gmra.mrb[28].mxu1 %v6081_v22 }
 0x183   : > { %3061 = vmatmul.mubr.f32.gmra.mrb[28].mxu0 %v3954_v45  ;;  %1839 = vmatprep.mubr.f32.mxu1 %v4635_v60 }
 0x184   : > { %3066 = vmatprep.mubr.f32.mxu0 %v4635_v60 }
 0x186   : > { %1840 = vmatmul.mubr.f32.gmra.mrb[30].mxu1 %v6090_v35 }
 0x187   : > { %3067 = vmatmul.mubr.f32.gmra.mrb[30].mxu0 %v3955_v18 }
 0x1fd   : > { %v1445_v63 = vpop.f32.mrb[0].mxu1 }
 0x1fe   : > { %v1447_v6 = vpop.f32.mrb[1].mxu1 }
 0x201   : > { %v1451_v29 = vpop.f32.mrb[2].mxu1 }
 0x202   : > { %v1453_v8 = vpop.f32.mrb[3].mxu1 }
 0x205   : > { %v1457_v19 = vpop.f32.mrb[4].mxu1 }
 0x206   : > { %v1459_v5 = vpop.f32.mrb[5].mxu1 }
 0x209   : > { %v1463_v41 = vpop.f32.mrb[6].mxu1 }
 0x20a   : > { %v1465_v23 = vpop.f32.mrb[7].mxu1 }
 0x20d   : > { %v6172_v0 = vpop.f32.mrb[8].mxu1 }
 0x20e   : > { %v6174_v15 = vpop.f32.mrb[9].mxu1 }
 0x211   : > { %v6176_v20 = vpop.f32.mrb[10].mxu1 }
 0x212   : > { %v6178_v60 = vpop.f32.mrb[11].mxu1 }
 0x215   : > { %v6180_v30 = vpop.f32.mrb[12].mxu1 }
 0x216   : > { %v6182_v34 = vpop.f32.mrb[13].mxu1 }
 0x219   : > { %v6184_v38 = vpop.f32.mrb[14].mxu1 }
 0x21a   : > { %v6186_v33 = vpop.f32.mrb[15].mxu1 }
 0x21e   : > { %v2978_v37 = vpop.f32.mrb[0].mxu0 }
 0x21f   : > { %v4296_v51 = vadd.f32 %v2978_v37, %v1445_v63  ;;  %v2980_v46 = vpop.f32.mrb[1].mxu0 }
 0x220   : > { %v4297_v49 = vadd.f32 %v2980_v46, %v1447_v6 }
 0x221   : > { %v3213_v4 = vmul.f32 %v4296_v51, %v6194_v44 }
 0x222   : > { %v3214_v7 = vmul.f32 %v4297_v49, %v6196_v21  ;;  %v2984_v32 = vpop.f32.mrb[2].mxu0 }
 0x223   : > { %v3257_v9 = vadd.f32 %v6198_v52, %v3213_v4  ;;  %v4298_v14 = vadd.f32 %v2984_v32, %v1451_v29  ;;  %v2986_v22 = vpop.f32.mrb[3].mxu0 }
 0x224   : > { %v3258_v27 = vadd.f32 %v6200_v56, %v3214_v7  ;;  %v4299_v35 = vadd.f32 %v2986_v22, %v1453_v8 }
 0x225   : > { %vm3289_vm0 = vcmp.gt.f32.partialorder %v3257_v9, 0.0  ;;  %v3321_v40 = vmul.f32 0.1, %v3257_v9  ;;  %v3215_v48 = vmul.f32 %v4298_v14, %v6194_v44 }
 0x226   : > { %vm3290_vm1 = vcmp.gt.f32.partialorder %v3258_v27, 0.0  ;;  %v3322_v53 = vmul.f32 0.1, %v3258_v27  ;;  %v3216_v61 = vmul.f32 %v4299_v35, %v6196_v21  ;;  %v2990_v2 = vpop.f32.mrb[4].mxu0 }
 0x227   : > { %v3353_v11 = vsel %vm3289_vm0, %v3257_v9, %v3321_v40  ;;  %v3259_v17 = vadd.f32 %v6198_v52, %v3215_v48  ;;  %v4300_v25 = vadd.f32 %v2990_v2, %v1457_v19  ;;  %v2992_v31 = vpop.f32.mrb[5].mxu0 }
 0x228   : > { %3385 = vst [vmem:[%s4701_s30] sm:$0xff] %v3353_v11  ;;  %v3354_v39 = vsel %vm3290_vm1, %v3258_v27, %v3322_v53  ;;  %v3260_v54 = vadd.f32 %v6200_v56, %v3216_v61  ;;  %v4301_v36 = vadd.f32 %v2992_v31, %v1459_v5 }
 0x229   : > { %3386 = vst [vmem:[%s4701_s30 + $0x8] sm:$0xff] %v3354_v39  ;;  %vm3291_vm2 = vcmp.gt.f32.partialorder %v3259_v17, 0.0  ;;  %v3323_v57 = vmul.f32 0.1, %v3259_v17  ;;  %v3217_v62 = vmul.f32 %v4300_v25, %v6194_v44 }
 0x22a   : > { %vm3292_vm3 = vcmp.gt.f32.partialorder %v3260_v54, 0.0  ;;  %v3324_v10 = vmul.f32 0.1, %v3260_v54  ;;  %v3218_v47 = vmul.f32 %v4301_v36, %v6196_v21  ;;  %v2996_v59 = vpop.f32.mrb[6].mxu0 }
 0x22b   : > { %v3355_v12 = vsel %vm3291_vm2, %v3259_v17, %v3323_v57  ;;  %v3261_v50 = vadd.f32 %v6198_v52, %v3217_v62  ;;  %v4302_v55 = vadd.f32 %v2996_v59, %v1463_v41  ;;  %v2998_v1 = vpop.f32.mrb[7].mxu0 }
 0x22c   : > { %3387 = vst [vmem:[%s4701_s30 + $0x10] sm:$0xff] %v3355_v12  ;;  %v3356_v13 = vsel %vm3292_vm3, %v3260_v54, %v3324_v10  ;;  %v3262_v28 = vadd.f32 %v6200_v56, %v3218_v47  ;;  %v4303_v24 = vadd.f32 %v2998_v1, %v1465_v23 }
 0x22d   : > { %3388 = vst [vmem:[%s4701_s30 + $0x18] sm:$0xff] %v3356_v13  ;;  %vm3293_vm4 = vcmp.gt.f32.partialorder %v3261_v50, 0.0  ;;  %v3325_v45 = vmul.f32 0.1, %v3261_v50  ;;  %v3219_v18 = vmul.f32 %v4302_v55, %v6194_v44 }
 0x22e   : > { %vm3294_vm5 = vcmp.gt.f32.partialorder %v3262_v28, 0.0  ;;  %v3326_v63 = vmul.f32 0.1, %v3262_v28  ;;  %v3220_v6 = vmul.f32 %v4303_v24, %v6196_v21  ;;  %v3002_v29 = vpop.f32.mrb[8].mxu0 }
 0x22f   : > { %v3357_v8 = vsel %vm3293_vm4, %v3261_v50, %v3325_v45  ;;  %v3263_v19 = vadd.f32 %v6198_v52, %v3219_v18  ;;  %v4304_v5 = vadd.f32 %v3002_v29, %v6172_v0  ;;  %v3004_v41 = vpop.f32.mrb[9].mxu0 }
 0x230   : > { %3389 = vst [vmem:[%s4701_s30 + $0x20] sm:$0xff] %v3357_v8  ;;  %v3358_v23 = vsel %vm3294_vm5, %v3262_v28, %v3326_v63  ;;  %v3264_v3 = vadd.f32 %v6200_v56, %v3220_v6  ;;  %v4305_v58 = vadd.f32 %v3004_v41, %v6174_v15 }
 0x231   : > { %3390 = vst [vmem:[%s4701_s30 + $0x28] sm:$0xff] %v3358_v23  ;;  %vm3295_vm6 = vcmp.gt.f32.partialorder %v3263_v19, 0.0  ;;  %v3327_v16 = vmul.f32 0.1, %v3263_v19  ;;  %v3221_v43 = vmul.f32 %v4304_v5, %v6194_v44 }
 0x232   : > { %vm3296_vm7 = vcmp.gt.f32.partialorder %v3264_v3, 0.0  ;;  %v3328_v42 = vmul.f32 0.1, %v3264_v3  ;;  %v3222_v26 = vmul.f32 %v4305_v58, %v6196_v21  ;;  %v3008_v37 = vpop.f32.mrb[10].mxu0 }
 0x233   : > { %v3359_v0 = vsel %vm3295_vm6, %v3263_v19, %v3327_v16  ;;  %v3265_v51 = vadd.f32 %v6198_v52, %v3221_v43  ;;  %v4306_v46 = vadd.f32 %v3008_v37, %v6176_v20  ;;  %v3010_v49 = vpop.f32.mrb[11].mxu0 }
 0x234   : > { %3391 = vst [vmem:[%s4701_s30 + $0x30] sm:$0xff] %v3359_v0  ;;  %v3360_v15 = vsel %vm3296_vm7, %v3264_v3, %v3328_v42  ;;  %v3266_v4 = vadd.f32 %v6200_v56, %v3222_v26  ;;  %v4307_v7 = vadd.f32 %v3010_v49, %v6178_v60 }
 0x235   : > { %3392 = vst [vmem:[%s4701_s30 + $0x38] sm:$0xff] %v3360_v15  ;;  %vm3297_vm8 = vcmp.gt.f32.partialorder %v3265_v51, 0.0  ;;  %v3329_v32 = vmul.f32 0.1, %v3265_v51  ;;  %v3223_v9 = vmul.f32 %v4306_v46, %v6194_v44 }
 0x236   : > { %vm3298_vm9 = vcmp.gt.f32.partialorder %v3266_v4, 0.0  ;;  %v3330_v14 = vmul.f32 0.1, %v3266_v4  ;;  %v3224_v22 = vmul.f32 %v4307_v7, %v6196_v21  ;;  %v3014_v27 = vpop.f32.mrb[12].mxu0 }
 0x237   : > { %v3361_v20 = vsel %vm3297_vm8, %v3265_v51, %v3329_v32  ;;  %v3267_v35 = vadd.f32 %v6198_v52, %v3223_v9  ;;  %v4308_v40 = vadd.f32 %v3014_v27, %v6180_v30  ;;  %v3016_v48 = vpop.f32.mrb[13].mxu0 }
 0x238   : > { %3393 = vst [vmem:[%s4701_s30 + $0x40] sm:$0xff] %v3361_v20  ;;  %v3362_v60 = vsel %vm3298_vm9, %v3266_v4, %v3330_v14  ;;  %v3268_v53 = vadd.f32 %v6200_v56, %v3224_v22  ;;  %v4309_v61 = vadd.f32 %v3016_v48, %v6182_v34 }
 0x239   : > { %3394 = vst [vmem:[%s4701_s30 + $0x48] sm:$0xff] %v3362_v60  ;;  %vm3299_vm10 = vcmp.gt.f32.partialorder %v3267_v35, 0.0  ;;  %v3331_v2 = vmul.f32 0.1, %v3267_v35  ;;  %v3225_v11 = vmul.f32 %v4308_v40, %v6194_v44 }
 0x23a   : > { %vm3300_vm11 = vcmp.gt.f32.partialorder %v3268_v53, 0.0  ;;  %v3332_v17 = vmul.f32 0.1, %v3268_v53  ;;  %v3226_v25 = vmul.f32 %v4309_v61, %v6196_v21  ;;  %v3020_v31 = vpop.f32.mrb[14].mxu0 }
 0x23b   : > { %v3363_v30 = vsel %vm3299_vm10, %v3267_v35, %v3331_v2  ;;  %v3269_v39 = vadd.f32 %v6198_v52, %v3225_v11  ;;  %v4310_v54 = vadd.f32 %v3020_v31, %v6184_v38  ;;  %v3022_v36 = vpop.f32.mrb[15].mxu0 }
 0x23c   : > { %3395 = vst [vmem:[%s4701_s30 + $0x50] sm:$0xff] %v3363_v30  ;;  %v3364_v57 = vsel %vm3300_vm11, %v3268_v53, %v3332_v17  ;;  %v3270_v34 = vadd.f32 %v6200_v56, %v3226_v25  ;;  %v4311_v62 = vadd.f32 %v3022_v36, %v6186_v33 }
 0x23d   : > { %3396 = vst [vmem:[%s4701_s30 + $0x58] sm:$0xff] %v3364_v57  ;;  %vm3301_vm12 = vcmp.gt.f32.partialorder %v3269_v39, 0.0  ;;  %v3333_v10 = vmul.f32 0.1, %v3269_v39  ;;  %v3227_v47 = vmul.f32 %v4310_v54, %v6194_v44  ;;  %v1799_v59 = vpop.f32.mrb[16].mxu1 }
 0x23e   : > { %vm3302_vm13 = vcmp.gt.f32.partialorder %v3270_v34, 0.0  ;;  %v3334_v12 = vmul.f32 0.1, %v3270_v34  ;;  %v3228_v50 = vmul.f32 %v4311_v62, %v6196_v21  ;;  %v3026_v38 = vpop.f32.mrb[16].mxu0  ;;  %v1801_v55 = vpop.f32.mrb[17].mxu1 }
 0x23f   : > { %v3365_v1 = vsel %vm3301_vm12, %v3269_v39, %v3333_v10  ;;  %v3271_v13 = vadd.f32 %v6198_v52, %v3227_v47  ;;  %v4312_v28 = vadd.f32 %v3026_v38, %v1799_v59  ;;  %v3028_v24 = vpop.f32.mrb[17].mxu0 }
 0x240   : > { %3397 = vst [vmem:[%s4701_s30 + $0x60] sm:$0xff] %v3365_v1  ;;  %v3366_v33 = vsel %vm3302_vm13, %v3270_v34, %v3334_v12  ;;  %v3272_v45 = vadd.f32 %v6200_v56, %v3228_v50  ;;  %v4313_v18 = vadd.f32 %v3028_v24, %v1801_v55 }
 0x241   : > { %3398 = vst [vmem:[%s4701_s30 + $0x68] sm:$0xff] %v3366_v33  ;;  %vm3303_vm14 = vcmp.gt.f32.partialorder %v3271_v13, 0.0  ;;  %v3335_v63 = vmul.f32 0.1, %v3271_v13  ;;  %v3229_v6 = vmul.f32 %v4312_v28, %v6194_v44  ;;  %v1805_v29 = vpop.f32.mrb[18].mxu1 }
 0x242   : > { %vm3304_vm15 = vcmp.gt.f32.partialorder %v3272_v45, 0.0  ;;  %v3336_v8 = vmul.f32 0.1, %v3272_v45  ;;  %v3230_v19 = vmul.f32 %v4313_v18, %v6196_v21  ;;  %v3032_v5 = vpop.f32.mrb[18].mxu0  ;;  %v1807_v41 = vpop.f32.mrb[19].mxu1 }
 0x243   : > { %v3367_v23 = vsel %vm3303_vm14, %v3271_v13, %v3335_v63  ;;  %v3273_v3 = vadd.f32 %v6198_v52, %v3229_v6  ;;  %v4314_v58 = vadd.f32 %v3032_v5, %v1805_v29  ;;  %v3034_v16 = vpop.f32.mrb[19].mxu0 }
 0x244   : > { %3399 = vst [vmem:[%s4701_s30 + $0x70] sm:$0xff] %v3367_v23  ;;  %v3368_v43 = vsel %vm3304_vm15, %v3272_v45, %v3336_v8  ;;  %v3274_v42 = vadd.f32 %v6200_v56, %v3230_v19  ;;  %v4315_v26 = vadd.f32 %v3034_v16, %v1807_v41 }
 0x245   : > { %3400 = vst [vmem:[%s4701_s30 + $0x78] sm:$0xff] %v3368_v43  ;;  %vm3305_vm0 = vcmp.gt.f32.partialorder %v3273_v3, 0.0  ;;  %v3337_v37 = vmul.f32 0.1, %v3273_v3  ;;  %v3231_v0 = vmul.f32 %v4314_v58, %v6194_v44  ;;  %v1811_v51 = vpop.f32.mrb[20].mxu1 }
 0x246   : > { %vm3306_vm1 = vcmp.gt.f32.partialorder %v3274_v42, 0.0  ;;  %v3338_v46 = vmul.f32 0.1, %v3274_v42  ;;  %v3232_v49 = vmul.f32 %v4315_v26, %v6196_v21  ;;  %v3038_v15 = vpop.f32.mrb[20].mxu0  ;;  %v1813_v4 = vpop.f32.mrb[21].mxu1 }
 0x247   : > { %v3369_v7 = vsel %vm3305_vm0, %v3273_v3, %v3337_v37  ;;  %v3275_v32 = vadd.f32 %v6198_v52, %v3231_v0  ;;  %v4316_v9 = vadd.f32 %v3038_v15, %v1811_v51  ;;  %v3040_v14 = vpop.f32.mrb[21].mxu0 }
 0x248   : > { %3401 = vst [vmem:[%s4701_s30 + $0x80] sm:$0xff] %v3369_v7  ;;  %v3370_v22 = vsel %vm3306_vm1, %v3274_v42, %v3338_v46  ;;  %v3276_v27 = vadd.f32 %v6200_v56, %v3232_v49  ;;  %v4317_v20 = vadd.f32 %v3040_v14, %v1813_v4 }
 0x249   : > { %3402 = vst [vmem:[%s4701_s30 + $0x88] sm:$0xff] %v3370_v22  ;;  %vm3307_vm2 = vcmp.gt.f32.partialorder %v3275_v32, 0.0  ;;  %v3339_v35 = vmul.f32 0.1, %v3275_v32  ;;  %v3233_v40 = vmul.f32 %v4316_v9, %v6194_v44  ;;  %v1817_v48 = vpop.f32.mrb[22].mxu1 }
 0x24a   : > { %vm3308_vm3 = vcmp.gt.f32.partialorder %v3276_v27, 0.0  ;;  %v3340_v60 = vmul.f32 0.1, %v3276_v27  ;;  %v3234_v53 = vmul.f32 %v4317_v20, %v6196_v21  ;;  %v3044_v61 = vpop.f32.mrb[22].mxu0  ;;  %v1819_v2 = vpop.f32.mrb[23].mxu1 }
 0x24b   : > { %v3371_v11 = vsel %vm3307_vm2, %v3275_v32, %v3339_v35  ;;  %v3277_v17 = vadd.f32 %v6198_v52, %v3233_v40  ;;  %v4318_v25 = vadd.f32 %v3044_v61, %v1817_v48  ;;  %v3046_v31 = vpop.f32.mrb[23].mxu0 }
 0x24c   : > { %3403 = vst [vmem:[%s4701_s30 + $0x90] sm:$0xff] %v3371_v11  ;;  %v3372_v30 = vsel %vm3308_vm3, %v3276_v27, %v3340_v60  ;;  %v3278_v39 = vadd.f32 %v6200_v56, %v3234_v53  ;;  %v4319_v54 = vadd.f32 %v3046_v31, %v1819_v2 }
 0x24d   : > { %3404 = vst [vmem:[%s4701_s30 + $0x98] sm:$0xff] %v3372_v30  ;;  %vm3309_vm4 = vcmp.gt.f32.partialorder %v3277_v17, 0.0  ;;  %v3341_v36 = vmul.f32 0.1, %v3277_v17  ;;  %v3235_v57 = vmul.f32 %v4318_v25, %v6194_v44  ;;  %v1823_v34 = vpop.f32.mrb[24].mxu1 }
 0x24e   : > { %vm3310_vm5 = vcmp.gt.f32.partialorder %v3278_v39, 0.0  ;;  %v3342_v62 = vmul.f32 0.1, %v3278_v39  ;;  %v3236_v10 = vmul.f32 %v4319_v54, %v6196_v21  ;;  %v3050_v47 = vpop.f32.mrb[24].mxu0  ;;  %v1825_v59 = vpop.f32.mrb[25].mxu1 }
 0x24f   : > { %v3373_v12 = vsel %vm3309_vm4, %v3277_v17, %v3341_v36  ;;  %v3279_v50 = vadd.f32 %v6198_v52, %v3235_v57  ;;  %v4320_v38 = vadd.f32 %v3050_v47, %v1823_v34  ;;  %v3052_v55 = vpop.f32.mrb[25].mxu0 }
 0x250   : > { %3405 = vst [vmem:[%s4701_s30 + $0xa0] sm:$0xff] %v3373_v12  ;;  %v3374_v1 = vsel %vm3310_vm5, %v3278_v39, %v3342_v62  ;;  %v3280_v13 = vadd.f32 %v6200_v56, %v3236_v10  ;;  %v4321_v28 = vadd.f32 %v3052_v55, %v1825_v59 }
 0x251   : > { %3406 = vst [vmem:[%s4701_s30 + $0xa8] sm:$0xff] %v3374_v1  ;;  %vm3311_vm6 = vcmp.gt.f32.partialorder %v3279_v50, 0.0  ;;  %v3343_v24 = vmul.f32 0.1, %v3279_v50  ;;  %v3237_v33 = vmul.f32 %v4320_v38, %v6194_v44  ;;  %v1829_v45 = vpop.f32.mrb[26].mxu1 }
 0x252   : > { %vm3312_vm7 = vcmp.gt.f32.partialorder %v3280_v13, 0.0  ;;  %v3344_v18 = vmul.f32 0.1, %v3280_v13  ;;  %v3238_v63 = vmul.f32 %v4321_v28, %v6196_v21  ;;  %v3056_v6 = vpop.f32.mrb[26].mxu0  ;;  %v1831_v29 = vpop.f32.mrb[27].mxu1 }
 0x253   : > { %v3375_v8 = vsel %vm3311_vm6, %v3279_v50, %v3343_v24  ;;  %v3281_v19 = vadd.f32 %v6198_v52, %v3237_v33  ;;  %v4322_v5 = vadd.f32 %v3056_v6, %v1829_v45  ;;  %v3058_v41 = vpop.f32.mrb[27].mxu0 }
 0x254   : > { %3407 = vst [vmem:[%s4701_s30 + $0xb0] sm:$0xff] %v3375_v8  ;;  %v3376_v23 = vsel %vm3312_vm7, %v3280_v13, %v3344_v18  ;;  %v3282_v3 = vadd.f32 %v6200_v56, %v3238_v63  ;;  %v4323_v58 = vadd.f32 %v3058_v41, %v1831_v29 }
 0x255   : > { %3408 = vst [vmem:[%s4701_s30 + $0xb8] sm:$0xff] %v3376_v23  ;;  %vm3313_vm8 = vcmp.gt.f32.partialorder %v3281_v19, 0.0  ;;  %v3345_v16 = vmul.f32 0.1, %v3281_v19  ;;  %v3239_v43 = vmul.f32 %v4322_v5, %v6194_v44  ;;  %v1835_v42 = vpop.f32.mrb[28].mxu1 }
 0x256   : > { %vm3314_vm9 = vcmp.gt.f32.partialorder %v3282_v3, 0.0  ;;  %v3346_v26 = vmul.f32 0.1, %v3282_v3  ;;  %v3240_v37 = vmul.f32 %v4323_v58, %v6196_v21  ;;  %v3062_v0 = vpop.f32.mrb[28].mxu0  ;;  %v1837_v51 = vpop.f32.mrb[29].mxu1 }
 0x257   : > { %v3377_v46 = vsel %vm3313_vm8, %v3281_v19, %v3345_v16  ;;  %v3283_v49 = vadd.f32 %v6198_v52, %v3239_v43  ;;  %v4324_v15 = vadd.f32 %v3062_v0, %v1835_v42  ;;  %v3064_v4 = vpop.f32.mrb[29].mxu0 }
 0x258   : > { %3409 = vst [vmem:[%s4701_s30 + $0xc0] sm:$0xff] %v3377_v46  ;;  %v3378_v7 = vsel %vm3314_vm9, %v3282_v3, %v3346_v26  ;;  %v3284_v32 = vadd.f32 %v6200_v56, %v3240_v37  ;;  %v4325_v9 = vadd.f32 %v3064_v4, %v1837_v51 }
 0x259   : > { %3410 = vst [vmem:[%s4701_s30 + $0xc8] sm:$0xff] %v3378_v7  ;;  %vm3315_vm10 = vcmp.gt.f32.partialorder %v3283_v49, 0.0  ;;  %v3347_v14 = vmul.f32 0.1, %v3283_v49  ;;  %v3241_v22 = vmul.f32 %v4324_v15, %v6194_v44  ;;  %v1841_v27 = vpop.f32.mrb[30].mxu1 }
 0x25a   : > { %vm3316_vm11 = vcmp.gt.f32.partialorder %v3284_v32, 0.0  ;;  %v3348_v20 = vmul.f32 0.1, %v3284_v32  ;;  %v3242_v35 = vmul.f32 %v4325_v9, %v6196_v21  ;;  %v3068_v40 = vpop.f32.mrb[30].mxu0  ;;  %v1843_v48 = vpop.f32.mrb[31].mxu1 }
 0x25b   : > { %v3379_v60 = vsel %vm3315_vm10, %v3283_v49, %v3347_v14  ;;  %v3285_v53 = vadd.f32 %v6198_v52, %v3241_v22  ;;  %v4326_v61 = vadd.f32 %v3068_v40, %v1841_v27  ;;  %v3070_v2 = vpop.f32.mrb[31].mxu0 }
 0x25c   : > { %3411 = vst [vmem:[%s4701_s30 + $0xd0] sm:$0xff] %v3379_v60  ;;  %v3380_v11 = vsel %vm3316_vm11, %v3284_v32, %v3348_v20  ;;  %v3286_v17 = vadd.f32 %v6200_v56, %v3242_v35  ;;  %v4327_v25 = vadd.f32 %v3070_v2, %v1843_v48 }
 0x25d   : > { %3412 = vst [vmem:[%s4701_s30 + $0xd8] sm:$0xff] %v3380_v11  ;;  %vm3317_vm12 = vcmp.gt.f32.partialorder %v3285_v53, 0.0  ;;  %v3349_v31 = vmul.f32 0.1, %v3285_v53  ;;  %v3243_v30 = vmul.f32 %v4326_v61, %v6194_v44 }
 0x25e   : > { %vm3318_vm13 = vcmp.gt.f32.partialorder %v3286_v17, 0.0  ;;  %v3350_v39 = vmul.f32 0.1, %v3286_v17  ;;  %v3244_v54 = vmul.f32 %v4327_v25, %v6196_v21 }
 0x25f   : > { %v3381_v36 = vsel %vm3317_vm12, %v3285_v53, %v3349_v31  ;;  %v3287_v57 = vadd.f32 %v6198_v52, %v3243_v30 }
 0x260   : > { %3413 = vst [vmem:[%s4701_s30 + $0xe0] sm:$0xff] %v3381_v36  ;;  %v3382_v34 = vsel %vm3318_vm13, %v3286_v17, %v3350_v39  ;;  %v3288_v62 = vadd.f32 %v6200_v56, %v3244_v54 }
 0x261   : > { %3414 = vst [vmem:[%s4701_s30 + $0xe8] sm:$0xff] %v3382_v34  ;;  %vm3319_vm14 = vcmp.gt.f32.partialorder %v3287_v57, 0.0  ;;  %v3351_v10 = vmul.f32 0.1, %v3287_v57 }
 0x262   : > { %vm3320_vm15 = vcmp.gt.f32.partialorder %v3288_v62, 0.0  ;;  %v3352_v47 = vmul.f32 0.1, %v3288_v62 }
 0x263   : > { %v3383_v59 = vsel %vm3319_vm14, %v3287_v57, %v3351_v10 }
 0x264   : > { %3415 = vst [vmem:[%s4701_s30 + $0xf0] sm:$0xff] %v3383_v59  ;;  %v3384_v44 = vsel %vm3320_vm15, %v3288_v62, %v3352_v47 }
 0x265   : > { %3416 = vst [vmem:[%s4701_s30 + $0xf8] sm:$0xff] %v3384_v44 }
 0x266 PF: > { %s14_s19 = sadd.s32 1, %s4633_s19   ;;  %s6326_s15 = smov %s4625_s17 }
 0x267   : > { %p11_p11 = scmp.ge.s32.totalorder %s14_s19, 6   ;;  %s6327_s16 = smov %s4629_s18 }
 0x268   : > { %s6328_s17 = smov %s6331_s20  ;;  %s6329_s18 = smov %s6335_s21 }
 0x269   :  { %13 = sbr.rel (!%p11_p11) target bundleno = 3 (0x3), region = 186 }
 0x270   :  { %3449 = vsyncmov [#allocation3] }
 0x273   :  { %s3450_s30 = vpop.sfrf %3449 }
 0x274   :  { %p3990_p12 = scmp.ne.s32.totalorder %s3450_s30, 0 }
 0x276   :  { %3454 = shalt.err (%p3990_p12)  }
 0x277   :  { %3456 = vsyncmov [#allocation3 + $0x1] }
 0x27a   :  { %s3457_s23 = vpop.sfrf %3456 }
 0x27b   :  { %p3991_p13 = scmp.ne.s32.totalorder %s3457_s23, 0 }
 0x27d   :  { %3461 = shalt.err (%p3991_p13)  }

// kernel: cca_forward.15
= control target key start
LH: loop header
LB: loop body
LE: loop exit
PB: predicated region body
PF: predicated region fallthrough
CT: control target
= control target key end

     0   :  { %s690_s9 = smov 0   ;;  %s692_s10 = smov 0   ;;  %s817_s0 = inlined_call_operand.vmem [shape: f32[2,256,128], index: 0, kind: input, shape index: {}]   ;;  %s818_s1 = inlined_call_operand.vmem [shape: f32[2,256,128], index: 1, kind: input, shape index: {}]   ;;  %s819_s2 = inlined_call_operand.vmem [shape: f32[2,256,256], index: 2, kind: output, shape index: {}]  }
   0x1   :  { %s694_s11 = smov 0   ;;  %s696_s12 = smov 0  }
   0x2   :  { %s698_s13 = smov 0  }
   0x3 LB: > { %s21_s14 = sadd.s32 1, %s665_s11  ;;  %s24_s15 = sadd.s32 1, %s669_s12  ;;  %s673_s13 = sphi %s698_s13, %s12_s13   ;;  %s669_s12 = sphi %s696_s12, %s823_s12   ;;  %s665_s11 = sphi %s694_s11, %s822_s11   ;;  %s661_s10 = sphi %s692_s10, %s821_s10   ;;  %s657_s9 = sphi %s690_s9, %s820_s9  }
   0x4   : > { %p22_p0 = scmp.ge.s32.totalorder %s21_s14, 4  ;;  %p486_p1 = scmp.ge.s32.totalorder %s673_s13, 1 }
   0x5   : > { %p143_p2 = scmp.lt.s32.totalorder %s673_s13, 9 }
   0x6   : > { %s825_s14 = smov (%p22_p0, %s21_s14), 0  ;;  %s827_s15 = smov (!%p22_p0, %s24_s15), %s669_s12 }
   0x7   : > { %p144_p3 = pnand %p486_p1, %p143_p2  ;;  %p26_p4 = scmp.ge.s32.totalorder %s827_s15, 2 }
   0x8   : > { %p179_p5 = scmp.lt.s32.totalorder (!%p144_p3), %s661_s10, 1  ;;  %s489_s16 = sshll.u32 (!%p144_p3), %s657_s9, 3 }
   0x9   : > { %s829_s15 = smov (%p26_p4, %s827_s15), 0  ;;  %147 = sbr.rel (%p144_p3) target bundleno = 312 (0x138), region = 28 }
   0xa   : > { %p187_p6 = scmp.lt.s32.totalorder (!%p144_p3), %s489_s16, 31 }
  0x10   : > { %s831_s10 = smov (!%p179_p5, %s661_s10), 1  ;;  %s833_s16 = smov (!%p187_p6, %s489_s16), 31 }
  0x11   : > { %s498_s17 = sshll.u32 %s831_s10, 8  ;;  %s490_s18 = sshll.u32 %s831_s10, 5 }
  0x12   : > { %s723_s21 = scalar_lea.vmem %s817_s0, %s498_s17  ;;  %s493_s22 = sshll.u32 %s833_s16, 1 }
  0x13   : > { %v229_v0 = vld [vmem:[%s723_s21 + $0x80] sm:$0xff]  ;;  %v230_v1 = vld [vmem:[%s723_s21 + $0x88] sm:$0xff]  ;;  %v231_v5 = vld [vmem:[%s723_s21 + $0x90] sm:$0xff]  ;;  %s190_s23 = sadd.s32 %s490_s18, %s833_s16  ;;  %s494_s24 = sshll.u32 %s831_s10, 6 }
  0x14   : > { %v213_v2 = vld [vmem:[%s723_s21] sm:$0xff]  ;;  %v547_v3 = vpack.c.bf16 %v230_v1, %v229_v0  ;;  %v214_v4 = vld [vmem:[%s723_s21 + $0x8] sm:$0xff]  ;;  %v232_v6 = vld [vmem:[%s723_s21 + $0x98] sm:$0xff]  ;;  %s731_s25 = sadd.s32 %s494_s24, %s493_s22  ;;  %s491_s26 = sshll.u32 %s190_s23, 3 }
  0x15   : > { %v549_v7 = vpack.c.bf16 %v214_v4, %v213_v2  ;;  %v551_v8 = vpack.c.bf16 %v232_v6, %v231_v5  ;;  %v215_v9 = vld [vmem:[%s723_s21 + $0x10] sm:$0xff]  ;;  %v216_v10 = vld [vmem:[%s723_s21 + $0x18] sm:$0xff]  ;;  %v233_v11 = vld [vmem:[%s723_s21 + $0xa0] sm:$0xff]  ;;  %s740_s29 = scalar_lea.vmem %s818_s1, %s491_s26  ;;  %s495_s30 = sshll.u32 %s731_s25, 3 }
  0x16   : > { %548 = vmatprep.subr.bf16.mxu0 %v547_v3  ;;  %579 = vmatprep.subr.bf16.mxu1 %v547_v3  ;;  %v234_v12 = vld [vmem:[%s723_s21 + $0xa8] sm:$0xff]  ;;  %v553_v13 = vpack.c.bf16 %v216_v10, %v215_v9  ;;  %v743_v15 = vld [vmem:[%s740_s29] sm:$0xff]  ;;  %v235_v19 = vld [vmem:[%s723_s21 + $0xb0] sm:$0xff]  ;;  %s784_s5 = scalar_lea.vmem %s819_s2, %s495_s30 }
  0x17   : > { %550 = vmatpush3.bf16.xpose.msra.mxu0 %v549_v7  ;;  %587 = vmatpush3.bf16.xpose.msra.mxu1 %v549_v7  ;;  %v555_v14 = vpack.c.bf16 %v234_v12, %v233_v11  ;;  %v747_v16 = vld [vmem:[%s740_s29 + $0x20] sm:$0xff]  ;;  %v218_v18 = vld [vmem:[%s723_s21 + $0x28] sm:$0xff]  ;;  %v236_v20 = vld [vmem:[%s723_s21 + $0xb8] sm:$0xff] }
  0x18   : > { %552 = vmatprep.subr.bf16.mxu0 %v551_v8  ;;  %580 = vmatprep.subr.bf16.mxu1 %v551_v8  ;;  %v217_v17 = vld [vmem:[%s723_s21 + $0x20] sm:$0xff]  ;;  %v559_v22 = vpack.c.bf16 %v236_v20, %v235_v19  ;;  %v219_v23 = vld [vmem:[%s723_s21 + $0x30] sm:$0xff]  ;;  %v220_v24 = vld [vmem:[%s723_s21 + $0x38] sm:$0xff] }
  0x19   : > { %531 = vmatprep.mubr.f32.mxu0 %v743_v15  ;;  %539 = vmatprep.mubr.f32.mxu1 %v747_v16  ;;  %v557_v21 = vpack.c.bf16 %v218_v18, %v217_v17  ;;  %v237_v25 = vld [vmem:[%s723_s21 + $0xc0] sm:$0xff]  ;;  %v238_v26 = vld [vmem:[%s723_s21 + $0xc8] sm:$0xff]  ;;  %v561_v27 = vpack.c.bf16 %v220_v24, %v219_v23  ;;  %v239_v31 = vld [vmem:[%s723_s21 + $0xd0] sm:$0xff] }
  0x1a   : > { %v563_v28 = vpack.c.bf16 %v238_v26, %v237_v25  ;;  %v221_v29 = vld [vmem:[%s723_s21 + $0x40] sm:$0xff]  ;;  %v222_v30 = vld [vmem:[%s723_s21 + $0x48] sm:$0xff]  ;;  %v240_v32 = vld [vmem:[%s723_s21 + $0xd8] sm:$0xff] }
  0x1b   : > { %v565_v33 = vpack.c.bf16 %v222_v30, %v221_v29  ;;  %v567_v34 = vpack.c.bf16 %v240_v32, %v239_v31  ;;  %v223_v35 = vld [vmem:[%s723_s21 + $0x50] sm:$0xff]  ;;  %v224_v36 = vld [vmem:[%s723_s21 + $0x58] sm:$0xff]  ;;  %v241_v37 = vld [vmem:[%s723_s21 + $0xe0] sm:$0xff] }
  0x1c   : > { %v242_v38 = vld [vmem:[%s723_s21 + $0xe8] sm:$0xff]  ;;  %v569_v39 = vpack.c.bf16 %v224_v36, %v223_v35  ;;  %v225_v41 = vld [vmem:[%s723_s21 + $0x60] sm:$0xff]  ;;  %v243_v43 = vld [vmem:[%s723_s21 + $0xf0] sm:$0xff] }
  0x1d   : > { %v571_v40 = vpack.c.bf16 %v242_v38, %v241_v37  ;;  %v226_v42 = vld [vmem:[%s723_s21 + $0x68] sm:$0xff]  ;;  %v244_v44 = vld [vmem:[%s723_s21 + $0xf8] sm:$0xff]  ;;  %v227_v47 = vld [vmem:[%s723_s21 + $0x70] sm:$0xff] }
  0x1e   : > { %v573_v45 = vpack.c.bf16 %v226_v42, %v225_v41  ;;  %v575_v46 = vpack.c.bf16 %v244_v44, %v243_v43  ;;  %v228_v48 = vld [vmem:[%s723_s21 + $0x78] sm:$0xff]  ;;  %v206_v50 = vld [vmem:[%s740_s29 + $0x8] sm:$0xff]  ;;  %v207_v52 = vld [vmem:[%s740_s29 + $0x10] sm:$0xff] }
  0x1f   : > { %554 = vmatpush3.bf16.xpose.msra.mxu0 %v553_v13  ;;  %588 = vmatpush3.bf16.xpose.msra.mxu1 %v553_v13  ;;  %v577_v49 = vpack.c.bf16 %v228_v48, %v227_v47  ;;  %v210_v51 = vld [vmem:[%s740_s29 + $0x28] sm:$0xff]  ;;  %v211_v53 = vld [vmem:[%s740_s29 + $0x30] sm:$0xff]  ;;  %v208_v54 = vld [vmem:[%s740_s29 + $0x18] sm:$0xff] }
  0x20   : > { %556 = vmatprep.subr.bf16.mxu0 %v555_v14  ;;  %581 = vmatprep.subr.bf16.mxu1 %v555_v14  ;;  %v212_v55 = vld [vmem:[%s740_s29 + $0x38] sm:$0xff] }
  0x27   : > { %558 = vmatpush3.bf16.xpose.msra.mxu0 %v557_v21  ;;  %589 = vmatpush3.bf16.xpose.msra.mxu1 %v557_v21 }
  0x28   : > { %560 = vmatprep.subr.bf16.mxu0 %v559_v22  ;;  %582 = vmatprep.subr.bf16.mxu1 %v559_v22 }
  0x2f   : > { %562 = vmatpush3.bf16.xpose.msra.mxu0 %v561_v27  ;;  %590 = vmatpush3.bf16.xpose.msra.mxu1 %v561_v27 }
  0x30   : > { %564 = vmatprep.subr.bf16.mxu0 %v563_v28  ;;  %583 = vmatprep.subr.bf16.mxu1 %v563_v28 }
  0x37   : > { %566 = vmatpush3.bf16.xpose.msra.mxu0 %v565_v33  ;;  %591 = vmatpush3.bf16.xpose.msra.mxu1 %v565_v33 }
  0x38   : > { %568 = vmatprep.subr.bf16.mxu0 %v567_v34  ;;  %584 = vmatprep.subr.bf16.mxu1 %v567_v34 }
  0x3f   : > { %570 = vmatpush3.bf16.xpose.msra.mxu0 %v569_v39  ;;  %592 = vmatpush3.bf16.xpose.msra.mxu1 %v569_v39 }
  0x40   : > { %572 = vmatprep.subr.bf16.mxu0 %v571_v40  ;;  %585 = vmatprep.subr.bf16.mxu1 %v571_v40 }
  0x47   : > { %574 = vmatpush3.bf16.xpose.msra.mxu0 %v573_v45  ;;  %593 = vmatpush3.bf16.xpose.msra.mxu1 %v573_v45 }
  0x48   : > { %576 = vmatprep.subr.bf16.mxu0 %v575_v46  ;;  %586 = vmatprep.subr.bf16.mxu1 %v575_v46 }
  0x4f   : > { %578 = vmatpush3.bf16.xpose.msra.mxu0 %v577_v49  ;;  %594 = vmatpush3.bf16.xpose.msra.mxu1 %v577_v49 }
  0x56   : > { %532 = vmatmul.mubr.f32.vlgmr.msra.gmra.mrb[0].mxu0 %v743_v15  ;;  %540 = vmatmul.mubr.f32.vlgmr.msra.gmra.mrb[0].mxu1 %v747_v16 }
  0x57   : > { %533 = vmatprep.mubr.f32.mxu0 %v206_v50  ;;  %541 = vmatprep.mubr.f32.mxu1 %v210_v51 }
  0x5a   : > { %534 = vmatmul.mubr.f32.gmra.mrb[2].mxu0 %v206_v50  ;;  %542 = vmatmul.mubr.f32.gmra.mrb[2].mxu1 %v210_v51 }
  0x5b   : > { %535 = vmatprep.mubr.f32.mxu0 %v207_v52  ;;  %543 = vmatprep.mubr.f32.mxu1 %v211_v53 }
  0x5e   : > { %536 = vmatmul.mubr.f32.gmra.mrb[4].mxu0 %v207_v52  ;;  %544 = vmatmul.mubr.f32.gmra.mrb[4].mxu1 %v211_v53 }
  0x5f   : > { %537 = vmatprep.mubr.f32.mxu0 %v208_v54  ;;  %545 = vmatprep.mubr.f32.mxu1 %v212_v55 }
  0x62   : > { %538 = vmatmul.mubr.f32.gmra.mrb[6].mxu0 %v208_v54  ;;  %546 = vmatmul.mubr.f32.gmra.mrb[6].mxu1 %v212_v55 }
 0x129   : > { %v311_v56 = vpop.f32.mrb[0].mxu0  ;;  %v335_v57 = vpop.f32.mrb[0].mxu1 }
 0x12a   : > { %358 = vst [vmem:[%s784_s5] sm:$0xff] %v311_v56  ;;  %366 = vst [vmem:[%s784_s5 + $0x40] sm:$0xff] %v335_v57  ;;  %v313_v58 = vpop.f32.mrb[1].mxu0  ;;  %v337_v59 = vpop.f32.mrb[1].mxu1 }
 0x12b   : > { %359 = vst [vmem:[%s784_s5 + $0x8] sm:$0xff] %v313_v58  ;;  %367 = vst [vmem:[%s784_s5 + $0x48] sm:$0xff] %v337_v59 }
 0x12d   : > { %v317_v60 = vpop.f32.mrb[2].mxu0  ;;  %v341_v61 = vpop.f32.mrb[2].mxu1 }
 0x12e   : > { %360 = vst [vmem:[%s784_s5 + $0x10] sm:$0xff] %v317_v60  ;;  %368 = vst [vmem:[%s784_s5 + $0x50] sm:$0xff] %v341_v61  ;;  %v319_v62 = vpop.f32.mrb[3].mxu0  ;;  %v343_v63 = vpop.f32.mrb[3].mxu1 }
 0x12f   : > { %361 = vst [vmem:[%s784_s5 + $0x18] sm:$0xff] %v319_v62  ;;  %369 = vst [vmem:[%s784_s5 + $0x58] sm:$0xff] %v343_v63 }
 0x131   : > { %v323_v0 = vpop.f32.mrb[4].mxu0  ;;  %v347_v1 = vpop.f32.mrb[4].mxu1 }
 0x132   : > { %362 = vst [vmem:[%s784_s5 + $0x20] sm:$0xff] %v323_v0  ;;  %370 = vst [vmem:[%s784_s5 + $0x60] sm:$0xff] %v347_v1  ;;  %v325_v2 = vpop.f32.mrb[5].mxu0  ;;  %v349_v3 = vpop.f32.mrb[5].mxu1 }
 0x133   : > { %363 = vst [vmem:[%s784_s5 + $0x28] sm:$0xff] %v325_v2  ;;  %371 = vst [vmem:[%s784_s5 + $0x68] sm:$0xff] %v349_v3 }
 0x135   : > { %v329_v4 = vpop.f32.mrb[6].mxu0  ;;  %v353_v5 = vpop.f32.mrb[6].mxu1 }
 0x136   : > { %364 = vst [vmem:[%s784_s5 + $0x30] sm:$0xff] %v329_v4  ;;  %372 = vst [vmem:[%s784_s5 + $0x70] sm:$0xff] %v353_v5  ;;  %v331_v6 = vpop.f32.mrb[7].mxu0  ;;  %v355_v7 = vpop.f32.mrb[7].mxu1 }
 0x137   : > { %365 = vst [vmem:[%s784_s5 + $0x38] sm:$0xff] %v331_v6  ;;  %373 = vst [vmem:[%s784_s5 + $0x78] sm:$0xff] %v355_v7 }
 0x138 PF: > { %s12_s13 = sadd.s32 1, %s673_s13   ;;  %s820_s9 = smov %s665_s11 }
 0x139   : > { %p9_p7 = scmp.ge.s32.totalorder %s12_s13, 10   ;;  %s821_s10 = smov %s669_s12 }
 0x13a   : > { %s822_s11 = smov %s825_s14  ;;  %s823_s12 = smov %s829_s15 }
 0x13b   :  { %11 = sbr.rel (!%p9_p7) target bundleno = 3 (0x3), region = 61 }

// kernel: cca_forward.17
= control target key start
LH: loop header
LB: loop body
LE: loop exit
PB: predicated region body
PF: predicated region fallthrough
CT: control target
= control target key end

     0   :  { %s6490_s0 = inlined_call_operand.vmem [shape: f32[2,18,18,128], index: 0, kind: input, shape index: {}]   ;;  %s6491_s1 = inlined_call_operand.vmem [shape: f32[3,3,128,256], index: 1, kind: input, shape index: {}]   ;;  %s6492_s2 = inlined_call_operand.vmem [shape: f32[1,256], index: 2, kind: input, shape index: {}]   ;;  %s6493_s3 = inlined_call_operand.vmem [shape: f32[1,256], index: 3, kind: input, shape index: {}]   ;;  %s6494_s4 = inlined_call_operand.hbm [shape: f32[2,256,256], index: 4, kind: output, shape index: {}]  }
   0x1   :  { %6496 = sst [smem:[#allocation11_spill]] %s6490_s0 }
   0x2   :  { %9 = vsyncpa [#allocation6], 0 }
   0x3   :  { %11 = vsyncpa [#allocation6 + $0x1], 0  ;;  %s4747_s15 = smov 0   ;;  %s4749_s16 = smov 0  }
   0x4   :  { %s4751_s17 = smov 0   ;;  %s4753_s18 = smov 0  }
   0x5   :  { %s4755_s19 = smov 0   ;;  %s4757_s20 = smov 0  }
   0x6   :  { %s4759_s21 = smov 0   ;;  %s4761_s22 = smov 0  }
   0x7 LB: > { %s3549_s23 = sadd.s32 4294967295, %s4716_s22   ;;  %s3550_s24 = sadd.s32 4294967294, %s4716_s22   ;;  %s4716_s22 = sphi %s4761_s22, %s17_s22   ;;  %s4712_s21 = sphi %s4759_s21, %s6508_s21   ;;  %s4708_s20 = sphi %s4757_s20, %s6507_s20   ;;  %s4704_s19 = sphi %s4755_s19, %s6506_s19   ;;  %s4700_s18 = sphi %s4753_s18, %s6505_s18   ;;  %s4696_s17 = sphi %s4751_s17, %s6504_s17   ;;  %s4692_s16 = sphi %s4749_s16, %s6503_s16   ;;  %s4688_s15 = sphi %s4747_s15, %s6502_s15  }
   0x8   : > { %s26_s25 = sadd.s32 1, %s4708_s20  ;;  %s29_s26 = sadd.s32 1, %s4712_s21 }
   0x9   : > { %p27_p0 = scmp.ge.s32.totalorder %s26_s25, 2  ;;  %p111_p1 = scmp.ne.s32.totalorder %s4696_s17, %s4692_s16 }
   0xa   : > { %p112_p2 = scmp.eq.s32.totalorder %s3549_s23, 3  ;;  %p117_p5 = scmp.ne.s32.totalorder %s4692_s16, %s4688_s15 }
   0xb   : > { %s6510_s25 = smov (%p27_p0, %s26_s25), 0  ;;  %s6512_s26 = smov (!%p27_p0, %s29_s26), %s4712_s21 }
   0xc   : > { %s97_s27 = ssub.s32 %s4708_s20, %s6510_s25  ;;  %p4798_p3 = por %p112_p2, %p111_p1 }
   0xd   : > { %p31_p4 = scmp.ge.s32.totalorder %s6512_s26, 2  ;;  %p118_p6 = scmp.eq.s32.totalorder %s3550_s24, 3 }
   0xe   : > { %p3552_p7 = scmp.ge.s32.totalorder %s4716_s22, 1  ;;  %p145_p9 = scmp.lt.s32.totalorder %s4716_s22, 5 }
   0xf   : > { %s6514_s26 = smov (%p31_p4, %s6512_s26), 0  ;;  %p4807_p8 = por %p118_p6, %p117_p5 }
  0x10   : > { %s96_s30 = ssub.s32 %s4712_s21, %s6514_s26  ;;  %s101_s5 = sadd.s32 1, %s4696_s17 }
  0x11   : > { %s98_s6 = sor.u32 %s97_s27, %s96_s30  ;;  %p146_p10 = pnand %p3552_p7, %p145_p9 }
  0x12   : > { %p99_p11 = scmp.eq.s32.totalorder %s98_s6, 0  ;;  %s6495_s8 = sand.u32 (!%p146_p10), 1, %s4692_s16  }
  0x13   : > { %149 = sbr.rel (%p146_p10) target bundleno = 642 (0x282), region = 32  ;;  %s3553_s9 = sshll.u32 (!%p146_p10), %s6495_s8, 8 }
  0x14   : > { %s4816_s7 = scalar_select %p99_p11, %s4696_s17, %s101_s5  }
  0x15   : > { %s4821_s10 = scalar_lea.vmem (!%p146_p10), [#allocation5], %s3553_s9  ;;  %p3554_p12 = scmp.ne.s32.totalorder (!%p146_p10), %s4700_s18, 0 }
  0x1a   : > { %168 = sbr.rel (%p3554_p12) target bundleno = 51 (0x33), region = 36  ;;  %s6499_s0 = sld [smem:[#allocation11_spill]] (!%p3554_p12) }
  0x1b   : > { %s169_s11 = smul.u32 (!%p3554_p12), 432, %s4704_s19 }
  0x20   : > { %s4828_s14 = scalar_lea.vmem (!%p3554_p12), %s6499_s0, %s169_s11 }
  0x21   : > { %v226_v0 = vld [vmem:[%s4828_s14] sm:$0xff]  ;;  %v228_v1 = vld [vmem:[%s4828_s14 + $0x8] sm:$0xff]  ;;  %v230_v2 = vld [vmem:[%s4828_s14 + $0x18] sm:$0xff] }
  0x22   : > { %227 = vst [vmem:[#allocation2] sm:$0xff] %v226_v0  ;;  %229 = vst [vmem:[#allocation2 + $0x8] sm:$0xff] %v228_v1  ;;  %v232_v3 = vld [vmem:[%s4828_s14 + $0x20] sm:$0xff]  ;;  %v234_v4 = vld [vmem:[%s4828_s14 + $0x30] sm:$0xff] }
  0x23   : > { %231 = vst [vmem:[#allocation2 + $0x18] sm:$0xff] %v230_v2  ;;  %v236_v5 = vld [vmem:[%s4828_s14 + $0x38] sm:$0xff]  ;;  %233 = vst [vmem:[#allocation2 + $0x20] sm:$0xff] %v232_v3  ;;  %v238_v6 = vld [vmem:[%s4828_s14 + $0x48] sm:$0xff] }
  0x24   : > { %235 = vst [vmem:[#allocation2 + $0x30] sm:$0xff] %v234_v4  ;;  %237 = vst [vmem:[#allocation2 + $0x38] sm:$0xff] %v236_v5  ;;  %v240_v7 = vld [vmem:[%s4828_s14 + $0x50] sm:$0xff]  ;;  %v242_v8 = vld [vmem:[%s4828_s14 + $0x60] sm:$0xff] }
  0x25   : > { %239 = vst [vmem:[#allocation2 + $0x48] sm:$0xff] %v238_v6  ;;  %241 = vst [vmem:[#allocation2 + $0x50] sm:$0xff] %v240_v7  ;;  %v244_v9 = vld [vmem:[%s4828_s14 + $0x68] sm:$0xff]  ;;  %v246_v10 = vld [vmem:[%s4828_s14 + $0x78] sm:$0xff] }
  0x26   : > { %243 = vst [vmem:[#allocation2 + $0x60] sm:$0xff] %v242_v8  ;;  %v248_v11 = vld [vmem:[%s4828_s14 + $0x80] sm:$0xff]  ;;  %245 = vst [vmem:[#allocation2 + $0x68] sm:$0xff] %v244_v9  ;;  %v250_v12 = vld [vmem:[%s4828_s14 + $0x90] sm:$0xff] }
  0x27   : > { %247 = vst [vmem:[#allocation2 + $0x78] sm:$0xff] %v246_v10  ;;  %249 = vst [vmem:[#allocation2 + $0x80] sm:$0xff] %v248_v11  ;;  %v252_v13 = vld [vmem:[%s4828_s14 + $0x98] sm:$0xff]  ;;  %v254_v14 = vld [vmem:[%s4828_s14 + $0xa8] sm:$0xff] }
  0x28   : > { %251 = vst [vmem:[#allocation2 + $0x90] sm:$0xff] %v250_v12  ;;  %253 = vst [vmem:[#allocation2 + $0x98] sm:$0xff] %v252_v13  ;;  %v256_v15 = vld [vmem:[%s4828_s14 + $0xb0] sm:$0xff]  ;;  %v258_v16 = vld [vmem:[%s4828_s14 + $0xc0] sm:$0xff] }
  0x29   : > { %255 = vst [vmem:[#allocation2 + $0xa8] sm:$0xff] %v254_v14  ;;  %v260_v17 = vld [vmem:[%s4828_s14 + $0xc8] sm:$0xff]  ;;  %257 = vst [vmem:[#allocation2 + $0xb0] sm:$0xff] %v256_v15  ;;  %v262_v18 = vld [vmem:[%s4828_s14 + $0xd8] sm:$0xff] }
  0x2a   : > { %259 = vst [vmem:[#allocation2 + $0xc0] sm:$0xff] %v258_v16  ;;  %261 = vst [vmem:[#allocation2 + $0xc8] sm:$0xff] %v260_v17  ;;  %v264_v19 = vld [vmem:[%s4828_s14 + $0xe0] sm:$0xff]  ;;  %v3555_v20 = vld [vmem:[%s4828_s14 + $0x10] sm:$0x3] }
  0x2b   : > { %263 = vst [vmem:[#allocation2 + $0xd8] sm:$0xff] %v262_v18  ;;  %265 = vst [vmem:[#allocation2 + $0xe0] sm:$0xff] %v264_v19  ;;  %v3556_v21 = vld [vmem:[%s4828_s14 + $0x28] sm:$0x3]  ;;  %v3557_v22 = vld [vmem:[%s4828_s14 + $0x40] sm:$0x3] }
  0x2c   : > { %276 = vst [vmem:[#allocation2 + $0x10] sm:$0x3] %v3555_v20  ;;  %v3558_v23 = vld [vmem:[%s4828_s14 + $0x58] sm:$0x3]  ;;  %278 = vst [vmem:[#allocation2 + $0x28] sm:$0x3] %v3556_v21 }
  0x2d   : > { %280 = vst [vmem:[#allocation2 + $0x40] sm:$0x3] %v3557_v22  ;;  %282 = vst [vmem:[#allocation2 + $0x58] sm:$0x3] %v3558_v23  ;;  %v3559_v24 = vld [vmem:[%s4828_s14 + $0x70] sm:$0x3] }
  0x2e   : > { %v3560_v25 = vld [vmem:[%s4828_s14 + $0x88] sm:$0x3]  ;;  %v3561_v26 = vld [vmem:[%s4828_s14 + $0xa0] sm:$0x3]  ;;  %284 = vst [vmem:[#allocation2 + $0x70] sm:$0x3] %v3559_v24 }
  0x2f   : > { %286 = vst [vmem:[#allocation2 + $0x88] sm:$0x3] %v3560_v25  ;;  %288 = vst [vmem:[#allocation2 + $0xa0] sm:$0x3] %v3561_v26  ;;  %v3562_v27 = vld [vmem:[%s4828_s14 + $0xb8] sm:$0x3] }
  0x30   : > { %v3563_v28 = vld [vmem:[%s4828_s14 + $0xd0] sm:$0x3]  ;;  %v3564_v29 = vld [vmem:[%s4828_s14 + $0xe8] sm:$0x3]  ;;  %290 = vst [vmem:[#allocation2 + $0xb8] sm:$0x3] %v3562_v27 }
  0x31   : > { %292 = vst [vmem:[#allocation2 + $0xd0] sm:$0x3] %v3563_v28  ;;  %294 = vst [vmem:[#allocation2 + $0xe8] sm:$0x3] %v3564_v29 }
  0x32   : > { %298 = vsyncadd [#allocation3], 2880 }
  0x33 PF: > { %p299_p13 = scmp.lt.s32.totalorder %s4700_s18, 0  ;;  %s300_s23 = ssub.s32 0, %s4700_s18 }
  0x34   : > { %s3565_s24 = smin.u32 %s4700_s18, %s300_s23  ;;  %s311_s27 = sadd.s32 1, %s4700_s18 }
  0x35   : > { %s302_s30 = sand.u32 1, %s3565_s24   ;;  %p3568_p1 = scmp.ge.s32.totalorder %s311_s27, 2 }
  0x36   : > { %s303_s5 = ssub.s32 0, %s302_s30  ;;  %s3466_s11 = smul.u32 (!%p3568_p1), 192, %s4700_s18 }
  0x37   : > { %s6516_s5 = smov (!%p299_p13, %s303_s5), %s302_s30  ;;  %315 = sbr.rel (%p3568_p1) target bundleno = 82 (0x52), region = 77 }
  0x38   : > { %p3567_p0 = scmp.lt.s32.totalorder %s6516_s5, 0  ;;  %s309_s6 = sadd.s32 2, %s6516_s5 }
  0x39   : > { %s3467_s12 = smul.u32 (!%p3568_p1), 432, %s4704_s19  ;;  %s6500_s0 = sld [smem:[#allocation11_spill]] (!%p3568_p1) }
  0x3a   : > { %s6518_s6 = smov (!%p3567_p0, %s309_s6), %s6516_s5 }
  0x3b   : > { %s316_s9 = ssub.s32 (!%p3568_p1), 1, %s6518_s6  ;;  %s3468_s14 = sadd.s32 (!%p3568_p1), %s3467_s12, %s3466_s11 }
  0x3c   : > { %s3569_s13 = smul.u32 (!%p3568_p1), 240, %s316_s9  ;;  %s325_s5 = scalar_lea.sflag (!%p3568_p1), [#allocation3], %s316_s9 }
  0x3e   : > { %s4879_s27 = scalar_lea.vmem [#allocation2], %s3569_s13 }
  0x3f   : > { %s4874_s30 = scalar_lea.vmem %s6500_s0, %s3468_s14 }
  0x40   : > { %v3571_v30 = vld [vmem:[%s4874_s30 + $0xc0] sm:$0xff]  ;;  %v3572_v31 = vld [vmem:[%s4874_s30 + $0xc8] sm:$0xff]  ;;  %v3573_v32 = vld [vmem:[%s4874_s30 + $0xd8] sm:$0xff] }
  0x41   : > { %382 = vst [vmem:[%s4879_s27] sm:$0xff] %v3571_v30  ;;  %384 = vst [vmem:[%s4879_s27 + $0x8] sm:$0xff] %v3572_v31  ;;  %v3574_v33 = vld [vmem:[%s4874_s30 + $0xe0] sm:$0xff]  ;;  %v3575_v34 = vld [vmem:[%s4874_s30 + $0xf0] sm:$0xff] }
  0x42   : > { %386 = vst [vmem:[%s4879_s27 + $0x18] sm:$0xff] %v3573_v32  ;;  %v3576_v35 = vld [vmem:[%s4874_s30 + $0xf8] sm:$0xff]  ;;  %388 = vst [vmem:[%s4879_s27 + $0x20] sm:$0xff] %v3574_v33  ;;  %v3577_v36 = vld [vmem:[%s4874_s30 + $0x108] sm:$0xff] }
  0x43   : > { %390 = vst [vmem:[%s4879_s27 + $0x30] sm:$0xff] %v3575_v34  ;;  %392 = vst [vmem:[%s4879_s27 + $0x38] sm:$0xff] %v3576_v35  ;;  %v3578_v37 = vld [vmem:[%s4874_s30 + $0x110] sm:$0xff]  ;;  %v3579_v38 = vld [vmem:[%s4874_s30 + $0x120] sm:$0xff] }
  0x44   : > { %394 = vst [vmem:[%s4879_s27 + $0x48] sm:$0xff] %v3577_v36  ;;  %396 = vst [vmem:[%s4879_s27 + $0x50] sm:$0xff] %v3578_v37  ;;  %v3580_v39 = vld [vmem:[%s4874_s30 + $0x128] sm:$0xff]  ;;  %v3581_v40 = vld [vmem:[%s4874_s30 + $0x138] sm:$0xff] }
  0x45   : > { %398 = vst [vmem:[%s4879_s27 + $0x60] sm:$0xff] %v3579_v38  ;;  %v3582_v41 = vld [vmem:[%s4874_s30 + $0x140] sm:$0xff]  ;;  %400 = vst [vmem:[%s4879_s27 + $0x68] sm:$0xff] %v3580_v39  ;;  %v3583_v42 = vld [vmem:[%s4874_s30 + $0x150] sm:$0xff] }
  0x46   : > { %402 = vst [vmem:[%s4879_s27 + $0x78] sm:$0xff] %v3581_v40  ;;  %404 = vst [vmem:[%s4879_s27 + $0x80] sm:$0xff] %v3582_v41  ;;  %v3584_v43 = vld [vmem:[%s4874_s30 + $0x158] sm:$0xff]  ;;  %v3585_v44 = vld [vmem:[%s4874_s30 + $0x168] sm:$0xff] }
  0x47   : > { %406 = vst [vmem:[%s4879_s27 + $0x90] sm:$0xff] %v3583_v42  ;;  %408 = vst [vmem:[%s4879_s27 + $0x98] sm:$0xff] %v3584_v43  ;;  %v3586_v45 = vld [vmem:[%s4874_s30 + $0x170] sm:$0xff]  ;;  %v3587_v46 = vld [vmem:[%s4874_s30 + $0x180] sm:$0xff] }
  0x48   : > { %410 = vst [vmem:[%s4879_s27 + $0xa8] sm:$0xff] %v3585_v44  ;;  %v3588_v47 = vld [vmem:[%s4874_s30 + $0x188] sm:$0xff]  ;;  %412 = vst [vmem:[%s4879_s27 + $0xb0] sm:$0xff] %v3586_v45  ;;  %v3589_v48 = vld [vmem:[%s4874_s30 + $0x198] sm:$0xff] }
  0x49   : > { %414 = vst [vmem:[%s4879_s27 + $0xc0] sm:$0xff] %v3587_v46  ;;  %416 = vst [vmem:[%s4879_s27 + $0xc8] sm:$0xff] %v3588_v47  ;;  %v3590_v49 = vld [vmem:[%s4874_s30 + $0x1a0] sm:$0xff]  ;;  %v3591_v50 = vld [vmem:[%s4874_s30 + $0xd0] sm:$0x3] }
  0x4a   : > { %418 = vst [vmem:[%s4879_s27 + $0xd8] sm:$0xff] %v3589_v48  ;;  %420 = vst [vmem:[%s4879_s27 + $0xe0] sm:$0xff] %v3590_v49  ;;  %v3593_v51 = vld [vmem:[%s4874_s30 + $0xe8] sm:$0x3]  ;;  %v3595_v52 = vld [vmem:[%s4874_s30 + $0x100] sm:$0x3] }
  0x4b   : > { %3592 = vst [vmem:[%s4879_s27 + $0x10] sm:$0x3] %v3591_v50  ;;  %v3597_v53 = vld [vmem:[%s4874_s30 + $0x118] sm:$0x3]  ;;  %3594 = vst [vmem:[%s4879_s27 + $0x28] sm:$0x3] %v3593_v51 }
  0x4c   : > { %3596 = vst [vmem:[%s4879_s27 + $0x40] sm:$0x3] %v3595_v52  ;;  %3598 = vst [vmem:[%s4879_s27 + $0x58] sm:$0x3] %v3597_v53  ;;  %v3599_v54 = vld [vmem:[%s4874_s30 + $0x130] sm:$0x3] }
  0x4d   : > { %v3601_v55 = vld [vmem:[%s4874_s30 + $0x148] sm:$0x3]  ;;  %v3603_v56 = vld [vmem:[%s4874_s30 + $0x160] sm:$0x3]  ;;  %3600 = vst [vmem:[%s4879_s27 + $0x70] sm:$0x3] %v3599_v54 }
  0x4e   : > { %3602 = vst [vmem:[%s4879_s27 + $0x88] sm:$0x3] %v3601_v55  ;;  %3604 = vst [vmem:[%s4879_s27 + $0xa0] sm:$0x3] %v3603_v56  ;;  %v3605_v57 = vld [vmem:[%s4874_s30 + $0x178] sm:$0x3] }
  0x4f   : > { %v3607_v58 = vld [vmem:[%s4874_s30 + $0x190] sm:$0x3]  ;;  %v3609_v59 = vld [vmem:[%s4874_s30 + $0x1a8] sm:$0x3]  ;;  %3606 = vst [vmem:[%s4879_s27 + $0xb8] sm:$0x3] %v3605_v57 }
  0x50   : > { %3608 = vst [vmem:[%s4879_s27 + $0xd0] sm:$0x3] %v3607_v58  ;;  %3610 = vst [vmem:[%s4879_s27 + $0xe8] sm:$0x3] %v3609_v59 }
  0x51   : > { %453 = vsyncadd %s325_s5, 2880 }
  0x52 PF: > { %s455_s11 = scalar_lea.sflag [#allocation3], %s6518_s6 }
  0x53   : > { %4680 = dma.done.wait %s455_s11, 2880 }
  0x54   : > { %4681 = vsyncadd %s455_s11, 4294964416  ;;  %v4718_v60 = vmov 0.0   ;;  %v479_v61 = vld [vmem:[%s6491_s1 + $0x8] sm:$0xff]  ;;  %v481_v62 = vld [vmem:[%s6491_s1 + $0x18] sm:$0xff]  ;;  %s3621_s0 = smul.u32 240, %s6518_s6  ;;  %s3985_s27 = sshll.u32 %s4700_s18, 5 }
  0x55   : > { %574 = vmatprep.mubr.f32.mxu1 %v4718_v60  ;;  %1737 = vmatprep.mubr.f32.mxu0 %v4718_v60  ;;  %v3752_v63 = vld [vmem:[%s6491_s1 + $0x408] sm:$0xff]  ;;  %v3986_v0 = vpack.c.bf16 %v481_v62, %v479_v61  ;;  %v3754_v1 = vld [vmem:[%s6491_s1 + $0x418] sm:$0xff]  ;;  %v478_v2 = vld [vmem:[%s6491_s1] sm:$0xff]  ;;  %s3979_s11 = sshll.u32 %s4704_s19, 6  ;;  %s3422_s12 = sshll.u32 %s4821_s10, 4  ;;  %s6432_s12 = int_to_ptr.vmem [resolvable:$true] %s3422_s12 }
  0x56   : > { %v480_v3 = vld [vmem:[%s6491_s1 + $0x10] sm:$0xff]  ;;  %v4961_v4 = vpack.c.bf16 %v3754_v1, %v3752_v63  ;;  %v3751_v6 = vld [vmem:[%s6491_s1 + $0x400] sm:$0xff]  ;;  %v483_v8 = vld [vmem:[%s6491_s1 + $0x28] sm:$0xff]  ;;  %s5213_s5 = scalar_lea.vmem [#allocation2], %s3621_s0  ;;  %s3419_s18 = sadd.s32 %s3985_s27, %s3979_s11 }
  0x57   : > { %v3988_v5 = vpack.c.bf16 %v480_v3, %v478_v2  ;;  %v3753_v7 = vld [vmem:[%s6491_s1 + $0x410] sm:$0xff]  ;;  %3987 = vmatprep.subr.bf16.mxu1 %v3986_v0  ;;  %v485_v10 = vld [vmem:[%s6491_s1 + $0x38] sm:$0xff]  ;;  %v3756_v11 = vld [vmem:[%s6491_s1 + $0x428] sm:$0xff]  ;;  %s3980_s19 = sshll.u32 %s3419_s18, 7  ;;  %s6501_s23 = sand.u32 1, %s4692_s16  }
  0x58   : > { %v4972_v9 = vpack.c.bf16 %v3753_v7, %v3751_v6  ;;  %v3758_v12 = vld [vmem:[%s6491_s1 + $0x438] sm:$0xff]  ;;  %4115 = vmatprep.subr.bf16.mxu0 %v4961_v4  ;;  %v3990_v13 = vpack.c.bf16 %v485_v10, %v483_v8  ;;  %v482_v15 = vld [vmem:[%s6491_s1 + $0x20] sm:$0xff]  ;;  %v484_v16 = vld [vmem:[%s6491_s1 + $0x30] sm:$0xff]  ;;  %s6430_s0 = scalar_lea.hbm %s6494_s4, %s3980_s19  ;;  %s6438_s9 = scalar_lea.sflag [#allocation6], %s6501_s23 }
  0x59   : > { %3989 = vmatpush1.bf16.msra.mxu1 %v3988_v5  ;;  %v4984_v14 = vpack.c.bf16 %v3758_v12, %v3756_v11  ;;  %v3755_v17 = vld [vmem:[%s6491_s1 + $0x420] sm:$0xff]  ;;  %v3992_v18 = vpack.c.bf16 %v484_v16, %v482_v15  ;;  %v3757_v19 = vld [vmem:[%s6491_s1 + $0x430] sm:$0xff]  ;;  %v487_v20 = vld [vmem:[%s6491_s1 + $0x48] sm:$0xff]  ;;  %s4620_s24 = scalar_lea.vmem %s6432_s12, 4096 }
  0x5a   : > { %4117 = vmatpush1.bf16.msra.mxu0 %v4972_v9  ;;  %v489_v21 = vld [vmem:[%s6491_s1 + $0x58] sm:$0xff]  ;;  %3991 = vmatprep.subr.bf16.mxu1 %v3990_v13  ;;  %v5006_v22 = vpack.c.bf16 %v3757_v19, %v3755_v17  ;;  %v3760_v24 = vld [vmem:[%s6491_s1 + $0x448] sm:$0xff]  ;;  %v486_v26 = vld [vmem:[%s6491_s1 + $0x40] sm:$0xff]  ;;  %p4621_p2 = scmp.ne.s32.totalorder %s6432_s12, %s4620_s24 }
  0x5b   : > { %4119 = vmatprep.subr.bf16.mxu0 %v4984_v14  ;;  %v3994_v23 = vpack.c.bf16 %v489_v21, %v487_v20  ;;  %v3762_v25 = vld [vmem:[%s6491_s1 + $0x458] sm:$0xff]  ;;  %v488_v28 = vld [vmem:[%s6491_s1 + $0x50] sm:$0xff]  ;;  %v3759_v29 = vld [vmem:[%s6491_s1 + $0x440] sm:$0xff] }
  0x5c   : > { %v5017_v27 = vpack.c.bf16 %v3762_v25, %v3760_v24  ;;  %v3761_v30 = vld [vmem:[%s6491_s1 + $0x450] sm:$0xff]  ;;  %v3996_v31 = vpack.c.bf16 %v488_v28, %v486_v26  ;;  %v491_v32 = vld [vmem:[%s6491_s1 + $0x68] sm:$0xff]  ;;  %v493_v33 = vld [vmem:[%s6491_s1 + $0x78] sm:$0xff]  ;;  %p4622_p4 = pnand %p4621_p2, %p4798_p3 }
  0x5d   : > { %3993 = vmatpush1.bf16.msra.mxu1 %v3992_v18  ;;  %v3764_v34 = vld [vmem:[%s6491_s1 + $0x468] sm:$0xff]  ;;  %v5038_v35 = vpack.c.bf16 %v3761_v30, %v3759_v29  ;;  %v3998_v36 = vpack.c.bf16 %v493_v33, %v491_v32  ;;  %v3766_v37 = vld [vmem:[%s6491_s1 + $0x478] sm:$0xff]  ;;  %v490_v38 = vld [vmem:[%s6491_s1 + $0x60] sm:$0xff] }
  0x5e   : > { %4121 = vmatpush1.bf16.msra.mxu0 %v5006_v22  ;;  %3995 = vmatprep.subr.bf16.mxu1 %v3994_v23  ;;  %v492_v39 = vld [vmem:[%s6491_s1 + $0x70] sm:$0xff]  ;;  %v5050_v40 = vpack.c.bf16 %v3766_v37, %v3764_v34  ;;  %v3763_v41 = vld [vmem:[%s6491_s1 + $0x460] sm:$0xff]  ;;  %v495_v43 = vld [vmem:[%s6491_s1 + $0x88] sm:$0xff]  ;;  %p4623_p5 = pneg %p4622_p4 }
  0x5f   : > { %4123 = vmatprep.subr.bf16.mxu0 %v5017_v27  ;;  %v3765_v42 = vld [vmem:[%s6491_s1 + $0x470] sm:$0xff]  ;;  %v497_v44 = vld [vmem:[%s6491_s1 + $0x98] sm:$0xff]  ;;  %v3768_v45 = vld [vmem:[%s6491_s1 + $0x488] sm:$0xff]  ;;  %v4000_v47 = vpack.c.bf16 %v492_v39, %v490_v38 }
  0x60   : > { %v3770_v46 = vld [vmem:[%s6491_s1 + $0x498] sm:$0xff]  ;;  %v5071_v48 = vpack.c.bf16 %v3765_v42, %v3763_v41  ;;  %v4002_v49 = vpack.c.bf16 %v497_v44, %v495_v43  ;;  %v494_v50 = vld [vmem:[%s6491_s1 + $0x80] sm:$0xff]  ;;  %v496_v51 = vld [vmem:[%s6491_s1 + $0x90] sm:$0xff] }
  0x61   : > { %3997 = vmatpush1.bf16.msra.mxu1 %v3996_v31  ;;  %v3767_v52 = vld [vmem:[%s6491_s1 + $0x480] sm:$0xff]  ;;  %v5083_v53 = vpack.c.bf16 %v3770_v46, %v3768_v45  ;;  %v3769_v54 = vld [vmem:[%s6491_s1 + $0x490] sm:$0xff]  ;;  %v499_v55 = vld [vmem:[%s6491_s1 + $0xa8] sm:$0xff]  ;;  %v4004_v59 = vpack.c.bf16 %v496_v51, %v494_v50 }
  0x62   : > { %4125 = vmatpush1.bf16.msra.mxu0 %v5038_v35  ;;  %3999 = vmatprep.subr.bf16.mxu1 %v3998_v36  ;;  %v501_v56 = vld [vmem:[%s6491_s1 + $0xb8] sm:$0xff]  ;;  %v3772_v57 = vld [vmem:[%s6491_s1 + $0x4a8] sm:$0xff]  ;;  %v5101_v61 = vpack.c.bf16 %v3769_v54, %v3767_v52  ;;  %v498_v63 = vld [vmem:[%s6491_s1 + $0xa0] sm:$0xff] }
  0x63   : > { %4127 = vmatprep.subr.bf16.mxu0 %v5050_v40  ;;  %v3774_v58 = vld [vmem:[%s6491_s1 + $0x4b8] sm:$0xff]  ;;  %v4006_v62 = vpack.c.bf16 %v501_v56, %v499_v55  ;;  %v500_v0 = vld [vmem:[%s6491_s1 + $0xb0] sm:$0xff]  ;;  %v3771_v1 = vld [vmem:[%s6491_s1 + $0x4a0] sm:$0xff] }
  0x64   : > { %v5113_v2 = vpack.c.bf16 %v3774_v58, %v3772_v57  ;;  %v3773_v3 = vld [vmem:[%s6491_s1 + $0x4b0] sm:$0xff]  ;;  %v503_v5 = vld [vmem:[%s6491_s1 + $0xc8] sm:$0xff]  ;;  %v505_v6 = vld [vmem:[%s6491_s1 + $0xd8] sm:$0xff]  ;;  %v4008_v10 = vpack.c.bf16 %v500_v0, %v498_v63 }
  0x65   : > { %4001 = vmatpush1.bf16.msra.mxu1 %v4000_v47  ;;  %v3776_v7 = vld [vmem:[%s6491_s1 + $0x4c8] sm:$0xff]  ;;  %v3778_v8 = vld [vmem:[%s6491_s1 + $0x4d8] sm:$0xff]  ;;  %v5131_v11 = vpack.c.bf16 %v3773_v3, %v3771_v1  ;;  %v4010_v12 = vpack.c.bf16 %v505_v6, %v503_v5  ;;  %v502_v13 = vld [vmem:[%s6491_s1 + $0xc0] sm:$0xff] }
  0x66   : > { %4129 = vmatpush1.bf16.msra.mxu0 %v5071_v48  ;;  %4003 = vmatprep.subr.bf16.mxu1 %v4002_v49  ;;  %v504_v15 = vld [vmem:[%s6491_s1 + $0xd0] sm:$0xff]  ;;  %v3775_v16 = vld [vmem:[%s6491_s1 + $0x4c0] sm:$0xff]  ;;  %v5143_v17 = vpack.c.bf16 %v3778_v8, %v3776_v7  ;;  %v507_v19 = vld [vmem:[%s6491_s1 + $0xe8] sm:$0xff] }
  0x67   : > { %4131 = vmatprep.subr.bf16.mxu0 %v5083_v53  ;;  %v3777_v18 = vld [vmem:[%s6491_s1 + $0x4d0] sm:$0xff]  ;;  %v509_v20 = vld [vmem:[%s6491_s1 + $0xf8] sm:$0xff]  ;;  %v3780_v21 = vld [vmem:[%s6491_s1 + $0x4e8] sm:$0xff]  ;;  %v4012_v24 = vpack.c.bf16 %v504_v15, %v502_v13 }
  0x68   : > { %v3782_v23 = vld [vmem:[%s6491_s1 + $0x4f8] sm:$0xff]  ;;  %v5161_v25 = vpack.c.bf16 %v3777_v18, %v3775_v16  ;;  %v4014_v26 = vpack.c.bf16 %v509_v20, %v507_v19  ;;  %v506_v28 = vld [vmem:[%s6491_s1 + $0xe0] sm:$0xff]  ;;  %v508_v29 = vld [vmem:[%s6491_s1 + $0xf0] sm:$0xff] }
  0x69   : > { %4005 = vmatpush1.bf16.msra.mxu1 %v4004_v59  ;;  %v3779_v30 = vld [vmem:[%s6491_s1 + $0x4e0] sm:$0xff]  ;;  %v5174_v31 = vpack.c.bf16 %v3782_v23, %v3780_v21  ;;  %v3781_v32 = vld [vmem:[%s6491_s1 + $0x4f0] sm:$0xff]  ;;  %v3623_v33 = vld [vmem:[%s6491_s1 + $0x108] sm:$0xff]  ;;  %v4016_v38 = vpack.c.bf16 %v508_v29, %v506_v28 }
  0x6a   : > { %4133 = vmatpush1.bf16.msra.mxu0 %v5101_v61  ;;  %4007 = vmatprep.subr.bf16.mxu1 %v4006_v62  ;;  %v3625_v34 = vld [vmem:[%s6491_s1 + $0x118] sm:$0xff]  ;;  %v3800_v36 = vld [vmem:[%s6491_s1 + $0x508] sm:$0xff]  ;;  %v5192_v39 = vpack.c.bf16 %v3781_v32, %v3779_v30  ;;  %v3622_v42 = vld [vmem:[%s6491_s1 + $0x100] sm:$0xff] }
  0x6b   : > { %4135 = vmatprep.subr.bf16.mxu0 %v5113_v2  ;;  %v3802_v37 = vld [vmem:[%s6491_s1 + $0x518] sm:$0xff]  ;;  %v4018_v41 = vpack.c.bf16 %v3625_v34, %v3623_v33  ;;  %v3624_v43 = vld [vmem:[%s6491_s1 + $0x110] sm:$0xff]  ;;  %v3799_v45 = vld [vmem:[%s6491_s1 + $0x500] sm:$0xff] }
  0x6c   : > { %v4146_v44 = vpack.c.bf16 %v3802_v37, %v3800_v36  ;;  %v3801_v46 = vld [vmem:[%s6491_s1 + $0x510] sm:$0xff]  ;;  %v3804_v47 = vld [vmem:[%s6491_s1 + $0x528] sm:$0xff]  ;;  %v3806_v49 = vld [vmem:[%s6491_s1 + $0x538] sm:$0xff]  ;;  %v4020_v51 = vpack.c.bf16 %v3624_v43, %v3622_v42 }
  0x6d   : > { %4009 = vmatpush1.bf16.msra.mxu1 %v4008_v10  ;;  %v462_v50 = vld [vmem:[%s5213_s5] sm:$0xff]  ;;  %v3627_v52 = vld [vmem:[%s6491_s1 + $0x128] sm:$0xff]  ;;  %v3629_v54 = vld [vmem:[%s6491_s1 + $0x138] sm:$0xff]  ;;  %v4148_v56 = vpack.c.bf16 %v3801_v46, %v3799_v45  ;;  %v4150_v57 = vpack.c.bf16 %v3806_v49, %v3804_v47 }
  0x6e   : > { %4137 = vmatpush1.bf16.msra.mxu0 %v5131_v11  ;;  %4011 = vmatprep.subr.bf16.mxu1 %v4010_v12  ;;  %v5224_v55 = vld [vmem:[%s5213_s5 + $0x19] sm:$0xff]  ;;  %v4022_v63 = vpack.c.bf16 %v3629_v54, %v3627_v52  ;;  %v463_v5 = vld [vmem:[%s5213_s5 + $0x8] sm:$0xff]  ;;  %v5286_v29 = vld [vmem:[%s5213_s5 + $0x31] sm:$0xff] }
  0x6f   : > { %4139 = vmatprep.subr.bf16.mxu0 %v5143_v17  ;;  %v3803_v58 = vld [vmem:[%s6491_s1 + $0x520] sm:$0xff]  ;;  %v3805_v59 = vld [vmem:[%s6491_s1 + $0x530] sm:$0xff]  ;;  %v3808_v62 = vld [vmem:[%s6491_s1 + $0x548] sm:$0xff] }
  0x70   : > { %v3810_v0 = vld [vmem:[%s6491_s1 + $0x558] sm:$0xff]  ;;  %v3626_v1 = vld [vmem:[%s6491_s1 + $0x120] sm:$0xff]  ;;  %v3628_v3 = vld [vmem:[%s6491_s1 + $0x130] sm:$0xff]  ;;  %v4152_v10 = vpack.c.bf16 %v3805_v59, %v3803_v58 }
  0x71   : > { %4013 = vmatpush1.bf16.msra.mxu1 %v4012_v24  ;;  %v3631_v6 = vld [vmem:[%s6491_s1 + $0x148] sm:$0xff]  ;;  %v3633_v7 = vld [vmem:[%s6491_s1 + $0x158] sm:$0xff]  ;;  %v4154_v12 = vpack.c.bf16 %v3810_v0, %v3808_v62  ;;  %v4024_v13 = vpack.c.bf16 %v3628_v3, %v3626_v1  ;;  %v3807_v15 = vld [vmem:[%s6491_s1 + $0x540] sm:$0xff] }
  0x72   : > { %4141 = vmatpush1.bf16.msra.mxu0 %v5161_v25  ;;  %4015 = vmatprep.subr.bf16.mxu1 %v4014_v26  ;;  %v5254_v8 = vld [vmem:[%s5213_s5 + $0x21] sm:$0xff]  ;;  %v4026_v20 = vpack.c.bf16 %v3633_v7, %v3631_v6  ;;  %v464_v24 = vld [vmem:[%s5213_s5 + $0x18] sm:$0xff]  ;;  %v5350_v3 = vld [vmem:[%s5213_s5 + $0x49] sm:$0xff] }
  0x73   : > { %4143 = vmatprep.subr.bf16.mxu0 %v5174_v31  ;;  %v3809_v16 = vld [vmem:[%s6491_s1 + $0x550] sm:$0xff]  ;;  %v3812_v18 = vld [vmem:[%s6491_s1 + $0x568] sm:$0xff]  ;;  %v3814_v19 = vld [vmem:[%s6491_s1 + $0x578] sm:$0xff] }
  0x74   : > { %v3630_v21 = vld [vmem:[%s6491_s1 + $0x140] sm:$0xff]  ;;  %v3632_v23 = vld [vmem:[%s6491_s1 + $0x150] sm:$0xff]  ;;  %v3635_v26 = vld [vmem:[%s6491_s1 + $0x168] sm:$0xff]  ;;  %v4156_v30 = vpack.c.bf16 %v3809_v16, %v3807_v15  ;;  %v4158_v32 = vpack.c.bf16 %v3814_v19, %v3812_v18 }
  0x75   : > { %4017 = vmatpush1.bf16.msra.mxu1 %v4016_v38  ;;  %v3637_v28 = vld [vmem:[%s6491_s1 + $0x178] sm:$0xff]  ;;  %v3811_v33 = vld [vmem:[%s6491_s1 + $0x560] sm:$0xff]  ;;  %v3813_v34 = vld [vmem:[%s6491_s1 + $0x570] sm:$0xff]  ;;  %v4028_v37 = vpack.c.bf16 %v3632_v23, %v3630_v21 }
  0x76   : > { %4145 = vmatpush1.bf16.msra.mxu0 %v5192_v39  ;;  %4019 = vmatprep.subr.bf16.mxu1 %v4018_v41  ;;  %v3816_v36 = vld [vmem:[%s6491_s1 + $0x588] sm:$0xff]  ;;  %v3818_v38 = vld [vmem:[%s6491_s1 + $0x598] sm:$0xff]  ;;  %v4030_v41 = vpack.c.bf16 %v3637_v28, %v3635_v26  ;;  %v3634_v42 = vld [vmem:[%s6491_s1 + $0x160] sm:$0xff]  ;;  %v4160_v49 = vpack.c.bf16 %v3813_v34, %v3811_v33 }
  0x77   : > { %4147 = vmatprep.subr.bf16.mxu0 %v4146_v44  ;;  %v3636_v43 = vld [vmem:[%s6491_s1 + $0x170] sm:$0xff]  ;;  %v3639_v45 = vld [vmem:[%s6491_s1 + $0x188] sm:$0xff]  ;;  %v3641_v46 = vld [vmem:[%s6491_s1 + $0x198] sm:$0xff] }
  0x78   : > { %575 = vmatmul.mubr.f32.vlgmr.msra.gmra.mrb[0].mxu1 %v462_v50  ;;  %v465_v44 = vld [vmem:[%s5213_s5 + $0x20] sm:$0xff]  ;;  %v4162_v50 = vpack.c.bf16 %v3818_v38, %v3816_v36  ;;  %v3820_v54 = vld [vmem:[%s6491_s1 + $0x5a8] sm:$0xff]  ;;  %v4034_v58 = vpack.c.bf16 %v3641_v46, %v3639_v45  ;;  %v3645_v1 = vld [vmem:[%s6491_s1 + $0x1b8] sm:$0xff] }
  0x79   : > { %1738 = vmatmul.mubr.f32.vlgmr.msra.gmra.mrb[0].mxu0 %v5224_v55  ;;  %4021 = vmatpush1.bf16.msra.mxu1 %v4020_v51  ;;  %v5317_v47 = vld [vmem:[%s5213_s5 + $0x39] sm:$0xff]  ;;  %v5418_v45 = vld [vmem:[%s5213_s5 + $0x61] sm:$0xff] }
  0x7a   : > { %4149 = vmatpush1.bf16.msra.mxu0 %v4148_v56  ;;  %580 = vmatprep.mubr.f32.mxu1 %v4718_v60  ;;  %v3815_v51 = vld [vmem:[%s6491_s1 + $0x580] sm:$0xff]  ;;  %v3817_v52 = vld [vmem:[%s6491_s1 + $0x590] sm:$0xff]  ;;  %v4032_v56 = vpack.c.bf16 %v3636_v43, %v3634_v42  ;;  %v3643_v0 = vld [vmem:[%s6491_s1 + $0x1a8] sm:$0xff] }
  0x7b   : > { %1743 = vmatprep.mubr.f32.mxu0 %v4718_v60  ;;  %4151 = vmatprep.subr.bf16.mxu0 %v4150_v57  ;;  %v3822_v57 = vld [vmem:[%s6491_s1 + $0x5b8] sm:$0xff]  ;;  %v3638_v59 = vld [vmem:[%s6491_s1 + $0x180] sm:$0xff]  ;;  %v3640_v62 = vld [vmem:[%s6491_s1 + $0x190] sm:$0xff]  ;;  %v4038_v16 = vpack.c.bf16 %v3645_v1, %v3643_v0 }
  0x7c   : > { %581 = vmatmul.mubr.f32.gmra.mrb[2].mxu1 %v463_v5  ;;  %4023 = vmatprep.subr.bf16.mxu1 %v4022_v63  ;;  %v5340_v63 = vld [vmem:[%s5213_s5 + $0x30] sm:$0xff]  ;;  %v4164_v5 = vpack.c.bf16 %v3817_v52, %v3815_v51  ;;  %v4166_v6 = vpack.c.bf16 %v3822_v57, %v3820_v54  ;;  %v3826_v15 = vld [vmem:[%s6491_s1 + $0x5d8] sm:$0xff]  ;;  %v3647_v21 = vld [vmem:[%s6491_s1 + $0x1c8] sm:$0xff] }
  0x7d   : > { %1744 = vmatmul.mubr.f32.gmra.mrb[2].mxu0 %v5254_v8  ;;  %586 = vmatprep.mubr.f32.mxu1 %v4718_v60  ;;  %v3819_v7 = vld [vmem:[%s6491_s1 + $0x5a0] sm:$0xff]  ;;  %v3644_v19 = vld [vmem:[%s6491_s1 + $0x1b0] sm:$0xff]  ;;  %v3649_v23 = vld [vmem:[%s6491_s1 + $0x1d8] sm:$0xff] }
  0x7e   : > { %4153 = vmatpush1.bf16.msra.mxu0 %v4152_v10  ;;  %1749 = vmatprep.mubr.f32.mxu0 %v4718_v60  ;;  %v3821_v10 = vld [vmem:[%s6491_s1 + $0x5b0] sm:$0xff]  ;;  %v3642_v18 = vld [vmem:[%s6491_s1 + $0x1a0] sm:$0xff]  ;;  %v3828_v33 = vld [vmem:[%s6491_s1 + $0x5e8] sm:$0xff] }
  0x7f   : > { %4155 = vmatprep.subr.bf16.mxu0 %v4154_v12  ;;  %4025 = vmatpush1.bf16.msra.mxu1 %v4024_v13  ;;  %v3824_v12 = vld [vmem:[%s6491_s1 + $0x5c8] sm:$0xff]  ;;  %v4036_v13 = vpack.c.bf16 %v3640_v62, %v3638_v59  ;;  %v4168_v26 = vpack.c.bf16 %v3821_v10, %v3819_v7  ;;  %v4040_v34 = vpack.c.bf16 %v3644_v19, %v3642_v18  ;;  %v3830_v36 = vld [vmem:[%s6491_s1 + $0x5f8] sm:$0xff]  ;;  %v3646_v38 = vld [vmem:[%s6491_s1 + $0x1c0] sm:$0xff] }
  0x80   : > { %587 = vmatmul.mubr.f32.gmra.mrb[4].mxu1 %v464_v24  ;;  %4027 = vmatprep.subr.bf16.mxu1 %v4026_v20  ;;  %v5374_v20 = vld [vmem:[%s5213_s5 + $0x38] sm:$0xff]  ;;  %v4170_v28 = vpack.c.bf16 %v3826_v15, %v3824_v12  ;;  %v5408_v42 = vld [vmem:[%s5213_s5 + $0x48] sm:$0xff]  ;;  %v3829_v51 = vld [vmem:[%s6491_s1 + $0x5f0] sm:$0xff] }
  0x81   : > { %1750 = vmatmul.mubr.f32.gmra.mrb[4].mxu0 %v5286_v29  ;;  %592 = vmatprep.mubr.f32.mxu1 %v4718_v60  ;;  %v5384_v24 = vld [vmem:[%s5213_s5 + $0x51] sm:$0xff]  ;;  %v5470_v19 = vld [vmem:[%s5213_s5 + $0x60] sm:$0xff] }
  0x82   : > { %4157 = vmatpush1.bf16.msra.mxu0 %v4156_v30  ;;  %1755 = vmatprep.mubr.f32.mxu0 %v4718_v60  ;;  %v3823_v30 = vld [vmem:[%s6491_s1 + $0x5c0] sm:$0xff]  ;;  %v3651_v43 = vld [vmem:[%s6491_s1 + $0x1e8] sm:$0xff]  ;;  %v3652_v59 = vld [vmem:[%s6491_s1 + $0x1f0] sm:$0xff] }
  0x83   : > { %4159 = vmatprep.subr.bf16.mxu0 %v4158_v32  ;;  %4029 = vmatpush1.bf16.msra.mxu1 %v4028_v37  ;;  %v3825_v32 = vld [vmem:[%s6491_s1 + $0x5d0] sm:$0xff]  ;;  %v4042_v37 = vpack.c.bf16 %v3649_v23, %v3647_v21  ;;  %v3849_v52 = vld [vmem:[%s6491_s1 + $0x608] sm:$0xff]  ;;  %v3657_v1 = vld [vmem:[%s6491_s1 + $0x218] sm:$0xff] }
  0x84   : > { %593 = vmatmul.mubr.f32.gmra.mrb[6].mxu1 %v465_v44  ;;  %4031 = vmatprep.subr.bf16.mxu1 %v4030_v41  ;;  %v3648_v41 = vld [vmem:[%s6491_s1 + $0x1d0] sm:$0xff]  ;;  %v3653_v44 = vld [vmem:[%s6491_s1 + $0x1f8] sm:$0xff]  ;;  %v4172_v46 = vpack.c.bf16 %v3825_v32, %v3823_v30  ;;  %v3655_v0 = vld [vmem:[%s6491_s1 + $0x208] sm:$0xff] }
  0x85   : > { %1756 = vmatmul.mubr.f32.gmra.mrb[6].mxu0 %v5317_v47  ;;  %598 = vmatprep.mubr.f32.mxu1 %v4718_v60  ;;  %v4044_v54 = vpack.c.bf16 %v3648_v41, %v3646_v38  ;;  %v4046_v57 = vpack.c.bf16 %v3653_v44, %v3651_v43  ;;  %v5442_v62 = vld [vmem:[%s5213_s5 + $0x50] sm:$0xff]  ;;  %v3853_v15 = vld [vmem:[%s6491_s1 + $0x628] sm:$0xff]  ;;  %v4050_v18 = vpack.c.bf16 %v3657_v1, %v3655_v0 }
  0x86   : > { %4161 = vmatpush1.bf16.msra.mxu0 %v4160_v49  ;;  %1761 = vmatprep.mubr.f32.mxu0 %v4718_v60  ;;  %v4174_v49 = vpack.c.bf16 %v3830_v36, %v3828_v33  ;;  %v3848_v10 = vld [vmem:[%s6491_s1 + $0x600] sm:$0xff]  ;;  %v3850_v12 = vld [vmem:[%s6491_s1 + $0x610] sm:$0xff]  ;;  %v3857_v32 = vld [vmem:[%s6491_s1 + $0x648] sm:$0xff] }
  0x87   : > { %4163 = vmatprep.subr.bf16.mxu0 %v4162_v50  ;;  %4033 = vmatpush1.bf16.msra.mxu1 %v4032_v56  ;;  %v3827_v50 = vld [vmem:[%s6491_s1 + $0x5e0] sm:$0xff]  ;;  %v3851_v56 = vld [vmem:[%s6491_s1 + $0x618] sm:$0xff]  ;;  %v4180_v23 = vpack.c.bf16 %v3850_v12, %v3848_v10  ;;  %v3854_v30 = vld [vmem:[%s6491_s1 + $0x630] sm:$0xff] }
  0x88   : > { %599 = vmatmul.mubr.f32.gmra.mrb[8].mxu1 %v5340_v63  ;;  %4035 = vmatprep.subr.bf16.mxu1 %v4034_v58  ;;  %v3650_v58 = vld [vmem:[%s6491_s1 + $0x1e0] sm:$0xff]  ;;  %v4178_v7 = vpack.c.bf16 %v3851_v56, %v3849_v52  ;;  %v3859_v33 = vld [vmem:[%s6491_s1 + $0x658] sm:$0xff]  ;;  %v3858_v43 = vld [vmem:[%s6491_s1 + $0x650] sm:$0xff] }
  0x89   : > { %1762 = vmatmul.mubr.f32.gmra.mrb[8].mxu0 %v5350_v3  ;;  %604 = vmatprep.mubr.f32.mxu1 %v4718_v60  ;;  %v5474_v21 = vld [vmem:[%s5213_s5 + $0x1a] sm:$0xff]  ;;  %v5496_v36 = vld [vmem:[%s5213_s5 + $0x22] sm:$0xff]  ;;  %v4186_v38 = vpack.c.bf16 %v3859_v33, %v3857_v32 }
  0x8a   : > { %4165 = vmatpush1.bf16.msra.mxu0 %v4164_v5  ;;  %1767 = vmatprep.mubr.f32.mxu0 %v4718_v60  ;;  %v5452_v5 = vld [vmem:[%s5213_s5 + $0x69] sm:$0xff]  ;;  %v5540_v0 = vld [vmem:[%s5213_s5 + $0x3a] sm:$0xff] }
  0x8b   : > { %4167 = vmatprep.subr.bf16.mxu0 %v4166_v6  ;;  %4037 = vmatpush1.bf16.msra.mxu1 %v4036_v13  ;;  %v4176_v6 = vpack.c.bf16 %v3829_v51, %v3827_v50  ;;  %v4048_v13 = vpack.c.bf16 %v3652_v59, %v3650_v58  ;;  %v3856_v41 = vld [vmem:[%s6491_s1 + $0x640] sm:$0xff]  ;;  %v3861_v44 = vld [vmem:[%s6491_s1 + $0x668] sm:$0xff]  ;;  %v3862_v56 = vld [vmem:[%s6491_s1 + $0x670] sm:$0xff] }
  0x8c   : > { %605 = vmatmul.mubr.f32.gmra.mrb[10].mxu1 %v5374_v20  ;;  %4039 = vmatprep.subr.bf16.mxu1 %v4038_v16  ;;  %v3855_v16 = vld [vmem:[%s6491_s1 + $0x638] sm:$0xff]  ;;  %v4188_v51 = vpack.c.bf16 %v3858_v43, %v3856_v41  ;;  %v5536_v59 = vld [vmem:[%s5213_s5 + $0x80] sm:$0xff]  ;;  %v3869_v12 = vld [vmem:[%s6491_s1 + $0x6a8] sm:$0xff] }
  0x8d   : > { %1768 = vmatmul.mubr.f32.gmra.mrb[10].mxu0 %v5384_v24  ;;  %610 = vmatprep.mubr.f32.mxu1 %v4718_v60  ;;  %v5518_v50 = vld [vmem:[%s5213_s5 + $0x32] sm:$0xff] }
  0x8e   : > { %4169 = vmatpush1.bf16.msra.mxu0 %v4168_v26  ;;  %1773 = vmatprep.mubr.f32.mxu0 %v4718_v60  ;;  %v4182_v26 = vpack.c.bf16 %v3855_v16, %v3853_v15  ;;  %v3867_v58 = vld [vmem:[%s6491_s1 + $0x698] sm:$0xff]  ;;  %v3866_v10 = vld [vmem:[%s6491_s1 + $0x690] sm:$0xff]  ;;  %v3872_v43 = vld [vmem:[%s6491_s1 + $0x6c0] sm:$0xff] }
  0x8f   : > { %4171 = vmatprep.subr.bf16.mxu0 %v4170_v28  ;;  %4041 = vmatpush1.bf16.msra.mxu1 %v4040_v34  ;;  %v3852_v28 = vld [vmem:[%s6491_s1 + $0x620] sm:$0xff]  ;;  %v5492_v34 = vld [vmem:[%s5213_s5 + $0x68] sm:$0xff]  ;;  %v5580_v33 = vld [vmem:[%s5213_s5 + $0x98] sm:$0xff] }
  0x90   : > { %611 = vmatmul.mubr.f32.gmra.mrb[12].mxu1 %v5408_v42  ;;  %4043 = vmatprep.subr.bf16.mxu1 %v4042_v37  ;;  %v4184_v37 = vpack.c.bf16 %v3854_v30, %v3852_v28  ;;  %v5558_v15 = vld [vmem:[%s5213_s5 + $0x90] sm:$0xff]  ;;  %v3873_v30 = vld [vmem:[%s6491_s1 + $0x6c8] sm:$0xff]  ;;  %v3875_v32 = vld [vmem:[%s6491_s1 + $0x6d8] sm:$0xff] }
  0x91   : > { %1774 = vmatmul.mubr.f32.gmra.mrb[12].mxu0 %v5418_v45  ;;  %616 = vmatprep.mubr.f32.mxu1 %v4718_v60  ;;  %v5562_v16 = vld [vmem:[%s5213_s5 + $0x4a] sm:$0xff]  ;;  %v4202_v41 = vpack.c.bf16 %v3875_v32, %v3873_v30  ;;  %v703_v32 = vld [vmem:[%s5213_s5 + $0x1] sm:$0xff] }
  0x92   : > { %4173 = vmatpush1.bf16.msra.mxu0 %v4172_v46  ;;  %1779 = vmatprep.mubr.f32.mxu0 %v4718_v60  ;;  %v3863_v46 = vld [vmem:[%s6491_s1 + $0x678] sm:$0xff]  ;;  %v3870_v28 = vld [vmem:[%s6491_s1 + $0x6b0] sm:$0xff] }
  0x93   : > { %4175 = vmatprep.subr.bf16.mxu0 %v4174_v49  ;;  %4045 = vmatpush1.bf16.msra.mxu1 %v4044_v54  ;;  %v5514_v49 = vld [vmem:[%s5213_s5 + $0x78] sm:$0xff]  ;;  %v4190_v52 = vpack.c.bf16 %v3863_v46, %v3861_v44  ;;  %v3860_v54 = vld [vmem:[%s6491_s1 + $0x660] sm:$0xff]  ;;  %v3874_v44 = vld [vmem:[%s6491_s1 + $0x6d0] sm:$0xff] }
  0x94   : > { %617 = vmatmul.mubr.f32.gmra.mrb[14].mxu1 %v5442_v62  ;;  %4047 = vmatprep.subr.bf16.mxu1 %v4046_v57  ;;  %v3865_v57 = vld [vmem:[%s6491_s1 + $0x688] sm:$0xff]  ;;  %v4192_v1 = vpack.c.bf16 %v3862_v56, %v3860_v54  ;;  %v4204_v56 = vpack.c.bf16 %v3874_v44, %v3872_v43  ;;  %v3661_v30 = vld [vmem:[%s6491_s1 + $0x238] sm:$0xff]  ;;  %v3658_v44 = vld [vmem:[%s6491_s1 + $0x220] sm:$0xff] }
  0x95   : > { %1780 = vmatmul.mubr.f32.gmra.mrb[14].mxu0 %v5452_v5  ;;  %622 = vmatprep.mubr.f32.mxu1 %v4718_v60  ;;  %v3877_v46 = vld [vmem:[%s6491_s1 + $0x6e8] sm:$0xff] }
  0x96   : > { %4177 = vmatpush1.bf16.msra.mxu0 %v4176_v6  ;;  %2043 = vmatprep.mubr.f32.mxu0 %v4718_v60  ;;  %v4194_v6 = vpack.c.bf16 %v3867_v58, %v3865_v57  ;;  %v5606_v54 = vld [vmem:[%s5213_s5 + $0x62] sm:$0xff] }
  0x97   : > { %4179 = vmatprep.subr.bf16.mxu0 %v4178_v7  ;;  %4049 = vmatpush1.bf16.msra.mxu1 %v4048_v13  ;;  %v3864_v7 = vld [vmem:[%s6491_s1 + $0x680] sm:$0xff]  ;;  %v3871_v13 = vld [vmem:[%s6491_s1 + $0x6b8] sm:$0xff] }
  0x98   : > { %623 = vmatmul.mubr.f32.gmra.mrb[16].mxu1 %v5470_v19  ;;  %4051 = vmatprep.subr.bf16.mxu1 %v4050_v18  ;;  %v4196_v18 = vpack.c.bf16 %v3866_v10, %v3864_v7  ;;  %v3876_v58 = vld [vmem:[%s6491_s1 + $0x6e0] sm:$0xff]  ;;  %v3899_v7 = vld [vmem:[%s6491_s1 + $0x718] sm:$0xff] }
  0x99   : > { %2044 = vmatmul.mubr.f32.vlgmr.msra.gmra.mrb[0].mxu0 %v5474_v21  ;;  %628 = vmatprep.mubr.f32.mxu1 %v4718_v60  ;;  %v5624_v10 = vld [vmem:[%s5213_s5 + $0xb0] sm:$0xff] }
  0x9a   : > { %4181 = vmatpush1.bf16.msra.mxu0 %v4180_v23  ;;  %2049 = vmatprep.mubr.f32.mxu0 %v4718_v60  ;;  %v4198_v23 = vpack.c.bf16 %v3871_v13, %v3869_v12  ;;  %v5628_v12 = vld [vmem:[%s5213_s5 + $0x6a] sm:$0xff] }
  0x9b   : > { %4183 = vmatprep.subr.bf16.mxu0 %v4182_v26  ;;  %v3868_v26 = vld [vmem:[%s6491_s1 + $0x6a0] sm:$0xff] }
  0x9c   : > { %629 = vmatmul.mubr.f32.gmra.mrb[18].mxu1 %v5492_v34  ;;  %v3654_v13 = vld [vmem:[%s6491_s1 + $0x200] sm:$0xff] }
  0x9d   : > { %2050 = vmatmul.mubr.f32.gmra.mrb[2].mxu0 %v5496_v36  ;;  %634 = vmatprep.mubr.f32.mxu1 %v4718_v60 }
  0x9e   : > { %2055 = vmatprep.mubr.f32.mxu0 %v4718_v60  ;;  %4185 = vmatpush1.bf16.msra.mxu0 %v4184_v37  ;;  %v5584_v37 = vld [vmem:[%s5213_s5 + $0x52] sm:$0xff] }
  0x9f   : > { %4187 = vmatprep.subr.bf16.mxu0 %v4186_v38  ;;  %v4200_v38 = vpack.c.bf16 %v3870_v28, %v3868_v26  ;;  %v3659_v28 = vld [vmem:[%s6491_s1 + $0x228] sm:$0xff] }
  0xa0   : > { %635 = vmatmul.mubr.f32.gmra.mrb[20].mxu1 %v5514_v49  ;;  %v4054_v43 = vpack.c.bf16 %v3661_v30, %v3659_v28 }
  0xa1   : > { %2056 = vmatmul.mubr.f32.gmra.mrb[4].mxu0 %v5518_v50  ;;  %640 = vmatprep.mubr.f32.mxu1 %v4718_v60 }
  0xa2   : > { %2061 = vmatprep.mubr.f32.mxu0 %v4718_v60  ;;  %4189 = vmatpush1.bf16.msra.mxu0 %v4188_v51  ;;  %v3879_v51 = vld [vmem:[%s6491_s1 + $0x6f8] sm:$0xff] }
  0xa3   : > { %4191 = vmatprep.subr.bf16.mxu0 %v4190_v52  ;;  %v5602_v52 = vld [vmem:[%s5213_s5 + $0xa8] sm:$0xff]  ;;  %v4206_v57 = vpack.c.bf16 %v3879_v51, %v3877_v46  ;;  %v3660_v46 = vld [vmem:[%s6491_s1 + $0x230] sm:$0xff] }
  0xa4   : > { %641 = vmatmul.mubr.f32.gmra.mrb[22].mxu1 %v5536_v59  ;;  %v3663_v51 = vld [vmem:[%s6491_s1 + $0x248] sm:$0xff] }
  0xa5   : > { %2062 = vmatmul.mubr.f32.gmra.mrb[6].mxu0 %v5540_v0  ;;  %646 = vmatprep.mubr.f32.mxu1 %v4718_v60 }
  0xa6   : > { %2067 = vmatprep.mubr.f32.mxu0 %v4718_v60  ;;  %4193 = vmatpush1.bf16.msra.mxu0 %v4192_v1  ;;  %v3878_v1 = vld [vmem:[%s6491_s1 + $0x6f0] sm:$0xff] }
  0xa7   : > { %4195 = vmatprep.subr.bf16.mxu0 %v4194_v6  ;;  %v3897_v6 = vld [vmem:[%s6491_s1 + $0x708] sm:$0xff] }
  0xa8   : > { %647 = vmatmul.mubr.f32.gmra.mrb[24].mxu1 %v5558_v15  ;;  %v4210_v26 = vpack.c.bf16 %v3899_v7, %v3897_v6  ;;  %v3662_v7 = vld [vmem:[%s6491_s1 + $0x240] sm:$0xff] }
  0xa9   : > { %2068 = vmatmul.mubr.f32.gmra.mrb[8].mxu0 %v5562_v16  ;;  %652 = vmatprep.mubr.f32.mxu1 %v4718_v60 }
  0xaa   : > { %2073 = vmatprep.mubr.f32.mxu0 %v4718_v60  ;;  %4197 = vmatpush1.bf16.msra.mxu0 %v4196_v18  ;;  %v3656_v18 = vld [vmem:[%s6491_s1 + $0x210] sm:$0xff] }
  0xab   : > { %4199 = vmatprep.subr.bf16.mxu0 %v4198_v23  ;;  %v4208_v23 = vpack.c.bf16 %v3878_v1, %v3876_v58  ;;  %v5667_v58 = vld [vmem:[%s5213_s5 + $0x82] sm:$0xff]  ;;  %v4056_v1 = vpack.c.bf16 %v3660_v46, %v3658_v44  ;;  %v5704_v46 = vld [vmem:[%s5213_s5 + $0x9a] sm:$0xff] }
  0xac   : > { %653 = vmatmul.mubr.f32.gmra.mrb[26].mxu1 %v5580_v33  ;;  %v3673_v44 = vld [vmem:[%s6491_s1 + $0x298] sm:$0xff] }
  0xad   : > { %2074 = vmatmul.mubr.f32.gmra.mrb[10].mxu0 %v5584_v37  ;;  %658 = vmatprep.mubr.f32.mxu1 %v4718_v60 }
  0xae   : > { %2079 = vmatprep.mubr.f32.mxu0 %v4718_v60  ;;  %4201 = vmatpush1.bf16.msra.mxu0 %v4200_v38  ;;  %v4052_v38 = vpack.c.bf16 %v3656_v18, %v3654_v13  ;;  %v3664_v13 = vld [vmem:[%s6491_s1 + $0x250] sm:$0xff]  ;;  %v3667_v18 = vld [vmem:[%s6491_s1 + $0x268] sm:$0xff] }
  0xaf   : > { %4203 = vmatprep.subr.bf16.mxu0 %v4202_v41  ;;  %v5648_v41 = vld [vmem:[%s5213_s5 + $0x7a] sm:$0xff]  ;;  %v4060_v28 = vpack.c.bf16 %v3664_v13, %v3662_v7  ;;  %v5723_v7 = vld [vmem:[%s5213_s5 + $0xaa] sm:$0xff] }
  0xb0   : > { %659 = vmatmul.mubr.f32.gmra.mrb[28].mxu1 %v5602_v52 }
  0xb1   : > { %2080 = vmatmul.mubr.f32.gmra.mrb[12].mxu0 %v5606_v54  ;;  %664 = vmatprep.mubr.f32.mxu1 %v4718_v60 }
  0xb2   : > { %2085 = vmatprep.mubr.f32.mxu0 %v4718_v60  ;;  %4205 = vmatpush1.bf16.msra.mxu0 %v4204_v56  ;;  %v3665_v56 = vld [vmem:[%s6491_s1 + $0x258] sm:$0xff] }
  0xb3   : > { %4207 = vmatprep.subr.bf16.mxu0 %v4206_v57  ;;  %v704_v57 = vld [vmem:[%s5213_s5 + $0x9] sm:$0xff]  ;;  %v4058_v6 = vpack.c.bf16 %v3665_v56, %v3663_v51 }
  0xb4   : > { %665 = vmatmul.mubr.f32.gmra.mrb[30].mxu1 %v5624_v10  ;;  %v3670_v56 = vld [vmem:[%s6491_s1 + $0x280] sm:$0xff] }
  0xb5   : > { %2086 = vmatmul.mubr.f32.gmra.mrb[14].mxu0 %v5628_v12  ;;  %816 = vmatprep.mubr.f32.mxu1 %v4718_v60 }
  0xb6   : > { %2091 = vmatprep.mubr.f32.mxu0 %v4718_v60  ;;  %4209 = vmatpush1.bf16.msra.mxu0 %v4208_v23  ;;  %v3669_v23 = vld [vmem:[%s6491_s1 + $0x278] sm:$0xff] }
  0xb7   : > { %4211 = vmatprep.subr.bf16.mxu0 %v4210_v26  ;;  %v5685_v26 = vld [vmem:[%s5213_s5 + $0x92] sm:$0xff]  ;;  %v4062_v30 = vpack.c.bf16 %v3669_v23, %v3667_v18 }
  0xb8   : > { %817 = vmatmul.mubr.f32.vlgmr.msra.gmra.mrb[0].mxu1 %v703_v32  ;;  %v3666_v32 = vld [vmem:[%s6491_s1 + $0x260] sm:$0xff]  ;;  %v3676_v23 = vld [vmem:[%s6491_s1 + $0x2b0] sm:$0xff] }
  0xb9   : > { %2092 = vmatmul.mubr.f32.gmra.mrb[16].mxu0 %v5648_v41  ;;  %4053 = vmatpush1.bf16.msra.mxu1 %v4052_v38  ;;  %v3668_v38 = vld [vmem:[%s6491_s1 + $0x270] sm:$0xff]  ;;  %v3674_v18 = vld [vmem:[%s6491_s1 + $0x2a0] sm:$0xff] }
  0xba   : > { %822 = vmatprep.mubr.f32.mxu1 %v4718_v60  ;;  %2097 = vmatprep.mubr.f32.mxu0 %v4718_v60  ;;  %v4064_v51 = vpack.c.bf16 %v3668_v38, %v3666_v32  ;;  %v5742_v32 = vld [vmem:[%s5213_s5 + $0xb2] sm:$0xff]  ;;  %v4072_v38 = vpack.c.bf16 %v3676_v23, %v3674_v18  ;;  %v3798_v18 = vld [vmem:[%s5213_s5 + $0xca] sm:$0xff] }
  0xbb   : > { %4055 = vmatprep.subr.bf16.mxu1 %v4054_v43  ;;  %v3671_v43 = vld [vmem:[%s6491_s1 + $0x288] sm:$0xff] }
  0xbc   : > { %823 = vmatmul.mubr.f32.gmra.mrb[2].mxu1 %v704_v57  ;;  %v3672_v57 = vld [vmem:[%s6491_s1 + $0x290] sm:$0xff] }
  0xbd   : > { %2098 = vmatmul.mubr.f32.gmra.mrb[18].mxu0 %v5667_v58  ;;  %828 = vmatprep.mubr.f32.mxu1 %v4718_v60  ;;  %v4068_v13 = vpack.c.bf16 %v3672_v57, %v3670_v56  ;;  %v3797_v56 = vld [vmem:[%s5213_s5 + $0xc2] sm:$0xff] }
  0xbe   : > { %2103 = vmatprep.mubr.f32.mxu0 %v4718_v60  ;;  %4057 = vmatpush1.bf16.msra.mxu1 %v4056_v1  ;;  %v3675_v1 = vld [vmem:[%s6491_s1 + $0x2a8] sm:$0xff] }
  0xbf   : > { %4059 = vmatprep.subr.bf16.mxu1 %v4058_v6  ;;  %v3677_v6 = vld [vmem:[%s6491_s1 + $0x2b8] sm:$0xff] }
  0xc0   : > { %829 = vmatmul.mubr.f32.gmra.mrb[4].mxu1 %v5224_v55  ;;  %v4066_v55 = vpack.c.bf16 %v3673_v44, %v3671_v43  ;;  %v3678_v43 = vld [vmem:[%s6491_s1 + $0x2c0] sm:$0xff]  ;;  %v3680_v44 = vld [vmem:[%s6491_s1 + $0x2d0] sm:$0xff] }
  0xc1   : > { %2104 = vmatmul.mubr.f32.gmra.mrb[20].mxu0 %v5685_v26  ;;  %834 = vmatprep.mubr.f32.mxu1 %v4718_v60  ;;  %v4076_v57 = vpack.c.bf16 %v3680_v44, %v3678_v43 }
  0xc2   : > { %2109 = vmatprep.mubr.f32.mxu0 %v4718_v60  ;;  %4061 = vmatpush1.bf16.msra.mxu1 %v4060_v28  ;;  %v3679_v28 = vld [vmem:[%s6491_s1 + $0x2c8] sm:$0xff] }
  0xc3   : > { %4063 = vmatprep.subr.bf16.mxu1 %v4062_v30  ;;  %v3681_v30 = vld [vmem:[%s6491_s1 + $0x2d8] sm:$0xff] }
  0xc4   : > { %835 = vmatmul.mubr.f32.gmra.mrb[6].mxu1 %v5254_v8  ;;  %v4070_v8 = vpack.c.bf16 %v3677_v6, %v3675_v1  ;;  %v3682_v1 = vld [vmem:[%s6491_s1 + $0x2e0] sm:$0xff]  ;;  %v3684_v6 = vld [vmem:[%s6491_s1 + $0x2f0] sm:$0xff] }
  0xc5   : > { %2110 = vmatmul.mubr.f32.gmra.mrb[22].mxu0 %v5704_v46  ;;  %840 = vmatprep.mubr.f32.mxu1 %v4718_v60  ;;  %v4080_v23 = vpack.c.bf16 %v3684_v6, %v3682_v1  ;;  %v3906_v1 = vld [vmem:[%s6491_s1 + $0x750] sm:$0xff]  ;;  %v3911_v6 = vld [vmem:[%s6491_s1 + $0x778] sm:$0xff] }
  0xc6   : > { %2115 = vmatprep.mubr.f32.mxu0 %v4718_v60  ;;  %4065 = vmatpush1.bf16.msra.mxu1 %v4064_v51  ;;  %v3683_v51 = vld [vmem:[%s6491_s1 + $0x2e8] sm:$0xff] }
  0xc7   : > { %4067 = vmatprep.subr.bf16.mxu1 %v4066_v55  ;;  %v3685_v55 = vld [vmem:[%s6491_s1 + $0x2f8] sm:$0xff] }
  0xc8   : > { %841 = vmatmul.mubr.f32.gmra.mrb[8].mxu1 %v5286_v29  ;;  %v4074_v29 = vpack.c.bf16 %v3681_v30, %v3679_v28  ;;  %v3898_v28 = vld [vmem:[%s6491_s1 + $0x710] sm:$0xff] }
  0xc9   : > { %2116 = vmatmul.mubr.f32.gmra.mrb[24].mxu0 %v5723_v7  ;;  %846 = vmatprep.mubr.f32.mxu1 %v4718_v60 }
  0xca   : > { %2121 = vmatprep.mubr.f32.mxu0 %v4718_v60  ;;  %4069 = vmatpush1.bf16.msra.mxu1 %v4068_v13  ;;  %v3704_v13 = vld [vmem:[%s6491_s1 + $0x308] sm:$0xff] }
  0xcb   : > { %4071 = vmatprep.subr.bf16.mxu1 %v4070_v8  ;;  %v3706_v8 = vld [vmem:[%s6491_s1 + $0x318] sm:$0xff] }
  0xcc   : > { %847 = vmatmul.mubr.f32.gmra.mrb[10].mxu1 %v5317_v47  ;;  %v4078_v47 = vpack.c.bf16 %v3685_v55, %v3683_v51  ;;  %v4082_v30 = vpack.c.bf16 %v3706_v8, %v3704_v13  ;;  %v3902_v51 = vld [vmem:[%s6491_s1 + $0x730] sm:$0xff]  ;;  %v3905_v55 = vld [vmem:[%s6491_s1 + $0x748] sm:$0xff] }
  0xcd   : > { %2122 = vmatmul.mubr.f32.gmra.mrb[26].mxu0 %v5742_v32  ;;  %852 = vmatprep.mubr.f32.mxu1 %v4718_v60  ;;  %v5824_v13 = vld [vmem:[%s5213_s5 + $0x79] sm:$0xff] }
  0xce   : > { %2127 = vmatprep.mubr.f32.mxu0 %v4718_v60  ;;  %4073 = vmatpush1.bf16.msra.mxu1 %v4072_v38  ;;  %v3901_v38 = vld [vmem:[%s6491_s1 + $0x728] sm:$0xff] }
  0xcf   : > { %4075 = vmatprep.subr.bf16.mxu1 %v4074_v29  ;;  %v3903_v29 = vld [vmem:[%s6491_s1 + $0x738] sm:$0xff] }
  0xd0   : > { %853 = vmatmul.mubr.f32.gmra.mrb[12].mxu1 %v5350_v3  ;;  %v3896_v3 = vld [vmem:[%s6491_s1 + $0x700] sm:$0xff]  ;;  %v4214_v44 = vpack.c.bf16 %v3903_v29, %v3901_v38 }
  0xd1   : > { %2128 = vmatmul.mubr.f32.gmra.mrb[28].mxu0 %v3797_v56  ;;  %858 = vmatprep.mubr.f32.mxu1 %v4718_v60  ;;  %v4212_v43 = vpack.c.bf16 %v3898_v28, %v3896_v3  ;;  %v3907_v56 = vld [vmem:[%s6491_s1 + $0x758] sm:$0xff]  ;;  %v3912_v29 = vld [vmem:[%s6491_s1 + $0x780] sm:$0xff] }
  0xd2   : > { %2133 = vmatprep.mubr.f32.mxu0 %v4718_v60  ;;  %4077 = vmatpush1.bf16.msra.mxu1 %v4076_v57  ;;  %v3915_v3 = vld [vmem:[%s6491_s1 + $0x798] sm:$0xff] }
  0xd3   : > { %4079 = vmatprep.subr.bf16.mxu1 %v4078_v47  ;;  %v4218_v47 = vpack.c.bf16 %v3907_v56, %v3905_v55  ;;  %v5843_v28 = vld [vmem:[%s5213_s5 + $0x81] sm:$0xff] }
  0xd4   : > { %859 = vmatmul.mubr.f32.gmra.mrb[14].mxu1 %v5384_v24  ;;  %v3900_v24 = vld [vmem:[%s6491_s1 + $0x720] sm:$0xff] }
  0xd5   : > { %2134 = vmatmul.mubr.f32.gmra.mrb[30].mxu0 %v3798_v18  ;;  %864 = vmatprep.mubr.f32.mxu1 %v4718_v60  ;;  %v4216_v57 = vpack.c.bf16 %v3902_v51, %v3900_v24  ;;  %v3908_v18 = vld [vmem:[%s6491_s1 + $0x760] sm:$0xff] }
  0xd6   : > { %2352 = vmatprep.mubr.f32.mxu0 %v4718_v60  ;;  %4081 = vmatpush1.bf16.msra.mxu1 %v4080_v23  ;;  %v3910_v23 = vld [vmem:[%s6491_s1 + $0x770] sm:$0xff]  ;;  %v3916_v56 = vld [vmem:[%s6491_s1 + $0x7a0] sm:$0xff] }
  0xd7   : > { %4083 = vmatprep.subr.bf16.mxu1 %v4082_v30  ;;  %v4224_v30 = vpack.c.bf16 %v3910_v23, %v3908_v18  ;;  %v5862_v24 = vld [vmem:[%s5213_s5 + $0x91] sm:$0xff]  ;;  %v5900_v18 = vld [vmem:[%s5213_s5 + $0xa9] sm:$0xff] }
  0xd8   : > { %865 = vmatmul.mubr.f32.gmra.mrb[16].mxu1 %v5418_v45  ;;  %v3904_v45 = vld [vmem:[%s6491_s1 + $0x740] sm:$0xff] }
  0xd9   : > { %2353 = vmatmul.mubr.f32.vlgmr.msra.gmra.mrb[0].mxu0 %v5340_v63  ;;  %870 = vmatprep.mubr.f32.mxu1 %v4718_v60  ;;  %v3909_v63 = vld [vmem:[%s6491_s1 + $0x768] sm:$0xff]  ;;  %v4220_v8 = vpack.c.bf16 %v3906_v1, %v3904_v45 }
  0xda   : > { %4213 = vmatpush1.bf16.msra.mxu0 %v4212_v43  ;;  %2358 = vmatprep.mubr.f32.mxu0 %v4718_v60  ;;  %v3914_v43 = vld [vmem:[%s6491_s1 + $0x790] sm:$0xff] }
  0xdb   : > { %4215 = vmatprep.subr.bf16.mxu0 %v4214_v44  ;;  %v3919_v44 = vld [vmem:[%s6491_s1 + $0x7b8] sm:$0xff]  ;;  %v4228_v51 = vpack.c.bf16 %v3914_v43, %v3912_v29  ;;  %v3703_v43 = vld [vmem:[%s6491_s1 + $0x300] sm:$0xff] }
  0xdc   : > { %871 = vmatmul.mubr.f32.gmra.mrb[18].mxu1 %v5452_v5  ;;  %v4222_v5 = vpack.c.bf16 %v3911_v6, %v3909_v63  ;;  %v5881_v45 = vld [vmem:[%s5213_s5 + $0x99] sm:$0xff]  ;;  %v5919_v29 = vld [vmem:[%s5213_s5 + $0xb1] sm:$0xff] }
  0xdd   : > { %2359 = vmatmul.mubr.f32.gmra.mrb[2].mxu0 %v5374_v20  ;;  %876 = vmatprep.mubr.f32.mxu1 %v4718_v60  ;;  %v3913_v20 = vld [vmem:[%s6491_s1 + $0x788] sm:$0xff]  ;;  %v3920_v6 = vld [vmem:[%s6491_s1 + $0x7c0] sm:$0xff] }
  0xde   : > { %2364 = vmatprep.mubr.f32.mxu0 %v4718_v60  ;;  %4217 = vmatpush1.bf16.msra.mxu0 %v4216_v57  ;;  %v4226_v38 = vpack.c.bf16 %v3915_v3, %v3913_v20  ;;  %v3918_v57 = vld [vmem:[%s6491_s1 + $0x7b0] sm:$0xff]  ;;  %v3924_v3 = vld [vmem:[%s6491_s1 + $0x7e0] sm:$0xff] }
  0xdf   : > { %4219 = vmatprep.subr.bf16.mxu0 %v4218_v47  ;;  %v3923_v47 = vld [vmem:[%s6491_s1 + $0x7d8] sm:$0xff]  ;;  %v4232_v1 = vpack.c.bf16 %v3918_v57, %v3916_v56 }
  0xe0   : > { %877 = vmatmul.mubr.f32.gmra.mrb[20].mxu1 %v5824_v13  ;;  %v1009_v56 = vld [vmem:[%s5213_s5 + $0x2] sm:$0xff] }
  0xe1   : > { %2365 = vmatmul.mubr.f32.gmra.mrb[4].mxu0 %v5408_v42  ;;  %882 = vmatprep.mubr.f32.mxu1 %v4718_v60  ;;  %v3917_v42 = vld [vmem:[%s6491_s1 + $0x7a8] sm:$0xff] }
  0xe2   : > { %2370 = vmatprep.mubr.f32.mxu0 %v4718_v60  ;;  %4221 = vmatpush1.bf16.msra.mxu0 %v4220_v8  ;;  %v4230_v55 = vpack.c.bf16 %v3919_v44, %v3917_v42  ;;  %v3922_v8 = vld [vmem:[%s6491_s1 + $0x7d0] sm:$0xff] }
  0xe3   : > { %4223 = vmatprep.subr.bf16.mxu0 %v4222_v5  ;;  %v3927_v5 = vld [vmem:[%s6491_s1 + $0x7f8] sm:$0xff]  ;;  %v4236_v23 = vpack.c.bf16 %v3922_v8, %v3920_v6  ;;  %v3705_v42 = vld [vmem:[%s6491_s1 + $0x310] sm:$0xff] }
  0xe4   : > { %883 = vmatmul.mubr.f32.gmra.mrb[22].mxu1 %v5843_v28  ;;  %v4084_v57 = vpack.c.bf16 %v3705_v42, %v3703_v43  ;;  %v1010_v6 = vld [vmem:[%s5213_s5 + $0xa] sm:$0xff] }
  0xe5   : > { %2371 = vmatmul.mubr.f32.gmra.mrb[6].mxu0 %v5442_v62  ;;  %888 = vmatprep.mubr.f32.mxu1 %v4718_v60  ;;  %v3921_v62 = vld [vmem:[%s6491_s1 + $0x7c8] sm:$0xff]  ;;  %v3722_v43 = vld [vmem:[%s6491_s1 + $0x398] sm:$0xff] }
  0xe6   : > { %2376 = vmatprep.mubr.f32.mxu0 %v4718_v60  ;;  %4225 = vmatpush1.bf16.msra.mxu0 %v4224_v30  ;;  %v4234_v63 = vpack.c.bf16 %v3923_v47, %v3921_v62  ;;  %v3926_v30 = vld [vmem:[%s6491_s1 + $0x7f0] sm:$0xff]  ;;  %v3707_v47 = vld [vmem:[%s6491_s1 + $0x320] sm:$0xff] }
  0xe7   : > { %4227 = vmatprep.subr.bf16.mxu0 %v4226_v38  ;;  %v3947_v38 = vld [vmem:[%s6491_s1 + $0x818] sm:$0xff]  ;;  %v4240_v44 = vpack.c.bf16 %v3926_v30, %v3924_v3 }
  0xe8   : > { %889 = vmatmul.mubr.f32.gmra.mrb[24].mxu1 %v5862_v24 }
  0xe9   : > { %2377 = vmatmul.mubr.f32.gmra.mrb[8].mxu0 %v5470_v19  ;;  %894 = vmatprep.mubr.f32.mxu1 %v4718_v60  ;;  %v3925_v19 = vld [vmem:[%s6491_s1 + $0x7e8] sm:$0xff] }
  0xea   : > { %2382 = vmatprep.mubr.f32.mxu0 %v4718_v60  ;;  %4229 = vmatpush1.bf16.msra.mxu0 %v4228_v51  ;;  %v4238_v20 = vpack.c.bf16 %v3927_v5, %v3925_v19  ;;  %v3711_v5 = vld [vmem:[%s6491_s1 + $0x340] sm:$0xff] }
  0xeb   : > { %4231 = vmatprep.subr.bf16.mxu0 %v4230_v55  ;;  %v3710_v55 = vld [vmem:[%s6491_s1 + $0x338] sm:$0xff] }
  0xec   : > { %895 = vmatmul.mubr.f32.gmra.mrb[26].mxu1 %v5881_v45 }
  0xed   : > { %2383 = vmatmul.mubr.f32.gmra.mrb[10].mxu0 %v5492_v34  ;;  %900 = vmatprep.mubr.f32.mxu1 %v4718_v60  ;;  %v3945_v34 = vld [vmem:[%s6491_s1 + $0x808] sm:$0xff] }
  0xee   : > { %2388 = vmatprep.mubr.f32.mxu0 %v4718_v60  ;;  %4233 = vmatpush1.bf16.msra.mxu0 %v4232_v1  ;;  %v4242_v51 = vpack.c.bf16 %v3947_v38, %v3945_v34  ;;  %v3709_v1 = vld [vmem:[%s6491_s1 + $0x330] sm:$0xff]  ;;  %v3715_v34 = vld [vmem:[%s6491_s1 + $0x360] sm:$0xff] }
  0xef   : > { %4235 = vmatprep.subr.bf16.mxu0 %v4234_v63  ;;  %v3714_v63 = vld [vmem:[%s6491_s1 + $0x358] sm:$0xff]  ;;  %v4088_v8 = vpack.c.bf16 %v3709_v1, %v3707_v47  ;;  %v3717_v38 = vld [vmem:[%s6491_s1 + $0x370] sm:$0xff] }
  0xf0   : > { %901 = vmatmul.mubr.f32.gmra.mrb[28].mxu1 %v5900_v18  ;;  %v4096_v42 = vpack.c.bf16 %v3717_v38, %v3715_v34  ;;  %v3730_v47 = vld [vmem:[%s6491_s1 + $0x3d8] sm:$0xff]  ;;  %v3944_v34 = vld [vmem:[%s6491_s1 + $0x800] sm:$0xff]  ;;  %v3946_v38 = vld [vmem:[%s6491_s1 + $0x810] sm:$0xff] }
  0xf1   : > { %2389 = vmatmul.mubr.f32.gmra.mrb[12].mxu0 %v5514_v49  ;;  %906 = vmatprep.mubr.f32.mxu1 %v4718_v60  ;;  %v3708_v49 = vld [vmem:[%s6491_s1 + $0x328] sm:$0xff] }
  0xf2   : > { %2394 = vmatprep.mubr.f32.mxu0 %v4718_v60  ;;  %4237 = vmatpush1.bf16.msra.mxu0 %v4236_v23  ;;  %v4086_v62 = vpack.c.bf16 %v3710_v55, %v3708_v49  ;;  %v3713_v23 = vld [vmem:[%s6491_s1 + $0x350] sm:$0xff]  ;;  %v3726_v49 = vld [vmem:[%s6491_s1 + $0x3b8] sm:$0xff] }
  0xf3   : > { %4239 = vmatprep.subr.bf16.mxu0 %v4238_v20  ;;  %v3718_v20 = vld [vmem:[%s6491_s1 + $0x378] sm:$0xff]  ;;  %v4092_v3 = vpack.c.bf16 %v3713_v23, %v3711_v5  ;;  %v6003_v55 = vld [vmem:[%s5213_s5 + $0xc0] sm:$0xff] }
  0xf4   : > { %907 = vmatmul.mubr.f32.gmra.mrb[30].mxu1 %v5919_v29  ;;  %v6022_v1 = vld [vmem:[%s5213_s5 + $0xc8] sm:$0xff]  ;;  %v3846_v5 = vld [vmem:[%s5213_s5 + $0xd8] sm:$0xff] }
  0xf5   : > { %2395 = vmatmul.mubr.f32.gmra.mrb[14].mxu0 %v5536_v59  ;;  %1122 = vmatprep.mubr.f32.mxu1 %v4718_v60  ;;  %v3712_v59 = vld [vmem:[%s6491_s1 + $0x348] sm:$0xff] }
  0xf6   : > { %2400 = vmatprep.mubr.f32.mxu0 %v4718_v60  ;;  %4241 = vmatpush1.bf16.msra.mxu0 %v4240_v44  ;;  %v4090_v19 = vpack.c.bf16 %v3714_v63, %v3712_v59  ;;  %v3727_v63 = vld [vmem:[%s6491_s1 + $0x3c0] sm:$0xff] }
  0xf7   : > { %4243 = vmatprep.subr.bf16.mxu0 %v4242_v51  ;;  %v3721_v51 = vld [vmem:[%s6491_s1 + $0x390] sm:$0xff] }
  0xf8   : > { %1123 = vmatmul.mubr.f32.vlgmr.msra.gmra.mrb[0].mxu1 %v1009_v56 }
  0xf9   : > { %2401 = vmatmul.mubr.f32.gmra.mrb[16].mxu0 %v5558_v15  ;;  %4085 = vmatpush1.bf16.msra.mxu1 %v4084_v57  ;;  %v3716_v15 = vld [vmem:[%s6491_s1 + $0x368] sm:$0xff]  ;;  %v3723_v57 = vld [vmem:[%s6491_s1 + $0x3a0] sm:$0xff] }
  0xfa   : > { %1128 = vmatprep.mubr.f32.mxu1 %v4718_v60  ;;  %2406 = vmatprep.mubr.f32.mxu0 %v4718_v60  ;;  %v4094_v30 = vpack.c.bf16 %v3718_v20, %v3716_v15  ;;  %v3731_v15 = vld [vmem:[%s6491_s1 + $0x3e0] sm:$0xff]  ;;  %v3733_v20 = vld [vmem:[%s6491_s1 + $0x3f0] sm:$0xff] }
  0xfb   : > { %4087 = vmatprep.subr.bf16.mxu1 %v4086_v62  ;;  %v3725_v62 = vld [vmem:[%s6491_s1 + $0x3b0] sm:$0xff] }
  0xfc   : > { %1129 = vmatmul.mubr.f32.gmra.mrb[2].mxu1 %v1010_v6  ;;  %v4104_v59 = vpack.c.bf16 %v3725_v62, %v3723_v57  ;;  %v3729_v6 = vld [vmem:[%s6491_s1 + $0x3d0] sm:$0xff]  ;;  %v3957_v57 = vld [vmem:[%s6491_s1 + $0x868] sm:$0xff]  ;;  %v3959_v62 = vld [vmem:[%s6491_s1 + $0x878] sm:$0xff] }
  0xfd   : > { %2407 = vmatmul.mubr.f32.gmra.mrb[18].mxu0 %v5580_v33  ;;  %1134 = vmatprep.mubr.f32.mxu1 %v4718_v60  ;;  %v3720_v33 = vld [vmem:[%s6491_s1 + $0x388] sm:$0xff]  ;;  %v4108_v23 = vpack.c.bf16 %v3729_v6, %v3727_v63  ;;  %v3963_v6 = vld [vmem:[%s6491_s1 + $0x898] sm:$0xff] }
  0xfe   : > { %2412 = vmatprep.mubr.f32.mxu0 %v4718_v60  ;;  %4089 = vmatpush1.bf16.msra.mxu1 %v4088_v8  ;;  %v4098_v44 = vpack.c.bf16 %v3722_v43, %v3720_v33  ;;  %v3732_v8 = vld [vmem:[%s6491_s1 + $0x3e8] sm:$0xff]  ;;  %v3951_v33 = vld [vmem:[%s6491_s1 + $0x838] sm:$0xff] }
  0xff   : > { %4091 = vmatprep.subr.bf16.mxu1 %v4090_v19  ;;  %v3734_v19 = vld [vmem:[%s6491_s1 + $0x3f8] sm:$0xff]  ;;  %v3961_v63 = vld [vmem:[%s6491_s1 + $0x888] sm:$0xff] }
 0x100   : > { %1135 = vmatmul.mubr.f32.gmra.mrb[4].mxu1 %v5474_v21  ;;  %v3719_v21 = vld [vmem:[%s6491_s1 + $0x380] sm:$0xff] }
 0x101   : > { %2413 = vmatmul.mubr.f32.gmra.mrb[20].mxu0 %v5602_v52  ;;  %1140 = vmatprep.mubr.f32.mxu1 %v4718_v60  ;;  %v3724_v52 = vld [vmem:[%s6491_s1 + $0x3a8] sm:$0xff]  ;;  %v4100_v56 = vpack.c.bf16 %v3721_v51, %v3719_v21  ;;  %v3950_v21 = vld [vmem:[%s6491_s1 + $0x830] sm:$0xff] }
 0x102   : > { %2418 = vmatprep.mubr.f32.mxu0 %v4718_v60  ;;  %4093 = vmatpush1.bf16.msra.mxu1 %v4092_v3  ;;  %v3847_v3 = vld [vmem:[%s5213_s5 + $0xe0] sm:$0xff]  ;;  %v3880_v43 = vld [vmem:[%s5213_s5 + $0x31] sm:$0xff] }
 0x103   : > { %4095 = vmatprep.subr.bf16.mxu1 %v4094_v30  ;;  %v4112_v30 = vpack.c.bf16 %v3733_v20, %v3731_v15  ;;  %v3953_v51 = vld [vmem:[%s6491_s1 + $0x848] sm:$0xff]  ;;  %v3967_v15 = vld [vmem:[%s6491_s1 + $0x8b8] sm:$0xff] }
 0x104   : > { %1141 = vmatmul.mubr.f32.gmra.mrb[6].mxu1 %v5496_v36  ;;  %v4102_v36 = vpack.c.bf16 %v3726_v49, %v3724_v52  ;;  %v3955_v52 = vld [vmem:[%s6491_s1 + $0x858] sm:$0xff] }
 0x105   : > { %2419 = vmatmul.mubr.f32.gmra.mrb[22].mxu0 %v5624_v10  ;;  %1146 = vmatprep.mubr.f32.mxu1 %v4718_v60  ;;  %v3728_v10 = vld [vmem:[%s6491_s1 + $0x3c8] sm:$0xff] }
 0x106   : > { %2424 = vmatprep.mubr.f32.mxu0 %v4718_v60  ;;  %4097 = vmatpush1.bf16.msra.mxu1 %v4096_v42  ;;  %v4244_v42 = vpack.c.bf16 %v3946_v38, %v3944_v34  ;;  %v3881_v49 = vld [vmem:[%s5213_s5 + $0x39] sm:$0xff]  ;;  %v3884_v20 = vld [vmem:[%s5213_s5 + $0x61] sm:$0xff] }
 0x107   : > { %4099 = vmatprep.subr.bf16.mxu1 %v4098_v44  ;;  %v3966_v34 = vld [vmem:[%s6491_s1 + $0x8b0] sm:$0xff]  ;;  %v3969_v38 = vld [vmem:[%s6491_s1 + $0x8c8] sm:$0xff] }
 0x108   : > { %1147 = vmatmul.mubr.f32.gmra.mrb[8].mxu1 %v5518_v50  ;;  %v4106_v50 = vpack.c.bf16 %v3730_v47, %v3728_v10  ;;  %v3882_v10 = vld [vmem:[%s5213_s5 + $0x49] sm:$0xff] }
 0x109   : > { %2425 = vmatmul.mubr.f32.gmra.mrb[24].mxu0 %v6003_v55  ;;  %1152 = vmatprep.mubr.f32.mxu1 %v4718_v60 }
 0x10a   : > { %2430 = vmatprep.mubr.f32.mxu0 %v4718_v60  ;;  %4101 = vmatpush1.bf16.msra.mxu1 %v4100_v56 }
 0x10b   : > { %4103 = vmatprep.subr.bf16.mxu1 %v4102_v36  ;;  %v3954_v36 = vld [vmem:[%s6491_s1 + $0x850] sm:$0xff] }
 0x10c   : > { %1153 = vmatmul.mubr.f32.gmra.mrb[10].mxu1 %v5540_v0  ;;  %v4110_v0 = vpack.c.bf16 %v3734_v19, %v3732_v8  ;;  %v3883_v8 = vld [vmem:[%s5213_s5 + $0x51] sm:$0xff] }
 0x10d   : > { %2431 = vmatmul.mubr.f32.gmra.mrb[26].mxu0 %v6022_v1  ;;  %1158 = vmatprep.mubr.f32.mxu1 %v4718_v60 }
 0x10e   : > { %2436 = vmatprep.mubr.f32.mxu0 %v4718_v60  ;;  %4105 = vmatpush1.bf16.msra.mxu1 %v4104_v59  ;;  %v4254_v59 = vpack.c.bf16 %v3959_v62, %v3957_v57  ;;  %v3699_v57 = vld [vmem:[%s5213_s5 + $0xa8] sm:$0xff] }
 0x10f   : > { %4107 = vmatprep.subr.bf16.mxu1 %v4106_v50  ;;  %v3958_v50 = vld [vmem:[%s6491_s1 + $0x870] sm:$0xff] }
 0x110   : > { %1159 = vmatmul.mubr.f32.gmra.mrb[12].mxu1 %v5562_v16  ;;  %v3949_v16 = vld [vmem:[%s6491_s1 + $0x828] sm:$0xff] }
 0x111   : > { %2437 = vmatmul.mubr.f32.gmra.mrb[28].mxu0 %v3846_v5  ;;  %1164 = vmatprep.mubr.f32.mxu1 %v4718_v60  ;;  %v4246_v44 = vpack.c.bf16 %v3951_v33, %v3949_v16  ;;  %v4258_v5 = vpack.c.bf16 %v3963_v6, %v3961_v63  ;;  %v3971_v16 = vld [vmem:[%s6491_s1 + $0x8d8] sm:$0xff] }
 0x112   : > { %2442 = vmatprep.mubr.f32.mxu0 %v4718_v60  ;;  %4109 = vmatpush1.bf16.msra.mxu1 %v4108_v23  ;;  %v3962_v23 = vld [vmem:[%s6491_s1 + $0x890] sm:$0xff] }
 0x113   : > { %4111 = vmatprep.subr.bf16.mxu1 %v4110_v0  ;;  %v3965_v0 = vld [vmem:[%s6491_s1 + $0x8a8] sm:$0xff] }
 0x114   : > { %1165 = vmatmul.mubr.f32.gmra.mrb[14].mxu1 %v5584_v37  ;;  %v3948_v37 = vld [vmem:[%s6491_s1 + $0x820] sm:$0xff] }
 0x115   : > { %2443 = vmatmul.mubr.f32.gmra.mrb[30].mxu0 %v3847_v3  ;;  %1170 = vmatprep.mubr.f32.mxu1 %v4718_v60  ;;  %v4248_v56 = vpack.c.bf16 %v3950_v21, %v3948_v37  ;;  %v3885_v33 = vld [vmem:[%s5213_s5 + $0x69] sm:$0xff] }
 0x116   : > { %2658 = vmatprep.mubr.f32.mxu0 %v4718_v60  ;;  %4113 = vmatpush1.bf16.msra.mxu1 %v4112_v30  ;;  %v4262_v30 = vpack.c.bf16 %v3967_v15, %v3965_v0  ;;  %v3973_v37 = vld [vmem:[%s6491_s1 + $0x8e8] sm:$0xff]  ;;  %v3975_v21 = vld [vmem:[%s6491_s1 + $0x8f8] sm:$0xff] }
 0x117   : > { %4274 = vmatprep.subr.bf16.mxu1 %v4961_v4  ;;  %v4250_v4 = vpack.c.bf16 %v3955_v52, %v3953_v51  ;;  %v4270_v52 = vpack.c.bf16 %v3975_v21, %v3973_v37  ;;  %v3932_v62 = vld [vmem:[%s5213_s5 + $0x62] sm:$0xff] }
 0x118   : > { %1171 = vmatmul.mubr.f32.gmra.mrb[16].mxu1 %v5606_v54  ;;  %v3952_v54 = vld [vmem:[%s6491_s1 + $0x840] sm:$0xff] }
 0x119   : > { %2659 = vmatmul.mubr.f32.vlgmr.msra.gmra.mrb[0].mxu0 %v3880_v43  ;;  %1176 = vmatprep.mubr.f32.mxu1 %v4718_v60  ;;  %v4252_v47 = vpack.c.bf16 %v3954_v36, %v3952_v54  ;;  %v3698_v54 = vld [vmem:[%s5213_s5 + $0x98] sm:$0xff] }
 0x11a   : > { %4245 = vmatpush1.bf16.msra.mxu0 %v4244_v42  ;;  %2664 = vmatprep.mubr.f32.mxu0 %v4718_v60  ;;  %v4266_v42 = vpack.c.bf16 %v3971_v16, %v3969_v38  ;;  %v3931_v36 = vld [vmem:[%s5213_s5 + $0x52] sm:$0xff] }
 0x11b   : > { %4247 = vmatprep.subr.bf16.mxu0 %v4246_v44  ;;  %v3970_v44 = vld [vmem:[%s6491_s1 + $0x8d0] sm:$0xff] }
 0x11c   : > { %1177 = vmatmul.mubr.f32.gmra.mrb[18].mxu1 %v5628_v12  ;;  %v3956_v12 = vld [vmem:[%s6491_s1 + $0x860] sm:$0xff] }
 0x11d   : > { %2665 = vmatmul.mubr.f32.gmra.mrb[2].mxu0 %v3881_v49  ;;  %1182 = vmatprep.mubr.f32.mxu1 %v4718_v60  ;;  %v4256_v19 = vpack.c.bf16 %v3958_v50, %v3956_v12  ;;  %v3974_v49 = vld [vmem:[%s6491_s1 + $0x8f0] sm:$0xff] }
 0x11e   : > { %2670 = vmatprep.mubr.f32.mxu0 %v4718_v60  ;;  %4249 = vmatpush1.bf16.msra.mxu0 %v4248_v56  ;;  %v3935_v12 = vld [vmem:[%s5213_s5 + $0x82] sm:$0xff]  ;;  %v3936_v50 = vld [vmem:[%s5213_s5 + $0x92] sm:$0xff] }
 0x11f   : > { %4251 = vmatprep.subr.bf16.mxu0 %v4250_v4  ;;  %v3687_v4 = vld [vmem:[%s5213_s5 + $0x18] sm:$0xff] }
 0x120   : > { %1183 = vmatmul.mubr.f32.gmra.mrb[20].mxu1 %v5648_v41  ;;  %v3960_v41 = vld [vmem:[%s6491_s1 + $0x880] sm:$0xff] }
 0x121   : > { %2671 = vmatmul.mubr.f32.gmra.mrb[4].mxu0 %v3882_v10  ;;  %1188 = vmatprep.mubr.f32.mxu1 %v4718_v60  ;;  %v4260_v3 = vpack.c.bf16 %v3962_v23, %v3960_v41  ;;  %v3700_v10 = vld [vmem:[%s5213_s5 + $0xb0] sm:$0xff] }
 0x122   : > { %2676 = vmatprep.mubr.f32.mxu0 %v4718_v60  ;;  %4253 = vmatpush1.bf16.msra.mxu0 %v4252_v47  ;;  %v3933_v47 = vld [vmem:[%s5213_s5 + $0x6a] sm:$0xff] }
 0x123   : > { %4255 = vmatprep.subr.bf16.mxu0 %v4254_v59  ;;  %v3934_v59 = vld [vmem:[%s5213_s5 + $0x7a] sm:$0xff] }
 0x124   : > { %1189 = vmatmul.mubr.f32.gmra.mrb[22].mxu1 %v5667_v58  ;;  %v3964_v58 = vld [vmem:[%s6491_s1 + $0x8a0] sm:$0xff] }
 0x125   : > { %2677 = vmatmul.mubr.f32.gmra.mrb[6].mxu0 %v3883_v8  ;;  %1194 = vmatprep.mubr.f32.mxu1 %v4718_v60  ;;  %v4264_v43 = vpack.c.bf16 %v3966_v34, %v3964_v58 }
 0x126   : > { %2682 = vmatprep.mubr.f32.mxu0 %v4718_v60  ;;  %4257 = vmatpush1.bf16.msra.mxu0 %v4256_v19 }
 0x127   : > { %4259 = vmatprep.subr.bf16.mxu0 %v4258_v5 }
 0x128   : > { %1195 = vmatmul.mubr.f32.gmra.mrb[24].mxu1 %v5685_v26  ;;  %v3968_v26 = vld [vmem:[%s6491_s1 + $0x8c0] sm:$0xff] }
 0x129   : > { %2683 = vmatmul.mubr.f32.gmra.mrb[8].mxu0 %v3884_v20  ;;  %1200 = vmatprep.mubr.f32.mxu1 %v4718_v60  ;;  %v4268_v51 = vpack.c.bf16 %v3970_v44, %v3968_v26  ;;  %v3233_v26 = vld [vmem:[%s6493_s3] sm:$0x3] }
 0x12a   : > { %2688 = vmatprep.mubr.f32.mxu0 %v4718_v60  ;;  %4261 = vmatpush1.bf16.msra.mxu0 %v4260_v3  ;;  %v3191_v3 = vlaneseq }
 0x12b   : > { %4263 = vmatprep.subr.bf16.mxu0 %v4262_v30 }
 0x12c   : > { %1201 = vmatmul.mubr.f32.gmra.mrb[26].mxu1 %v5704_v46  ;;  %v3972_v46 = vld [vmem:[%s6491_s1 + $0x8e0] sm:$0xff]  ;;  %v3192_v58 = vshrl.u32 %v3191_v3, 7 }
 0x12d   : > { %2689 = vmatmul.mubr.f32.gmra.mrb[10].mxu0 %v3885_v33  ;;  %1206 = vmatprep.mubr.f32.mxu1 %v4718_v60  ;;  %v4272_v56 = vpack.c.bf16 %v3974_v49, %v3972_v46 }
 0x12e   : > { %2694 = vmatprep.mubr.f32.mxu0 %v4718_v60  ;;  %4265 = vmatpush1.bf16.msra.mxu0 %v4264_v43  ;;  %v3193_v16 = vsub.s32 0, %v3192_v58  ;;  %v3189_v43 = vld [vmem:[%s6492_s2] sm:$0x3] }
 0x12f   : > { %4267 = vmatprep.subr.bf16.mxu0 %v4266_v42  ;;  %v3197_v42 = vsub.s32 1, %v3192_v58 }
 0x130   : > { %1207 = vmatmul.mubr.f32.gmra.mrb[28].mxu1 %v5723_v7  ;;  %v3688_v7 = vld [vmem:[%s5213_s5 + $0x20] sm:$0xff]  ;;  %v6314_v44 = vrot.slane %v3189_v43, %v3193_v16 }
 0x131   : > { %2695 = vmatmul.mubr.f32.gmra.mrb[12].mxu0 %v5824_v13  ;;  %1212 = vmatprep.mubr.f32.mxu1 %v4718_v60  ;;  %v6316_v21 = vrot.slane %v3189_v43, %v3197_v42 }
 0x132   : > { %2700 = vmatprep.mubr.f32.mxu0 %v4718_v60  ;;  %4269 = vmatpush1.bf16.msra.mxu0 %v4268_v51 }
 0x133   : > { %4271 = vmatprep.subr.bf16.mxu0 %v4270_v52  ;;  %v6318_v52 = vrot.slane %v3233_v26, %v3193_v16 }
 0x134   : > { %1213 = vmatmul.mubr.f32.gmra.mrb[30].mxu1 %v5742_v32  ;;  %v3689_v32 = vld [vmem:[%s5213_s5 + $0x30] sm:$0xff] }
 0x135   : > { %2701 = vmatmul.mubr.f32.gmra.mrb[14].mxu0 %v5843_v28  ;;  %1431 = vmatprep.mubr.f32.mxu1 %v4718_v60 }
 0x136   : > { %2706 = vmatprep.mubr.f32.mxu0 %v4718_v60  ;;  %4273 = vmatpush1.bf16.msra.mxu0 %v4272_v56  ;;  %v6320_v56 = vrot.slane %v3233_v26, %v3197_v42 }
 0x138   : > { %1432 = vmatmul.mubr.f32.vlgmr.msra.gmra.mrb[0].mxu1 %v3687_v4 }
 0x139   : > { %2707 = vmatmul.mubr.f32.gmra.mrb[16].mxu0 %v5862_v24  ;;  %4282 = vmatpush1.bf16.msra.mxu1 %v4972_v9  ;;  %v3690_v9 = vld [vmem:[%s5213_s5 + $0x38] sm:$0xff] }
 0x13a   : > { %1437 = vmatprep.mubr.f32.mxu1 %v4718_v60  ;;  %2712 = vmatprep.mubr.f32.mxu0 %v4718_v60 }
 0x13b   : > { %4275 = vmatprep.subr.bf16.mxu1 %v4984_v14  ;;  %v3691_v14 = vld [vmem:[%s5213_s5 + $0x48] sm:$0xff] }
 0x13c   : > { %1438 = vmatmul.mubr.f32.gmra.mrb[2].mxu1 %v3688_v7 }
 0x13d   : > { %2713 = vmatmul.mubr.f32.gmra.mrb[18].mxu0 %v5881_v45  ;;  %1443 = vmatprep.mubr.f32.mxu1 %v4718_v60 }
 0x13e   : > { %2718 = vmatprep.mubr.f32.mxu0 %v4718_v60  ;;  %4283 = vmatpush1.bf16.msra.mxu1 %v5006_v22  ;;  %v6201_v22 = vld [vmem:[%s5213_s5 + $0xc1] sm:$0xff] }
 0x13f   : > { %4276 = vmatprep.subr.bf16.mxu1 %v5017_v27  ;;  %v3692_v27 = vld [vmem:[%s5213_s5 + $0x50] sm:$0xff] }
 0x140   : > { %1444 = vmatmul.mubr.f32.gmra.mrb[4].mxu1 %v3689_v32 }
 0x141   : > { %2719 = vmatmul.mubr.f32.gmra.mrb[20].mxu0 %v5900_v18  ;;  %1449 = vmatprep.mubr.f32.mxu1 %v4718_v60 }
 0x142   : > { %2724 = vmatprep.mubr.f32.mxu0 %v4718_v60  ;;  %4284 = vmatpush1.bf16.msra.mxu1 %v5038_v35  ;;  %v6210_v35 = vld [vmem:[%s5213_s5 + $0xc9] sm:$0xff] }
 0x143   : > { %4277 = vmatprep.subr.bf16.mxu1 %v5050_v40  ;;  %v3693_v40 = vld [vmem:[%s5213_s5 + $0x60] sm:$0xff] }
 0x144   : > { %1450 = vmatmul.mubr.f32.gmra.mrb[6].mxu1 %v3690_v9 }
 0x145   : > { %2725 = vmatmul.mubr.f32.gmra.mrb[22].mxu0 %v5919_v29  ;;  %1455 = vmatprep.mubr.f32.mxu1 %v4718_v60 }
 0x146   : > { %2730 = vmatprep.mubr.f32.mxu0 %v4718_v60  ;;  %4285 = vmatpush1.bf16.msra.mxu1 %v5071_v48  ;;  %v3894_v48 = vld [vmem:[%s5213_s5 + $0xd9] sm:$0xff] }
 0x147   : > { %4278 = vmatprep.subr.bf16.mxu1 %v5083_v53  ;;  %v3694_v53 = vld [vmem:[%s5213_s5 + $0x68] sm:$0xff] }
 0x148   : > { %1456 = vmatmul.mubr.f32.gmra.mrb[8].mxu1 %v3691_v14 }
 0x149   : > { %2731 = vmatmul.mubr.f32.gmra.mrb[24].mxu0 %v6201_v22  ;;  %1461 = vmatprep.mubr.f32.mxu1 %v4718_v60 }
 0x14a   : > { %2736 = vmatprep.mubr.f32.mxu0 %v4718_v60  ;;  %4286 = vmatpush1.bf16.msra.mxu1 %v5101_v61  ;;  %v3895_v61 = vld [vmem:[%s5213_s5 + $0xe1] sm:$0xff] }
 0x14b   : > { %4279 = vmatprep.subr.bf16.mxu1 %v5113_v2  ;;  %v3695_v2 = vld [vmem:[%s5213_s5 + $0x78] sm:$0xff] }
 0x14c   : > { %1462 = vmatmul.mubr.f32.gmra.mrb[10].mxu1 %v3692_v27 }
 0x14d   : > { %2737 = vmatmul.mubr.f32.gmra.mrb[26].mxu0 %v6210_v35  ;;  %1467 = vmatprep.mubr.f32.mxu1 %v4718_v60 }
 0x14e   : > { %2742 = vmatprep.mubr.f32.mxu0 %v4718_v60  ;;  %4287 = vmatpush1.bf16.msra.mxu1 %v5131_v11  ;;  %v3928_v11 = vld [vmem:[%s5213_s5 + $0x32] sm:$0xff] }
 0x14f   : > { %4280 = vmatprep.subr.bf16.mxu1 %v5143_v17  ;;  %v3696_v17 = vld [vmem:[%s5213_s5 + $0x80] sm:$0xff] }
 0x150   : > { %1468 = vmatmul.mubr.f32.gmra.mrb[12].mxu1 %v3693_v40 }
 0x151   : > { %2743 = vmatmul.mubr.f32.gmra.mrb[28].mxu0 %v3894_v48  ;;  %1473 = vmatprep.mubr.f32.mxu1 %v4718_v60 }
 0x152   : > { %2748 = vmatprep.mubr.f32.mxu0 %v4718_v60  ;;  %4288 = vmatpush1.bf16.msra.mxu1 %v5161_v25  ;;  %v3929_v25 = vld [vmem:[%s5213_s5 + $0x3a] sm:$0xff] }
 0x153   : > { %4281 = vmatprep.subr.bf16.mxu1 %v5174_v31  ;;  %v3697_v31 = vld [vmem:[%s5213_s5 + $0x90] sm:$0xff] }
 0x154   : > { %1474 = vmatmul.mubr.f32.gmra.mrb[14].mxu1 %v3694_v53 }
 0x155   : > { %2749 = vmatmul.mubr.f32.gmra.mrb[30].mxu0 %v3895_v61  ;;  %1479 = vmatprep.mubr.f32.mxu1 %v4718_v60 }
 0x156   : > { %2964 = vmatprep.mubr.f32.mxu0 %v4718_v60  ;;  %4289 = vmatpush1.bf16.msra.mxu1 %v5192_v39  ;;  %v3930_v39 = vld [vmem:[%s5213_s5 + $0x4a] sm:$0xff] }
 0x158   : > { %1480 = vmatmul.mubr.f32.gmra.mrb[16].mxu1 %v3695_v2 }
 0x159   : > { %2965 = vmatmul.mubr.f32.vlgmr.msra.gmra.mrb[0].mxu0 %v3928_v11  ;;  %1485 = vmatprep.mubr.f32.mxu1 %v4718_v60 }
 0x15a   : > { %2970 = vmatprep.mubr.f32.mxu0 %v4718_v60 }
 0x15c   : > { %1486 = vmatmul.mubr.f32.gmra.mrb[18].mxu1 %v3696_v17 }
 0x15d   : > { %2971 = vmatmul.mubr.f32.gmra.mrb[2].mxu0 %v3929_v25  ;;  %1491 = vmatprep.mubr.f32.mxu1 %v4718_v60 }
 0x15e   : > { %2976 = vmatprep.mubr.f32.mxu0 %v4718_v60 }
 0x160   : > { %1492 = vmatmul.mubr.f32.gmra.mrb[20].mxu1 %v3697_v31 }
 0x161   : > { %2977 = vmatmul.mubr.f32.gmra.mrb[4].mxu0 %v3930_v39  ;;  %1497 = vmatprep.mubr.f32.mxu1 %v4718_v60 }
 0x162   : > { %2982 = vmatprep.mubr.f32.mxu0 %v4718_v60 }
 0x164   : > { %1498 = vmatmul.mubr.f32.gmra.mrb[22].mxu1 %v3698_v54 }
 0x165   : > { %2983 = vmatmul.mubr.f32.gmra.mrb[6].mxu0 %v3931_v36  ;;  %1503 = vmatprep.mubr.f32.mxu1 %v4718_v60 }
 0x166   : > { %2988 = vmatprep.mubr.f32.mxu0 %v4718_v60 }
 0x168   : > { %1504 = vmatmul.mubr.f32.gmra.mrb[24].mxu1 %v3699_v57 }
 0x169   : > { %2989 = vmatmul.mubr.f32.gmra.mrb[8].mxu0 %v3932_v62  ;;  %1509 = vmatprep.mubr.f32.mxu1 %v4718_v60 }
 0x16a   : > { %2994 = vmatprep.mubr.f32.mxu0 %v4718_v60 }
 0x16c   : > { %1510 = vmatmul.mubr.f32.gmra.mrb[26].mxu1 %v3700_v10 }
 0x16d   : > { %2995 = vmatmul.mubr.f32.gmra.mrb[10].mxu0 %v3933_v47  ;;  %1515 = vmatprep.mubr.f32.mxu1 %v4718_v60 }
 0x16e   : > { %3000 = vmatprep.mubr.f32.mxu0 %v4718_v60 }
 0x170   : > { %1516 = vmatmul.mubr.f32.gmra.mrb[28].mxu1 %v6003_v55  ;;  %v3937_v55 = vld [vmem:[%s5213_s5 + $0x9a] sm:$0xff] }
 0x171   : > { %3001 = vmatmul.mubr.f32.gmra.mrb[12].mxu0 %v3934_v59  ;;  %1521 = vmatprep.mubr.f32.mxu1 %v4718_v60 }
 0x172   : > { %3006 = vmatprep.mubr.f32.mxu0 %v4718_v60 }
 0x174   : > { %1522 = vmatmul.mubr.f32.gmra.mrb[30].mxu1 %v6022_v1  ;;  %v3938_v1 = vld [vmem:[%s5213_s5 + $0xaa] sm:$0xff] }
 0x175   : > { %3007 = vmatmul.mubr.f32.gmra.mrb[14].mxu0 %v3935_v12  ;;  %1785 = vmatprep.mubr.f32.mxu1 %v4718_v60 }
 0x176   : > { %3012 = vmatprep.mubr.f32.mxu0 %v4718_v60 }
 0x178   : > { %1786 = vmatmul.mubr.f32.vlgmr.msra.gmra.mrb[16].mxu1 %v5824_v13  ;;  %v3939_v13 = vld [vmem:[%s5213_s5 + $0xb2] sm:$0xff] }
 0x179   : > { %3013 = vmatmul.mubr.f32.gmra.mrb[16].mxu0 %v3936_v50  ;;  %1791 = vmatprep.mubr.f32.mxu1 %v4718_v60 }
 0x17a   : > { %3018 = vmatprep.mubr.f32.mxu0 %v4718_v60 }
 0x17c   : > { %1792 = vmatmul.mubr.f32.gmra.mrb[18].mxu1 %v5843_v28  ;;  %v3940_v28 = vld [vmem:[%s5213_s5 + $0xc2] sm:$0xff] }
 0x17d   : > { %3019 = vmatmul.mubr.f32.gmra.mrb[18].mxu0 %v3937_v55  ;;  %1797 = vmatprep.mubr.f32.mxu1 %v4718_v60 }
 0x17e   : > { %3024 = vmatprep.mubr.f32.mxu0 %v4718_v60 }
 0x180   : > { %1798 = vmatmul.mubr.f32.gmra.mrb[20].mxu1 %v5862_v24  ;;  %v3941_v24 = vld [vmem:[%s5213_s5 + $0xca] sm:$0xff] }
 0x181   : > { %3025 = vmatmul.mubr.f32.gmra.mrb[20].mxu0 %v3938_v1  ;;  %1803 = vmatprep.mubr.f32.mxu1 %v4718_v60 }
 0x182   : > { %3030 = vmatprep.mubr.f32.mxu0 %v4718_v60 }
 0x184   : > { %1804 = vmatmul.mubr.f32.gmra.mrb[22].mxu1 %v5881_v45  ;;  %v3942_v45 = vld [vmem:[%s5213_s5 + $0xda] sm:$0xff] }
 0x185   : > { %3031 = vmatmul.mubr.f32.gmra.mrb[22].mxu0 %v3939_v13  ;;  %1809 = vmatprep.mubr.f32.mxu1 %v4718_v60 }
 0x186   : > { %3036 = vmatprep.mubr.f32.mxu0 %v4718_v60 }
 0x188   : > { %1810 = vmatmul.mubr.f32.gmra.mrb[24].mxu1 %v5900_v18  ;;  %v3943_v18 = vld [vmem:[%s5213_s5 + $0xe2] sm:$0xff]  ;;  %s4719_s5 = smov [#allocation5]  }
 0x189   : > { %3037 = vmatmul.mubr.f32.gmra.mrb[24].mxu0 %v3940_v28  ;;  %1815 = vmatprep.mubr.f32.mxu1 %v4718_v60  ;;  %s4624_s30 = sshll.u32 %s4719_s5, 4  ;;  %s4625_s30 = int_to_ptr.vmem [resolvable:$false] %s4624_s30 }
 0x18a   : > { %3042 = vmatprep.mubr.f32.mxu0 %v4718_v60  ;;  %s4626_s8 = scalar_lea.vmem %s4625_s30, 8192  ;;  %p4627_p6 = scmp.lt.s32.totalorder %s6432_s12, %s4625_s30 }
 0x18b   : > { %p4628_p7 = scmp.lt.s32.totalorder %s4626_s8, %s4620_s24 }
 0x18c   : > { %1816 = vmatmul.mubr.f32.gmra.mrb[26].mxu1 %v5919_v29 }
 0x18d   : > { %3043 = vmatmul.mubr.f32.gmra.mrb[26].mxu0 %v3941_v24  ;;  %1821 = vmatprep.mubr.f32.mxu1 %v4718_v60  ;;  %p4629_p9 = por %p4628_p7, %p4627_p6 }
 0x18e   : > { %3048 = vmatprep.mubr.f32.mxu0 %v4718_v60 }
 0x18f   : > { %p4630_p10 = pnand %p4629_p9, %p4623_p5 }
 0x190   : > { %1822 = vmatmul.mubr.f32.gmra.mrb[28].mxu1 %v6201_v22 }
 0x191   : > { %3049 = vmatmul.mubr.f32.gmra.mrb[28].mxu0 %v3942_v45  ;;  %1827 = vmatprep.mubr.f32.mxu1 %v4718_v60 }
 0x192   : > { %3054 = vmatprep.mubr.f32.mxu0 %v4718_v60 }
 0x194   : > { %1828 = vmatmul.mubr.f32.gmra.mrb[30].mxu1 %v6210_v35 }
 0x195   : > { %3055 = vmatmul.mubr.f32.gmra.mrb[30].mxu0 %v3943_v18 }
 0x20b   : > { %v1433_v63 = vpop.f32.mrb[0].mxu1 }
 0x20c   : > { %v1435_v6 = vpop.f32.mrb[1].mxu1 }
 0x20f   : > { %v1439_v29 = vpop.f32.mrb[2].mxu1 }
 0x210   : > { %v1441_v8 = vpop.f32.mrb[3].mxu1 }
 0x213   : > { %v1445_v19 = vpop.f32.mrb[4].mxu1 }
 0x214   : > { %v1447_v5 = vpop.f32.mrb[5].mxu1 }
 0x217   : > { %v1451_v41 = vpop.f32.mrb[6].mxu1 }
 0x218   : > { %v1453_v23 = vpop.f32.mrb[7].mxu1 }
 0x21b   : > { %v6292_v0 = vpop.f32.mrb[8].mxu1 }
 0x21c   : > { %v6294_v15 = vpop.f32.mrb[9].mxu1 }
 0x21f   : > { %v6296_v20 = vpop.f32.mrb[10].mxu1 }
 0x220   : > { %v6298_v60 = vpop.f32.mrb[11].mxu1 }
 0x223   : > { %v6300_v30 = vpop.f32.mrb[12].mxu1 }
 0x224   : > { %v6302_v34 = vpop.f32.mrb[13].mxu1 }
 0x227   : > { %v6304_v38 = vpop.f32.mrb[14].mxu1 }
 0x228   : > { %v6306_v33 = vpop.f32.mrb[15].mxu1 }
 0x22c   : > { %v2966_v37 = vpop.f32.mrb[0].mxu0 }
 0x22d   : > { %v4290_v51 = vadd.f32 %v2966_v37, %v1433_v63  ;;  %v2968_v46 = vpop.f32.mrb[1].mxu0 }
 0x22e   : > { %v4291_v49 = vadd.f32 %v2968_v46, %v1435_v6 }
 0x22f   : > { %v3201_v4 = vmul.f32 %v4290_v51, %v6314_v44 }
 0x230   : > { %v3202_v7 = vmul.f32 %v4291_v49, %v6316_v21  ;;  %v2972_v32 = vpop.f32.mrb[2].mxu0 }
 0x231   : > { %v3245_v9 = vadd.f32 %v6318_v52, %v3201_v4  ;;  %v4292_v14 = vadd.f32 %v2972_v32, %v1439_v29  ;;  %v2974_v22 = vpop.f32.mrb[3].mxu0 }
 0x232   : > { %v3246_v27 = vadd.f32 %v6320_v56, %v3202_v7  ;;  %v4293_v35 = vadd.f32 %v2974_v22, %v1441_v8 }
 0x233   : > { %vm3277_vm0 = vcmp.gt.f32.partialorder %v3245_v9, 0.0  ;;  %v3309_v40 = vmul.f32 0.1, %v3245_v9  ;;  %v3203_v48 = vmul.f32 %v4292_v14, %v6314_v44 }
 0x234   : > { %vm3278_vm1 = vcmp.gt.f32.partialorder %v3246_v27, 0.0  ;;  %v3310_v53 = vmul.f32 0.1, %v3246_v27  ;;  %v3204_v61 = vmul.f32 %v4293_v35, %v6316_v21  ;;  %v2978_v2 = vpop.f32.mrb[4].mxu0 }
 0x235   : > { %v3341_v11 = vsel %vm3277_vm0, %v3245_v9, %v3309_v40  ;;  %v3247_v17 = vadd.f32 %v6318_v52, %v3203_v48  ;;  %v4294_v25 = vadd.f32 %v2978_v2, %v1445_v19  ;;  %v2980_v31 = vpop.f32.mrb[5].mxu0 }
 0x236   : > { %3373 = vst [vmem:[%s4821_s10] sm:$0xff] %v3341_v11  ;;  %v3342_v39 = vsel %vm3278_vm1, %v3246_v27, %v3310_v53  ;;  %v3248_v54 = vadd.f32 %v6320_v56, %v3204_v61  ;;  %v4295_v36 = vadd.f32 %v2980_v31, %v1447_v5 }
 0x237   : > { %3374 = vst [vmem:[%s4821_s10 + $0x8] sm:$0xff] %v3342_v39  ;;  %vm3279_vm2 = vcmp.gt.f32.partialorder %v3247_v17, 0.0  ;;  %v3311_v57 = vmul.f32 0.1, %v3247_v17  ;;  %v3205_v62 = vmul.f32 %v4294_v25, %v6314_v44 }
 0x238   : > { %vm3280_vm3 = vcmp.gt.f32.partialorder %v3248_v54, 0.0  ;;  %v3312_v10 = vmul.f32 0.1, %v3248_v54  ;;  %v3206_v47 = vmul.f32 %v4295_v36, %v6316_v21  ;;  %v2984_v59 = vpop.f32.mrb[6].mxu0 }
 0x239   : > { %v3343_v12 = vsel %vm3279_vm2, %v3247_v17, %v3311_v57  ;;  %v3249_v50 = vadd.f32 %v6318_v52, %v3205_v62  ;;  %v4296_v55 = vadd.f32 %v2984_v59, %v1451_v41  ;;  %v2986_v1 = vpop.f32.mrb[7].mxu0 }
 0x23a   : > { %3375 = vst [vmem:[%s4821_s10 + $0x10] sm:$0xff] %v3343_v12  ;;  %v3344_v13 = vsel %vm3280_vm3, %v3248_v54, %v3312_v10  ;;  %v3250_v28 = vadd.f32 %v6320_v56, %v3206_v47  ;;  %v4297_v24 = vadd.f32 %v2986_v1, %v1453_v23 }
 0x23b   : > { %3376 = vst [vmem:[%s4821_s10 + $0x18] sm:$0xff] %v3344_v13  ;;  %vm3281_vm4 = vcmp.gt.f32.partialorder %v3249_v50, 0.0  ;;  %v3313_v45 = vmul.f32 0.1, %v3249_v50  ;;  %v3207_v18 = vmul.f32 %v4296_v55, %v6314_v44 }
 0x23c   : > { %vm3282_vm5 = vcmp.gt.f32.partialorder %v3250_v28, 0.0  ;;  %v3314_v63 = vmul.f32 0.1, %v3250_v28  ;;  %v3208_v6 = vmul.f32 %v4297_v24, %v6316_v21  ;;  %v2990_v29 = vpop.f32.mrb[8].mxu0 }
 0x23d   : > { %v3345_v8 = vsel %vm3281_vm4, %v3249_v50, %v3313_v45  ;;  %v3251_v19 = vadd.f32 %v6318_v52, %v3207_v18  ;;  %v4298_v5 = vadd.f32 %v2990_v29, %v6292_v0  ;;  %v2992_v41 = vpop.f32.mrb[9].mxu0 }
 0x23e   : > { %3377 = vst [vmem:[%s4821_s10 + $0x20] sm:$0xff] %v3345_v8  ;;  %v3346_v23 = vsel %vm3282_vm5, %v3250_v28, %v3314_v63  ;;  %v3252_v3 = vadd.f32 %v6320_v56, %v3208_v6  ;;  %v4299_v58 = vadd.f32 %v2992_v41, %v6294_v15 }
 0x23f   : > { %3378 = vst [vmem:[%s4821_s10 + $0x28] sm:$0xff] %v3346_v23  ;;  %vm3283_vm6 = vcmp.gt.f32.partialorder %v3251_v19, 0.0  ;;  %v3315_v16 = vmul.f32 0.1, %v3251_v19  ;;  %v3209_v43 = vmul.f32 %v4298_v5, %v6314_v44 }
 0x240   : > { %vm3284_vm7 = vcmp.gt.f32.partialorder %v3252_v3, 0.0  ;;  %v3316_v42 = vmul.f32 0.1, %v3252_v3  ;;  %v3210_v26 = vmul.f32 %v4299_v58, %v6316_v21  ;;  %v2996_v37 = vpop.f32.mrb[10].mxu0 }
 0x241   : > { %v3347_v0 = vsel %vm3283_vm6, %v3251_v19, %v3315_v16  ;;  %v3253_v51 = vadd.f32 %v6318_v52, %v3209_v43  ;;  %v4300_v46 = vadd.f32 %v2996_v37, %v6296_v20  ;;  %v2998_v49 = vpop.f32.mrb[11].mxu0 }
 0x242   : > { %3379 = vst [vmem:[%s4821_s10 + $0x30] sm:$0xff] %v3347_v0  ;;  %v3348_v15 = vsel %vm3284_vm7, %v3252_v3, %v3316_v42  ;;  %v3254_v4 = vadd.f32 %v6320_v56, %v3210_v26  ;;  %v4301_v7 = vadd.f32 %v2998_v49, %v6298_v60 }
 0x243   : > { %3380 = vst [vmem:[%s4821_s10 + $0x38] sm:$0xff] %v3348_v15  ;;  %vm3285_vm8 = vcmp.gt.f32.partialorder %v3253_v51, 0.0  ;;  %v3317_v32 = vmul.f32 0.1, %v3253_v51  ;;  %v3211_v9 = vmul.f32 %v4300_v46, %v6314_v44 }
 0x244   : > { %vm3286_vm9 = vcmp.gt.f32.partialorder %v3254_v4, 0.0  ;;  %v3318_v14 = vmul.f32 0.1, %v3254_v4  ;;  %v3212_v22 = vmul.f32 %v4301_v7, %v6316_v21  ;;  %v3002_v27 = vpop.f32.mrb[12].mxu0 }
 0x245   : > { %v3349_v20 = vsel %vm3285_vm8, %v3253_v51, %v3317_v32  ;;  %v3255_v35 = vadd.f32 %v6318_v52, %v3211_v9  ;;  %v4302_v40 = vadd.f32 %v3002_v27, %v6300_v30  ;;  %v3004_v48 = vpop.f32.mrb[13].mxu0 }
 0x246   : > { %3381 = vst [vmem:[%s4821_s10 + $0x40] sm:$0xff] %v3349_v20  ;;  %v3350_v60 = vsel %vm3286_vm9, %v3254_v4, %v3318_v14  ;;  %v3256_v53 = vadd.f32 %v6320_v56, %v3212_v22  ;;  %v4303_v61 = vadd.f32 %v3004_v48, %v6302_v34 }
 0x247   : > { %3382 = vst [vmem:[%s4821_s10 + $0x48] sm:$0xff] %v3350_v60  ;;  %vm3287_vm10 = vcmp.gt.f32.partialorder %v3255_v35, 0.0  ;;  %v3319_v2 = vmul.f32 0.1, %v3255_v35  ;;  %v3213_v11 = vmul.f32 %v4302_v40, %v6314_v44 }
 0x248   : > { %vm3288_vm11 = vcmp.gt.f32.partialorder %v3256_v53, 0.0  ;;  %v3320_v17 = vmul.f32 0.1, %v3256_v53  ;;  %v3214_v25 = vmul.f32 %v4303_v61, %v6316_v21  ;;  %v3008_v31 = vpop.f32.mrb[14].mxu0 }
 0x249   : > { %v3351_v30 = vsel %vm3287_vm10, %v3255_v35, %v3319_v2  ;;  %v3257_v39 = vadd.f32 %v6318_v52, %v3213_v11  ;;  %v4304_v54 = vadd.f32 %v3008_v31, %v6304_v38  ;;  %v3010_v36 = vpop.f32.mrb[15].mxu0 }
 0x24a   : > { %3383 = vst [vmem:[%s4821_s10 + $0x50] sm:$0xff] %v3351_v30  ;;  %v3352_v57 = vsel %vm3288_vm11, %v3256_v53, %v3320_v17  ;;  %v3258_v34 = vadd.f32 %v6320_v56, %v3214_v25  ;;  %v4305_v62 = vadd.f32 %v3010_v36, %v6306_v33 }
 0x24b   : > { %3384 = vst [vmem:[%s4821_s10 + $0x58] sm:$0xff] %v3352_v57  ;;  %vm3289_vm12 = vcmp.gt.f32.partialorder %v3257_v39, 0.0  ;;  %v3321_v10 = vmul.f32 0.1, %v3257_v39  ;;  %v3215_v47 = vmul.f32 %v4304_v54, %v6314_v44  ;;  %v1787_v59 = vpop.f32.mrb[16].mxu1 }
 0x24c   : > { %vm3290_vm13 = vcmp.gt.f32.partialorder %v3258_v34, 0.0  ;;  %v3322_v12 = vmul.f32 0.1, %v3258_v34  ;;  %v3216_v50 = vmul.f32 %v4305_v62, %v6316_v21  ;;  %v3014_v38 = vpop.f32.mrb[16].mxu0  ;;  %v1789_v55 = vpop.f32.mrb[17].mxu1 }
 0x24d   : > { %v3353_v1 = vsel %vm3289_vm12, %v3257_v39, %v3321_v10  ;;  %v3259_v13 = vadd.f32 %v6318_v52, %v3215_v47  ;;  %v4306_v28 = vadd.f32 %v3014_v38, %v1787_v59  ;;  %v3016_v24 = vpop.f32.mrb[17].mxu0 }
 0x24e   : > { %3385 = vst [vmem:[%s4821_s10 + $0x60] sm:$0xff] %v3353_v1  ;;  %v3354_v33 = vsel %vm3290_vm13, %v3258_v34, %v3322_v12  ;;  %v3260_v45 = vadd.f32 %v6320_v56, %v3216_v50  ;;  %v4307_v18 = vadd.f32 %v3016_v24, %v1789_v55 }
 0x24f   : > { %3386 = vst [vmem:[%s4821_s10 + $0x68] sm:$0xff] %v3354_v33  ;;  %vm3291_vm14 = vcmp.gt.f32.partialorder %v3259_v13, 0.0  ;;  %v3323_v63 = vmul.f32 0.1, %v3259_v13  ;;  %v3217_v6 = vmul.f32 %v4306_v28, %v6314_v44  ;;  %v1793_v29 = vpop.f32.mrb[18].mxu1 }
 0x250   : > { %vm3292_vm15 = vcmp.gt.f32.partialorder %v3260_v45, 0.0  ;;  %v3324_v8 = vmul.f32 0.1, %v3260_v45  ;;  %v3218_v19 = vmul.f32 %v4307_v18, %v6316_v21  ;;  %v3020_v5 = vpop.f32.mrb[18].mxu0  ;;  %v1795_v41 = vpop.f32.mrb[19].mxu1 }
 0x251   : > { %v3355_v23 = vsel %vm3291_vm14, %v3259_v13, %v3323_v63  ;;  %v3261_v3 = vadd.f32 %v6318_v52, %v3217_v6  ;;  %v4308_v58 = vadd.f32 %v3020_v5, %v1793_v29  ;;  %v3022_v16 = vpop.f32.mrb[19].mxu0 }
 0x252   : > { %3387 = vst [vmem:[%s4821_s10 + $0x70] sm:$0xff] %v3355_v23  ;;  %v3356_v43 = vsel %vm3292_vm15, %v3260_v45, %v3324_v8  ;;  %v3262_v42 = vadd.f32 %v6320_v56, %v3218_v19  ;;  %v4309_v26 = vadd.f32 %v3022_v16, %v1795_v41 }
 0x253   : > { %3388 = vst [vmem:[%s4821_s10 + $0x78] sm:$0xff] %v3356_v43  ;;  %vm3293_vm0 = vcmp.gt.f32.partialorder %v3261_v3, 0.0  ;;  %v3325_v37 = vmul.f32 0.1, %v3261_v3  ;;  %v3219_v0 = vmul.f32 %v4308_v58, %v6314_v44  ;;  %v1799_v51 = vpop.f32.mrb[20].mxu1 }
 0x254   : > { %vm3294_vm1 = vcmp.gt.f32.partialorder %v3262_v42, 0.0  ;;  %v3326_v46 = vmul.f32 0.1, %v3262_v42  ;;  %v3220_v49 = vmul.f32 %v4309_v26, %v6316_v21  ;;  %v3026_v15 = vpop.f32.mrb[20].mxu0  ;;  %v1801_v4 = vpop.f32.mrb[21].mxu1 }
 0x255   : > { %v3357_v7 = vsel %vm3293_vm0, %v3261_v3, %v3325_v37  ;;  %v3263_v32 = vadd.f32 %v6318_v52, %v3219_v0  ;;  %v4310_v9 = vadd.f32 %v3026_v15, %v1799_v51  ;;  %v3028_v14 = vpop.f32.mrb[21].mxu0 }
 0x256   : > { %3389 = vst [vmem:[%s4821_s10 + $0x80] sm:$0xff] %v3357_v7  ;;  %v3358_v22 = vsel %vm3294_vm1, %v3262_v42, %v3326_v46  ;;  %v3264_v27 = vadd.f32 %v6320_v56, %v3220_v49  ;;  %v4311_v20 = vadd.f32 %v3028_v14, %v1801_v4 }
 0x257   : > { %3390 = vst [vmem:[%s4821_s10 + $0x88] sm:$0xff] %v3358_v22  ;;  %vm3295_vm2 = vcmp.gt.f32.partialorder %v3263_v32, 0.0  ;;  %v3327_v35 = vmul.f32 0.1, %v3263_v32  ;;  %v3221_v40 = vmul.f32 %v4310_v9, %v6314_v44  ;;  %v1805_v48 = vpop.f32.mrb[22].mxu1 }
 0x258   : > { %vm3296_vm3 = vcmp.gt.f32.partialorder %v3264_v27, 0.0  ;;  %v3328_v60 = vmul.f32 0.1, %v3264_v27  ;;  %v3222_v53 = vmul.f32 %v4311_v20, %v6316_v21  ;;  %v3032_v61 = vpop.f32.mrb[22].mxu0  ;;  %v1807_v2 = vpop.f32.mrb[23].mxu1 }
 0x259   : > { %v3359_v11 = vsel %vm3295_vm2, %v3263_v32, %v3327_v35  ;;  %v3265_v17 = vadd.f32 %v6318_v52, %v3221_v40  ;;  %v4312_v25 = vadd.f32 %v3032_v61, %v1805_v48  ;;  %v3034_v31 = vpop.f32.mrb[23].mxu0 }
 0x25a   : > { %3391 = vst [vmem:[%s4821_s10 + $0x90] sm:$0xff] %v3359_v11  ;;  %v3360_v30 = vsel %vm3296_vm3, %v3264_v27, %v3328_v60  ;;  %v3266_v39 = vadd.f32 %v6320_v56, %v3222_v53  ;;  %v4313_v54 = vadd.f32 %v3034_v31, %v1807_v2 }
 0x25b   : > { %3392 = vst [vmem:[%s4821_s10 + $0x98] sm:$0xff] %v3360_v30  ;;  %vm3297_vm4 = vcmp.gt.f32.partialorder %v3265_v17, 0.0  ;;  %v3329_v36 = vmul.f32 0.1, %v3265_v17  ;;  %v3223_v57 = vmul.f32 %v4312_v25, %v6314_v44  ;;  %v1811_v34 = vpop.f32.mrb[24].mxu1 }
 0x25c   : > { %vm3298_vm5 = vcmp.gt.f32.partialorder %v3266_v39, 0.0  ;;  %v3330_v62 = vmul.f32 0.1, %v3266_v39  ;;  %v3224_v10 = vmul.f32 %v4313_v54, %v6316_v21  ;;  %v3038_v47 = vpop.f32.mrb[24].mxu0  ;;  %v1813_v59 = vpop.f32.mrb[25].mxu1 }
 0x25d   : > { %v3361_v12 = vsel %vm3297_vm4, %v3265_v17, %v3329_v36  ;;  %v3267_v50 = vadd.f32 %v6318_v52, %v3223_v57  ;;  %v4314_v38 = vadd.f32 %v3038_v47, %v1811_v34  ;;  %v3040_v55 = vpop.f32.mrb[25].mxu0 }
 0x25e   : > { %3393 = vst [vmem:[%s4821_s10 + $0xa0] sm:$0xff] %v3361_v12  ;;  %v3362_v1 = vsel %vm3298_vm5, %v3266_v39, %v3330_v62  ;;  %v3268_v13 = vadd.f32 %v6320_v56, %v3224_v10  ;;  %v4315_v28 = vadd.f32 %v3040_v55, %v1813_v59 }
 0x25f   : > { %3394 = vst [vmem:[%s4821_s10 + $0xa8] sm:$0xff] %v3362_v1  ;;  %vm3299_vm6 = vcmp.gt.f32.partialorder %v3267_v50, 0.0  ;;  %v3331_v24 = vmul.f32 0.1, %v3267_v50  ;;  %v3225_v33 = vmul.f32 %v4314_v38, %v6314_v44  ;;  %v1817_v45 = vpop.f32.mrb[26].mxu1 }
 0x260   : > { %vm3300_vm7 = vcmp.gt.f32.partialorder %v3268_v13, 0.0  ;;  %v3332_v18 = vmul.f32 0.1, %v3268_v13  ;;  %v3226_v63 = vmul.f32 %v4315_v28, %v6316_v21  ;;  %v3044_v6 = vpop.f32.mrb[26].mxu0  ;;  %v1819_v29 = vpop.f32.mrb[27].mxu1 }
 0x261   : > { %v3363_v8 = vsel %vm3299_vm6, %v3267_v50, %v3331_v24  ;;  %v3269_v19 = vadd.f32 %v6318_v52, %v3225_v33  ;;  %v4316_v5 = vadd.f32 %v3044_v6, %v1817_v45  ;;  %v3046_v41 = vpop.f32.mrb[27].mxu0 }
 0x262   : > { %3395 = vst [vmem:[%s4821_s10 + $0xb0] sm:$0xff] %v3363_v8  ;;  %v3364_v23 = vsel %vm3300_vm7, %v3268_v13, %v3332_v18  ;;  %v3270_v3 = vadd.f32 %v6320_v56, %v3226_v63  ;;  %v4317_v58 = vadd.f32 %v3046_v41, %v1819_v29 }
 0x263   : > { %3396 = vst [vmem:[%s4821_s10 + $0xb8] sm:$0xff] %v3364_v23  ;;  %vm3301_vm8 = vcmp.gt.f32.partialorder %v3269_v19, 0.0  ;;  %v3333_v16 = vmul.f32 0.1, %v3269_v19  ;;  %v3227_v43 = vmul.f32 %v4316_v5, %v6314_v44  ;;  %v1823_v42 = vpop.f32.mrb[28].mxu1 }
 0x264   : > { %vm3302_vm9 = vcmp.gt.f32.partialorder %v3270_v3, 0.0  ;;  %v3334_v26 = vmul.f32 0.1, %v3270_v3  ;;  %v3228_v37 = vmul.f32 %v4317_v58, %v6316_v21  ;;  %v3050_v0 = vpop.f32.mrb[28].mxu0  ;;  %v1825_v51 = vpop.f32.mrb[29].mxu1 }
 0x265   : > { %v3365_v46 = vsel %vm3301_vm8, %v3269_v19, %v3333_v16  ;;  %v3271_v49 = vadd.f32 %v6318_v52, %v3227_v43  ;;  %v4318_v15 = vadd.f32 %v3050_v0, %v1823_v42  ;;  %v3052_v4 = vpop.f32.mrb[29].mxu0 }
 0x266   : > { %3397 = vst [vmem:[%s4821_s10 + $0xc0] sm:$0xff] %v3365_v46  ;;  %v3366_v7 = vsel %vm3302_vm9, %v3270_v3, %v3334_v26  ;;  %v3272_v32 = vadd.f32 %v6320_v56, %v3228_v37  ;;  %v4319_v9 = vadd.f32 %v3052_v4, %v1825_v51 }
 0x267   : > { %3398 = vst [vmem:[%s4821_s10 + $0xc8] sm:$0xff] %v3366_v7  ;;  %vm3303_vm10 = vcmp.gt.f32.partialorder %v3271_v49, 0.0  ;;  %v3335_v14 = vmul.f32 0.1, %v3271_v49  ;;  %v3229_v22 = vmul.f32 %v4318_v15, %v6314_v44  ;;  %v1829_v27 = vpop.f32.mrb[30].mxu1 }
 0x268   : > { %vm3304_vm11 = vcmp.gt.f32.partialorder %v3272_v32, 0.0  ;;  %v3336_v20 = vmul.f32 0.1, %v3272_v32  ;;  %v3230_v35 = vmul.f32 %v4319_v9, %v6316_v21  ;;  %v3056_v40 = vpop.f32.mrb[30].mxu0  ;;  %v1831_v48 = vpop.f32.mrb[31].mxu1 }
 0x269   : > { %v3367_v60 = vsel %vm3303_vm10, %v3271_v49, %v3335_v14  ;;  %v3273_v53 = vadd.f32 %v6318_v52, %v3229_v22  ;;  %v4320_v61 = vadd.f32 %v3056_v40, %v1829_v27  ;;  %v3058_v2 = vpop.f32.mrb[31].mxu0 }
 0x26a   : > { %3399 = vst [vmem:[%s4821_s10 + $0xd0] sm:$0xff] %v3367_v60  ;;  %v3368_v11 = vsel %vm3304_vm11, %v3272_v32, %v3336_v20  ;;  %v3274_v17 = vadd.f32 %v6320_v56, %v3230_v35  ;;  %v4321_v25 = vadd.f32 %v3058_v2, %v1831_v48 }
 0x26b   : > { %3400 = vst [vmem:[%s4821_s10 + $0xd8] sm:$0xff] %v3368_v11  ;;  %vm3305_vm12 = vcmp.gt.f32.partialorder %v3273_v53, 0.0  ;;  %v3337_v31 = vmul.f32 0.1, %v3273_v53  ;;  %v3231_v30 = vmul.f32 %v4320_v61, %v6314_v44 }
 0x26c   : > { %vm3306_vm13 = vcmp.gt.f32.partialorder %v3274_v17, 0.0  ;;  %v3338_v39 = vmul.f32 0.1, %v3274_v17  ;;  %v3232_v54 = vmul.f32 %v4321_v25, %v6316_v21 }
 0x26d   : > { %v3369_v36 = vsel %vm3305_vm12, %v3273_v53, %v3337_v31  ;;  %v3275_v57 = vadd.f32 %v6318_v52, %v3231_v30 }
 0x26e   : > { %3401 = vst [vmem:[%s4821_s10 + $0xe0] sm:$0xff] %v3369_v36  ;;  %v3370_v34 = vsel %vm3306_vm13, %v3274_v17, %v3338_v39  ;;  %v3276_v62 = vadd.f32 %v6320_v56, %v3232_v54 }
 0x26f   : > { %3402 = vst [vmem:[%s4821_s10 + $0xe8] sm:$0xff] %v3370_v34  ;;  %vm3307_vm14 = vcmp.gt.f32.partialorder %v3275_v57, 0.0  ;;  %v3339_v44 = vmul.f32 0.1, %v3275_v57 }
 0x270   : > { %vm3308_vm15 = vcmp.gt.f32.partialorder %v3276_v62, 0.0  ;;  %v3340_v10 = vmul.f32 0.1, %v3276_v62 }
 0x271   : > { %v3371_v21 = vsel %vm3307_vm14, %v3275_v57, %v3339_v44 }
 0x272   : > { %3403 = vst [vmem:[%s4821_s10 + $0xf0] sm:$0xff] %v3371_v21  ;;  %v3372_v52 = vsel %vm3308_vm15, %v3276_v62, %v3340_v10 }
 0x273   : > { %3404 = vst [vmem:[%s4821_s10 + $0xf8] sm:$0xff] %v3372_v52 }
 0x274   : > { %4633 = shalt.err (!%p4630_p10)
}
 0x275   : > { %s4634_s10 = scalar_lea.hbm %s6430_s0, 4096  ;;  %s4638_s11 = scalar_lea.hbm %s6494_s4, 16384 }
 0x276   : > { %p4635_p11 = scmp.ne.s32.totalorder %s6430_s0, %s4634_s10  ;;  %p4639_p0 = scmp.lt.u32.totalorder %s6430_s0, %s6494_s4 }
 0x277   : > { %p4640_p1 = scmp.lt.u32.totalorder %s4638_s11, %s4634_s10  ;;  %p4642_p4 = scmp.lt.u32.totalorder %s4634_s10, %s6430_s0 }
 0x278   : > { %p4636_p12 = pnand %p4635_p11, %p4798_p3 }
 0x279   : > { %p4641_p2 = por %p4640_p1, %p4639_p0 }
 0x27a   : > { %p4637_p13 = pneg %p4636_p12 }
 0x27b   : > { %p4643_p5 = por %p4642_p4, %p4641_p2 }
 0x27d   : > { %p4644_p6 = pnand %p4643_p5, %p4637_p13 }
 0x27f   : > { %4647 = shalt.err (!%p4644_p6)
}
 0x280   : > { %s4720_s13 = smov 256   ;;  %s4721_s14 = smov 16  }
 0x281   : > { %4546 = dma.vmem_to_hbm [thread:$0]  (%p4798_p3), %s6432_s12, 4096, %s6430_s0, %s6438_s9, %s4720_s13, %s4720_s13, %s4721_s14  }
 0x282 PF: > { %p4552_p7 = scmp.ge.s32.totalorder %s4716_s22, 2  ;;  %s3437_s23 = sand.u32 1, %s4688_s15  }
 0x283   : > { %s3438_s24 = scalar_lea.sflag [#allocation6], %s3437_s23 }
 0x284   : > { %p4549_p9 = pnand %p4552_p7, %p4807_p8 }
 0x286   : > { %4683 = dma.done.wait (!%p4549_p9), %s3438_s24, 4096  }
 0x287   : > { %4685 = vsyncadd (!%p4549_p9), %s3438_s24, 4294963200  ;;  %s17_s22 = sadd.s32 1, %s4716_s22   ;;  %s6502_s15 = smov %s4692_s16 }
 0x288   : > { %p14_p10 = scmp.ge.s32.totalorder %s17_s22, 6   ;;  %s6503_s16 = smov %s4696_s17 }
 0x289   : > { %s6504_s17 = smov %s4816_s7  ;;  %s6505_s18 = smov %s4708_s20 }
 0x28a   : > { %s6506_s19 = smov %s4712_s21  ;;  %s6507_s20 = smov %s6510_s25 }
 0x28b   : > { %s6508_s21 = smov %s6514_s26  ;;  %16 = sbr.rel (!%p14_p10) target bundleno = 7 (0x7), region = 191 }
 0x292   :  { %3443 = vsyncpa [#allocation6], 1 }
 0x293   :  { %3445 = vsyncpa [#allocation6 + $0x1], 1 }
 0x294   :  { %3446 = vsyncmov [#allocation3] }
 0x297   :  { %s3447_s28 = vpop.sfrf %3446 }
 0x298   :  { %p3983_p3 = scmp.ne.s32.totalorder %s3447_s28, 0 }
 0x29a   :  { %3451 = shalt.err (%p3983_p3)  }
 0x29b   :  { %3453 = vsyncmov [#allocation3 + $0x1] }
 0x29e   :  { %s3454_s29 = vpop.sfrf %3453 }
 0x29f   :  { %p3984_p8 = scmp.ne.s32.totalorder %s3454_s29, 0 }
 0x2a1   :  { %3458 = shalt.err (%p3984_p8)  }

</bundles_post_ra>
